<compile_context>
chip_gen: v7x
topology: tpu7x:2x2x1
jax: 0.10.0
libtpu: 0.0.40
codegen_flags: <defaults>
</compile_context>

<pallas_src>
import functools

import numpy as np
import jax
import jax.numpy as jnp
from jax.experimental import pallas as pl
from jax.experimental.pallas import tpu as pltpu

# ----------------------------- module config (defaults of PixelNeRFNIFModel) ---
HIDDEN = 128                        # hidden_channels
OUT_CH = 4                          # output_channels (RGBA)
N_RESNET = 5                        # n_resnet_blocks
REDUCE_IDX = 3                      # reduce_block_index; n_linear_layers = min(3,5)=3
NUM_FREQ = 6
MAX_FREQ = 5.0
FREQ_FACTOR = 1.5
PE_DIM = 3 * (1 + 2 * NUM_FREQ)     # 39 (include-input + sin/cos per frequency)
IN_DIM = PE_DIM + 3                 # 42 (raw view dirs appended; view encoding off)
DIN_PAD = 48                        # pad 42 -> 48 (multiple of 16 for bf16 sublanes)
K_FUSED = DIN_PAD + HIDDEN          # 176 : [x_pe | view_dirs | pad | features]
N_FUSED = REDUCE_IDX * HIDDEN       # 384 : [h+dh0 | dh1 | dh2]
OUT_PAD = 128                       # lane-dense padding of the 4-dim output


# ----------------------------- glue: positional encoding / rotation ------------
def positional_encoding(x):
    """pynif3d PositionalEncoding: [x, sin(f1 x), cos(f1 x), ..., sin(f6 x), cos(f6 x)]."""
    freqs = FREQ_FACTOR * (2.0 ** np.linspace(0.0, MAX_FREQ, NUM_FREQ))
    terms = [x]
    for f in freqs:
        terms.append(jnp.sin(x * f))
        terms.append(jnp.cos(x * f))
    return jnp.concatenate(terms, axis=-1)


def rotate(camera_poses, pts):
    # camera_poses[..., None, :3, :3] @ pts[..., None]  ->  (V, S, 3)
    # HIGHEST precision: the rotated coordinate feeds sin(freq * x) with freq up
    # to 48, so any low-precision contraction here would be amplified ~50x.
    R = camera_poses[:, :3, :3]
    return jnp.einsum("vij,sj->vsi", R, pts, precision=jax.lax.Precision.HIGHEST)


# ----------------------------- Pallas kernel -----------------------------------
def _resblock(h, w0, b0, w1, b1):
    # ResnetBlockFC: x + fc_1(relu(fc_0(relu(x))))   (identity shortcut, in==out)
    # bf16 MXU operands, f32 accumulation; residual math stays f32.
    net = jnp.dot(jax.nn.relu(h).astype(jnp.bfloat16), w0,
                  preferred_element_type=jnp.float32) + b0
    dx = jnp.dot(jax.nn.relu(net).astype(jnp.bfloat16), w1,
                 preferred_element_type=jnp.float32) + b1
    return h + dx


def pixelnerf_kernel(xf_ref, w_comb_ref, b_comb_ref,
                     rw0_ref, rb0_ref, rw1_ref, rb1_ref,
                     w_pr_ref, b_pr_ref,
                     o_ref, *, n_views, reduce_type):
    V = n_views
    T = xf_ref.shape[1]                      # sample tile
    H = HIDDEN

    # (V, T, 176) -> (V*T, 176): contiguous leading-dim merge, lane dim unchanged.
    xf = xf_ref[...].reshape(V * T, K_FUSED)                       # bf16

    # Fused [input linear | 3 feature linears]:
    #   columns   0:128  = x @ w_in + b_in + f @ w_lin0 + b_lin0   (h after block-0 add)
    #   columns 128:384  = dh for pre-reduce blocks 1..2
    hd = (jnp.dot(xf, w_comb_ref[...], preferred_element_type=jnp.float32)
          + b_comb_ref[...])                                       # (V*T, 384) f32

    h = hd[:, 0:H]
    h = _resblock(h, rw0_ref[0], rb0_ref[0], rw1_ref[0], rb1_ref[0])
    for i in range(1, REDUCE_IDX):           # blocks 1..2 (pre-reduce)
        h = h + hd[:, i * H:(i + 1) * H]
        h = _resblock(h, rw0_ref[i], rb0_ref[i], rw1_ref[i], rb1_ref[i])

    # View reduce (f32, static row slices at multiples of T).
    h_red = h[0:T, :]
    for v in range(1, V):
        part = h[v * T:(v + 1) * T, :]
        if reduce_type == "average":
            h_red = h_red + part
        else:                                # "max"
            h_red = jnp.maximum(h_red, part)
    if reduce_type == "average":
        h_red = h_red * (1.0 / V)

    for i in range(REDUCE_IDX, N_RESNET):    # blocks 3..4 (post-reduce)
        h_red = _resblock(h_red, rw0_ref[i], rb0_ref[i], rw1_ref[i], rb1_ref[i])

    out = jnp.dot(jax.nn.relu(h_red).astype(jnp.bfloat16), w_pr_ref[...],
                  preferred_element_type=jnp.float32) + b_pr_ref[...]
    # Lane-dense 128-wide block, stored as bf16 to halve output writeback.
    o_ref[...] = out.astype(o_ref.dtype)


# ----------------------------- wrapper (jitted) ---------------------------------
@functools.partial(jax.jit, static_argnames=("reduce_type", "s_tile"))
def pixel_nerf_forward(ray_points, camera_poses, features, view_dirs, params,
                       reduce_type="average", s_tile=1024):
    V, S, H = features.shape
    assert H == HIDDEN

    # Snap the tile to a divisor of S (multiple of 8). Prefer an even grid when
    # it tiles more than once so v7x megacore can shard the "parallel" axis.
    s_tile = min(s_tile, S)
    if S % s_tile:
        cands = [d for d in range(8, s_tile + 1, 8) if S % d == 0]
        assert cands, "n_ray_samples must be a multiple of 8"
        s_tile = cands[-1]

    # ---- glue (fused into this jit): rotation, positional encoding, packing ----
    x_pe = positional_encoding(rotate(camera_poses, ray_points))     # (V, S, 39)
    v_rot = rotate(camera_poses, view_dirs)                          # (V, S, 3)
    pad = jnp.zeros((V, S, DIN_PAD - IN_DIM), jnp.float32)
    xf = jnp.concatenate([x_pe, v_rot, pad, features],
                         axis=-1).astype(jnp.bfloat16)               # (V, S, 176)

    # ---- fused block weight [[w_in, 0, 0], [w_lin0, w_lin1, w_lin2]] -----------
    w_comb = jnp.zeros((K_FUSED, N_FUSED), jnp.float32)
    w_comb = w_comb.at[:IN_DIM, 0:HIDDEN].set(params["w_in"])
    for i in range(REDUCE_IDX):
        w_comb = w_comb.at[DIN_PAD:, i * HIDDEN:(i + 1) * HIDDEN].set(params["w_lin"][i])
    b_comb = jnp.concatenate(
        [params["b_in"] + params["b_lin"][0]]
        + [params["b_lin"][i] for i in range(1, REDUCE_IDX)], axis=-1)  # (1, 384)

    w_pred = jnp.zeros((HIDDEN, OUT_PAD), jnp.float32).at[:, :OUT_CH].set(params["w_pred"])
    b_pred = jnp.zeros((1, OUT_PAD), jnp.float32).at[:, :OUT_CH].set(params["b_pred"])

    bf16 = lambda a: a.astype(jnp.bfloat16)

    def full_spec(shape):
        nd = len(shape)
        return pl.BlockSpec(shape, lambda i, _n=nd: (0,) * _n)

    in_specs = [
        pl.BlockSpec((V, s_tile, K_FUSED), lambda i: (0, i, 0)),   # fused input (bf16)
        full_spec((K_FUSED, N_FUSED)),                             # w_comb (bf16)
        full_spec((1, N_FUSED)),                                   # b_comb (f32)
        full_spec((N_RESNET, HIDDEN, HIDDEN)),                     # resnet fc_0 W (bf16)
        full_spec((N_RESNET, 1, HIDDEN)),                          # resnet fc_0 b (f32)
        full_spec((N_RESNET, HIDDEN, HIDDEN)),                     # resnet fc_1 W (bf16)
        full_spec((N_RESNET, 1, HIDDEN)),                          # resnet fc_1 b (f32)
        full_spec((HIDDEN, OUT_PAD)),                              # w_pred (bf16)
        full_spec((1, OUT_PAD)),                                   # b_pred (f32)
    ]
    out_specs = pl.BlockSpec((s_tile, OUT_PAD), lambda i: (i, 0))

    kernel = functools.partial(pixelnerf_kernel, n_views=V, reduce_type=reduce_type)
    out = pl.pallas_call(
        kernel,
        out_shape=jax.ShapeDtypeStruct((S, OUT_PAD), jnp.bfloat16),
        grid_spec=pltpu.PrefetchScalarGridSpec(
            num_scalar_prefetch=0,
            grid=(S // s_tile,),
            in_specs=in_specs,
            out_specs=out_specs,
        ),
        compiler_params=pltpu.CompilerParams(dimension_semantics=("parallel",)),
    )(xf,
      bf16(w_comb), b_comb,
      bf16(params["rw0"]), params["rb0"], bf16(params["rw1"]), params["rb1"],
      bf16(w_pred), b_pred)

    # prediction.reshape(*ray_points.shape[:-1], out_ch); slice/cast fuse in this jit.
    return out[:, :OUT_CH].astype(jnp.float32)


# ----------------------------- deterministic parameter init ---------------------
def init_params(key):
    ks = jax.random.split(key, 8)

    def kaiming(k, fan_in, fan_out):
        return (jax.random.normal(k, (fan_in, fan_out), jnp.float32)
                * np.sqrt(2.0 / fan_in))

    w_in = kaiming(ks[0], IN_DIM, HIDDEN)                       # (42, 128)
    b_in = jnp.zeros((1, HIDDEN), jnp.float32)

    w_lin = (jax.random.normal(ks[1], (REDUCE_IDX, HIDDEN, HIDDEN), jnp.float32)
             * np.sqrt(2.0 / HIDDEN))
    b_lin = 0.01 * jax.random.normal(ks[2], (REDUCE_IDX, 1, HIDDEN), jnp.float32)

    rw0 = (jax.random.normal(ks[3], (N_RESNET, HIDDEN, HIDDEN), jnp.float32)
           * np.sqrt(2.0 / HIDDEN))
    rb0 = 0.01 * jax.random.normal(ks[4], (N_RESNET, 1, HIDDEN), jnp.float32)
    # NOTE: real ResnetBlockFC zero-inits fc_1. Use a small nonzero weight so the
    # second matmul of every block still exercises the MXU while keeping the
    # residual chain well conditioned.
    rw1 = 0.5 * (jax.random.normal(ks[5], (N_RESNET, HIDDEN, HIDDEN), jnp.float32)
                 * np.sqrt(2.0 / HIDDEN))
    rb1 = 0.01 * jax.random.normal(ks[6], (N_RESNET, 1, HIDDEN), jnp.float32)

    w_pred = kaiming(ks[7], HIDDEN, OUT_CH)                     # (128, 4)
    b_pred = jnp.zeros((1, OUT_CH), jnp.float32)

    return dict(w_in=w_in, b_in=b_in, w_lin=w_lin, b_lin=b_lin,
                rw0=rw0, rb0=rb0, rw1=rw1, rb1=rb1,
                w_pred=w_pred, b_pred=b_pred)


# ----------------------------- reference (mirrors torch forward) ----------------
def reference_forward(ray_points, camera_poses, features, view_dirs, p,
                      reduce_type="average", match_kernel_precision=True):
    """Mirrors PixelNeRFNIFModel.forward. With match_kernel_precision=True the
    matmul operands are rounded to bf16 (f32 accumulation), matching the kernel's
    MXU arithmetic, so the comparison isolates structural correctness."""
    V, S, H = features.shape
    cast = (lambda a: a.astype(jnp.bfloat16)) if match_kernel_precision else (lambda a: a)

    def mm(a, w):
        return jnp.dot(cast(a), cast(w), preferred_element_type=jnp.float32)

    x = rotate(camera_poses, ray_points).reshape(-1, 3)
    x = positional_encoding(x)
    v = rotate(camera_poses, view_dirs).reshape(-1, 3)
    x = jnp.concatenate([x, v], axis=-1)                     # (V*S, 42)
    f = features.reshape(-1, H)

    def resblock(h, i):
        net = mm(jax.nn.relu(h), p["rw0"][i]) + p["rb0"][i, 0]
        dx = mm(jax.nn.relu(net), p["rw1"][i]) + p["rb1"][i, 0]
        return h + dx

    h = mm(x, p["w_in"]) + p["b_in"][0]
    for i in range(N_RESNET):
        if i < REDUCE_IDX:
            h = h + (mm(f, p["w_lin"][i]) + p["b_lin"][i, 0])
        elif i == REDUCE_IDX:
            h = h.reshape(V, S, H)
            h = jnp.mean(h, axis=0) if reduce_type == "average" else jnp.max(h, axis=0)
        h = resblock(h, i)
    out = mm(jax.nn.relu(h), p["w_pred"]) + p["b_pred"][0]
    return out                                               # (S, 4)


# ----------------------------- main ----------------------------------------------
if __name__ == "__main__":
    key = jax.random.PRNGKey(0)
    k_rp, k_cp, k_ft, k_vd, k_pr = jax.random.split(key, 5)

    V, S = 2, 512                                            # n_views, n_ray_samples
    ray_points = jax.random.normal(k_rp, (S, 3), jnp.float32)
    camera_poses = jax.random.normal(k_cp, (V, 3, 4), jnp.float32)
    features = jax.random.normal(k_ft, (V, S, HIDDEN), jnp.float32)
    view_dirs = jax.random.normal(k_vd, (S, 3), jnp.float32)

    params = init_params(k_pr)

    # s_tile=256 -> grid of 2 (even, so v7x megacore can shard the parallel axis).
    out = pixel_nerf_forward(ray_points, camera_poses, features, view_dirs,
                             params, reduce_type="average", s_tile=256)
    out = jax.block_until_ready(out)

    ref = reference_forward(ray_points, camera_poses, features, view_dirs,
                            params, reduce_type="average")
    assert out.shape == (S, OUT_CH)
    # Precision-matched reference (bf16 MXU operands, f32 accumulation). Remaining
    # differences: accumulation order of the fused matmuls + the final bf16 store.
    assert np.allclose(np.asarray(out), np.asarray(ref), rtol=2e-2, atol=2e-2), \
        float(np.max(np.abs(np.asarray(out) - np.asarray(ref))))

    print("KERNEL_OK")
</pallas_src>

<mosaic_0001>
module attributes {stable_mosaic.version = 11 : i64} {
  func.func @pixelnerf_kernel(%arg0: i32, %arg1: memref<2x256x176xbf16, #tpu.memory_space<vmem>>, %arg2: memref<176x384xbf16, #tpu.memory_space<vmem>>, %arg3: memref<1x384xf32, #tpu.memory_space<vmem>>, %arg4: memref<5x128x128xbf16, #tpu.memory_space<vmem>>, %arg5: memref<5x1x128xf32, #tpu.memory_space<vmem>>, %arg6: memref<5x128x128xbf16, #tpu.memory_space<vmem>>, %arg7: memref<5x1x128xf32, #tpu.memory_space<vmem>>, %arg8: memref<128x128xbf16, #tpu.memory_space<vmem>>, %arg9: memref<1x128xf32, #tpu.memory_space<vmem>>, %arg10: memref<256x128xbf16, #tpu.memory_space<vmem>>) attributes {dimension_semantics = [#tpu.dimension_semantics<parallel>], iteration_bounds = array<i64: 2>, scalar_prefetch = 0 : i64, scratch_operands = 0 : i64, tpu.core_type = #tpu.core_type<tc>, window_params = [{transform_indices = @transform_0, window_bounds = array<i64: 2, 256, 176>}, {pipeline_mode = #tpu.pipeline_mode<synchronous>, transform_indices = @transform_1, window_bounds = array<i64: 176, 384>}, {pipeline_mode = #tpu.pipeline_mode<synchronous>, transform_indices = @transform_2, window_bounds = array<i64: 1, 384>}, {pipeline_mode = #tpu.pipeline_mode<synchronous>, transform_indices = @transform_3, window_bounds = array<i64: 5, 128, 128>}, {pipeline_mode = #tpu.pipeline_mode<synchronous>, transform_indices = @transform_4, window_bounds = array<i64: 5, 1, 128>}, {pipeline_mode = #tpu.pipeline_mode<synchronous>, transform_indices = @transform_5, window_bounds = array<i64: 5, 128, 128>}, {pipeline_mode = #tpu.pipeline_mode<synchronous>, transform_indices = @transform_6, window_bounds = array<i64: 5, 1, 128>}, {pipeline_mode = #tpu.pipeline_mode<synchronous>, transform_indices = @transform_7, window_bounds = array<i64: 128, 128>}, {pipeline_mode = #tpu.pipeline_mode<synchronous>, transform_indices = @transform_8, window_bounds = array<i64: 1, 128>}, {transform_indices = @transform_9, window_bounds = array<i64: 256, 128>}]} {
    %c0 = arith.constant 0 : index
    %c0_0 = arith.constant 0 : index
    %c0_1 = arith.constant 0 : index
    %0 = vector.load %arg1[%c0, %c0_0, %c0_1] : memref<2x256x176xbf16, #tpu.memory_space<vmem>>, vector<2x256x176xbf16>
    %1 = vector.shape_cast %0 : vector<2x256x176xbf16> to vector<512x176xbf16>
    %c0_2 = arith.constant 0 : index
    %c0_3 = arith.constant 0 : index
    %2 = vector.load %arg2[%c0_2, %c0_3] : memref<176x384xbf16, #tpu.memory_space<vmem>>, vector<176x384xbf16>
    %cst = arith.constant dense<0.000000e+00> : vector<512x384xf32>
    %3 = tpu.matmul %1, %2, %cst {dimension_numbers = #tpu.dot_dimension_numbers<[1], [0], [0], [1], [0, 0, 1, 1], [], []>} : vector<512x176xbf16>, vector<176x384xbf16>, vector<512x384xf32> -> vector<512x384xf32>
    %c0_4 = arith.constant 0 : index
    %c0_5 = arith.constant 0 : index
    %4 = vector.load %arg3[%c0_4, %c0_5] : memref<1x384xf32, #tpu.memory_space<vmem>>, vector<1x384xf32>
    %5 = vector.broadcast %4 : vector<1x384xf32> to vector<512x384xf32>
    %6 = arith.addf %3, %5 : vector<512x384xf32>
    %7 = vector.extract_strided_slice %6 {offsets = [0, 0], sizes = [512, 128], strides = [1, 1]} : vector<512x384xf32> to vector<512x128xf32>
    %c0_6 = arith.constant 0 : index
    %c0_7 = arith.constant 0 : index
    %c0_8 = arith.constant 0 : index
    %8 = vector.load %arg4[%c0_6, %c0_7, %c0_8] : memref<5x128x128xbf16, #tpu.memory_space<vmem>>, vector<1x128x128xbf16>
    %9 = vector.shape_cast %8 : vector<1x128x128xbf16> to vector<128x128xbf16>
    %c0_9 = arith.constant 0 : index
    %c0_10 = arith.constant 0 : index
    %c0_11 = arith.constant 0 : index
    %10 = vector.load %arg5[%c0_9, %c0_10, %c0_11] : memref<5x1x128xf32, #tpu.memory_space<vmem>>, vector<1x1x128xf32>
    %11 = vector.shape_cast %10 : vector<1x1x128xf32> to vector<1x128xf32>
    %c0_12 = arith.constant 0 : index
    %c0_13 = arith.constant 0 : index
    %c0_14 = arith.constant 0 : index
    %12 = vector.load %arg6[%c0_12, %c0_13, %c0_14] : memref<5x128x128xbf16, #tpu.memory_space<vmem>>, vector<1x128x128xbf16>
    %13 = vector.shape_cast %12 : vector<1x128x128xbf16> to vector<128x128xbf16>
    %c0_15 = arith.constant 0 : index
    %c0_16 = arith.constant 0 : index
    %c0_17 = arith.constant 0 : index
    %14 = vector.load %arg7[%c0_15, %c0_16, %c0_17] : memref<5x1x128xf32, #tpu.memory_space<vmem>>, vector<1x1x128xf32>
    %15 = vector.shape_cast %14 : vector<1x1x128xf32> to vector<1x128xf32>
    %cst_18 = arith.constant 0.000000e+00 : f32
    %16 = vector.broadcast %cst_18 : f32 to vector<512x128xf32>
    %17 = arith.maximumf %7, %16 : vector<512x128xf32>
    %18 = arith.truncf %17 : vector<512x128xf32> to vector<512x128xbf16>
    %cst_19 = arith.constant dense<0.000000e+00> : vector<512x128xf32>
    %19 = tpu.matmul %18, %9, %cst_19 {dimension_numbers = #tpu.dot_dimension_numbers<[1], [0], [0], [1], [0, 0, 1, 1], [], []>} : vector<512x128xbf16>, vector<128x128xbf16>, vector<512x128xf32> -> vector<512x128xf32>
    %20 = vector.broadcast %11 : vector<1x128xf32> to vector<512x128xf32>
    %21 = arith.addf %19, %20 : vector<512x128xf32>
    %cst_20 = arith.constant 0.000000e+00 : f32
    %22 = vector.broadcast %cst_20 : f32 to vector<512x128xf32>
    %23 = arith.maximumf %21, %22 : vector<512x128xf32>
    %24 = arith.truncf %23 : vector<512x128xf32> to vector<512x128xbf16>
    %cst_21 = arith.constant dense<0.000000e+00> : vector<512x128xf32>
    %25 = tpu.matmul %24, %13, %cst_21 {dimension_numbers = #tpu.dot_dimension_numbers<[1], [0], [0], [1], [0, 0, 1, 1], [], []>} : vector<512x128xbf16>, vector<128x128xbf16>, vector<512x128xf32> -> vector<512x128xf32>
    %26 = vector.broadcast %15 : vector<1x128xf32> to vector<512x128xf32>
    %27 = arith.addf %25, %26 : vector<512x128xf32>
    %28 = arith.addf %7, %27 : vector<512x128xf32>
    %29 = vector.extract_strided_slice %6 {offsets = [0, 128], sizes = [512, 128], strides = [1, 1]} : vector<512x384xf32> to vector<512x128xf32>
    %30 = arith.addf %28, %29 : vector<512x128xf32>
    %c1 = arith.constant 1 : index
    %c0_22 = arith.constant 0 : index
    %c0_23 = arith.constant 0 : index
    %31 = vector.load %arg4[%c1, %c0_22, %c0_23] : memref<5x128x128xbf16, #tpu.memory_space<vmem>>, vector<1x128x128xbf16>
    %32 = vector.shape_cast %31 : vector<1x128x128xbf16> to vector<128x128xbf16>
    %c1_24 = arith.constant 1 : index
    %c0_25 = arith.constant 0 : index
    %c0_26 = arith.constant 0 : index
    %33 = vector.load %arg5[%c1_24, %c0_25, %c0_26] : memref<5x1x128xf32, #tpu.memory_space<vmem>>, vector<1x1x128xf32>
    %34 = vector.shape_cast %33 : vector<1x1x128xf32> to vector<1x128xf32>
    %c1_27 = arith.constant 1 : index
    %c0_28 = arith.constant 0 : index
    %c0_29 = arith.constant 0 : index
    %35 = vector.load %arg6[%c1_27, %c0_28, %c0_29] : memref<5x128x128xbf16, #tpu.memory_space<vmem>>, vector<1x128x128xbf16>
    %36 = vector.shape_cast %35 : vector<1x128x128xbf16> to vector<128x128xbf16>
    %c1_30 = arith.constant 1 : index
    %c0_31 = arith.constant 0 : index
    %c0_32 = arith.constant 0 : index
    %37 = vector.load %arg7[%c1_30, %c0_31, %c0_32] : memref<5x1x128xf32, #tpu.memory_space<vmem>>, vector<1x1x128xf32>
    %38 = vector.shape_cast %37 : vector<1x1x128xf32> to vector<1x128xf32>
    %cst_33 = arith.constant 0.000000e+00 : f32
    %39 = vector.broadcast %cst_33 : f32 to vector<512x128xf32>
    %40 = arith.maximumf %30, %39 : vector<512x128xf32>
    %41 = arith.truncf %40 : vector<512x128xf32> to vector<512x128xbf16>
    %cst_34 = arith.constant dense<0.000000e+00> : vector<512x128xf32>
    %42 = tpu.matmul %41, %32, %cst_34 {dimension_numbers = #tpu.dot_dimension_numbers<[1], [0], [0], [1], [0, 0, 1, 1], [], []>} : vector<512x128xbf16>, vector<128x128xbf16>, vector<512x128xf32> -> vector<512x128xf32>
    %43 = vector.broadcast %34 : vector<1x128xf32> to vector<512x128xf32>
    %44 = arith.addf %42, %43 : vector<512x128xf32>
    %cst_35 = arith.constant 0.000000e+00 : f32
    %45 = vector.broadcast %cst_35 : f32 to vector<512x128xf32>
    %46 = arith.maximumf %44, %45 : vector<512x128xf32>
    %47 = arith.truncf %46 : vector<512x128xf32> to vector<512x128xbf16>
    %cst_36 = arith.constant dense<0.000000e+00> : vector<512x128xf32>
    %48 = tpu.matmul %47, %36, %cst_36 {dimension_numbers = #tpu.dot_dimension_numbers<[1], [0], [0], [1], [0, 0, 1, 1], [], []>} : vector<512x128xbf16>, vector<128x128xbf16>, vector<512x128xf32> -> vector<512x128xf32>
    %49 = vector.broadcast %38 : vector<1x128xf32> to vector<512x128xf32>
    %50 = arith.addf %48, %49 : vector<512x128xf32>
    %51 = arith.addf %30, %50 : vector<512x128xf32>
    %52 = vector.extract_strided_slice %6 {offsets = [0, 256], sizes = [512, 128], strides = [1, 1]} : vector<512x384xf32> to vector<512x128xf32>
    %53 = arith.addf %51, %52 : vector<512x128xf32>
    %c2 = arith.constant 2 : index
    %c0_37 = arith.constant 0 : index
    %c0_38 = arith.constant 0 : index
    %54 = vector.load %arg4[%c2, %c0_37, %c0_38] : memref<5x128x128xbf16, #tpu.memory_space<vmem>>, vector<1x128x128xbf16>
    %55 = vector.shape_cast %54 : vector<1x128x128xbf16> to vector<128x128xbf16>
    %c2_39 = arith.constant 2 : index
    %c0_40 = arith.constant 0 : index
    %c0_41 = arith.constant 0 : index
    %56 = vector.load %arg5[%c2_39, %c0_40, %c0_41] : memref<5x1x128xf32, #tpu.memory_space<vmem>>, vector<1x1x128xf32>
    %57 = vector.shape_cast %56 : vector<1x1x128xf32> to vector<1x128xf32>
    %c2_42 = arith.constant 2 : index
    %c0_43 = arith.constant 0 : index
    %c0_44 = arith.constant 0 : index
    %58 = vector.load %arg6[%c2_42, %c0_43, %c0_44] : memref<5x128x128xbf16, #tpu.memory_space<vmem>>, vector<1x128x128xbf16>
    %59 = vector.shape_cast %58 : vector<1x128x128xbf16> to vector<128x128xbf16>
    %c2_45 = arith.constant 2 : index
    %c0_46 = arith.constant 0 : index
    %c0_47 = arith.constant 0 : index
    %60 = vector.load %arg7[%c2_45, %c0_46, %c0_47] : memref<5x1x128xf32, #tpu.memory_space<vmem>>, vector<1x1x128xf32>
    %61 = vector.shape_cast %60 : vector<1x1x128xf32> to vector<1x128xf32>
    %cst_48 = arith.constant 0.000000e+00 : f32
    %62 = vector.broadcast %cst_48 : f32 to vector<512x128xf32>
    %63 = arith.maximumf %53, %62 : vector<512x128xf32>
    %64 = arith.truncf %63 : vector<512x128xf32> to vector<512x128xbf16>
    %cst_49 = arith.constant dense<0.000000e+00> : vector<512x128xf32>
    %65 = tpu.matmul %64, %55, %cst_49 {dimension_numbers = #tpu.dot_dimension_numbers<[1], [0], [0], [1], [0, 0, 1, 1], [], []>} : vector<512x128xbf16>, vector<128x128xbf16>, vector<512x128xf32> -> vector<512x128xf32>
    %66 = vector.broadcast %57 : vector<1x128xf32> to vector<512x128xf32>
    %67 = arith.addf %65, %66 : vector<512x128xf32>
    %cst_50 = arith.constant 0.000000e+00 : f32
    %68 = vector.broadcast %cst_50 : f32 to vector<512x128xf32>
    %69 = arith.maximumf %67, %68 : vector<512x128xf32>
    %70 = arith.truncf %69 : vector<512x128xf32> to vector<512x128xbf16>
    %cst_51 = arith.constant dense<0.000000e+00> : vector<512x128xf32>
    %71 = tpu.matmul %70, %59, %cst_51 {dimension_numbers = #tpu.dot_dimension_numbers<[1], [0], [0], [1], [0, 0, 1, 1], [], []>} : vector<512x128xbf16>, vector<128x128xbf16>, vector<512x128xf32> -> vector<512x128xf32>
    %72 = vector.broadcast %61 : vector<1x128xf32> to vector<512x128xf32>
    %73 = arith.addf %71, %72 : vector<512x128xf32>
    %74 = arith.addf %53, %73 : vector<512x128xf32>
    %75 = vector.extract_strided_slice %74 {offsets = [0, 0], sizes = [256, 128], strides = [1, 1]} : vector<512x128xf32> to vector<256x128xf32>
    %76 = vector.extract_strided_slice %74 {offsets = [256, 0], sizes = [256, 128], strides = [1, 1]} : vector<512x128xf32> to vector<256x128xf32>
    %77 = arith.addf %75, %76 : vector<256x128xf32>
    %cst_52 = arith.constant 5.000000e-01 : f32
    %78 = vector.broadcast %cst_52 : f32 to vector<256x128xf32>
    %79 = arith.mulf %77, %78 : vector<256x128xf32>
    %c3 = arith.constant 3 : index
    %c0_53 = arith.constant 0 : index
    %c0_54 = arith.constant 0 : index
    %80 = vector.load %arg4[%c3, %c0_53, %c0_54] : memref<5x128x128xbf16, #tpu.memory_space<vmem>>, vector<1x128x128xbf16>
    %81 = vector.shape_cast %80 : vector<1x128x128xbf16> to vector<128x128xbf16>
    %c3_55 = arith.constant 3 : index
    %c0_56 = arith.constant 0 : index
    %c0_57 = arith.constant 0 : index
    %82 = vector.load %arg5[%c3_55, %c0_56, %c0_57] : memref<5x1x128xf32, #tpu.memory_space<vmem>>, vector<1x1x128xf32>
    %83 = vector.shape_cast %82 : vector<1x1x128xf32> to vector<1x128xf32>
    %c3_58 = arith.constant 3 : index
    %c0_59 = arith.constant 0 : index
    %c0_60 = arith.constant 0 : index
    %84 = vector.load %arg6[%c3_58, %c0_59, %c0_60] : memref<5x128x128xbf16, #tpu.memory_space<vmem>>, vector<1x128x128xbf16>
    %85 = vector.shape_cast %84 : vector<1x128x128xbf16> to vector<128x128xbf16>
    %c3_61 = arith.constant 3 : index
    %c0_62 = arith.constant 0 : index
    %c0_63 = arith.constant 0 : index
    %86 = vector.load %arg7[%c3_61, %c0_62, %c0_63] : memref<5x1x128xf32, #tpu.memory_space<vmem>>, vector<1x1x128xf32>
    %87 = vector.shape_cast %86 : vector<1x1x128xf32> to vector<1x128xf32>
    %cst_64 = arith.constant 0.000000e+00 : f32
    %88 = vector.broadcast %cst_64 : f32 to vector<256x128xf32>
    %89 = arith.maximumf %79, %88 : vector<256x128xf32>
    %90 = arith.truncf %89 : vector<256x128xf32> to vector<256x128xbf16>
    %cst_65 = arith.constant dense<0.000000e+00> : vector<256x128xf32>
    %91 = tpu.matmul %90, %81, %cst_65 {dimension_numbers = #tpu.dot_dimension_numbers<[1], [0], [0], [1], [0, 0, 1, 1], [], []>} : vector<256x128xbf16>, vector<128x128xbf16>, vector<256x128xf32> -> vector<256x128xf32>
    %92 = vector.broadcast %83 : vector<1x128xf32> to vector<256x128xf32>
    %93 = arith.addf %91, %92 : vector<256x128xf32>
    %cst_66 = arith.constant 0.000000e+00 : f32
    %94 = vector.broadcast %cst_66 : f32 to vector<256x128xf32>
    %95 = arith.maximumf %93, %94 : vector<256x128xf32>
    %96 = arith.truncf %95 : vector<256x128xf32> to vector<256x128xbf16>
    %cst_67 = arith.constant dense<0.000000e+00> : vector<256x128xf32>
    %97 = tpu.matmul %96, %85, %cst_67 {dimension_numbers = #tpu.dot_dimension_numbers<[1], [0], [0], [1], [0, 0, 1, 1], [], []>} : vector<256x128xbf16>, vector<128x128xbf16>, vector<256x128xf32> -> vector<256x128xf32>
    %98 = vector.broadcast %87 : vector<1x128xf32> to vector<256x128xf32>
    %99 = arith.addf %97, %98 : vector<256x128xf32>
    %100 = arith.addf %79, %99 : vector<256x128xf32>
    %c4 = arith.constant 4 : index
    %c0_68 = arith.constant 0 : index
    %c0_69 = arith.constant 0 : index
    %101 = vector.load %arg4[%c4, %c0_68, %c0_69] : memref<5x128x128xbf16, #tpu.memory_space<vmem>>, vector<1x128x128xbf16>
    %102 = vector.shape_cast %101 : vector<1x128x128xbf16> to vector<128x128xbf16>
    %c4_70 = arith.constant 4 : index
    %c0_71 = arith.constant 0 : index
    %c0_72 = arith.constant 0 : index
    %103 = vector.load %arg5[%c4_70, %c0_71, %c0_72] : memref<5x1x128xf32, #tpu.memory_space<vmem>>, vector<1x1x128xf32>
    %104 = vector.shape_cast %103 : vector<1x1x128xf32> to vector<1x128xf32>
    %c4_73 = arith.constant 4 : index
    %c0_74 = arith.constant 0 : index
    %c0_75 = arith.constant 0 : index
    %105 = vector.load %arg6[%c4_73, %c0_74, %c0_75] : memref<5x128x128xbf16, #tpu.memory_space<vmem>>, vector<1x128x128xbf16>
    %106 = vector.shape_cast %105 : vector<1x128x128xbf16> to vector<128x128xbf16>
    %c4_76 = arith.constant 4 : index
    %c0_77 = arith.constant 0 : index
    %c0_78 = arith.constant 0 : index
    %107 = vector.load %arg7[%c4_76, %c0_77, %c0_78] : memref<5x1x128xf32, #tpu.memory_space<vmem>>, vector<1x1x128xf32>
    %108 = vector.shape_cast %107 : vector<1x1x128xf32> to vector<1x128xf32>
    %cst_79 = arith.constant 0.000000e+00 : f32
    %109 = vector.broadcast %cst_79 : f32 to vector<256x128xf32>
    %110 = arith.maximumf %100, %109 : vector<256x128xf32>
    %111 = arith.truncf %110 : vector<256x128xf32> to vector<256x128xbf16>
    %cst_80 = arith.constant dense<0.000000e+00> : vector<256x128xf32>
    %112 = tpu.matmul %111, %102, %cst_80 {dimension_numbers = #tpu.dot_dimension_numbers<[1], [0], [0], [1], [0, 0, 1, 1], [], []>} : vector<256x128xbf16>, vector<128x128xbf16>, vector<256x128xf32> -> vector<256x128xf32>
    %113 = vector.broadcast %104 : vector<1x128xf32> to vector<256x128xf32>
    %114 = arith.addf %112, %113 : vector<256x128xf32>
    %cst_81 = arith.constant 0.000000e+00 : f32
    %115 = vector.broadcast %cst_81 : f32 to vector<256x128xf32>
    %116 = arith.maximumf %114, %115 : vector<256x128xf32>
    %117 = arith.truncf %116 : vector<256x128xf32> to vector<256x128xbf16>
    %cst_82 = arith.constant dense<0.000000e+00> : vector<256x128xf32>
    %118 = tpu.matmul %117, %106, %cst_82 {dimension_numbers = #tpu.dot_dimension_numbers<[1], [0], [0], [1], [0, 0, 1, 1], [], []>} : vector<256x128xbf16>, vector<128x128xbf16>, vector<256x128xf32> -> vector<256x128xf32>
    %119 = vector.broadcast %108 : vector<1x128xf32> to vector<256x128xf32>
    %120 = arith.addf %118, %119 : vector<256x128xf32>
    %121 = arith.addf %100, %120 : vector<256x128xf32>
    %cst_83 = arith.constant 0.000000e+00 : f32
    %122 = vector.broadcast %cst_83 : f32 to vector<256x128xf32>
    %123 = arith.maximumf %121, %122 : vector<256x128xf32>
    %124 = arith.truncf %123 : vector<256x128xf32> to vector<256x128xbf16>
    %c0_84 = arith.constant 0 : index
    %c0_85 = arith.constant 0 : index
    %125 = vector.load %arg8[%c0_84, %c0_85] : memref<128x128xbf16, #tpu.memory_space<vmem>>, vector<128x128xbf16>
    %cst_86 = arith.constant dense<0.000000e+00> : vector<256x128xf32>
    %126 = tpu.matmul %124, %125, %cst_86 {dimension_numbers = #tpu.dot_dimension_numbers<[1], [0], [0], [1], [0, 0, 1, 1], [], []>} : vector<256x128xbf16>, vector<128x128xbf16>, vector<256x128xf32> -> vector<256x128xf32>
    %c0_87 = arith.constant 0 : index
    %c0_88 = arith.constant 0 : index
    %127 = vector.load %arg9[%c0_87, %c0_88] : memref<1x128xf32, #tpu.memory_space<vmem>>, vector<1x128xf32>
    %128 = vector.broadcast %127 : vector<1x128xf32> to vector<256x128xf32>
    %129 = arith.addf %126, %128 : vector<256x128xf32>
    %130 = arith.truncf %129 : vector<256x128xf32> to vector<256x128xbf16>
    %c0_89 = arith.constant 0 : index
    %c0_90 = arith.constant 0 : index
    %131 = vector.load %arg10[%c0_89, %c0_90] : memref<256x128xbf16, #tpu.memory_space<vmem>>, vector<256x128xbf16>
    tpu.vector_store %arg10[%c0_89, %c0_90], %130 {strides = array<i32>} : memref<256x128xbf16, #tpu.memory_space<vmem>>, vector<256x128xbf16>,
    return
  }
  func.func @transform_0(%arg0: i32) -> (i32, i32, i32) {
    %c0_i32 = arith.constant 0 : i32
    %c0_i32_0 = arith.constant 0 : i32
    %c0_i32_1 = arith.constant 0 : i32
    return %c0_i32, %arg0, %c0_i32_0 : i32, i32, i32
  }
  func.func @transform_1(%arg0: i32) -> (i32, i32) {
    %c0_i32 = arith.constant 0 : i32
    %c0_i32_0 = arith.constant 0 : i32
    %c0_i32_1 = arith.constant 0 : i32
    return %c0_i32, %c0_i32_0 : i32, i32
  }
  func.func @transform_2(%arg0: i32) -> (i32, i32) {
    %c0_i32 = arith.constant 0 : i32
    %c0_i32_0 = arith.constant 0 : i32
    %c0_i32_1 = arith.constant 0 : i32
    return %c0_i32, %c0_i32_0 : i32, i32
  }
  func.func @transform_3(%arg0: i32) -> (i32, i32, i32) {
    %c0_i32 = arith.constant 0 : i32
    %c0_i32_0 = arith.constant 0 : i32
    %c0_i32_1 = arith.constant 0 : i32
    %c0_i32_2 = arith.constant 0 : i32
    return %c0_i32, %c0_i32_0, %c0_i32_1 : i32, i32, i32
  }
  func.func @transform_4(%arg0: i32) -> (i32, i32, i32) {
    %c0_i32 = arith.constant 0 : i32
    %c0_i32_0 = arith.constant 0 : i32
    %c0_i32_1 = arith.constant 0 : i32
    %c0_i32_2 = arith.constant 0 : i32
    return %c0_i32, %c0_i32_0, %c0_i32_1 : i32, i32, i32
  }
  func.func @transform_5(%arg0: i32) -> (i32, i32, i32) {
    %c0_i32 = arith.constant 0 : i32
    %c0_i32_0 = arith.constant 0 : i32
    %c0_i32_1 = arith.constant 0 : i32
    %c0_i32_2 = arith.constant 0 : i32
    return %c0_i32, %c0_i32_0, %c0_i32_1 : i32, i32, i32
  }
  func.func @transform_6(%arg0: i32) -> (i32, i32, i32) {
    %c0_i32 = arith.constant 0 : i32
    %c0_i32_0 = arith.constant 0 : i32
    %c0_i32_1 = arith.constant 0 : i32
    %c0_i32_2 = arith.constant 0 : i32
    return %c0_i32, %c0_i32_0, %c0_i32_1 : i32, i32, i32
  }
  func.func @transform_7(%arg0: i32) -> (i32, i32) {
    %c0_i32 = arith.constant 0 : i32
    %c0_i32_0 = arith.constant 0 : i32
    %c0_i32_1 = arith.constant 0 : i32
    return %c0_i32, %c0_i32_0 : i32, i32
  }
  func.func @transform_8(%arg0: i32) -> (i32, i32) {
    %c0_i32 = arith.constant 0 : i32
    %c0_i32_0 = arith.constant 0 : i32
    %c0_i32_1 = arith.constant 0 : i32
    return %c0_i32, %c0_i32_0 : i32, i32
  }
  func.func @transform_9(%arg0: i32) -> (i32, i32) {
    %c0_i32 = arith.constant 0 : i32
    %c0_i32_0 = arith.constant 0 : i32
    return %arg0, %c0_i32 : i32, i32
  }
}

</mosaic_0001>

<bundles_post_ra>
// kernel: pixel_nerf_forward.1
= control target key start
LH: loop header
LB: loop body
LE: loop exit
PB: predicated region body
PF: predicated region fallthrough
CT: control target
= control target key end

     0   :  { %s8931_s30 = smov 0   ;;  %s8933_s10 = smov 0   ;;  %s11908_s0 = inlined_call_operand.vmem [shape: bf16[2,512,176], index: 0, kind: input, shape index: {}]   ;;  %s11909_s1 = inlined_call_operand.vmem [shape: bf16[176,384], index: 1, kind: input, shape index: {}]   ;;  %s11910_s2 = inlined_call_operand.vmem [shape: f32[1,384], index: 2, kind: input, shape index: {}]   ;;  %s11911_s3 = inlined_call_operand.vmem [shape: bf16[5,128,128], index: 3, kind: input, shape index: {}]   ;;  %s11912_s4 = inlined_call_operand.vmem [shape: f32[5,1,128], index: 4, kind: input, shape index: {}]   ;;  %s11913_s5 = inlined_call_operand.vmem [shape: bf16[5,128,128], index: 5, kind: input, shape index: {}]   ;;  %s11914_s6 = inlined_call_operand.vmem [shape: f32[5,1,128], index: 6, kind: input, shape index: {}]   ;;  %s11915_s7 = inlined_call_operand.vmem [shape: bf16[128,128], index: 7, kind: input, shape index: {}]   ;;  %s11916_s8 = inlined_call_operand.vmem [shape: f32[1,128], index: 8, kind: input, shape index: {}]   ;;  %s11917_s9 = inlined_call_operand.vmem [shape: bf16[512,128], index: 9, kind: output, shape index: {}]  }
   0x1   :  { %s8935_s11 = smov 0  }
   0x2 LB: > { %s6774_s12 = sadd.s32 4294967295, %s8878_s11   ;;  %s8948_s13 = sadd.s32 1, %s8878_s11   ;;  %s8878_s11 = sphi %s8935_s11, %s12386_s11   ;;  %s8874_s10 = sphi %s8933_s10, %s12385_s10   ;;  %s8870_s30 = sphi %s8931_s30, %s12384_s30  }
   0x3   : > { %s23_s14 = ssub.s32 %s8878_s11, %s8948_s13  ;;  %s26_s15 = sadd.s32 1, %s8874_s10 }
   0x4   : > { %p24_p0 = scmp.eq.s32.totalorder %s23_s14, 0  ;;  %p33_p1 = scmp.ne.s32.totalorder %s8874_s10, %s8870_s30 }
   0x5   : > { %p34_p2 = scmp.eq.s32.totalorder %s8878_s11, 0  ;;  %p6777_p4 = scmp.ge.s32.totalorder %s8878_s11, 2 }
   0x6   : > { %s8957_s16 = scalar_select %p24_p0, %s8874_s10, %s26_s15  }
   0x7   : > { %p35_p3 = por %p34_p2, %p33_p1  ;;  %277 = sbr.rel (%p6777_p4) target bundleno = 50 (0x32), region = 48 }
   0xe   : > { %280 = sbr.rel (!%p35_p3) target bundleno = 50 (0x32), region = 52  ;;  %s282_s17 = sand.u32 (%p35_p3), 1, %s8874_s10  }
   0xf   : > { %s7217_s18 = sshll.u32 (%p35_p3), %s8878_s11, 8  ;;  %s6778_s19 = sshll.u32 (%p35_p3), %s282_s17, 9 }
  0x10   : > { %s8965_s22 = scalar_lea.vmem (%p35_p3), %s11908_s0, %s7217_s18  ;;  %s8970_s23 = scalar_lea.vmem (%p35_p3), [#allocation2], %s6778_s19 }
  0x11   : > { %v442_v0 = vld [vmem:[%s8965_s22] sm:$0xff] (%p35_p3)  ;;  %v444_v1 = vld [vmem:[%s8965_s22 + $0x8] sm:$0xff] (%p35_p3)  ;;  %v446_v2 = vld [vmem:[%s8965_s22 + $0x10] sm:$0xff] (%p35_p3) }
  0x12   : > { %443 = vst [vmem:[%s8970_s23] sm:$0xff] (%p35_p3), %v442_v0  ;;  %445 = vst [vmem:[%s8970_s23 + $0x8] sm:$0xff] (%p35_p3), %v444_v1  ;;  %v448_v3 = vld [vmem:[%s8965_s22 + $0x18] sm:$0xff] (%p35_p3)  ;;  %v450_v4 = vld [vmem:[%s8965_s22 + $0x20] sm:$0xff] (%p35_p3) }
  0x13   : > { %447 = vst [vmem:[%s8970_s23 + $0x10] sm:$0xff] (%p35_p3), %v446_v2  ;;  %v452_v5 = vld [vmem:[%s8965_s22 + $0x28] sm:$0xff] (%p35_p3)  ;;  %449 = vst [vmem:[%s8970_s23 + $0x18] sm:$0xff] (%p35_p3), %v448_v3  ;;  %v454_v6 = vld [vmem:[%s8965_s22 + $0x30] sm:$0xff] (%p35_p3) }
  0x14   : > { %451 = vst [vmem:[%s8970_s23 + $0x20] sm:$0xff] (%p35_p3), %v450_v4  ;;  %453 = vst [vmem:[%s8970_s23 + $0x28] sm:$0xff] (%p35_p3), %v452_v5  ;;  %v456_v7 = vld [vmem:[%s8965_s22 + $0x38] sm:$0xff] (%p35_p3)  ;;  %v458_v8 = vld [vmem:[%s8965_s22 + $0x40] sm:$0xff] (%p35_p3) }
  0x15   : > { %455 = vst [vmem:[%s8970_s23 + $0x30] sm:$0xff] %v454_v6  ;;  %457 = vst [vmem:[%s8970_s23 + $0x38] sm:$0xff] %v456_v7  ;;  %v460_v9 = vld [vmem:[%s8965_s22 + $0x48] sm:$0xff]  ;;  %v462_v10 = vld [vmem:[%s8965_s22 + $0x50] sm:$0xff] }
  0x16   : > { %459 = vst [vmem:[%s8970_s23 + $0x40] sm:$0xff] %v458_v8  ;;  %v464_v11 = vld [vmem:[%s8965_s22 + $0x58] sm:$0xff]  ;;  %461 = vst [vmem:[%s8970_s23 + $0x48] sm:$0xff] %v460_v9  ;;  %v466_v12 = vld [vmem:[%s8965_s22 + $0x60] sm:$0xff] }
  0x17   : > { %463 = vst [vmem:[%s8970_s23 + $0x50] sm:$0xff] %v462_v10  ;;  %465 = vst [vmem:[%s8970_s23 + $0x58] sm:$0xff] %v464_v11  ;;  %v468_v13 = vld [vmem:[%s8965_s22 + $0x68] sm:$0xff]  ;;  %v470_v14 = vld [vmem:[%s8965_s22 + $0x70] sm:$0xff] }
  0x18   : > { %467 = vst [vmem:[%s8970_s23 + $0x60] sm:$0xff] %v466_v12  ;;  %469 = vst [vmem:[%s8970_s23 + $0x68] sm:$0xff] %v468_v13  ;;  %v472_v15 = vld [vmem:[%s8965_s22 + $0x78] sm:$0xff]  ;;  %v474_v16 = vld [vmem:[%s8965_s22 + $0x80] sm:$0xff] }
  0x19   : > { %471 = vst [vmem:[%s8970_s23 + $0x70] sm:$0xff] %v470_v14  ;;  %v476_v17 = vld [vmem:[%s8965_s22 + $0x88] sm:$0xff]  ;;  %473 = vst [vmem:[%s8970_s23 + $0x78] sm:$0xff] %v472_v15  ;;  %v478_v18 = vld [vmem:[%s8965_s22 + $0x90] sm:$0xff] }
  0x1a   : > { %475 = vst [vmem:[%s8970_s23 + $0x80] sm:$0xff] %v474_v16  ;;  %477 = vst [vmem:[%s8970_s23 + $0x88] sm:$0xff] %v476_v17  ;;  %v480_v19 = vld [vmem:[%s8965_s22 + $0x98] sm:$0xff]  ;;  %v482_v20 = vld [vmem:[%s8965_s22 + $0xa0] sm:$0xff] }
  0x1b   : > { %479 = vst [vmem:[%s8970_s23 + $0x90] sm:$0xff] %v478_v18  ;;  %481 = vst [vmem:[%s8970_s23 + $0x98] sm:$0xff] %v480_v19  ;;  %v484_v21 = vld [vmem:[%s8965_s22 + $0xa8] sm:$0xff]  ;;  %v486_v22 = vld [vmem:[%s8965_s22 + $0xb0] sm:$0xff] }
  0x1c   : > { %483 = vst [vmem:[%s8970_s23 + $0xa0] sm:$0xff] %v482_v20  ;;  %v488_v23 = vld [vmem:[%s8965_s22 + $0xb8] sm:$0xff]  ;;  %485 = vst [vmem:[%s8970_s23 + $0xa8] sm:$0xff] %v484_v21  ;;  %v490_v24 = vld [vmem:[%s8965_s22 + $0xc0] sm:$0xff] }
  0x1d   : > { %487 = vst [vmem:[%s8970_s23 + $0xb0] sm:$0xff] %v486_v22  ;;  %489 = vst [vmem:[%s8970_s23 + $0xb8] sm:$0xff] %v488_v23  ;;  %v492_v25 = vld [vmem:[%s8965_s22 + $0xc8] sm:$0xff]  ;;  %v494_v26 = vld [vmem:[%s8965_s22 + $0xd0] sm:$0xff] }
  0x1e   : > { %491 = vst [vmem:[%s8970_s23 + $0xc0] sm:$0xff] %v490_v24  ;;  %493 = vst [vmem:[%s8970_s23 + $0xc8] sm:$0xff] %v492_v25  ;;  %v496_v27 = vld [vmem:[%s8965_s22 + $0xd8] sm:$0xff]  ;;  %v498_v28 = vld [vmem:[%s8965_s22 + $0xe0] sm:$0xff] }
  0x1f   : > { %495 = vst [vmem:[%s8970_s23 + $0xd0] sm:$0xff] %v494_v26  ;;  %v500_v29 = vld [vmem:[%s8965_s22 + $0xe8] sm:$0xff]  ;;  %497 = vst [vmem:[%s8970_s23 + $0xd8] sm:$0xff] %v496_v27  ;;  %v502_v30 = vld [vmem:[%s8965_s22 + $0xf0] sm:$0xff] }
  0x20   : > { %499 = vst [vmem:[%s8970_s23 + $0xe0] sm:$0xff] %v498_v28  ;;  %501 = vst [vmem:[%s8970_s23 + $0xe8] sm:$0xff] %v500_v29  ;;  %v504_v31 = vld [vmem:[%s8965_s22 + $0xf8] sm:$0xff]  ;;  %v506_v32 = vld [vmem:[%s8965_s22 + $0x200] sm:$0xff] }
  0x21   : > { %503 = vst [vmem:[%s8970_s23 + $0xf0] sm:$0xff] %v502_v30  ;;  %505 = vst [vmem:[%s8970_s23 + $0xf8] sm:$0xff] %v504_v31  ;;  %v508_v33 = vld [vmem:[%s8965_s22 + $0x208] sm:$0xff]  ;;  %v510_v34 = vld [vmem:[%s8965_s22 + $0x210] sm:$0xff] }
  0x22   : > { %507 = vst [vmem:[%s8970_s23 + $0x100] sm:$0xff] %v506_v32  ;;  %v512_v35 = vld [vmem:[%s8965_s22 + $0x218] sm:$0xff]  ;;  %509 = vst [vmem:[%s8970_s23 + $0x108] sm:$0xff] %v508_v33  ;;  %v514_v36 = vld [vmem:[%s8965_s22 + $0x220] sm:$0xff] }
  0x23   : > { %511 = vst [vmem:[%s8970_s23 + $0x110] sm:$0xff] %v510_v34  ;;  %513 = vst [vmem:[%s8970_s23 + $0x118] sm:$0xff] %v512_v35  ;;  %v516_v37 = vld [vmem:[%s8965_s22 + $0x228] sm:$0xff]  ;;  %v518_v38 = vld [vmem:[%s8965_s22 + $0x230] sm:$0xff] }
  0x24   : > { %515 = vst [vmem:[%s8970_s23 + $0x120] sm:$0xff] %v514_v36  ;;  %517 = vst [vmem:[%s8970_s23 + $0x128] sm:$0xff] %v516_v37  ;;  %v520_v39 = vld [vmem:[%s8965_s22 + $0x238] sm:$0xff]  ;;  %v522_v40 = vld [vmem:[%s8965_s22 + $0x240] sm:$0xff] }
  0x25   : > { %519 = vst [vmem:[%s8970_s23 + $0x130] sm:$0xff] %v518_v38  ;;  %v524_v41 = vld [vmem:[%s8965_s22 + $0x248] sm:$0xff]  ;;  %521 = vst [vmem:[%s8970_s23 + $0x138] sm:$0xff] %v520_v39  ;;  %v526_v42 = vld [vmem:[%s8965_s22 + $0x250] sm:$0xff] }
  0x26   : > { %523 = vst [vmem:[%s8970_s23 + $0x140] sm:$0xff] %v522_v40  ;;  %525 = vst [vmem:[%s8970_s23 + $0x148] sm:$0xff] %v524_v41  ;;  %v528_v43 = vld [vmem:[%s8965_s22 + $0x258] sm:$0xff]  ;;  %v530_v44 = vld [vmem:[%s8965_s22 + $0x260] sm:$0xff] }
  0x27   : > { %527 = vst [vmem:[%s8970_s23 + $0x150] sm:$0xff] %v526_v42  ;;  %529 = vst [vmem:[%s8970_s23 + $0x158] sm:$0xff] %v528_v43  ;;  %v532_v45 = vld [vmem:[%s8965_s22 + $0x268] sm:$0xff]  ;;  %v534_v46 = vld [vmem:[%s8965_s22 + $0x270] sm:$0xff] }
  0x28   : > { %531 = vst [vmem:[%s8970_s23 + $0x160] sm:$0xff] %v530_v44  ;;  %v536_v47 = vld [vmem:[%s8965_s22 + $0x278] sm:$0xff]  ;;  %533 = vst [vmem:[%s8970_s23 + $0x168] sm:$0xff] %v532_v45  ;;  %v538_v48 = vld [vmem:[%s8965_s22 + $0x280] sm:$0xff] }
  0x29   : > { %535 = vst [vmem:[%s8970_s23 + $0x170] sm:$0xff] %v534_v46  ;;  %537 = vst [vmem:[%s8970_s23 + $0x178] sm:$0xff] %v536_v47  ;;  %v540_v49 = vld [vmem:[%s8965_s22 + $0x288] sm:$0xff]  ;;  %v542_v50 = vld [vmem:[%s8965_s22 + $0x290] sm:$0xff] }
  0x2a   : > { %539 = vst [vmem:[%s8970_s23 + $0x180] sm:$0xff] %v538_v48  ;;  %541 = vst [vmem:[%s8970_s23 + $0x188] sm:$0xff] %v540_v49  ;;  %v544_v51 = vld [vmem:[%s8965_s22 + $0x298] sm:$0xff]  ;;  %v546_v52 = vld [vmem:[%s8965_s22 + $0x2a0] sm:$0xff] }
  0x2b   : > { %543 = vst [vmem:[%s8970_s23 + $0x190] sm:$0xff] %v542_v50  ;;  %v548_v53 = vld [vmem:[%s8965_s22 + $0x2a8] sm:$0xff]  ;;  %545 = vst [vmem:[%s8970_s23 + $0x198] sm:$0xff] %v544_v51  ;;  %v550_v54 = vld [vmem:[%s8965_s22 + $0x2b0] sm:$0xff] }
  0x2c   : > { %547 = vst [vmem:[%s8970_s23 + $0x1a0] sm:$0xff] %v546_v52  ;;  %549 = vst [vmem:[%s8970_s23 + $0x1a8] sm:$0xff] %v548_v53  ;;  %v552_v55 = vld [vmem:[%s8965_s22 + $0x2b8] sm:$0xff]  ;;  %v554_v56 = vld [vmem:[%s8965_s22 + $0x2c0] sm:$0xff] }
  0x2d   : > { %551 = vst [vmem:[%s8970_s23 + $0x1b0] sm:$0xff] %v550_v54  ;;  %553 = vst [vmem:[%s8970_s23 + $0x1b8] sm:$0xff] %v552_v55  ;;  %v556_v57 = vld [vmem:[%s8965_s22 + $0x2c8] sm:$0xff]  ;;  %v558_v58 = vld [vmem:[%s8965_s22 + $0x2d0] sm:$0xff] }
  0x2e   : > { %555 = vst [vmem:[%s8970_s23 + $0x1c0] sm:$0xff] %v554_v56  ;;  %v560_v59 = vld [vmem:[%s8965_s22 + $0x2d8] sm:$0xff]  ;;  %557 = vst [vmem:[%s8970_s23 + $0x1c8] sm:$0xff] %v556_v57  ;;  %v562_v60 = vld [vmem:[%s8965_s22 + $0x2e0] sm:$0xff] }
  0x2f   : > { %559 = vst [vmem:[%s8970_s23 + $0x1d0] sm:$0xff] %v558_v58  ;;  %561 = vst [vmem:[%s8970_s23 + $0x1d8] sm:$0xff] %v560_v59  ;;  %v564_v61 = vld [vmem:[%s8965_s22 + $0x2e8] sm:$0xff]  ;;  %v566_v62 = vld [vmem:[%s8965_s22 + $0x2f0] sm:$0xff] }
  0x30   : > { %563 = vst [vmem:[%s8970_s23 + $0x1e0] sm:$0xff] %v562_v60  ;;  %565 = vst [vmem:[%s8970_s23 + $0x1e8] sm:$0xff] %v564_v61  ;;  %v568_v63 = vld [vmem:[%s8965_s22 + $0x2f8] sm:$0xff] }
  0x31   : > { %567 = vst [vmem:[%s8970_s23 + $0x1f0] sm:$0xff] %v566_v62  ;;  %569 = vst [vmem:[%s8970_s23 + $0x1f8] sm:$0xff] %v568_v63 }
  0x32 PF: > { %p6782_p5 = scmp.ge.s32.totalorder %s8878_s11, 1  ;;  %p574_p6 = scmp.lt.s32.totalorder %s8878_s11, 3 }
  0x34   : > { %p575_p7 = pnand %p6782_p5, %p574_p6 }
  0x36   : > { %578 = sbr.rel (%p575_p7) target bundleno = 3028 (0xbd4), region = 90 }
  0x3d   : > { %v8626_v0 = vld [vmem:[%s11909_s1 + $0x4] ss:$12 sps:$4 sm:$0xff]   ;;  %v8628_v1 = vld [vmem:[%s11909_s1] ss:$12 sps:$4 sm:$0xff]   ;;  %v8629_v2 = vld [vmem:[%s11909_s1 + $0x1c] ss:$12 sps:$4 sm:$0xff]  }
  0x3e   : > { %1310 = vmatprep.subr.bf16.mxu0 %v8626_v0  ;;  %v8631_v3 = vld [vmem:[%s11909_s1 + $0x18] ss:$12 sps:$4 sm:$0xff]   ;;  %v8632_v4 = vld [vmem:[%s11909_s1 + $0x34] ss:$12 sps:$4 sm:$0xff]   ;;  %s581_s19 = sand.u32 1, %s8870_s30   ;;  %vm1213_vm0 = vcmask 392192  }
  0x3f   : > { %1311 = vmatpush1.bf16.msra.mxu0 %v8628_v1  ;;  %v8634_v5 = vld [vmem:[%s11909_s1 + $0x30] ss:$12 sps:$4 sm:$0xff]   ;;  %v8635_v6 = vld [vmem:[%s11909_s1 + $0x4c] ss:$12 sps:$4 sm:$0xff]   ;;  %s6783_s24 = sshll.u32 %s581_s19, 9  ;;  %v8880_v20 = vmov 0  }
  0x40   : > { %1312 = vmatprep.subr.bf16.mxu0 %v8629_v2  ;;  %v8637_v7 = vld [vmem:[%s11909_s1 + $0x48] ss:$12 sps:$4 sm:$0xff]   ;;  %v8638_v8 = vld [vmem:[%s11909_s1 + $0x64] ss:$12 sps:$4 sm:$0xff]   ;;  %s9127_s30 = scalar_lea.vmem [#allocation2], %s6783_s24  ;;  %1663 = vmatprep.subr.bf16.mxu1 %v8880_v20  ;;  %v8745_v54 = vld [vmem:[%s11911_s3 + $0x18] sm:$0xff]  }
  0x41   : > { %v8640_v9 = vld [vmem:[%s11909_s1 + $0x60] ss:$12 sps:$4 sm:$0xff]   ;;  %v8641_v11 = vld [vmem:[%s11909_s1 + $0x7c] ss:$12 sps:$4 sm:$0xff]   ;;  %v8643_v12 = vld [vmem:[%s11909_s1 + $0x78] ss:$12 sps:$4 sm:$0xff]  }
  0x42   : > { %v8661_v10 = vld [vmem:[%s9127_s30 + $0x4] ss:$8 sps:$4 sm:$0xff]   ;;  %v8644_v13 = vld [vmem:[%s11909_s1 + $0x94] ss:$12 sps:$4 sm:$0xff]   ;;  %v8646_v14 = vld [vmem:[%s11909_s1 + $0x90] ss:$12 sps:$4 sm:$0xff]  }
  0x43   : > { %1313 = vmatpush1.bf16.msra.mxu0 %v8631_v3  ;;  %6883 = vmatprep.mubr.msk.bf16.mxu0 %vm1213_vm0, %v8661_v10  ;;  %v8647_v15 = vld [vmem:[%s11909_s1 + $0xac] ss:$12 sps:$4 sm:$0xff]   ;;  %v8649_v16 = vld [vmem:[%s11909_s1 + $0xa8] ss:$12 sps:$4 sm:$0xff]   ;;  %v8650_v17 = vld [vmem:[%s11909_s1 + $0xc4] ss:$12 sps:$4 sm:$0xff]  }
  0x44   : > { %1314 = vmatprep.subr.bf16.mxu0 %v8632_v4  ;;  %6915 = vmatprep.mubr.msk.bf16.mxu1 %vm1213_vm0, %v8661_v10  ;;  %v8652_v18 = vld [vmem:[%s11909_s1 + $0xc0] ss:$12 sps:$4 sm:$0xff]   ;;  %v8653_v19 = vld [vmem:[%s11909_s1 + $0xdc] ss:$12 sps:$4 sm:$0xff]   ;;  %v8655_v21 = vld [vmem:[%s11909_s1 + $0xd8] ss:$12 sps:$4 sm:$0xff]  }
  0x45   : > { %v8656_v22 = vld [vmem:[%s11909_s1 + $0xf4] ss:$12 sps:$4 sm:$0xff]   ;;  %v8658_v24 = vld [vmem:[%s11909_s1 + $0xf0] ss:$12 sps:$4 sm:$0xff]   ;;  %v9189_v29 = vld [vmem:[%s11911_s3 + $0x8] sm:$0xff]   ;;  %s6784_s27 = sshll.u32 %s6774_s12, 5 }
  0x46   : > { %v8708_v23 = vld [vmem:[%s11909_s1 + $0x8] ss:$12 sps:$4 sm:$0xff]   ;;  %v8710_v25 = vld [vmem:[%s11909_s1 + $0x20] ss:$12 sps:$4 sm:$0xff]   ;;  %v8714_v30 = vld [vmem:[%s11909_s1 + $0x38] ss:$12 sps:$4 sm:$0xff]  }
  0x47   : > { %1315 = vmatpush1.bf16.msra.mxu0 %v8634_v5  ;;  %1664 = vmatpush1.bf16.msra.mxu1 %v8708_v23  ;;  %v8659_v26 = vld [vmem:[%s9127_s30] ss:$8 sps:$4 sm:$0xff]   ;;  %v8662_v28 = vld [vmem:[%s9127_s30 + $0x14] ss:$8 sps:$4 sm:$0xff]   ;;  %v8664_v32 = vld [vmem:[%s9127_s30 + $0x10] ss:$8 sps:$4 sm:$0xff]  }
  0x48   : > { %1316 = vmatprep.subr.bf16.mxu0 %v8635_v6  ;;  %v9182_v27 = vld [vmem:[%s11911_s3] sm:$0xff]   ;;  %1665 = vmatprep.subr.bf16.mxu1 %v8880_v20  ;;  %v8715_v31 = vld [vmem:[%s11909_s1 + $0x50] ss:$12 sps:$4 sm:$0xff]   ;;  %v8719_v34 = vld [vmem:[%s11909_s1 + $0x68] ss:$12 sps:$4 sm:$0xff]   ;;  %p618_p8 = scmp.lt.s32.totalorder %s6784_s27, 63 }
  0x49   : > { %v8665_v33 = vld [vmem:[%s9127_s30 + $0x24] ss:$8 sps:$4 sm:$0xff]   ;;  %v8667_v36 = vld [vmem:[%s9127_s30 + $0x20] ss:$8 sps:$4 sm:$0xff]   ;;  %v8668_v37 = vld [vmem:[%s9127_s30 + $0x34] ss:$8 sps:$4 sm:$0xff]  }
  0x4a   : > { %v8720_v35 = vld [vmem:[%s11909_s1 + $0x80] ss:$12 sps:$4 sm:$0xff]   ;;  %v8724_v38 = vld [vmem:[%s11909_s1 + $0x98] ss:$12 sps:$4 sm:$0xff]   ;;  %v8725_v39 = vld [vmem:[%s11909_s1 + $0xb0] ss:$12 sps:$4 sm:$0xff]  }
  0x4b   : > { %1317 = vmatpush1.bf16.msra.mxu0 %v8637_v7  ;;  %1666 = vmatpush1.bf16.msra.mxu1 %v8710_v25  ;;  %v8670_v40 = vld [vmem:[%s9127_s30 + $0x30] ss:$8 sps:$4 sm:$0xff]   ;;  %v8671_v41 = vld [vmem:[%s9127_s30 + $0x44] ss:$8 sps:$4 sm:$0xff]   ;;  %v8729_v42 = vld [vmem:[%s11909_s1 + $0xc8] ss:$12 sps:$4 sm:$0xff]  }
  0x4c   : > { %1318 = vmatprep.subr.bf16.mxu0 %v8638_v8  ;;  %1667 = vmatprep.subr.bf16.mxu1 %v8880_v20  ;;  %v8730_v43 = vld [vmem:[%s11911_s3 + $0x10] sm:$0xff]   ;;  %v8731_v44 = vld [vmem:[%s11909_s1 + $0xe0] ss:$12 sps:$4 sm:$0xff]   ;;  %v8735_v47 = vld [vmem:[%s11909_s1 + $0xf8] ss:$12 sps:$4 sm:$0xff]   ;;  %s12388_s27 = smov (!%p618_p8, %s6784_s27), 63 }
  0x4d   : > { %v8673_v45 = vld [vmem:[%s9127_s30 + $0x40] ss:$8 sps:$4 sm:$0xff]   ;;  %v8674_v46 = vld [vmem:[%s9127_s30 + $0x54] ss:$8 sps:$4 sm:$0xff]   ;;  %v8676_v48 = vld [vmem:[%s9127_s30 + $0x50] ss:$8 sps:$4 sm:$0xff]  }
  0x4e   : > { %v8677_v49 = vld [vmem:[%s9127_s30 + $0x64] ss:$8 sps:$4 sm:$0xff]   ;;  %v8679_v50 = vld [vmem:[%s9127_s30 + $0x60] ss:$8 sps:$4 sm:$0xff]   ;;  %v8680_v51 = vld [vmem:[%s9127_s30 + $0x74] ss:$8 sps:$4 sm:$0xff]  }
  0x4f   : > { %1319 = vmatpush1.bf16.msra.mxu0 %v8640_v9  ;;  %1668 = vmatpush1.bf16.msra.mxu1 %v8714_v30  ;;  %v8682_v52 = vld [vmem:[%s9127_s30 + $0x70] ss:$8 sps:$4 sm:$0xff]   ;;  %v8683_v53 = vld [vmem:[%s9127_s30 + $0x84] ss:$8 sps:$4 sm:$0xff]   ;;  %v8685_v55 = vld [vmem:[%s9127_s30 + $0x80] ss:$8 sps:$4 sm:$0xff]  }
  0x50   : > { %1320 = vmatprep.subr.bf16.mxu0 %v8641_v11  ;;  %1669 = vmatprep.subr.bf16.mxu1 %v8880_v20  ;;  %v8686_v56 = vld [vmem:[%s9127_s30 + $0x94] ss:$8 sps:$4 sm:$0xff]   ;;  %v8688_v57 = vld [vmem:[%s9127_s30 + $0x90] ss:$8 sps:$4 sm:$0xff]   ;;  %v8689_v58 = vld [vmem:[%s9127_s30 + $0xa4] ss:$8 sps:$4 sm:$0xff]  }
  0x51   : > { %v8691_v59 = vld [vmem:[%s9127_s30 + $0xa0] ss:$8 sps:$4 sm:$0xff]   ;;  %v8692_v60 = vld [vmem:[%s9127_s30 + $0xb4] ss:$8 sps:$4 sm:$0xff]   ;;  %v8694_v61 = vld [vmem:[%s9127_s30 + $0xb0] ss:$8 sps:$4 sm:$0xff]  }
  0x52   : > { %v8696_v62 = vld [vmem:[%s9127_s30 + $0xc4] ss:$8 sps:$4 sm:$0xff]   ;;  %v8698_v63 = vld [vmem:[%s9127_s30 + $0xc0] ss:$8 sps:$4 sm:$0xff]   ;;  %v8699_v0 = vld [vmem:[%s9127_s30 + $0xd4] ss:$8 sps:$4 sm:$0xff]  }
  0x53   : > { %1321 = vmatpush1.bf16.msra.mxu0 %v8643_v12  ;;  %1670 = vmatpush1.bf16.msra.mxu1 %v8715_v31  ;;  %v8758_v1 = vld [vmem:[%s11911_s3 + $0x20] sm:$0xff]   ;;  %v8701_v2 = vld [vmem:[%s9127_s30 + $0xd0] ss:$8 sps:$4 sm:$0xff]   ;;  %v8705_v5 = vld [vmem:[%s9127_s30 + $0xf4] ss:$8 sps:$4 sm:$0xff]   ;;  %s6785_s14 = sshll.u32 %s12388_s27, 2 }
  0x54   : > { %1322 = vmatprep.subr.bf16.mxu0 %v8644_v13  ;;  %1671 = vmatprep.subr.bf16.mxu1 %v8880_v20  ;;  %v8702_v3 = vld [vmem:[%s9127_s30 + $0xe4] ss:$8 sps:$4 sm:$0xff]   ;;  %v8704_v4 = vld [vmem:[%s9127_s30 + $0xe0] ss:$8 sps:$4 sm:$0xff]   ;;  %v8707_v7 = vld [vmem:[%s9127_s30 + $0xf0] ss:$8 sps:$4 sm:$0xff]   ;;  %s11851_s15 = scalar_lea.vmem %s11917_s9, %s6785_s14 }
  0x55   : > { %v8768_v6 = vld [vmem:[%s11911_s3 + $0x28] sm:$0xff]   ;;  %v8772_v9 = vld [vmem:[%s11911_s3 + $0x30] sm:$0xff]   ;;  %v8773_v10 = vld [vmem:[%s11911_s3 + $0x38] sm:$0xff]  }
  0x56   : > { %v8711_v8 = vld [vmem:[%s9127_s30 + $0x104] ss:$8 sps:$4 sm:$0xff]   ;;  %v8713_v11 = vld [vmem:[%s9127_s30 + $0x100] ss:$8 sps:$4 sm:$0xff]   ;;  %v8716_v12 = vld [vmem:[%s9127_s30 + $0x114] ss:$8 sps:$4 sm:$0xff]  }
  0x57   : > { %1323 = vmatpush1.bf16.msra.mxu0 %v8646_v14  ;;  %1672 = vmatpush1.bf16.msra.mxu1 %v8719_v34  ;;  %v8718_v13 = vld [vmem:[%s9127_s30 + $0x110] ss:$8 sps:$4 sm:$0xff]   ;;  %v8721_v14 = vld [vmem:[%s9127_s30 + $0x124] ss:$8 sps:$4 sm:$0xff]   ;;  %v8741_v23 = vld [vmem:[%s9127_s30 + $0x160] ss:$8 sps:$4 sm:$0xff]  }
  0x58   : > { %1324 = vmatprep.subr.bf16.mxu0 %v8647_v15  ;;  %1673 = vmatprep.subr.bf16.mxu1 %v8880_v20  ;;  %v8723_v15 = vld [vmem:[%s9127_s30 + $0x120] ss:$8 sps:$4 sm:$0xff]   ;;  %v8744_v25 = vld [vmem:[%s9127_s30 + $0x170] ss:$8 sps:$4 sm:$0xff]   ;;  %v8752_v30 = vld [vmem:[%s9127_s30 + $0x1a4] ss:$8 sps:$4 sm:$0xff]  }
  0x59   : > { %v8754_v31 = vld [vmem:[%s9127_s30 + $0x1a0] ss:$8 sps:$4 sm:$0xff]  }
  0x5b   : > { %1325 = vmatpush1.bf16.msra.mxu0 %v8649_v16  ;;  %1674 = vmatpush1.bf16.msra.mxu1 %v8720_v35  ;;  %v8726_v16 = vld [vmem:[%s9127_s30 + $0x134] ss:$8 sps:$4 sm:$0xff]   ;;  %v9357_v35 = vld [vmem:[%s9127_s30 + $0x1b0] ss:$8 sps:$4 sm:$0xff]  }
  0x5c   : > { %1326 = vmatprep.subr.bf16.mxu0 %v8650_v17  ;;  %1675 = vmatprep.subr.bf16.mxu1 %v8880_v20  ;;  %v8728_v17 = vld [vmem:[%s9127_s30 + $0x130] ss:$8 sps:$4 sm:$0xff]  }
  0x5f   : > { %1327 = vmatpush1.bf16.msra.mxu0 %v8652_v18  ;;  %1676 = vmatpush1.bf16.msra.mxu1 %v8724_v38  ;;  %v8732_v18 = vld [vmem:[%s9127_s30 + $0x144] ss:$8 sps:$4 sm:$0xff]  }
  0x60   : > { %1328 = vmatprep.subr.bf16.mxu0 %v8653_v19  ;;  %1677 = vmatprep.subr.bf16.mxu1 %v8880_v20  ;;  %v8734_v19 = vld [vmem:[%s9127_s30 + $0x140] ss:$8 sps:$4 sm:$0xff]  }
  0x63   : > { %1329 = vmatpush1.bf16.msra.mxu0 %v8655_v21  ;;  %1678 = vmatpush1.bf16.msra.mxu1 %v8725_v39  ;;  %v8738_v21 = vld [vmem:[%s9127_s30 + $0x150] ss:$8 sps:$4 sm:$0xff]  }
  0x64   : > { %1330 = vmatprep.subr.bf16.mxu0 %v8656_v22  ;;  %1679 = vmatprep.subr.bf16.mxu1 %v8880_v20  ;;  %v8739_v22 = vld [vmem:[%s9127_s30 + $0x164] ss:$8 sps:$4 sm:$0xff]  }
  0x67   : > { %1331 = vmatpush1.bf16.msra.mxu0 %v8658_v24  ;;  %1680 = vmatpush1.bf16.msra.mxu1 %v8729_v42  ;;  %v8742_v24 = vld [vmem:[%s9127_s30 + $0x174] ss:$8 sps:$4 sm:$0xff]  }
  0x68   : > { %7705 = vmatprep.subr.bf16.mxu0 %v9182_v27  ;;  %1681 = vmatprep.subr.bf16.mxu1 %v8880_v20 }
  0x6a   : > { %1343 = vmatmul.mubr.bf16.vlgmr.msra.gmra.mrb[0].mxu0 %v8659_v26 }
  0x6b   : > { %6884 = vmatprep.mubr.msk.bf16.mxu0 %vm1213_vm0, %v8662_v28  ;;  %7706 = vmatpush3.bf16.msra.mxu0 %v9182_v27 }
  0x6c   : > { %7707 = vmatprep.subr.bf16.mxu0 %v9189_v29  ;;  %1682 = vmatpush1.bf16.msra.mxu1 %v8731_v44 }
  0x6d   : > { %1683 = vmatprep.subr.bf16.mxu1 %v8880_v20  ;;  %v8736_v20 = vld [vmem:[%s9127_s30 + $0x154] ss:$8 sps:$4 sm:$0xff]  }
  0x6f   : > { %7708 = vmatpush3.bf16.msra.mxu0 %v9189_v29 }
  0x70   : > { %7709 = vmatprep.subr.bf16.mxu0 %v8730_v43  ;;  %1684 = vmatpush1.bf16.msra.mxu1 %v8735_v47 }
  0x71   : > { %8425 = vmatprep.subr.bf16.mxu1 %v9182_v27 }
  0x72   : > { %1353 = vmatmul.mubr.bf16.gmra.mrb[4].mxu0 %v8664_v32 }
  0x73   : > { %6885 = vmatprep.mubr.msk.bf16.mxu0 %vm1213_vm0, %v8665_v33  ;;  %7710 = vmatpush3.bf16.msra.mxu0 %v8730_v43 }
  0x74   : > { %1696 = vmatmul.mubr.bf16.vlgmr.msra.gmra.mrb[0].mxu1 %v8659_v26  ;;  %7711 = vmatprep.subr.bf16.mxu0 %v8745_v54  ;;  %v8746_v26 = vld [vmem:[%s9127_s30 + $0x184] ss:$8 sps:$4 sm:$0xff]  }
  0x75   : > { %6916 = vmatprep.mubr.msk.bf16.mxu1 %vm1213_vm0, %v8662_v28  ;;  %8433 = vmatpush3.bf16.msra.mxu1 %v9182_v27  ;;  %v8748_v27 = vld [vmem:[%s9127_s30 + $0x180] ss:$8 sps:$4 sm:$0xff]   ;;  %v8749_v28 = vld [vmem:[%s9127_s30 + $0x194] ss:$8 sps:$4 sm:$0xff]  }
  0x76   : > { %8426 = vmatprep.subr.bf16.mxu1 %v9189_v29 }
  0x77   : > { %7712 = vmatpush3.bf16.msra.mxu0 %v8745_v54 }
  0x78   : > { %7713 = vmatprep.subr.bf16.mxu0 %v8758_v1 }
  0x79   : > { %8434 = vmatpush3.bf16.msra.mxu1 %v9189_v29  ;;  %v8751_v29 = vld [vmem:[%s9127_s30 + $0x190] ss:$8 sps:$4 sm:$0xff]  }
  0x7a   : > { %1363 = vmatmul.mubr.bf16.gmra.mrb[8].mxu0 %v8667_v36  ;;  %8427 = vmatprep.subr.bf16.mxu1 %v8730_v43 }
  0x7b   : > { %6886 = vmatprep.mubr.msk.bf16.mxu0 %vm1213_vm0, %v8668_v37  ;;  %7714 = vmatpush3.bf16.msra.mxu0 %v8758_v1 }
  0x7c   : > { %1704 = vmatmul.mubr.bf16.gmra.mrb[4].mxu1 %v8664_v32  ;;  %7715 = vmatprep.subr.bf16.mxu0 %v8768_v6  ;;  %v8755_v32 = vld [vmem:[%s9127_s30 + $0x1b4] ss:$8 sps:$4 sm:$0xff]  }
  0x7d   : > { %6917 = vmatprep.mubr.msk.bf16.mxu1 %vm1213_vm0, %v8665_v33  ;;  %8435 = vmatpush3.bf16.msra.mxu1 %v8730_v43  ;;  %v9374_v43 = vld [vmem:[%s9127_s30 + $0x1d4] ss:$8 sps:$4 sm:$0xff]  }
  0x7e   : > { %8428 = vmatprep.subr.bf16.mxu1 %v8745_v54 }
  0x7f   : > { %7716 = vmatpush3.bf16.msra.mxu0 %v8768_v6 }
  0x80   : > { %7717 = vmatprep.subr.bf16.mxu0 %v8772_v9 }
  0x81   : > { %8436 = vmatpush3.bf16.msra.mxu1 %v8745_v54  ;;  %v732_v54 = vld [vmem:[%s11910_s2] sm:$0x7] }
  0x82   : > { %1373 = vmatmul.mubr.bf16.gmra.mrb[12].mxu0 %v8670_v40  ;;  %8429 = vmatprep.subr.bf16.mxu1 %v8758_v1 }
  0x83   : > { %6887 = vmatprep.mubr.msk.bf16.mxu0 %vm1213_vm0, %v8671_v41  ;;  %7718 = vmatpush3.bf16.msra.mxu0 %v8772_v9 }
  0x84   : > { %1712 = vmatmul.mubr.bf16.gmra.mrb[8].mxu1 %v8667_v36  ;;  %7719 = vmatprep.subr.bf16.mxu0 %v8773_v10 }
  0x85   : > { %6918 = vmatprep.mubr.msk.bf16.mxu1 %vm1213_vm0, %v8668_v37  ;;  %8437 = vmatpush3.bf16.msra.mxu1 %v8758_v1  ;;  %v9360_v37 = vld [vmem:[%s9127_s30 + $0x1c4] ss:$8 sps:$4 sm:$0xff]  }
  0x86   : > { %8430 = vmatprep.subr.bf16.mxu1 %v8768_v6 }
  0x87   : > { %7720 = vmatpush3.bf16.msra.mxu0 %v8773_v10 }
  0x89   : > { %8438 = vmatpush3.bf16.msra.mxu1 %v8768_v6 }
  0x8a   : > { %1383 = vmatmul.mubr.bf16.gmra.mrb[16].mxu0 %v8673_v45  ;;  %8431 = vmatprep.subr.bf16.mxu1 %v8772_v9 }
  0x8b   : > { %6888 = vmatprep.mubr.msk.bf16.mxu0 %vm1213_vm0, %v8674_v46 }
  0x8c   : > { %1720 = vmatmul.mubr.bf16.gmra.mrb[12].mxu1 %v8670_v40 }
  0x8d   : > { %6919 = vmatprep.mubr.msk.bf16.mxu1 %vm1213_vm0, %v8671_v41  ;;  %8439 = vmatpush3.bf16.msra.mxu1 %v8772_v9  ;;  %v9371_v41 = vld [vmem:[%s9127_s30 + $0x1c0] ss:$8 sps:$4 sm:$0xff]  }
  0x8e   : > { %8432 = vmatprep.subr.bf16.mxu1 %v8773_v10 }
  0x91   : > { %8440 = vmatpush3.bf16.msra.mxu1 %v8773_v10 }
  0x92   : > { %1393 = vmatmul.mubr.bf16.gmra.mrb[20].mxu0 %v8676_v48 }
  0x93   : > { %6889 = vmatprep.mubr.msk.bf16.mxu0 %vm1213_vm0, %v8677_v49 }
  0x94   : > { %1728 = vmatmul.mubr.bf16.gmra.mrb[16].mxu1 %v8673_v45  ;;  %v734_v45 = vlaneseq }
  0x95   : > { %6920 = vmatprep.mubr.msk.bf16.mxu1 %vm1213_vm0, %v8674_v46 }
  0x9a   : > { %1403 = vmatmul.mubr.bf16.gmra.mrb[24].mxu0 %v8679_v50 }
  0x9b   : > { %6890 = vmatprep.mubr.msk.bf16.mxu0 %vm1213_vm0, %v8680_v51 }
  0x9c   : > { %1736 = vmatmul.mubr.bf16.gmra.mrb[20].mxu1 %v8676_v48  ;;  %v9385_v48 = vld [vmem:[%s9127_s30 + $0x1d0] ss:$8 sps:$4 sm:$0xff]  }
  0x9d   : > { %6921 = vmatprep.mubr.msk.bf16.mxu1 %vm1213_vm0, %v8677_v49  ;;  %v9387_v49 = vshrl.u32 %v734_v45, 7 }
  0xa2   : > { %1413 = vmatmul.mubr.bf16.gmra.mrb[28].mxu0 %v8682_v52 }
  0xa3   : > { %6891 = vmatprep.mubr.msk.bf16.mxu0 %vm1213_vm0, %v8683_v53 }
  0xa4   : > { %1744 = vmatmul.mubr.bf16.gmra.mrb[24].mxu1 %v8679_v50 }
  0xa5   : > { %6922 = vmatprep.mubr.msk.bf16.mxu1 %vm1213_vm0, %v8680_v51  ;;  %v9390_v51 = vld [vmem:[%s9127_s30 + $0x1e4] ss:$8 sps:$4 sm:$0xff]  }
  0xaa   : > { %1423 = vmatmul.mubr.bf16.gmra.mrb[32].mxu0 %v8685_v55 }
  0xab   : > { %6892 = vmatprep.mubr.msk.bf16.mxu0 %vm1213_vm0, %v8686_v56 }
  0xac   : > { %1752 = vmatmul.mubr.bf16.gmra.mrb[28].mxu1 %v8682_v52 }
  0xad   : > { %6923 = vmatprep.mubr.msk.bf16.mxu1 %vm1213_vm0, %v8683_v53  ;;  %v736_v53 = vsub.s32 0, %v9387_v49 }
  0xb2   : > { %1433 = vmatmul.mubr.bf16.gmra.mrb[36].mxu0 %v8688_v57 }
  0xb3   : > { %6893 = vmatprep.mubr.msk.bf16.mxu0 %vm1213_vm0, %v8689_v58 }
  0xb4   : > { %1760 = vmatmul.mubr.bf16.gmra.mrb[32].mxu1 %v8685_v55 }
  0xb5   : > { %6924 = vmatprep.mubr.msk.bf16.mxu1 %vm1213_vm0, %v8686_v56 }
  0xba   : > { %1443 = vmatmul.mubr.bf16.gmra.mrb[40].mxu0 %v8691_v59 }
  0xbb   : > { %6894 = vmatprep.mubr.msk.bf16.mxu0 %vm1213_vm0, %v8692_v60 }
  0xbc   : > { %1768 = vmatmul.mubr.bf16.gmra.mrb[36].mxu1 %v8688_v57  ;;  %v9405_v57 = vld [vmem:[%s9127_s30 + $0x1e0] ss:$8 sps:$4 sm:$0xff]  }
  0xbd   : > { %6925 = vmatprep.mubr.msk.bf16.mxu1 %vm1213_vm0, %v8689_v58  ;;  %v9407_v58 = vrot.slane %v732_v54, %v736_v53 }
  0xc2   : > { %1453 = vmatmul.mubr.bf16.gmra.mrb[44].mxu0 %v8694_v61 }
  0xc3   : > { %6895 = vmatprep.mubr.msk.bf16.mxu0 %vm1213_vm0, %v8696_v62 }
  0xc4   : > { %1776 = vmatmul.mubr.bf16.gmra.mrb[40].mxu1 %v8691_v59 }
  0xc5   : > { %6926 = vmatprep.mubr.msk.bf16.mxu1 %vm1213_vm0, %v8692_v60  ;;  %v9410_v60 = vld [vmem:[%s9127_s30 + $0x1f4] ss:$8 sps:$4 sm:$0xff]  }
  0xca   : > { %1463 = vmatmul.mubr.bf16.gmra.mrb[48].mxu0 %v8698_v63 }
  0xcb   : > { %6896 = vmatprep.mubr.msk.bf16.mxu0 %vm1213_vm0, %v8699_v0 }
  0xcc   : > { %1784 = vmatmul.mubr.bf16.gmra.mrb[44].mxu1 %v8694_v61 }
  0xcd   : > { %6927 = vmatprep.mubr.msk.bf16.mxu1 %vm1213_vm0, %v8696_v62 }
  0xd2   : > { %1473 = vmatmul.mubr.bf16.gmra.mrb[52].mxu0 %v8701_v2 }
  0xd3   : > { %6897 = vmatprep.mubr.msk.bf16.mxu0 %vm1213_vm0, %v8702_v3 }
  0xd4   : > { %1792 = vmatmul.mubr.bf16.gmra.mrb[48].mxu1 %v8698_v63 }
  0xd5   : > { %6928 = vmatprep.mubr.msk.bf16.mxu1 %vm1213_vm0, %v8699_v0 }
  0xda   : > { %1483 = vmatmul.mubr.bf16.gmra.mrb[56].mxu0 %v8704_v4 }
  0xdb   : > { %6898 = vmatprep.mubr.msk.bf16.mxu0 %vm1213_vm0, %v8705_v5 }
  0xdc   : > { %1800 = vmatmul.mubr.bf16.gmra.mrb[52].mxu1 %v8701_v2 }
  0xdd   : > { %6929 = vmatprep.mubr.msk.bf16.mxu1 %vm1213_vm0, %v8702_v3  ;;  %v9428_v3 = vld [vmem:[%s9127_s30 + $0x1f0] ss:$8 sps:$4 sm:$0xff]  }
  0xe2   : > { %1493 = vmatmul.mubr.bf16.gmra.mrb[60].mxu0 %v8707_v7 }
  0xe3   : > { %6899 = vmatprep.mubr.msk.bf16.mxu0 %vm1213_vm0, %v8711_v8 }
  0xe4   : > { %1808 = vmatmul.mubr.bf16.gmra.mrb[56].mxu1 %v8704_v4 }
  0xe5   : > { %6930 = vmatprep.mubr.msk.bf16.mxu1 %vm1213_vm0, %v8705_v5 }
  0xea   : > { %1503 = vmatmul.mubr.bf16.gmra.mrb[64].mxu0 %v8713_v11 }
  0xeb   : > { %6900 = vmatprep.mubr.msk.bf16.mxu0 %vm1213_vm0, %v8716_v12 }
  0xec   : > { %1816 = vmatmul.mubr.bf16.gmra.mrb[60].mxu1 %v8707_v7 }
  0xed   : > { %6931 = vmatprep.mubr.msk.bf16.mxu1 %vm1213_vm0, %v8711_v8 }
  0xf2   : > { %1513 = vmatmul.mubr.bf16.gmra.mrb[68].mxu0 %v8718_v13 }
  0xf3   : > { %6901 = vmatprep.mubr.msk.bf16.mxu0 %vm1213_vm0, %v8721_v14 }
  0xf4   : > { %1824 = vmatmul.mubr.bf16.gmra.mrb[64].mxu1 %v8713_v11 }
  0xf5   : > { %6932 = vmatprep.mubr.msk.bf16.mxu1 %vm1213_vm0, %v8716_v12 }
  0xfa   : > { %1523 = vmatmul.mubr.bf16.gmra.mrb[72].mxu0 %v8723_v15 }
  0xfb   : > { %6902 = vmatprep.mubr.msk.bf16.mxu0 %vm1213_vm0, %v8726_v16 }
  0xfc   : > { %1832 = vmatmul.mubr.bf16.gmra.mrb[68].mxu1 %v8718_v13 }
  0xfd   : > { %6933 = vmatprep.mubr.msk.bf16.mxu1 %vm1213_vm0, %v8721_v14 }
 0x102   : > { %1533 = vmatmul.mubr.bf16.gmra.mrb[76].mxu0 %v8728_v17 }
 0x103   : > { %6903 = vmatprep.mubr.msk.bf16.mxu0 %vm1213_vm0, %v8732_v18 }
 0x104   : > { %1840 = vmatmul.mubr.bf16.gmra.mrb[72].mxu1 %v8723_v15 }
 0x105   : > { %6934 = vmatprep.mubr.msk.bf16.mxu1 %vm1213_vm0, %v8726_v16 }
 0x10a   : > { %1543 = vmatmul.mubr.bf16.gmra.mrb[80].mxu0 %v8734_v19 }
 0x10b   : > { %6904 = vmatprep.mubr.msk.bf16.mxu0 %vm1213_vm0, %v8736_v20 }
 0x10c   : > { %1848 = vmatmul.mubr.bf16.gmra.mrb[76].mxu1 %v8728_v17 }
 0x10d   : > { %6935 = vmatprep.mubr.msk.bf16.mxu1 %vm1213_vm0, %v8732_v18 }
 0x112   : > { %1553 = vmatmul.mubr.bf16.gmra.mrb[84].mxu0 %v8738_v21 }
 0x113   : > { %6905 = vmatprep.mubr.msk.bf16.mxu0 %vm1213_vm0, %v8739_v22 }
 0x114   : > { %1856 = vmatmul.mubr.bf16.gmra.mrb[80].mxu1 %v8734_v19 }
 0x115   : > { %6936 = vmatprep.mubr.msk.bf16.mxu1 %vm1213_vm0, %v8736_v20 }
 0x11a   : > { %1563 = vmatmul.mubr.bf16.gmra.mrb[88].mxu0 %v8741_v23 }
 0x11b   : > { %6906 = vmatprep.mubr.msk.bf16.mxu0 %vm1213_vm0, %v8742_v24 }
 0x11c   : > { %1864 = vmatmul.mubr.bf16.gmra.mrb[84].mxu1 %v8738_v21 }
 0x11d   : > { %6937 = vmatprep.mubr.msk.bf16.mxu1 %vm1213_vm0, %v8739_v22 }
 0x122   : > { %1573 = vmatmul.mubr.bf16.gmra.mrb[92].mxu0 %v8744_v25 }
 0x123   : > { %6907 = vmatprep.mubr.msk.bf16.mxu0 %vm1213_vm0, %v8746_v26 }
 0x124   : > { %1872 = vmatmul.mubr.bf16.gmra.mrb[88].mxu1 %v8741_v23 }
 0x125   : > { %6938 = vmatprep.mubr.msk.bf16.mxu1 %vm1213_vm0, %v8742_v24 }
 0x12a   : > { %1583 = vmatmul.mubr.bf16.gmra.mrb[96].mxu0 %v8748_v27 }
 0x12b   : > { %6908 = vmatprep.mubr.msk.bf16.mxu0 %vm1213_vm0, %v8749_v28 }
 0x12c   : > { %1880 = vmatmul.mubr.bf16.gmra.mrb[92].mxu1 %v8744_v25 }
 0x12d   : > { %6939 = vmatprep.mubr.msk.bf16.mxu1 %vm1213_vm0, %v8746_v26 }
 0x132   : > { %1593 = vmatmul.mubr.bf16.gmra.mrb[100].mxu0 %v8751_v29 }
 0x133   : > { %6909 = vmatprep.mubr.msk.bf16.mxu0 %vm1213_vm0, %v8752_v30 }
 0x134   : > { %1888 = vmatmul.mubr.bf16.gmra.mrb[96].mxu1 %v8748_v27 }
 0x135   : > { %6940 = vmatprep.mubr.msk.bf16.mxu1 %vm1213_vm0, %v8749_v28 }
 0x13a   : > { %1603 = vmatmul.mubr.bf16.gmra.mrb[104].mxu0 %v8754_v31 }
 0x13b   : > { %6910 = vmatprep.mubr.msk.bf16.mxu0 %vm1213_vm0, %v8755_v32 }
 0x13c   : > { %1896 = vmatmul.mubr.bf16.gmra.mrb[100].mxu1 %v8751_v29 }
 0x13d   : > { %v1344_v33 = vpop.f32.mrb[0].mxu0  ;;  %6941 = vmatprep.mubr.msk.bf16.mxu1 %vm1213_vm0, %v8752_v30 }
 0x13e   : > { %v9354_v34 = vpop.f32.mrb[1].mxu0  ;;  %v9420_v63 = vadd.f32 %v1344_v33, %v9407_v58 }
 0x13f   : > { %v1348_v36 = vpop.f32.mrb[2].mxu0 }
 0x140   : > { %v9362_v38 = vpop.f32.mrb[3].mxu0  ;;  %v9416_v62 = vadd.f32 %v1348_v36, %v9407_v58  ;;  %v1986_v4 = vmax.f32 %v9420_v63, 0.0 }
 0x142   : > { %1613 = vmatmul.mubr.bf16.gmra.mrb[108].mxu0 %v9357_v35  ;;  %v1987_v0 = vmax.f32 %v9416_v62, 0.0 }
 0x143   : > { %6911 = vmatprep.mubr.msk.bf16.mxu0 %vm1213_vm0, %v9360_v37 }
 0x144   : > { %1904 = vmatmul.mubr.bf16.gmra.mrb[104].mxu1 %v8754_v31  ;;  %v2050_v9 = vpack.c.bf16 %v1987_v0, %v1986_v4 }
 0x145   : > { %v1354_v39 = vpop.f32.mrb[4].mxu0  ;;  %6942 = vmatprep.mubr.msk.bf16.mxu1 %vm1213_vm0, %v8755_v32 }
 0x146   : > { %v9368_v40 = vpop.f32.mrb[5].mxu0  ;;  %v9441_v10 = vadd.f32 %v1354_v39, %v9407_v58 }
 0x147   : > { %v1358_v42 = vpop.f32.mrb[6].mxu0  ;;  %v9498_v54 = vpop.f32.mrb[0].mxu1 }
 0x148   : > { %v9376_v44 = vpop.f32.mrb[7].mxu0  ;;  %v9432_v6 = vadd.f32 %v1358_v42, %v9407_v58  ;;  %v1988_v15 = vmax.f32 %v9441_v10, 0.0  ;;  %12002 = vst [vmem:[#allocation3_spill] sm:$0xff] %v9498_v54  ;;  %v1699_v0 = vpop.f32.mrb[1].mxu1 }
 0x14a   : > { %1623 = vmatmul.mubr.bf16.gmra.mrb[112].mxu0 %v9371_v41  ;;  %v1989_v12 = vmax.f32 %v9432_v6, 0.0 }
 0x14b   : > { %6912 = vmatprep.mubr.msk.bf16.mxu0 %vm1213_vm0, %v9374_v43 }
 0x14c   : > { %1912 = vmatmul.mubr.bf16.gmra.mrb[108].mxu1 %v9357_v35  ;;  %v2051_v19 = vpack.c.bf16 %v1989_v12, %v1988_v15 }
 0x14d   : > { %v1364_v46 = vpop.f32.mrb[8].mxu0  ;;  %6943 = vmatprep.mubr.msk.bf16.mxu1 %vm1213_vm0, %v9360_v37 }
 0x14e   : > { %v9382_v47 = vpop.f32.mrb[9].mxu0  ;;  %v9445_v11 = vadd.f32 %v1364_v46, %v9407_v58 }
 0x14f   : > { %v1368_v50 = vpop.f32.mrb[10].mxu0 }
 0x150   : > { %v9392_v52 = vpop.f32.mrb[11].mxu0  ;;  %v9438_v8 = vadd.f32 %v1368_v50, %v9407_v58  ;;  %v1990_v17 = vmax.f32 %v9445_v11, 0.0 }
 0x152   : > { %1633 = vmatmul.mubr.bf16.gmra.mrb[116].mxu0 %v9385_v48  ;;  %v1991_v13 = vmax.f32 %v9438_v8, 0.0 }
 0x153   : > { %6913 = vmatprep.mubr.msk.bf16.mxu0 %vm1213_vm0, %v9390_v51 }
 0x154   : > { %v2052_v23 = vpack.c.bf16 %v1991_v13, %v1990_v17  ;;  %1920 = vmatmul.mubr.bf16.gmra.mrb[112].mxu1 %v9371_v41 }
 0x155   : > { %v1374_v55 = vpop.f32.mrb[12].mxu0  ;;  %6944 = vmatprep.mubr.msk.bf16.mxu1 %vm1213_vm0, %v9374_v43 }
 0x156   : > { %v9402_v56 = vpop.f32.mrb[13].mxu0  ;;  %v9465_v24 = vadd.f32 %v1374_v55, %v9407_v58 }
 0x157   : > { %v1378_v59 = vpop.f32.mrb[14].mxu0 }
 0x158   : > { %v9412_v61 = vpop.f32.mrb[15].mxu0  ;;  %v9455_v20 = vadd.f32 %v1378_v59, %v9407_v58  ;;  %v1992_v29 = vmax.f32 %v9465_v24, 0.0 }
 0x15a   : > { %1643 = vmatmul.mubr.bf16.gmra.mrb[120].mxu0 %v9405_v57  ;;  %v1993_v26 = vmax.f32 %v9455_v20, 0.0 }
 0x15b   : > { %6914 = vmatprep.mubr.msk.bf16.mxu0 %vm1213_vm0, %v9410_v60 }
 0x15c   : > { %v2053_v36 = vpack.c.bf16 %v1993_v26, %v1992_v29  ;;  %1928 = vmatmul.mubr.bf16.gmra.mrb[116].mxu1 %v9385_v48 }
 0x15d   : > { %v1384_v1 = vpop.f32.mrb[16].mxu0  ;;  %6945 = vmatprep.mubr.msk.bf16.mxu1 %vm1213_vm0, %v9390_v51 }
 0x15e   : > { %v9425_v2 = vpop.f32.mrb[17].mxu0  ;;  %v9468_v25 = vadd.f32 %v1384_v1, %v9407_v58 }
 0x15f   : > { %v1388_v5 = vpop.f32.mrb[18].mxu0 }
 0x160   : > { %v9434_v7 = vpop.f32.mrb[19].mxu0  ;;  %v9462_v22 = vadd.f32 %v1388_v5, %v9407_v58  ;;  %v1994_v31 = vmax.f32 %v9468_v25, 0.0 }
 0x162   : > { %1653 = vmatmul.mubr.bf16.gmra.mrb[124].mxu0 %v9428_v3  ;;  %v1995_v27 = vmax.f32 %v9462_v22, 0.0 }
 0x163   : > { %7721 = vmatprep.mubr.bf16.mxu0 %v2050_v9  ;;  %v9507_v9 = vpop.f32.mrb[2].mxu1 }
 0x164   : > { %v2054_v39 = vpack.c.bf16 %v1995_v27, %v1994_v31  ;;  %12003 = vst [vmem:[#allocation4_spill] sm:$0xff] %v9507_v9  ;;  %v1702_v13 = vpop.f32.mrb[3].mxu1  ;;  %1936 = vmatmul.mubr.bf16.gmra.mrb[120].mxu1 %v9405_v57 }
 0x165   : > { %v1394_v14 = vpop.f32.mrb[20].mxu0  ;;  %6946 = vmatprep.mubr.msk.bf16.mxu1 %vm1213_vm0, %v9410_v60 }
 0x166   : > { %v9450_v16 = vpop.f32.mrb[21].mxu0  ;;  %v9488_v42 = vadd.f32 %v1394_v14, %v9407_v58 }
 0x167   : > { %v1398_v18 = vpop.f32.mrb[22].mxu0 }
 0x168   : > { %v9457_v21 = vpop.f32.mrb[23].mxu0  ;;  %v9478_v33 = vadd.f32 %v1398_v18, %v9407_v58  ;;  %v1996_v53 = vmax.f32 %v9488_v42, 0.0 }
 0x16a   : > { %7722 = vmatmul.mubr.bf16.vlgmr.msra.gmra.mrb[128].mxu0 %v2051_v19  ;;  %v1997_v41 = vmax.f32 %v9478_v33, 0.0 }
 0x16b   : > { %7725 = vmatprep.mubr.bf16.mxu0 %v2052_v23  ;;  %v9521_v23 = vpop.f32.mrb[4].mxu1 }
 0x16c   : > { %v2055_v5 = vpack.c.bf16 %v1997_v41, %v1996_v53  ;;  %12004 = vst [vmem:[#allocation5_spill] sm:$0xff] %v9521_v23  ;;  %v1707_v26 = vpop.f32.mrb[5].mxu1  ;;  %1944 = vmatmul.mubr.bf16.gmra.mrb[124].mxu1 %v9428_v3 }
 0x16d   : > { %v1404_v28 = vpop.f32.mrb[24].mxu0  ;;  %v9529_v31 = vpop.f32.mrb[6].mxu1 }
 0x16e   : > { %v9473_v30 = vpop.f32.mrb[25].mxu0  ;;  %v9491_v45 = vadd.f32 %v1404_v28, %v9407_v58  ;;  %12005 = vst [vmem:[#allocation6_spill] sm:$0xff] %v9529_v31 }
 0x16f   : > { %v1408_v32 = vpop.f32.mrb[26].mxu0 }
 0x170   : > { %v9480_v35 = vpop.f32.mrb[27].mxu0  ;;  %v9485_v37 = vadd.f32 %v1408_v32, %v9407_v58  ;;  %v1998_v55 = vmax.f32 %v9491_v45, 0.0  ;;  %v1710_v32 = vpop.f32.mrb[7].mxu1 }
 0x171   : > { %v9540_v53 = vpop.f32.mrb[8].mxu1 }
 0x172   : > { %7726 = vmatmul.mubr.bf16.gmra.mrb[132].mxu0 %v2053_v36  ;;  %v1999_v46 = vmax.f32 %v9485_v37, 0.0  ;;  %12006 = vst [vmem:[#allocation7_spill] sm:$0xff] %v9540_v53  ;;  %v1715_v60 = vpop.f32.mrb[9].mxu1 }
 0x173   : > { %7729 = vmatprep.mubr.bf16.mxu0 %v2054_v39 }
 0x174   : > { %v2056_v12 = vpack.c.bf16 %v1999_v46, %v1998_v55 }
 0x175   : > { %v1414_v50 = vpop.f32.mrb[28].mxu0 }
 0x176   : > { %v9496_v43 = vpop.f32.mrb[29].mxu0  ;;  %v9512_v14 = vadd.f32 %v1414_v50, %v9407_v58 }
 0x177   : > { %v1418_v59 = vpop.f32.mrb[30].mxu0 }
 0x178   : > { %v9503_v1 = vadd.f32 %v1418_v59, %v9407_v58  ;;  %v9505_v4 = vpop.f32.mrb[31].mxu0  ;;  %v2000_v17 = vmax.f32 %v9512_v14, 0.0 }
 0x17a   : > { %7730 = vmatmul.mubr.bf16.gmra.mrb[136].mxu0 %v2055_v5  ;;  %v2001_v48 = vmax.f32 %v9503_v1, 0.0  ;;  %v9548_v5 = vpop.f32.mrb[10].mxu1 }
 0x17b   : > { %7733 = vmatprep.mubr.bf16.mxu0 %v2056_v12  ;;  %12007 = vst [vmem:[#allocation8_spill] sm:$0xff] %v9548_v5  ;;  %v1718_v12 = vpop.f32.mrb[11].mxu1 }
 0x17c   : > { %v2057_v29 = vpack.c.bf16 %v2001_v48, %v2000_v17  ;;  %v9557_v3 = vpop.f32.mrb[12].mxu1 }
 0x17d   : > { %v1424_v15 = vpop.f32.mrb[32].mxu0  ;;  %12010 = vst [vmem:[#allocation11_spill] sm:$0xff] %v9557_v3  ;;  %v1723_v32 = vpop.f32.mrb[13].mxu1 }
 0x17e   : > { %v9517_v18 = vadd.f32 %v1424_v15, %v9407_v58  ;;  %v9519_v19 = vpop.f32.mrb[33].mxu0 }
 0x17f   : > { %v1428_v51 = vpop.f32.mrb[34].mxu0 }
 0x180   : > { %v9525_v27 = vadd.f32 %v1428_v51, %v9407_v58  ;;  %v9527_v28 = vpop.f32.mrb[35].mxu0  ;;  %v2002_v36 = vmax.f32 %v9517_v18, 0.0 }
 0x182   : > { %v2003_v39 = vmax.f32 %v9525_v27, 0.0  ;;  %7734 = vmatmul.mubr.bf16.gmra.mrb[140].mxu0 %v2057_v29 }
 0x184   : > { %v2058_v41 = vpack.c.bf16 %v2003_v39, %v2002_v36 }
 0x185   : > { %v1434_v57 = vpop.f32.mrb[36].mxu0 }
 0x186   : > { %v9536_v46 = vadd.f32 %v1434_v57, %v9407_v58  ;;  %v9538_v50 = vpop.f32.mrb[37].mxu0  ;;  %7737 = vmatprep.mubr.bf16.mxu0 %v2058_v41  ;;  %v9564_v41 = vpop.f32.mrb[14].mxu1 }
 0x187   : > { %v1438_v55 = vpop.f32.mrb[38].mxu0  ;;  %12013 = vst [vmem:[#allocation14_spill] sm:$0xff] %v9564_v41  ;;  %v1726_v57 = vpop.f32.mrb[15].mxu1 }
 0x188   : > { %v9544_v59 = vadd.f32 %v1438_v55, %v9407_v58  ;;  %v9546_v0 = vpop.f32.mrb[39].mxu0  ;;  %v2004_v13 = vmax.f32 %v9536_v46, 0.0 }
 0x18a   : > { %v2005_v48 = vmax.f32 %v9544_v59, 0.0 }
 0x18c   : > { %v2059_v15 = vpack.c.bf16 %v2005_v48, %v2004_v13 }
 0x18d   : > { %v1444_v17 = vpop.f32.mrb[40].mxu0 }
 0x18e   : > { %v9553_v51 = vadd.f32 %v1444_v17, %v9407_v58  ;;  %v9555_v26 = vpop.f32.mrb[41].mxu0  ;;  %7738 = vmatmul.mubr.bf16.gmra.mrb[144].mxu0 %v2059_v15  ;;  %v9573_v17 = vpop.f32.mrb[16].mxu1 }
 0x18f   : > { %12009 = vst [vmem:[#allocation10_spill] sm:$0xff] %v9555_v26  ;;  %v1448_v29 = vpop.f32.mrb[42].mxu0  ;;  %12014 = vst [vmem:[#allocation15_spill] sm:$0xff] %v9573_v17  ;;  %v1731_v32 = vpop.f32.mrb[17].mxu1 }
 0x190   : > { %12008 = vst [vmem:[#allocation9_spill] sm:$0xff] %v9553_v51  ;;  %v9560_v36 = vadd.f32 %v1448_v29, %v9407_v58  ;;  %v9562_v39 = vpop.f32.mrb[43].mxu0  ;;  %v2006_v55 = vmax.f32 %v9553_v51, 0.0  ;;  %v9580_v41 = vpop.f32.mrb[18].mxu1 }
 0x191   : > { %12012 = vst [vmem:[#allocation13_spill] sm:$0xff] %v9562_v39  ;;  %12017 = vst [vmem:[#allocation18_spill] sm:$0xff] %v9580_v41  ;;  %v1734_v53 = vpop.f32.mrb[19].mxu1 }
 0x192   : > { %12011 = vst [vmem:[#allocation12_spill] sm:$0xff] %v9560_v36  ;;  %v2007_v60 = vmax.f32 %v9560_v36, 0.0  ;;  %v9589_v32 = vpop.f32.mrb[20].mxu1 }
 0x193   : > { %12020 = vst [vmem:[#allocation21_spill] sm:$0xff] %v9589_v32  ;;  %v1739_v9 = vpop.f32.mrb[21].mxu1 }
 0x194   : > { %v2060_v12 = vpack.c.bf16 %v2007_v60, %v2006_v55  ;;  %v9596_v41 = vpop.f32.mrb[22].mxu1 }
 0x195   : > { %v1454_v13 = vpop.f32.mrb[44].mxu0  ;;  %12023 = vst [vmem:[#allocation24_spill] sm:$0xff] %v9596_v41  ;;  %v1742_v54 = vpop.f32.mrb[23].mxu1 }
 0x196   : > { %v9569_v48 = vadd.f32 %v1454_v13, %v9407_v58  ;;  %v9571_v15 = vpop.f32.mrb[45].mxu0  ;;  %7741 = vmatprep.mubr.bf16.mxu0 %v2060_v12  ;;  %v9605_v9 = vpop.f32.mrb[24].mxu1 }
 0x197   : > { %v1458_v29 = vpop.f32.mrb[46].mxu0  ;;  %12026 = vst [vmem:[#allocation27_spill] sm:$0xff] %v9605_v9  ;;  %v1747_v41 = vpop.f32.mrb[25].mxu1 }
 0x198   : > { %v9576_v5 = vadd.f32 %v1458_v29, %v9407_v58  ;;  %v9578_v57 = vpop.f32.mrb[47].mxu0  ;;  %v2008_v55 = vmax.f32 %v9569_v48, 0.0 }
 0x199   : > { %12016 = vst [vmem:[#allocation17_spill] sm:$0xff] %v9578_v57 }
 0x19a   : > { %12015 = vst [vmem:[#allocation16_spill] sm:$0xff] %v9576_v5  ;;  %v2009_v60 = vmax.f32 %v9576_v5, 0.0 }
 0x19c   : > { %v2061_v13 = vpack.c.bf16 %v2009_v60, %v2008_v55 }
 0x19d   : > { %v1464_v3 = vpop.f32.mrb[48].mxu0 }
 0x19e   : > { %v9585_v12 = vadd.f32 %v1464_v3, %v9407_v58  ;;  %v9587_v17 = vpop.f32.mrb[49].mxu0  ;;  %7742 = vmatmul.mubr.bf16.gmra.mrb[148].mxu0 %v2061_v13 }
 0x19f   : > { %12019 = vst [vmem:[#allocation20_spill] sm:$0xff] %v9587_v17  ;;  %v1468_v29 = vpop.f32.mrb[50].mxu0 }
 0x1a0   : > { %12018 = vst [vmem:[#allocation19_spill] sm:$0xff] %v9585_v12  ;;  %v9592_v31 = vadd.f32 %v1468_v29, %v9407_v58  ;;  %v9594_v53 = vpop.f32.mrb[51].mxu0  ;;  %v2010_v55 = vmax.f32 %v9585_v12, 0.0  ;;  %v9610_v29 = vld [vmem:[%s11913_s5] sm:$0xff]  }
 0x1a1   : > { %12022 = vst [vmem:[#allocation23_spill] sm:$0xff] %v9594_v53  ;;  %7785 = vmatprep.subr.bf16.mxu1 %v9610_v29 }
 0x1a2   : > { %12021 = vst [vmem:[#allocation22_spill] sm:$0xff] %v9592_v31  ;;  %v2011_v3 = vmax.f32 %v9592_v31, 0.0 }
 0x1a4   : > { %v2062_v60 = vpack.c.bf16 %v2011_v3, %v2010_v55  ;;  %v9617_v3 = vpop.f32.mrb[26].mxu1 }
 0x1a5   : > { %v1474_v23 = vpop.f32.mrb[52].mxu0  ;;  %12029 = vst [vmem:[#allocation30_spill] sm:$0xff] %v9617_v3 }
 0x1a6   : > { %v9601_v13 = vadd.f32 %v1474_v23, %v9407_v58  ;;  %v9603_v32 = vpop.f32.mrb[53].mxu0  ;;  %7745 = vmatprep.mubr.bf16.mxu0 %v2062_v60  ;;  %v1750_v23 = vpop.f32.mrb[27].mxu1 }
 0x1a7   : > { %12025 = vst [vmem:[#allocation26_spill] sm:$0xff] %v9603_v32  ;;  %v1478_v54 = vpop.f32.mrb[54].mxu0 }
 0x1a8   : > { %12024 = vst [vmem:[#allocation25_spill] sm:$0xff] %v9601_v13  ;;  %v9613_v53 = vadd.f32 %v1478_v54, %v9407_v58  ;;  %v9615_v55 = vpop.f32.mrb[55].mxu0  ;;  %v2012_v60 = vmax.f32 %v9601_v13, 0.0  ;;  %v9627_v54 = vpop.f32.mrb[28].mxu1 }
 0x1a9   : > { %12028 = vst [vmem:[#allocation29_spill] sm:$0xff] %v9615_v55  ;;  %12032 = vst [vmem:[#allocation33_spill] sm:$0xff] %v9627_v54  ;;  %v1755_v32 = vpop.f32.mrb[29].mxu1 }
 0x1aa   : > { %12027 = vst [vmem:[#allocation28_spill] sm:$0xff] %v9613_v53  ;;  %v2013_v9 = vmax.f32 %v9613_v53, 0.0  ;;  %v9634_v13 = vpop.f32.mrb[30].mxu1 }
 0x1ab   : > { %12035 = vst [vmem:[#allocation36_spill] sm:$0xff] %v9634_v13  ;;  %v1758_v53 = vpop.f32.mrb[31].mxu1 }
 0x1ac   : > { %v2063_v31 = vpack.c.bf16 %v2013_v9, %v2012_v60  ;;  %v9643_v32 = vpop.f32.mrb[32].mxu1 }
 0x1ad   : > { %v1484_v12 = vpop.f32.mrb[56].mxu0  ;;  %12038 = vst [vmem:[#allocation39_spill] sm:$0xff] %v9643_v32 }
 0x1ae   : > { %v9623_v17 = vadd.f32 %v1484_v12, %v9407_v58  ;;  %v9625_v41 = vpop.f32.mrb[57].mxu0  ;;  %7746 = vmatmul.mubr.bf16.gmra.mrb[152].mxu0 %v2063_v31 }
 0x1af   : > { %12031 = vst [vmem:[#allocation32_spill] sm:$0xff] %v9625_v41  ;;  %v1488_v55 = vpop.f32.mrb[58].mxu0  ;;  %v1763_v41 = vpop.f32.mrb[33].mxu1 }
 0x1b0   : > { %12030 = vst [vmem:[#allocation31_spill] sm:$0xff] %v9623_v17  ;;  %v9630_v3 = vadd.f32 %v1488_v55, %v9407_v58  ;;  %v9632_v23 = vpop.f32.mrb[59].mxu0  ;;  %v2014_v9 = vmax.f32 %v9623_v17, 0.0  ;;  %v9650_v13 = vpop.f32.mrb[34].mxu1 }
 0x1b1   : > { %12034 = vst [vmem:[#allocation35_spill] sm:$0xff] %v9632_v23  ;;  %12041 = vst [vmem:[#allocation42_spill] sm:$0xff] %v9650_v13 }
 0x1b2   : > { %12033 = vst [vmem:[#allocation34_spill] sm:$0xff] %v9630_v3  ;;  %v2015_v12 = vmax.f32 %v9630_v3, 0.0  ;;  %v1766_v3 = vpop.f32.mrb[35].mxu1 }
 0x1b3   : > { %v9659_v41 = vpop.f32.mrb[36].mxu1 }
 0x1b4   : > { %v2064_v60 = vpack.c.bf16 %v2015_v12, %v2014_v9  ;;  %12044 = vst [vmem:[#allocation45_spill] sm:$0xff] %v9659_v41 }
 0x1b5   : > { %v1494_v36 = vpop.f32.mrb[60].mxu0 }
 0x1b6   : > { %v9639_v31 = vadd.f32 %v1494_v36, %v9407_v58  ;;  %v9641_v54 = vpop.f32.mrb[61].mxu0  ;;  %7749 = vmatprep.mubr.bf16.mxu0 %v2064_v60 }
 0x1b7   : > { %12037 = vst [vmem:[#allocation38_spill] sm:$0xff] %v9641_v54  ;;  %v1498_v55 = vpop.f32.mrb[62].mxu0  ;;  %v1771_v54 = vpop.f32.mrb[37].mxu1 }
 0x1b8   : > { %12036 = vst [vmem:[#allocation37_spill] sm:$0xff] %v9639_v31  ;;  %v9646_v23 = vadd.f32 %v1498_v55, %v9407_v58  ;;  %v9648_v53 = vpop.f32.mrb[63].mxu0  ;;  %v2016_v9 = vmax.f32 %v9639_v31, 0.0  ;;  %v9666_v13 = vpop.f32.mrb[38].mxu1 }
 0x1b9   : > { %12040 = vst [vmem:[#allocation41_spill] sm:$0xff] %v9648_v53  ;;  %12047 = vst [vmem:[#allocation48_spill] sm:$0xff] %v9666_v13 }
 0x1ba   : > { %12039 = vst [vmem:[#allocation40_spill] sm:$0xff] %v9646_v23  ;;  %v2017_v36 = vmax.f32 %v9646_v23, 0.0  ;;  %v1774_v23 = vpop.f32.mrb[39].mxu1 }
 0x1bb   : > { %v9675_v54 = vpop.f32.mrb[40].mxu1 }
 0x1bc   : > { %v2065_v12 = vpack.c.bf16 %v2017_v36, %v2016_v9  ;;  %12050 = vst [vmem:[#allocation51_spill] sm:$0xff] %v9675_v54 }
 0x1bd   : > { %v1504_v17 = vpop.f32.mrb[64].mxu0 }
 0x1be   : > { %v9655_v60 = vadd.f32 %v1504_v17, %v9407_v58  ;;  %v9657_v32 = vpop.f32.mrb[65].mxu0  ;;  %7750 = vmatmul.mubr.bf16.gmra.mrb[156].mxu0 %v2065_v12 }
 0x1bf   : > { %12043 = vst [vmem:[#allocation44_spill] sm:$0xff] %v9657_v32  ;;  %v1508_v55 = vpop.f32.mrb[66].mxu0  ;;  %v1779_v32 = vpop.f32.mrb[41].mxu1 }
 0x1c0   : > { %12042 = vst [vmem:[#allocation43_spill] sm:$0xff] %v9655_v60  ;;  %v9662_v53 = vadd.f32 %v1508_v55, %v9407_v58  ;;  %v9664_v3 = vpop.f32.mrb[67].mxu0  ;;  %v2018_v9 = vmax.f32 %v9655_v60, 0.0  ;;  %v9682_v13 = vpop.f32.mrb[42].mxu1 }
 0x1c1   : > { %12046 = vst [vmem:[#allocation47_spill] sm:$0xff] %v9664_v3  ;;  %12053 = vst [vmem:[#allocation54_spill] sm:$0xff] %v9682_v13 }
 0x1c2   : > { %12045 = vst [vmem:[#allocation46_spill] sm:$0xff] %v9662_v53  ;;  %v2019_v17 = vmax.f32 %v9662_v53, 0.0  ;;  %v1782_v53 = vpop.f32.mrb[43].mxu1 }
 0x1c3   : > { %v9691_v32 = vpop.f32.mrb[44].mxu1 }
 0x1c4   : > { %v2066_v36 = vpack.c.bf16 %v2019_v17, %v2018_v9  ;;  %12056 = vst [vmem:[#allocation57_spill] sm:$0xff] %v9691_v32 }
 0x1c5   : > { %v1514_v31 = vpop.f32.mrb[68].mxu0 }
 0x1c6   : > { %v9671_v12 = vadd.f32 %v1514_v31, %v9407_v58  ;;  %v9673_v41 = vpop.f32.mrb[69].mxu0  ;;  %7753 = vmatprep.mubr.bf16.mxu0 %v2066_v36 }
 0x1c7   : > { %12049 = vst [vmem:[#allocation50_spill] sm:$0xff] %v9673_v41  ;;  %v1518_v55 = vpop.f32.mrb[70].mxu0  ;;  %v1787_v41 = vpop.f32.mrb[45].mxu1 }
 0x1c8   : > { %12048 = vst [vmem:[#allocation49_spill] sm:$0xff] %v9671_v12  ;;  %v9678_v3 = vadd.f32 %v1518_v55, %v9407_v58  ;;  %v9680_v23 = vpop.f32.mrb[71].mxu0  ;;  %v2020_v9 = vmax.f32 %v9671_v12, 0.0  ;;  %v9698_v13 = vpop.f32.mrb[46].mxu1 }
 0x1c9   : > { %12052 = vst [vmem:[#allocation53_spill] sm:$0xff] %v9680_v23  ;;  %12059 = vst [vmem:[#allocation60_spill] sm:$0xff] %v9698_v13 }
 0x1ca   : > { %12051 = vst [vmem:[#allocation52_spill] sm:$0xff] %v9678_v3  ;;  %v2021_v31 = vmax.f32 %v9678_v3, 0.0  ;;  %v1790_v3 = vpop.f32.mrb[47].mxu1 }
 0x1cb   : > { %v9707_v41 = vpop.f32.mrb[48].mxu1 }
 0x1cc   : > { %v2067_v17 = vpack.c.bf16 %v2021_v31, %v2020_v9  ;;  %12062 = vst [vmem:[#allocation63_spill] sm:$0xff] %v9707_v41 }
 0x1cd   : > { %v1524_v60 = vpop.f32.mrb[72].mxu0 }
 0x1ce   : > { %v9687_v36 = vadd.f32 %v1524_v60, %v9407_v58  ;;  %v9689_v54 = vpop.f32.mrb[73].mxu0  ;;  %7754 = vmatmul.mubr.bf16.gmra.mrb[160].mxu0 %v2067_v17 }
 0x1cf   : > { %12055 = vst [vmem:[#allocation56_spill] sm:$0xff] %v9689_v54  ;;  %v1528_v55 = vpop.f32.mrb[74].mxu0  ;;  %v1795_v54 = vpop.f32.mrb[49].mxu1 }
 0x1d0   : > { %12054 = vst [vmem:[#allocation55_spill] sm:$0xff] %v9687_v36  ;;  %v9694_v23 = vadd.f32 %v1528_v55, %v9407_v58  ;;  %v9696_v53 = vpop.f32.mrb[75].mxu0  ;;  %v2022_v9 = vmax.f32 %v9687_v36, 0.0  ;;  %v9714_v13 = vpop.f32.mrb[50].mxu1 }
 0x1d1   : > { %12058 = vst [vmem:[#allocation59_spill] sm:$0xff] %v9696_v53  ;;  %12065 = vst [vmem:[#allocation66_spill] sm:$0xff] %v9714_v13 }
 0x1d2   : > { %12057 = vst [vmem:[#allocation58_spill] sm:$0xff] %v9694_v23  ;;  %v2023_v60 = vmax.f32 %v9694_v23, 0.0  ;;  %v1798_v23 = vpop.f32.mrb[51].mxu1 }
 0x1d4   : > { %v2068_v31 = vpack.c.bf16 %v2023_v60, %v2022_v9  ;;  %v9718_v60 = vpop.f32.mrb[52].mxu1 }
 0x1d5   : > { %v1534_v12 = vpop.f32.mrb[76].mxu0  ;;  %12066 = vst [vmem:[#allocation67_spill] sm:$0xff] %v9718_v60 }
 0x1d6   : > { %v9703_v17 = vadd.f32 %v1534_v12, %v9407_v58  ;;  %v9705_v32 = vpop.f32.mrb[77].mxu0  ;;  %7757 = vmatprep.mubr.bf16.mxu0 %v2068_v31  ;;  %v1803_v31 = vpop.f32.mrb[53].mxu1 }
 0x1d7   : > { %12061 = vst [vmem:[#allocation62_spill] sm:$0xff] %v9705_v32  ;;  %v1538_v55 = vpop.f32.mrb[78].mxu0 }
 0x1d8   : > { %12060 = vst [vmem:[#allocation61_spill] sm:$0xff] %v9703_v17  ;;  %v9710_v53 = vadd.f32 %v1538_v55, %v9407_v58  ;;  %v9712_v3 = vpop.f32.mrb[79].mxu0  ;;  %v2024_v9 = vmax.f32 %v9703_v17, 0.0 }
 0x1d9   : > { %12064 = vst [vmem:[#allocation65_spill] sm:$0xff] %v9712_v3  ;;  %v9725_v3 = vpop.f32.mrb[54].mxu1 }
 0x1da   : > { %12063 = vst [vmem:[#allocation64_spill] sm:$0xff] %v9710_v53  ;;  %v2025_v12 = vmax.f32 %v9710_v53, 0.0  ;;  %12069 = vst [vmem:[#allocation70_spill] sm:$0xff] %v9725_v3  ;;  %v1806_v53 = vpop.f32.mrb[55].mxu1 }
 0x1dc   : > { %v2069_v36 = vpack.c.bf16 %v2025_v12, %v2024_v9 }
 0x1dd   : > { %v1544_v32 = vpop.f32.mrb[80].mxu0 }
 0x1de   : > { %v9721_v41 = vadd.f32 %v1544_v32, %v9407_v58  ;;  %v9723_v54 = vpop.f32.mrb[81].mxu0  ;;  %7758 = vmatmul.mubr.bf16.gmra.mrb[164].mxu0 %v2069_v36  ;;  %v9739_v36 = vpop.f32.mrb[56].mxu1 }
 0x1df   : > { %12068 = vst [vmem:[#allocation69_spill] sm:$0xff] %v9723_v54  ;;  %v1548_v55 = vpop.f32.mrb[82].mxu0  ;;  %12074 = vst [vmem:[#allocation75_spill] sm:$0xff] %v9739_v36 }
 0x1e0   : > { %12067 = vst [vmem:[#allocation68_spill] sm:$0xff] %v9721_v41  ;;  %v9728_v23 = vadd.f32 %v1548_v55, %v9407_v58  ;;  %v9730_v13 = vpop.f32.mrb[83].mxu0  ;;  %v2026_v60 = vmax.f32 %v9721_v41, 0.0  ;;  %v1811_v55 = vpop.f32.mrb[57].mxu1 }
 0x1e1   : > { %12071 = vst [vmem:[#allocation72_spill] sm:$0xff] %v9730_v13  ;;  %v9746_v13 = vpop.f32.mrb[58].mxu1 }
 0x1e2   : > { %12070 = vst [vmem:[#allocation71_spill] sm:$0xff] %v9728_v23  ;;  %v2027_v9 = vmax.f32 %v9728_v23, 0.0  ;;  %12077 = vst [vmem:[#allocation78_spill] sm:$0xff] %v9746_v13  ;;  %v1814_v23 = vpop.f32.mrb[59].mxu1 }
 0x1e3   : > { %v9750_v41 = vpop.f32.mrb[60].mxu1 }
 0x1e4   : > { %v2070_v12 = vpack.c.bf16 %v2027_v9, %v2026_v60  ;;  %12078 = vst [vmem:[#allocation79_spill] sm:$0xff] %v9750_v41 }
 0x1e5   : > { %v1554_v31 = vpop.f32.mrb[84].mxu0 }
 0x1e6   : > { %v9735_v32 = vadd.f32 %v1554_v31, %v9407_v58  ;;  %v9737_v54 = vpop.f32.mrb[85].mxu0  ;;  %7761 = vmatprep.mubr.bf16.mxu0 %v2070_v12 }
 0x1e7   : > { %12073 = vst [vmem:[#allocation74_spill] sm:$0xff] %v9737_v54  ;;  %v1558_v3 = vpop.f32.mrb[86].mxu0  ;;  %v1819_v54 = vpop.f32.mrb[61].mxu1 }
 0x1e8   : > { %12072 = vst [vmem:[#allocation73_spill] sm:$0xff] %v9735_v32  ;;  %v9742_v17 = vadd.f32 %v1558_v3, %v9407_v58  ;;  %v9744_v53 = vpop.f32.mrb[87].mxu0  ;;  %v2028_v60 = vmax.f32 %v9735_v32, 0.0  ;;  %v9757_v3 = vpop.f32.mrb[62].mxu1 }
 0x1e9   : > { %12076 = vst [vmem:[#allocation77_spill] sm:$0xff] %v9744_v53  ;;  %12081 = vst [vmem:[#allocation82_spill] sm:$0xff] %v9757_v3  ;;  %v1822_v13 = vpop.f32.mrb[63].mxu1 }
 0x1ea   : > { %12075 = vst [vmem:[#allocation76_spill] sm:$0xff] %v9742_v17  ;;  %v2029_v9 = vmax.f32 %v9742_v17, 0.0 }
 0x1ec   : > { %v2071_v31 = vpack.c.bf16 %v2029_v9, %v2028_v60 }
 0x1ed   : > { %v1564_v12 = vpop.f32.mrb[88].mxu0 }
 0x1ee   : > { %v9753_v36 = vadd.f32 %v1564_v12, %v9407_v58  ;;  %v9755_v55 = vpop.f32.mrb[89].mxu0  ;;  %7762 = vmatmul.mubr.bf16.gmra.mrb[168].mxu0 %v2071_v31  ;;  %v9771_v31 = vpop.f32.mrb[64].mxu1 }
 0x1ef   : > { %12080 = vst [vmem:[#allocation81_spill] sm:$0xff] %v9755_v55  ;;  %v1568_v53 = vpop.f32.mrb[90].mxu0  ;;  %12086 = vst [vmem:[#allocation87_spill] sm:$0xff] %v9771_v31  ;;  %v1827_v3 = vpop.f32.mrb[65].mxu1 }
 0x1f0   : > { %12079 = vst [vmem:[#allocation80_spill] sm:$0xff] %v9753_v36  ;;  %v9760_v23 = vadd.f32 %v1568_v53, %v9407_v58  ;;  %v9762_v32 = vpop.f32.mrb[91].mxu0  ;;  %v2030_v60 = vmax.f32 %v9753_v36, 0.0  ;;  %v9778_v36 = vpop.f32.mrb[66].mxu1 }
 0x1f1   : > { %12083 = vst [vmem:[#allocation84_spill] sm:$0xff] %v9762_v32  ;;  %12089 = vst [vmem:[#allocation90_spill] sm:$0xff] %v9778_v36 }
 0x1f2   : > { %12082 = vst [vmem:[#allocation83_spill] sm:$0xff] %v9760_v23  ;;  %v2031_v9 = vmax.f32 %v9760_v23, 0.0  ;;  %v1830_v23 = vpop.f32.mrb[67].mxu1 }
 0x1f3   : > { %v9782_v17 = vpop.f32.mrb[68].mxu1 }
 0x1f4   : > { %v2072_v54 = vpack.c.bf16 %v2031_v9, %v2030_v60  ;;  %12090 = vst [vmem:[#allocation91_spill] sm:$0xff] %v9782_v17 }
 0x1f5   : > { %v1574_v41 = vpop.f32.mrb[92].mxu0 }
 0x1f6   : > { %v9767_v12 = vadd.f32 %v1574_v41, %v9407_v58  ;;  %v9769_v55 = vpop.f32.mrb[93].mxu0  ;;  %7765 = vmatprep.mubr.bf16.mxu0 %v2072_v54 }
 0x1f7   : > { %12085 = vst [vmem:[#allocation86_spill] sm:$0xff] %v9769_v55  ;;  %v1578_v13 = vpop.f32.mrb[94].mxu0  ;;  %v1835_v55 = vpop.f32.mrb[69].mxu1 }
 0x1f8   : > { %12084 = vst [vmem:[#allocation85_spill] sm:$0xff] %v9767_v12  ;;  %v9774_v53 = vadd.f32 %v1578_v13, %v9407_v58  ;;  %v9776_v32 = vpop.f32.mrb[95].mxu0  ;;  %v2032_v60 = vmax.f32 %v9767_v12, 0.0  ;;  %v9789_v13 = vpop.f32.mrb[70].mxu1 }
 0x1f9   : > { %12088 = vst [vmem:[#allocation89_spill] sm:$0xff] %v9776_v32  ;;  %12093 = vst [vmem:[#allocation94_spill] sm:$0xff] %v9789_v13  ;;  %v1838_v36 = vpop.f32.mrb[71].mxu1 }
 0x1fa   : > { %12087 = vst [vmem:[#allocation88_spill] sm:$0xff] %v9774_v53  ;;  %v2033_v41 = vmax.f32 %v9774_v53, 0.0 }
 0x1fc   : > { %v2073_v9 = vpack.c.bf16 %v2033_v41, %v2032_v60 }
 0x1fd   : > { %v1584_v54 = vpop.f32.mrb[96].mxu0 }
 0x1fe   : > { %v9785_v31 = vadd.f32 %v1584_v54, %v9407_v58  ;;  %v9787_v3 = vpop.f32.mrb[97].mxu0  ;;  %7766 = vmatmul.mubr.bf16.gmra.mrb[172].mxu0 %v2073_v9  ;;  %v9803_v9 = vpop.f32.mrb[72].mxu1 }
 0x1ff   : > { %12092 = vst [vmem:[#allocation93_spill] sm:$0xff] %v9787_v3  ;;  %v1588_v32 = vpop.f32.mrb[98].mxu0  ;;  %12098 = vst [vmem:[#allocation99_spill] sm:$0xff] %v9803_v9  ;;  %v1843_v13 = vpop.f32.mrb[73].mxu1 }
 0x200   : > { %12091 = vst [vmem:[#allocation92_spill] sm:$0xff] %v9785_v31  ;;  %v9792_v23 = vadd.f32 %v1588_v32, %v9407_v58  ;;  %v9794_v12 = vpop.f32.mrb[99].mxu0  ;;  %v2034_v60 = vmax.f32 %v9785_v31, 0.0  ;;  %v9810_v31 = vpop.f32.mrb[74].mxu1 }
 0x201   : > { %12095 = vst [vmem:[#allocation96_spill] sm:$0xff] %v9794_v12  ;;  %12101 = vst [vmem:[#allocation102_spill] sm:$0xff] %v9810_v31 }
 0x202   : > { %12094 = vst [vmem:[#allocation95_spill] sm:$0xff] %v9792_v23  ;;  %v2035_v41 = vmax.f32 %v9792_v23, 0.0  ;;  %v1846_v23 = vpop.f32.mrb[75].mxu1 }
 0x203   : > { %v9817_v9 = vpop.f32.mrb[76].mxu1 }
 0x204   : > { %v2074_v55 = vpack.c.bf16 %v2035_v41, %v2034_v60  ;;  %12102 = vst [vmem:[#allocation103_spill] sm:$0xff] %v9817_v9 }
 0x205   : > { %v1594_v17 = vpop.f32.mrb[100].mxu0 }
 0x206   : > { %v9799_v54 = vadd.f32 %v1594_v17, %v9407_v58  ;;  %v9801_v3 = vpop.f32.mrb[101].mxu0  ;;  %7769 = vmatprep.mubr.bf16.mxu1 %v2074_v55  ;;  %v8775_v55 = vld [vmem:[%s11913_s5 + $0x8] sm:$0xff]  }
 0x207   : > { %12097 = vst [vmem:[#allocation98_spill] sm:$0xff] %v9801_v3  ;;  %v1598_v36 = vpop.f32.mrb[102].mxu0  ;;  %v1851_v3 = vpop.f32.mrb[77].mxu1 }
 0x208   : > { %12096 = vst [vmem:[#allocation97_spill] sm:$0xff] %v9799_v54  ;;  %v9806_v32 = vadd.f32 %v1598_v36, %v9407_v58  ;;  %v9808_v12 = vpop.f32.mrb[103].mxu0  ;;  %v2036_v60 = vmax.f32 %v9799_v54, 0.0  ;;  %v9824_v23 = vpop.f32.mrb[78].mxu1  ;;  %v8776_v3 = vld [vmem:[%s11913_s5 + $0x10] sm:$0xff]  }
 0x209   : > { %12100 = vst [vmem:[#allocation101_spill] sm:$0xff] %v9808_v12  ;;  %12105 = vst [vmem:[#allocation106_spill] sm:$0xff] %v9824_v23 }
 0x20a   : > { %12099 = vst [vmem:[#allocation100_spill] sm:$0xff] %v9806_v32  ;;  %v2037_v17 = vmax.f32 %v9806_v32, 0.0 }
 0x20c   : > { %v2075_v41 = vpack.c.bf16 %v2037_v17, %v2036_v60  ;;  %v1854_v60 = vpop.f32.mrb[79].mxu1 }
 0x20d   : > { %v1604_v13 = vpop.f32.mrb[104].mxu0 }
 0x20e   : > { %v9820_v36 = vadd.f32 %v1604_v13, %v9407_v58  ;;  %v9822_v12 = vpop.f32.mrb[105].mxu0  ;;  %7770 = vmatmul.mubr.bf16.vlgmr.msra.gmra.mrb[128].mxu1 %v2075_v41 }
 0x20f   : > { %12104 = vst [vmem:[#allocation105_spill] sm:$0xff] %v9822_v12  ;;  %v1608_v31 = vpop.f32.mrb[106].mxu0  ;;  %7786 = vmatpush3.bf16.msra.mxu1 %v9610_v29  ;;  %v8777_v29 = vld [vmem:[%s11913_s5 + $0x18] sm:$0xff]  }
 0x210   : > { %12103 = vst [vmem:[#allocation104_spill] sm:$0xff] %v9820_v36  ;;  %v9828_v17 = vadd.f32 %v1608_v31, %v9407_v58  ;;  %v9830_v32 = vpop.f32.mrb[107].mxu0  ;;  %7787 = vmatprep.subr.bf16.mxu1 %v8775_v55  ;;  %v2038_v13 = vmax.f32 %v9820_v36, 0.0 }
 0x211   : > { %12107 = vst [vmem:[#allocation108_spill] sm:$0xff] %v9830_v32  ;;  %v9845_v32 = vpop.f32.mrb[80].mxu1 }
 0x212   : > { %12106 = vst [vmem:[#allocation107_spill] sm:$0xff] %v9828_v17  ;;  %v2039_v41 = vmax.f32 %v9828_v17, 0.0  ;;  %12110 = vst [vmem:[#allocation111_spill] sm:$0xff] %v9845_v32  ;;  %v1859_v36 = vpop.f32.mrb[81].mxu1 }
 0x213   : > { %7788 = vmatpush3.bf16.msra.mxu1 %v8775_v55 }
 0x214   : > { %v2076_v23 = vpack.c.bf16 %v2039_v41, %v2038_v13  ;;  %7789 = vmatprep.subr.bf16.mxu1 %v8776_v3  ;;  %v8778_v41 = vld [vmem:[%s11913_s5 + $0x20] sm:$0xff]  }
 0x215   : > { %v1614_v31 = vpop.f32.mrb[108].mxu0 }
 0x216   : > { %v9841_v60 = vadd.f32 %v1614_v31, %v9407_v58  ;;  %v9843_v9 = vpop.f32.mrb[109].mxu0  ;;  %7773 = vmatprep.mubr.bf16.mxu1 %v2076_v23  ;;  %v9855_v31 = vpop.f32.mrb[82].mxu1 }
 0x217   : > { %12109 = vst [vmem:[#allocation110_spill] sm:$0xff] %v9843_v9  ;;  %v1618_v12 = vpop.f32.mrb[110].mxu0  ;;  %7790 = vmatpush3.bf16.msra.mxu1 %v8776_v3  ;;  %12113 = vst [vmem:[#allocation114_spill] sm:$0xff] %v9855_v31  ;;  %v1862_v17 = vpop.f32.mrb[83].mxu1 }
 0x218   : > { %12108 = vst [vmem:[#allocation109_spill] sm:$0xff] %v9841_v60  ;;  %v9848_v55 = vadd.f32 %v1618_v12, %v9407_v58  ;;  %v9850_v13 = vpop.f32.mrb[111].mxu0  ;;  %7791 = vmatprep.subr.bf16.mxu1 %v8777_v29  ;;  %v2040_v23 = vmax.f32 %v9841_v60, 0.0  ;;  %v8779_v12 = vld [vmem:[%s11913_s5 + $0x28] sm:$0xff]   ;;  %v9862_v36 = vpop.f32.mrb[84].mxu1 }
 0x219   : > { %12112 = vst [vmem:[#allocation113_spill] sm:$0xff] %v9850_v13  ;;  %12114 = vst [vmem:[#allocation115_spill] sm:$0xff] %v9862_v36  ;;  %v1867_v9 = vpop.f32.mrb[85].mxu1 }
 0x21a   : > { %12111 = vst [vmem:[#allocation112_spill] sm:$0xff] %v9848_v55  ;;  %v2041_v32 = vmax.f32 %v9848_v55, 0.0  ;;  %v9869_v17 = vpop.f32.mrb[86].mxu1  ;;  %v8780_v9 = vld [vmem:[%s11913_s5 + $0x30] sm:$0xff]  }
 0x21b   : > { %7792 = vmatpush3.bf16.msra.mxu1 %v8777_v29  ;;  %12117 = vst [vmem:[#allocation118_spill] sm:$0xff] %v9869_v17 }
 0x21c   : > { %v2077_v3 = vpack.c.bf16 %v2041_v32, %v2040_v23  ;;  %7793 = vmatprep.subr.bf16.mxu1 %v8778_v41  ;;  %v1870_v32 = vpop.f32.mrb[87].mxu1 }
 0x21d   : > { %v1624_v13 = vpop.f32.mrb[112].mxu0 }
 0x21e   : > { %v9865_v54 = vadd.f32 %v1624_v13, %v9407_v58  ;;  %v9867_v31 = vpop.f32.mrb[113].mxu0  ;;  %7774 = vmatmul.mubr.bf16.gmra.mrb[132].mxu1 %v2077_v3 }
 0x21f   : > { %12116 = vst [vmem:[#allocation117_spill] sm:$0xff] %v9867_v31  ;;  %v1628_v55 = vpop.f32.mrb[114].mxu0  ;;  %7794 = vmatpush3.bf16.msra.mxu1 %v8778_v41  ;;  %v8781_v41 = vld [vmem:[%s11913_s5 + $0x38] sm:$0xff]  }
 0x220   : > { %12115 = vst [vmem:[#allocation116_spill] sm:$0xff] %v9865_v54  ;;  %v9872_v29 = vadd.f32 %v1628_v55, %v9407_v58  ;;  %v9874_v23 = vpop.f32.mrb[115].mxu0  ;;  %7795 = vmatprep.subr.bf16.mxu1 %v8779_v12  ;;  %v2042_v13 = vmax.f32 %v9865_v54, 0.0 }
 0x221   : > { %12119 = vst [vmem:[#allocation120_spill] sm:$0xff] %v9874_v23  ;;  %v9889_v23 = vpop.f32.mrb[88].mxu1 }
 0x222   : > { %12118 = vst [vmem:[#allocation119_spill] sm:$0xff] %v9872_v29  ;;  %v2043_v36 = vmax.f32 %v9872_v29, 0.0  ;;  %12122 = vst [vmem:[#allocation123_spill] sm:$0xff] %v9889_v23  ;;  %v1875_v54 = vpop.f32.mrb[89].mxu1 }
 0x223   : > { %7796 = vmatpush3.bf16.msra.mxu1 %v8779_v12 }
 0x224   : > { %v2078_v3 = vpack.c.bf16 %v2043_v36, %v2042_v13  ;;  %7797 = vmatprep.subr.bf16.mxu1 %v8780_v9  ;;  %v9896_v13 = vpop.f32.mrb[90].mxu1 }
 0x225   : > { %v1634_v55 = vpop.f32.mrb[116].mxu0  ;;  %12125 = vst [vmem:[#allocation126_spill] sm:$0xff] %v9896_v13  ;;  %v1878_v29 = vpop.f32.mrb[91].mxu1 }
 0x226   : > { %v9885_v32 = vadd.f32 %v1634_v55, %v9407_v58  ;;  %v9887_v17 = vpop.f32.mrb[117].mxu0  ;;  %7777 = vmatprep.mubr.bf16.mxu1 %v2078_v3 }
 0x227   : > { %12121 = vst [vmem:[#allocation122_spill] sm:$0xff] %v9887_v17  ;;  %v1638_v31 = vpop.f32.mrb[118].mxu0  ;;  %7798 = vmatpush3.bf16.msra.mxu1 %v8780_v9  ;;  %v9900_v17 = vpop.f32.mrb[92].mxu1 }
 0x228   : > { %12120 = vst [vmem:[#allocation121_spill] sm:$0xff] %v9885_v32  ;;  %v9892_v12 = vadd.f32 %v1638_v31, %v9407_v58  ;;  %v9894_v36 = vpop.f32.mrb[119].mxu0  ;;  %7799 = vmatprep.subr.bf16.mxu1 %v8781_v41  ;;  %v2044_v55 = vmax.f32 %v9885_v32, 0.0  ;;  %12126 = vst [vmem:[#allocation127_spill] sm:$0xff] %v9900_v17  ;;  %v1883_v9 = vpop.f32.mrb[93].mxu1 }
 0x229   : > { %12124 = vst [vmem:[#allocation125_spill] sm:$0xff] %v9894_v36  ;;  %v9907_v36 = vpop.f32.mrb[94].mxu1 }
 0x22a   : > { %12123 = vst [vmem:[#allocation124_spill] sm:$0xff] %v9892_v12  ;;  %v2045_v60 = vmax.f32 %v9892_v12, 0.0  ;;  %12129 = vst [vmem:[#allocation130_spill] sm:$0xff] %v9907_v36  ;;  %v1886_v29 = vpop.f32.mrb[95].mxu1 }
 0x22b   : > { %7800 = vmatpush3.bf16.msra.mxu1 %v8781_v41 }
 0x22c   : > { %v2079_v3 = vpack.c.bf16 %v2045_v60, %v2044_v55 }
 0x22d   : > { %v1644_v23 = vpop.f32.mrb[120].mxu0 }
 0x22e   : > { %v9903_v54 = vadd.f32 %v1644_v23, %v9407_v58  ;;  %v9905_v31 = vpop.f32.mrb[121].mxu0  ;;  %7778 = vmatmul.mubr.bf16.gmra.mrb[136].mxu1 %v2079_v3  ;;  %v9921_v3 = vpop.f32.mrb[96].mxu1 }
 0x22f   : > { %12128 = vst [vmem:[#allocation129_spill] sm:$0xff] %v9905_v31  ;;  %v1648_v13 = vpop.f32.mrb[122].mxu0  ;;  %12134 = vst [vmem:[#allocation135_spill] sm:$0xff] %v9921_v3  ;;  %v1891_v36 = vpop.f32.mrb[97].mxu1 }
 0x230   : > { %12127 = vst [vmem:[#allocation128_spill] sm:$0xff] %v9903_v54  ;;  %v9910_v32 = vadd.f32 %v1648_v13, %v9407_v58  ;;  %v9912_v12 = vpop.f32.mrb[123].mxu0  ;;  %v2046_v60 = vmax.f32 %v9903_v54, 0.0  ;;  %v9928_v54 = vpop.f32.mrb[98].mxu1 }
 0x231   : > { %12131 = vst [vmem:[#allocation132_spill] sm:$0xff] %v9912_v12  ;;  %12137 = vst [vmem:[#allocation138_spill] sm:$0xff] %v9928_v54 }
 0x232   : > { %12130 = vst [vmem:[#allocation131_spill] sm:$0xff] %v9910_v32  ;;  %v2047_v41 = vmax.f32 %v9910_v32, 0.0  ;;  %v1894_v32 = vpop.f32.mrb[99].mxu1 }
 0x233   : > { %v9937_v3 = vpop.f32.mrb[100].mxu1 }
 0x234   : > { %v2080_v55 = vpack.c.bf16 %v2047_v41, %v2046_v60  ;;  %12138 = vst [vmem:[#allocation139_spill] sm:$0xff] %v9937_v3 }
 0x235   : > { %v1654_v9 = vpop.f32.mrb[124].mxu0 }
 0x236   : > { %v9917_v23 = vadd.f32 %v1654_v9, %v9407_v58  ;;  %v9919_v17 = vpop.f32.mrb[125].mxu0  ;;  %7781 = vmatprep.mubr.bf16.mxu1 %v2080_v55  ;;  %v9935_v55 = vld [vmem:[%s11912_s4] ss:$0 sm:$0xff] }
 0x237   : > { %12133 = vst [vmem:[#allocation134_spill] sm:$0xff] %v9919_v17  ;;  %v1658_v29 = vpop.f32.mrb[126].mxu0 }
 0x238   : > { %12132 = vst [vmem:[#allocation133_spill] sm:$0xff] %v9917_v23  ;;  %v9924_v13 = vadd.f32 %v1658_v29, %v9407_v58  ;;  %v9926_v12 = vpop.f32.mrb[127].mxu0  ;;  %v2048_v60 = vmax.f32 %v9917_v23, 0.0  ;;  %v1899_v58 = vpop.f32.mrb[101].mxu1 }
 0x239   : > { %12136 = vst [vmem:[#allocation137_spill] sm:$0xff] %v9926_v12  ;;  %v9940_v54 = vpop.f32.mrb[102].mxu1 }
 0x23a   : > { %12135 = vst [vmem:[#allocation136_spill] sm:$0xff] %v9924_v13  ;;  %v2049_v41 = vmax.f32 %v9924_v13, 0.0  ;;  %12139 = vst [vmem:[#allocation140_spill] sm:$0xff] %v9940_v54  ;;  %v1902_v13 = vpop.f32.mrb[103].mxu1 }
 0x23b   : > { %v9946_v54 = vpop.f32.mrb[104].mxu1 }
 0x23c   : > { %v2081_v9 = vpack.c.bf16 %v2049_v41, %v2048_v60  ;;  %12140 = vst [vmem:[#allocation141_spill] sm:$0xff] %v9946_v54 }
 0x23d   : > { %v7723_v36 = vpop.f32.mrb[128].mxu0 }
 0x23e   : > { %v2179_v29 = vadd.f32 %v7723_v36, %v9935_v55  ;;  %v2170_v12 = vpop.f32.mrb[129].mxu0  ;;  %7782 = vmatmul.mubr.bf16.gmra.mrb[140].mxu1 %v2081_v9 }
 0x23f   : > { %v2171_v32 = vadd.f32 %v9935_v55, %v2170_v12  ;;  %v7724_v31 = vpop.f32.mrb[130].mxu0 }
 0x240   : > { %v2182_v23 = vadd.f32 %v7724_v31, %v9935_v55  ;;  %v2173_v17 = vpop.f32.mrb[131].mxu0  ;;  %v2427_v60 = vmax.f32 %v2179_v29, 0.0  ;;  %v1907_v31 = vpop.f32.mrb[105].mxu1 }
 0x241   : > { %v2174_v53 = vadd.f32 %v9935_v55, %v2173_v17  ;;  %v2425_v3 = vmax.f32 %v2171_v32, 0.0 }
 0x242   : > { %v2428_v41 = vmax.f32 %v2182_v23, 0.0  ;;  %v9950_v23 = vpop.f32.mrb[106].mxu1 }
 0x243   : > { %v2426_v39 = vmax.f32 %v2174_v53, 0.0  ;;  %12141 = vst [vmem:[#allocation142_spill] sm:$0xff] %v9950_v23  ;;  %v1910_v29 = vpop.f32.mrb[107].mxu1 }
 0x244   : > { %v2490_v58 = vpack.c.bf16 %v2428_v41, %v2427_v60  ;;  %v9953_v41 = vpop.f32.mrb[108].mxu1 }
 0x245   : > { %v7727_v5 = vpop.f32.mrb[132].mxu0  ;;  %v2489_v36 = vpack.c.bf16 %v2426_v39, %v2425_v3  ;;  %12142 = vst [vmem:[#allocation143_spill] sm:$0xff] %v9953_v41 }
 0x246   : > { %v2195_v9 = vadd.f32 %v7727_v5, %v9935_v55  ;;  %v2186_v57 = vpop.f32.mrb[133].mxu0 }
 0x247   : > { %v2187_v12 = vadd.f32 %v9935_v55, %v2186_v57  ;;  %v7728_v13 = vpop.f32.mrb[134].mxu0  ;;  %7801 = vmatprep.mubr.bf16.mxu1 %v2489_v36  ;;  %v1915_v36 = vpop.f32.mrb[109].mxu1 }
 0x248   : > { %v2198_v51 = vadd.f32 %v7728_v13, %v9935_v55  ;;  %v2189_v17 = vpop.f32.mrb[135].mxu0  ;;  %7802 = vmatmul.mubr.bf16.vlgmr.msra.gmra.mrb[144].mxu1 %v2490_v58  ;;  %v2431_v39 = vmax.f32 %v2195_v9, 0.0  ;;  %v9956_v26 = vpop.f32.mrb[110].mxu1 }
 0x249   : > { %v2190_v53 = vadd.f32 %v9935_v55, %v2189_v17  ;;  %v2429_v5 = vmax.f32 %v2187_v12, 0.0  ;;  %12143 = vst [vmem:[#allocation144_spill] sm:$0xff] %v9956_v26  ;;  %v1918_v17 = vpop.f32.mrb[111].mxu1 }
 0x24a   : > { %v2432_v3 = vmax.f32 %v2198_v51, 0.0  ;;  %v9960_v12 = vpop.f32.mrb[112].mxu1 }
 0x24b   : > { %v2430_v32 = vmax.f32 %v2190_v53, 0.0  ;;  %12144 = vst [vmem:[#allocation145_spill] sm:$0xff] %v9960_v12  ;;  %v1923_v29 = vpop.f32.mrb[113].mxu1 }
 0x24c   : > { %v2492_v60 = vpack.c.bf16 %v2432_v3, %v2431_v39 }
 0x24d   : > { %v7731_v57 = vpop.f32.mrb[136].mxu0  ;;  %v2491_v54 = vpack.c.bf16 %v2430_v32, %v2429_v5 }
 0x24e   : > { %v2211_v31 = vadd.f32 %v7731_v57, %v9935_v55  ;;  %v2202_v13 = vpop.f32.mrb[137].mxu0  ;;  %v9963_v57 = vpop.f32.mrb[114].mxu1 }
 0x24f   : > { %v2203_v58 = vadd.f32 %v9935_v55, %v2202_v13  ;;  %v7732_v23 = vpop.f32.mrb[138].mxu0  ;;  %7805 = vmatprep.mubr.bf16.mxu1 %v2491_v54  ;;  %12145 = vst [vmem:[#allocation146_spill] sm:$0xff] %v9963_v57  ;;  %v1926_v13 = vpop.f32.mrb[115].mxu1 }
 0x250   : > { %v2214_v51 = vadd.f32 %v7732_v23, %v9935_v55  ;;  %v2205_v9 = vpop.f32.mrb[139].mxu0  ;;  %7806 = vmatmul.mubr.bf16.gmra.mrb[148].mxu1 %v2492_v60  ;;  %v2435_v39 = vmax.f32 %v2211_v31, 0.0  ;;  %v9965_v17 = vpop.f32.mrb[116].mxu1 }
 0x251   : > { %v2206_v53 = vadd.f32 %v9935_v55, %v2205_v9  ;;  %v2433_v5 = vmax.f32 %v2203_v58, 0.0  ;;  %12146 = vst [vmem:[#allocation147_spill] sm:$0xff] %v9965_v17  ;;  %v1931_v41 = vpop.f32.mrb[117].mxu1 }
 0x252   : > { %v2436_v3 = vmax.f32 %v2214_v51, 0.0  ;;  %v9969_v31 = vpop.f32.mrb[118].mxu1 }
 0x253   : > { %v2434_v32 = vmax.f32 %v2206_v53, 0.0  ;;  %12147 = vst [vmem:[#allocation148_spill] sm:$0xff] %v9969_v31  ;;  %v1934_v53 = vpop.f32.mrb[119].mxu1 }
 0x254   : > { %v2494_v36 = vpack.c.bf16 %v2436_v3, %v2435_v39  ;;  %v9973_v39 = vpop.f32.mrb[120].mxu1 }
 0x255   : > { %v7735_v26 = vpop.f32.mrb[140].mxu0  ;;  %v2493_v54 = vpack.c.bf16 %v2434_v32, %v2433_v5  ;;  %12148 = vst [vmem:[#allocation149_spill] sm:$0xff] %v9973_v39 }
 0x256   : > { %v2227_v23 = vadd.f32 %v7735_v26, %v9935_v55  ;;  %v2218_v60 = vpop.f32.mrb[141].mxu0  ;;  %v1939_v26 = vpop.f32.mrb[121].mxu1 }
 0x257   : > { %v2219_v12 = vadd.f32 %v9935_v55, %v2218_v60  ;;  %v7736_v9 = vpop.f32.mrb[142].mxu0  ;;  %7809 = vmatprep.mubr.bf16.mxu1 %v2493_v54  ;;  %v9975_v13 = vpop.f32.mrb[122].mxu1 }
 0x258   : > { %v2230_v58 = vadd.f32 %v7736_v9, %v9935_v55  ;;  %v2221_v51 = vpop.f32.mrb[143].mxu0  ;;  %7810 = vmatmul.mubr.bf16.gmra.mrb[152].mxu1 %v2494_v36  ;;  %v2439_v3 = vmax.f32 %v2227_v23, 0.0  ;;  %12149 = vst [vmem:[#allocation150_spill] sm:$0xff] %v9975_v13  ;;  %v1942_v54 = vpop.f32.mrb[123].mxu1 }
 0x259   : > { %v2222_v29 = vadd.f32 %v9935_v55, %v2221_v51  ;;  %v2437_v32 = vmax.f32 %v2219_v12, 0.0  ;;  %v9977_v31 = vpop.f32.mrb[124].mxu1 }
 0x25a   : > { %v2440_v5 = vmax.f32 %v2230_v58, 0.0  ;;  %12150 = vst [vmem:[#allocation151_spill] sm:$0xff] %v9977_v31  ;;  %v1947_v9 = vpop.f32.mrb[125].mxu1 }
 0x25b   : > { %v2438_v41 = vmax.f32 %v2222_v29, 0.0  ;;  %v9979_v36 = vpop.f32.mrb[126].mxu1 }
 0x25c   : > { %v2496_v60 = vpack.c.bf16 %v2440_v5, %v2439_v3  ;;  %12151 = vst [vmem:[#allocation152_spill] sm:$0xff] %v9979_v36  ;;  %v1950_v51 = vpop.f32.mrb[127].mxu1 }
 0x25d   : > { %v2495_v57 = vpack.c.bf16 %v2438_v41, %v2437_v32 }
 0x25f   : > { %7813 = vmatprep.mubr.bf16.mxu1 %v2495_v57 }
 0x260   : > { %7814 = vmatmul.mubr.bf16.gmra.mrb[156].mxu1 %v2496_v60 }
 0x261   : > { %v7739_v53 = vpop.f32.mrb[144].mxu0 }
 0x262   : > { %v2243_v23 = vadd.f32 %v7739_v53, %v9935_v55  ;;  %v2234_v58 = vpop.f32.mrb[145].mxu0 }
 0x263   : > { %v2235_v12 = vadd.f32 %v9935_v55, %v2234_v58  ;;  %v7740_v29 = vpop.f32.mrb[146].mxu0 }
 0x264   : > { %v2246_v26 = vadd.f32 %v7740_v29, %v9935_v55  ;;  %v2237_v3 = vpop.f32.mrb[147].mxu0  ;;  %v2443_v32 = vmax.f32 %v2243_v23, 0.0 }
 0x265   : > { %v2238_v5 = vadd.f32 %v9935_v55, %v2237_v3  ;;  %v2441_v54 = vmax.f32 %v2235_v12, 0.0 }
 0x266   : > { %v2444_v41 = vmax.f32 %v2246_v26, 0.0 }
 0x267   : > { %v2442_v57 = vmax.f32 %v2238_v5, 0.0 }
 0x268   : > { %v2498_v9 = vpack.c.bf16 %v2444_v41, %v2443_v32 }
 0x269   : > { %v2497_v13 = vpack.c.bf16 %v2442_v57, %v2441_v54 }
 0x26b   : > { %7817 = vmatprep.mubr.bf16.mxu1 %v2497_v13 }
 0x26c   : > { %7818 = vmatmul.mubr.bf16.gmra.mrb[160].mxu1 %v2498_v9 }
 0x271   : > { %v7743_v60 = vpop.f32.mrb[148].mxu0 }
 0x272   : > { %v2259_v51 = vadd.f32 %v7743_v60, %v9935_v55  ;;  %v2250_v53 = vpop.f32.mrb[149].mxu0 }
 0x273   : > { %v2251_v58 = vadd.f32 %v9935_v55, %v2250_v53  ;;  %v7744_v36 = vpop.f32.mrb[150].mxu0 }
 0x274   : > { %v2262_v29 = vadd.f32 %v7744_v36, %v9935_v55  ;;  %v2253_v39 = vpop.f32.mrb[151].mxu0  ;;  %v2447_v23 = vmax.f32 %v2259_v51, 0.0 }
 0x275   : > { %v2254_v3 = vadd.f32 %v9935_v55, %v2253_v39  ;;  %v2445_v12 = vmax.f32 %v2251_v58, 0.0 }
 0x276   : > { %v2448_v26 = vmax.f32 %v2262_v29, 0.0 }
 0x277   : > { %v2446_v5 = vmax.f32 %v2254_v3, 0.0 }
 0x278   : > { %v2500_v32 = vpack.c.bf16 %v2448_v26, %v2447_v23  ;;  %v8782_v26 = vld [vmem:[%s11911_s3 + $0x40] sm:$0xff]  }
 0x279   : > { %v2499_v41 = vpack.c.bf16 %v2446_v5, %v2445_v12  ;;  %7865 = vmatprep.subr.bf16.mxu0 %v8782_v26  ;;  %v8783_v5 = vld [vmem:[%s11911_s3 + $0x48] sm:$0xff]  }
 0x27a   : > { %7866 = vmatpush3.bf16.msra.mxu0 %v8782_v26  ;;  %v8786_v26 = vld [vmem:[%s11911_s3 + $0x60] sm:$0xff]  }
 0x27b   : > { %7821 = vmatprep.mubr.bf16.mxu1 %v2499_v41  ;;  %7867 = vmatprep.subr.bf16.mxu0 %v8783_v5 }
 0x27c   : > { %7822 = vmatmul.mubr.bf16.gmra.mrb[164].mxu1 %v2500_v32  ;;  %v8784_v32 = vld [vmem:[%s11911_s3 + $0x50] sm:$0xff]  }
 0x27e   : > { %7868 = vmatpush3.bf16.msra.mxu0 %v8783_v5  ;;  %v8787_v5 = vld [vmem:[%s11911_s3 + $0x68] sm:$0xff]  }
 0x27f   : > { %7869 = vmatprep.subr.bf16.mxu0 %v8784_v32 }
 0x281   : > { %v7747_v13 = vpop.f32.mrb[152].mxu0 }
 0x282   : > { %v2275_v54 = vadd.f32 %v7747_v13, %v9935_v55  ;;  %v2266_v57 = vpop.f32.mrb[153].mxu0  ;;  %7870 = vmatpush3.bf16.msra.mxu0 %v8784_v32  ;;  %v8788_v32 = vld [vmem:[%s11911_s3 + $0x70] sm:$0xff]  }
 0x283   : > { %v2267_v9 = vadd.f32 %v9935_v55, %v2266_v57  ;;  %v7748_v60 = vpop.f32.mrb[154].mxu0 }
 0x284   : > { %v2278_v36 = vadd.f32 %v7748_v60, %v9935_v55  ;;  %v2269_v53 = vpop.f32.mrb[155].mxu0  ;;  %v2451_v51 = vmax.f32 %v2275_v54, 0.0 }
 0x285   : > { %v2270_v39 = vadd.f32 %v9935_v55, %v2269_v53  ;;  %v2449_v58 = vmax.f32 %v2267_v9, 0.0  ;;  %v8785_v53 = vld [vmem:[%s11911_s3 + $0x58] sm:$0xff]  }
 0x286   : > { %v2452_v29 = vmax.f32 %v2278_v36, 0.0  ;;  %7871 = vmatprep.subr.bf16.mxu0 %v8785_v53 }
 0x287   : > { %v2450_v3 = vmax.f32 %v2270_v39, 0.0  ;;  %7872 = vmatpush3.bf16.msra.mxu0 %v8785_v53  ;;  %v8789_v53 = vld [vmem:[%s11911_s3 + $0x78] sm:$0xff]  }
 0x288   : > { %v2502_v23 = vpack.c.bf16 %v2452_v29, %v2451_v51  ;;  %7873 = vmatprep.subr.bf16.mxu0 %v8786_v26 }
 0x289   : > { %v2501_v12 = vpack.c.bf16 %v2450_v3, %v2449_v58 }
 0x28b   : > { %7825 = vmatprep.mubr.bf16.mxu1 %v2501_v12  ;;  %7874 = vmatpush3.bf16.msra.mxu0 %v8786_v26 }
 0x28c   : > { %7826 = vmatmul.mubr.bf16.gmra.mrb[168].mxu1 %v2502_v23  ;;  %7875 = vmatprep.subr.bf16.mxu0 %v8787_v5 }
 0x28f   : > { %7876 = vmatpush3.bf16.msra.mxu0 %v8787_v5 }
 0x290   : > { %7877 = vmatprep.subr.bf16.mxu0 %v8788_v32 }
 0x291   : > { %v7751_v41 = vpop.f32.mrb[156].mxu0 }
 0x292   : > { %v2291_v13 = vadd.f32 %v7751_v41, %v9935_v55  ;;  %v2282_v54 = vpop.f32.mrb[157].mxu0 }
 0x293   : > { %v2283_v57 = vadd.f32 %v9935_v55, %v2282_v54  ;;  %v7752_v9 = vpop.f32.mrb[158].mxu0  ;;  %7878 = vmatpush3.bf16.msra.mxu0 %v8788_v32 }
 0x294   : > { %v2294_v60 = vadd.f32 %v7752_v9, %v9935_v55  ;;  %v2285_v36 = vpop.f32.mrb[159].mxu0  ;;  %v2455_v51 = vmax.f32 %v2291_v13, 0.0  ;;  %7879 = vmatprep.subr.bf16.mxu0 %v8789_v53 }
 0x295   : > { %v2286_v39 = vadd.f32 %v9935_v55, %v2285_v36  ;;  %v2453_v58 = vmax.f32 %v2283_v57, 0.0 }
 0x296   : > { %v2456_v29 = vmax.f32 %v2294_v60, 0.0 }
 0x297   : > { %v2454_v3 = vmax.f32 %v2286_v39, 0.0  ;;  %7880 = vmatpush3.bf16.msra.mxu0 %v8789_v53 }
 0x298   : > { %v2504_v23 = vpack.c.bf16 %v2456_v29, %v2455_v51 }
 0x299   : > { %v2503_v12 = vpack.c.bf16 %v2454_v3, %v2453_v58 }
 0x29b   : > { %7829 = vmatprep.mubr.bf16.mxu1 %v2503_v12 }
 0x29c   : > { %7830 = vmatmul.mubr.bf16.gmra.mrb[172].mxu1 %v2504_v23 }
 0x2a1   : > { %v7755_v41 = vpop.f32.mrb[160].mxu0 }
 0x2a2   : > { %v2307_v13 = vadd.f32 %v7755_v41, %v9935_v55  ;;  %v2298_v54 = vpop.f32.mrb[161].mxu0 }
 0x2a3   : > { %v2299_v57 = vadd.f32 %v9935_v55, %v2298_v54  ;;  %v7756_v9 = vpop.f32.mrb[162].mxu0 }
 0x2a4   : > { %v2310_v60 = vadd.f32 %v7756_v9, %v9935_v55  ;;  %v2301_v36 = vpop.f32.mrb[163].mxu0  ;;  %v2459_v51 = vmax.f32 %v2307_v13, 0.0 }
 0x2a5   : > { %v2302_v39 = vadd.f32 %v9935_v55, %v2301_v36  ;;  %v2457_v58 = vmax.f32 %v2299_v57, 0.0 }
 0x2a6   : > { %v2460_v29 = vmax.f32 %v2310_v60, 0.0 }
 0x2a7   : > { %v2458_v3 = vmax.f32 %v2302_v39, 0.0 }
 0x2a8   : > { %v2506_v23 = vpack.c.bf16 %v2460_v29, %v2459_v51 }
 0x2a9   : > { %v2505_v26 = vpack.c.bf16 %v2458_v3, %v2457_v58 }
 0x2ab   : > { %7833 = vmatprep.mubr.bf16.mxu1 %v2505_v26 }
 0x2ac   : > { %7834 = vmatmul.mubr.bf16.gmra.mrb[176].mxu1 %v2506_v23 }
 0x2b1   : > { %v7759_v12 = vpop.f32.mrb[164].mxu0 }
 0x2b2   : > { %v2323_v5 = vadd.f32 %v7759_v12, %v9935_v55  ;;  %v2314_v32 = vpop.f32.mrb[165].mxu0 }
 0x2b3   : > { %v2315_v41 = vadd.f32 %v9935_v55, %v2314_v32  ;;  %v7760_v54 = vpop.f32.mrb[166].mxu0 }
 0x2b4   : > { %v2326_v9 = vadd.f32 %v7760_v54, %v9935_v55  ;;  %v2317_v36 = vpop.f32.mrb[167].mxu0  ;;  %v2463_v60 = vmax.f32 %v2323_v5, 0.0 }
 0x2b5   : > { %v2318_v13 = vadd.f32 %v9935_v55, %v2317_v36  ;;  %v2461_v39 = vmax.f32 %v2315_v41, 0.0 }
 0x2b6   : > { %v2464_v57 = vmax.f32 %v2326_v9, 0.0 }
 0x2b7   : > { %v2462_v53 = vmax.f32 %v2318_v13, 0.0 }
 0x2b8   : > { %v2508_v51 = vpack.c.bf16 %v2464_v57, %v2463_v60 }
 0x2b9   : > { %v2507_v29 = vpack.c.bf16 %v2462_v53, %v2461_v39 }
 0x2bb   : > { %7837 = vmatprep.mubr.bf16.mxu1 %v2507_v29 }
 0x2bc   : > { %7838 = vmatmul.mubr.bf16.gmra.mrb[180].mxu1 %v2508_v51 }
 0x2c1   : > { %v7763_v58 = vpop.f32.mrb[168].mxu0 }
 0x2c2   : > { %v2339_v3 = vadd.f32 %v7763_v58, %v9935_v55  ;;  %v2330_v23 = vpop.f32.mrb[169].mxu0 }
 0x2c3   : > { %v2331_v26 = vadd.f32 %v9935_v55, %v2330_v23  ;;  %v7764_v12 = vpop.f32.mrb[170].mxu0 }
 0x2c4   : > { %v2342_v32 = vadd.f32 %v7764_v12, %v9935_v55  ;;  %v2333_v54 = vpop.f32.mrb[171].mxu0  ;;  %v2467_v5 = vmax.f32 %v2339_v3, 0.0 }
 0x2c5   : > { %v2334_v36 = vadd.f32 %v9935_v55, %v2333_v54  ;;  %v2465_v41 = vmax.f32 %v2331_v26, 0.0 }
 0x2c6   : > { %v2468_v9 = vmax.f32 %v2342_v32, 0.0 }
 0x2c7   : > { %v2466_v13 = vmax.f32 %v2334_v36, 0.0 }
 0x2c8   : > { %v2510_v60 = vpack.c.bf16 %v2468_v9, %v2467_v5 }
 0x2c9   : > { %v2509_v57 = vpack.c.bf16 %v2466_v13, %v2465_v41 }
 0x2cb   : > { %7841 = vmatprep.mubr.bf16.mxu1 %v2509_v57 }
 0x2cc   : > { %7842 = vmatmul.mubr.bf16.gmra.mrb[184].mxu1 %v2510_v60 }
 0x2d1   : > { %v7767_v39 = vpop.f32.mrb[172].mxu0 }
 0x2d2   : > { %v2355_v53 = vadd.f32 %v7767_v39, %v9935_v55  ;;  %v2346_v51 = vpop.f32.mrb[173].mxu0 }
 0x2d3   : > { %v2347_v29 = vadd.f32 %v9935_v55, %v2346_v51  ;;  %v7768_v58 = vpop.f32.mrb[174].mxu0 }
 0x2d4   : > { %v2358_v23 = vadd.f32 %v7768_v58, %v9935_v55  ;;  %v2349_v12 = vpop.f32.mrb[175].mxu0  ;;  %v2471_v3 = vmax.f32 %v2355_v53, 0.0 }
 0x2d5   : > { %v2350_v54 = vadd.f32 %v9935_v55, %v2349_v12  ;;  %v2469_v26 = vmax.f32 %v2347_v29, 0.0 }
 0x2d6   : > { %v2472_v32 = vmax.f32 %v2358_v23, 0.0 }
 0x2d7   : > { %v2470_v36 = vmax.f32 %v2350_v54, 0.0 }
 0x2d8   : > { %v2512_v5 = vpack.c.bf16 %v2472_v32, %v2471_v3 }
 0x2d9   : > { %v2511_v9 = vpack.c.bf16 %v2470_v36, %v2469_v26 }
 0x2db   : > { %7845 = vmatprep.mubr.bf16.mxu1 %v2511_v9 }
 0x2dc   : > { %7846 = vmatmul.mubr.bf16.gmra.mrb[188].mxu1 %v2512_v5 }
 0x2e1   : > { %v7771_v41 = vpop.f32.mrb[128].mxu1 }
 0x2e2   : > { %v2371_v13 = vadd.f32 %v7771_v41, %v9935_v55  ;;  %v2362_v60 = vpop.f32.mrb[129].mxu1 }
 0x2e3   : > { %v2363_v57 = vadd.f32 %v9935_v55, %v2362_v60  ;;  %v7772_v39 = vpop.f32.mrb[130].mxu1 }
 0x2e4   : > { %v2374_v51 = vadd.f32 %v7772_v39, %v9935_v55  ;;  %v2365_v58 = vpop.f32.mrb[131].mxu1  ;;  %v2475_v53 = vmax.f32 %v2371_v13, 0.0 }
 0x2e5   : > { %v2366_v12 = vadd.f32 %v9935_v55, %v2365_v58  ;;  %v2473_v29 = vmax.f32 %v2363_v57, 0.0 }
 0x2e6   : > { %v2476_v23 = vmax.f32 %v2374_v51, 0.0 }
 0x2e7   : > { %v2474_v54 = vmax.f32 %v2366_v12, 0.0 }
 0x2e8   : > { %v2514_v3 = vpack.c.bf16 %v2476_v23, %v2475_v53 }
 0x2e9   : > { %v2513_v32 = vpack.c.bf16 %v2474_v54, %v2473_v29 }
 0x2eb   : > { %7849 = vmatprep.mubr.bf16.mxu1 %v2513_v32 }
 0x2ec   : > { %7850 = vmatmul.mubr.bf16.gmra.mrb[192].mxu1 %v2514_v3 }
 0x2f1   : > { %v7775_v26 = vpop.f32.mrb[132].mxu1 }
 0x2f2   : > { %v2387_v36 = vadd.f32 %v7775_v26, %v9935_v55  ;;  %v2378_v5 = vpop.f32.mrb[133].mxu1 }
 0x2f3   : > { %v2379_v9 = vadd.f32 %v9935_v55, %v2378_v5  ;;  %v7776_v41 = vpop.f32.mrb[134].mxu1 }
 0x2f4   : > { %v2390_v60 = vadd.f32 %v7776_v41, %v9935_v55  ;;  %v2381_v39 = vpop.f32.mrb[135].mxu1  ;;  %v2479_v13 = vmax.f32 %v2387_v36, 0.0 }
 0x2f5   : > { %v2382_v58 = vadd.f32 %v9935_v55, %v2381_v39  ;;  %v2477_v57 = vmax.f32 %v2379_v9, 0.0 }
 0x2f6   : > { %v2480_v51 = vmax.f32 %v2390_v60, 0.0 }
 0x2f7   : > { %v2478_v12 = vmax.f32 %v2382_v58, 0.0 }
 0x2f8   : > { %v2516_v53 = vpack.c.bf16 %v2480_v51, %v2479_v13 }
 0x2f9   : > { %v2515_v23 = vpack.c.bf16 %v2478_v12, %v2477_v57 }
 0x2fb   : > { %7853 = vmatprep.mubr.bf16.mxu1 %v2515_v23 }
 0x2fc   : > { %7854 = vmatmul.mubr.bf16.gmra.mrb[196].mxu1 %v2516_v53 }
 0x301   : > { %v7779_v29 = vpop.f32.mrb[136].mxu1 }
 0x302   : > { %v2403_v54 = vadd.f32 %v7779_v29, %v9935_v55  ;;  %v2394_v3 = vpop.f32.mrb[137].mxu1 }
 0x303   : > { %v2395_v32 = vadd.f32 %v9935_v55, %v2394_v3  ;;  %v7780_v26 = vpop.f32.mrb[138].mxu1 }
 0x304   : > { %v2406_v5 = vadd.f32 %v7780_v26, %v9935_v55  ;;  %v2397_v41 = vpop.f32.mrb[139].mxu1  ;;  %v2483_v36 = vmax.f32 %v2403_v54, 0.0 }
 0x305   : > { %v2398_v39 = vadd.f32 %v9935_v55, %v2397_v41  ;;  %v2481_v9 = vmax.f32 %v2395_v32, 0.0  ;;  %v740_v32 = vsub.s32 1, %v9387_v49 }
 0x306   : > { %v2484_v60 = vmax.f32 %v2406_v5, 0.0 }
 0x307   : > { %v2482_v58 = vmax.f32 %v2398_v39, 0.0 }
 0x308   : > { %v2518_v13 = vpack.c.bf16 %v2484_v60, %v2483_v36 }
 0x309   : > { %v2517_v51 = vpack.c.bf16 %v2482_v58, %v2481_v9  ;;  %v10057_v58 = vld [vmem:[%s11914_s6] ss:$0 sm:$0xff] }
 0x30b   : > { %7857 = vmatprep.mubr.bf16.mxu1 %v2517_v51 }
 0x30c   : > { %7858 = vmatmul.mubr.bf16.gmra.mrb[200].mxu1 %v2518_v13  ;;  %v8854_v13 = vld [vmem:[%s11910_s2] sm:$0x7] }
 0x30d   : > { %v10062_v51 = vrot.slane %v8854_v13, %v740_v32 }
 0x311   : > { %v7783_v57 = vpop.f32.mrb[140].mxu1 }
 0x312   : > { %v2419_v12 = vadd.f32 %v7783_v57, %v9935_v55  ;;  %v2410_v53 = vpop.f32.mrb[141].mxu1 }
 0x313   : > { %v2411_v23 = vadd.f32 %v9935_v55, %v2410_v53  ;;  %v7784_v29 = vpop.f32.mrb[142].mxu1 }
 0x314   : > { %v2422_v3 = vadd.f32 %v7784_v29, %v9935_v55  ;;  %v2413_v26 = vpop.f32.mrb[143].mxu1  ;;  %v2487_v54 = vmax.f32 %v2419_v12, 0.0  ;;  %v1357_v29 = vadd.f32 %v9368_v40, %v10062_v51  ;;  %v1351_v40 = vadd.f32 %v9362_v38, %v10062_v51 }
 0x315   : > { %v2414_v41 = vadd.f32 %v9935_v55, %v2413_v26  ;;  %v2485_v39 = vmax.f32 %v2411_v23, 0.0 }
 0x316   : > { %v2488_v5 = vmax.f32 %v2422_v3, 0.0 }
 0x317   : > { %v2486_v36 = vmax.f32 %v2414_v41, 0.0 }
 0x318   : > { %v2520_v60 = vpack.c.bf16 %v2488_v5, %v2487_v54  ;;  %v1347_v54 = vadd.f32 %v9354_v34, %v10062_v51 }
 0x319   : > { %v2519_v9 = vpack.c.bf16 %v2486_v36, %v2485_v39  ;;  %v1361_v39 = vadd.f32 %v9376_v44, %v10062_v51 }
 0x31b   : > { %v7803_v55 = vpop.f32.mrb[144].mxu1  ;;  %7861 = vmatprep.mubr.bf16.mxu1 %v2519_v9 }
 0x31c   : > { %v2618_v57 = vadd.f32 %v7803_v55, %v10057_v58  ;;  %v2609_v12 = vpop.f32.mrb[145].mxu1  ;;  %7862 = vmatmul.mubr.bf16.gmra.mrb[204].mxu1 %v2520_v60 }
 0x31d   : > { %v2610_v53 = vadd.f32 %v10057_v58, %v2609_v12  ;;  %v7804_v23 = vpop.f32.mrb[146].mxu1 }
 0x31e   : > { %v2866_v3 = vadd.f32 %v2618_v57, %v9441_v10  ;;  %v2621_v26 = vadd.f32 %v7804_v23, %v10057_v58  ;;  %v2612_v41 = vpop.f32.mrb[147].mxu1 }
 0x31f   : > { %v2864_v5 = vadd.f32 %v2610_v53, %v9420_v63  ;;  %v2613_v32 = vadd.f32 %v10057_v58, %v2612_v41  ;;  %v1367_v41 = vadd.f32 %v9382_v47, %v10062_v51 }
 0x320   : > { %v10076_v36 = vadd.f32 %v2866_v3, %v1357_v29  ;;  %v2867_v60 = vadd.f32 %v2621_v26, %v9432_v6 }
 0x321   : > { %v10081_v10 = vadd.f32 %v2864_v5, %v1347_v54  ;;  %v2865_v9 = vadd.f32 %v2613_v32, %v9416_v62  ;;  %v1377_v62 = vadd.f32 %v9402_v56, %v10062_v51 }
 0x322   : > { %v10084_v13 = vadd.f32 %v2867_v60, %v1361_v39  ;;  %v3032_v23 = vmax.f32 %v10076_v36, 0.0  ;;  %v1381_v39 = vadd.f32 %v9412_v61, %v10062_v51 }
 0x323   : > { %v10086_v34 = vadd.f32 %v2865_v9, %v1351_v40  ;;  %v7807_v63 = vpop.f32.mrb[148].mxu1  ;;  %v3030_v53 = vmax.f32 %v10081_v10, 0.0 }
 0x324   : > { %v3033_v55 = vmax.f32 %v10084_v13, 0.0  ;;  %v2634_v44 = vadd.f32 %v7807_v63, %v10057_v58  ;;  %v2625_v57 = vpop.f32.mrb[149].mxu1 }
 0x325   : > { %v2626_v12 = vadd.f32 %v10057_v58, %v2625_v57  ;;  %v7808_v6 = vpop.f32.mrb[150].mxu1  ;;  %v3031_v38 = vmax.f32 %v10086_v34, 0.0 }
 0x326   : > { %v2870_v29 = vadd.f32 %v2634_v44, %v9465_v24  ;;  %v2637_v3 = vadd.f32 %v7808_v6, %v10057_v58  ;;  %v2628_v26 = vpop.f32.mrb[151].mxu1  ;;  %v3095_v60 = vpack.c.bf16 %v3033_v55, %v3032_v23  ;;  %v1371_v24 = vadd.f32 %v9392_v52, %v10062_v51 }
 0x327   : > { %v2868_v54 = vadd.f32 %v2626_v12, %v9445_v11  ;;  %v2629_v5 = vadd.f32 %v10057_v58, %v2628_v26  ;;  %v3094_v32 = vpack.c.bf16 %v3031_v38, %v3030_v53 }
 0x328   : > { %v10104_v56 = vadd.f32 %v2870_v29, %v1377_v62  ;;  %v2871_v40 = vadd.f32 %v2637_v3, %v9455_v20  ;;  %v1387_v29 = vadd.f32 %v9425_v2, %v10062_v51 }
 0x329   : > { %v10109_v9 = vadd.f32 %v2868_v54, %v1367_v41  ;;  %v2869_v47 = vadd.f32 %v2629_v5, %v9438_v8  ;;  %7881 = vmatprep.mubr.bf16.mxu0 %v3094_v32  ;;  %v1397_v8 = vadd.f32 %v9450_v16, %v10062_v51  ;;  %v1401_v54 = vadd.f32 %v9457_v21, %v10062_v51 }
 0x32a   : > { %v10112_v11 = vadd.f32 %v2871_v40, %v1381_v39  ;;  %7882 = vmatmul.mubr.bf16.vlgmr.msra.gmra.mrb[176].mxu0 %v3095_v60  ;;  %v3036_v23 = vmax.f32 %v10104_v56, 0.0  ;;  %v1391_v32 = vadd.f32 %v9434_v7, %v10062_v51 }
 0x32b   : > { %v10114_v63 = vadd.f32 %v2869_v47, %v1371_v24  ;;  %v7811_v44 = vpop.f32.mrb[152].mxu1  ;;  %v3034_v52 = vmax.f32 %v10109_v9, 0.0 }
 0x32c   : > { %v2650_v61 = vadd.f32 %v7811_v44, %v10057_v58  ;;  %v2641_v55 = vpop.f32.mrb[153].mxu1  ;;  %v3037_v57 = vmax.f32 %v10112_v11, 0.0 }
 0x32d   : > { %v2642_v20 = vadd.f32 %v10057_v58, %v2641_v55  ;;  %v7812_v12 = vpop.f32.mrb[154].mxu1  ;;  %v3035_v6 = vmax.f32 %v10114_v63, 0.0 }
 0x32e   : > { %v2874_v53 = vadd.f32 %v2650_v61, %v9488_v42  ;;  %v2653_v38 = vadd.f32 %v7812_v12, %v10057_v58  ;;  %v2644_v62 = vpop.f32.mrb[155].mxu1  ;;  %v3097_v42 = vpack.c.bf16 %v3037_v57, %v3036_v23  ;;  %v1411_v23 = vadd.f32 %v9480_v35, %v10062_v51 }
 0x32f   : > { %v2872_v3 = vadd.f32 %v2642_v20, %v9468_v25  ;;  %v2645_v26 = vadd.f32 %v10057_v58, %v2644_v62  ;;  %v3096_v41 = vpack.c.bf16 %v3035_v6, %v3034_v52  ;;  %v1407_v52 = vadd.f32 %v9473_v30, %v10062_v51 }
 0x330   : > { %v10132_v5 = vadd.f32 %v2874_v53, %v1397_v8  ;;  %v2875_v16 = vadd.f32 %v2653_v38, %v9478_v33  ;;  %v1421_v38 = vadd.f32 %v9505_v4, %v10062_v51 }
 0x331   : > { %v10137_v39 = vadd.f32 %v2872_v3, %v1387_v29  ;;  %v2873_v2 = vadd.f32 %v2645_v26, %v9462_v22  ;;  %7885 = vmatprep.mubr.bf16.mxu0 %v3096_v41  ;;  %v1417_v22 = vadd.f32 %v9496_v43, %v10062_v51 }
 0x332   : > { %v10140_v25 = vadd.f32 %v2875_v16, %v1401_v54  ;;  %7886 = vmatmul.mubr.bf16.gmra.mrb[180].mxu0 %v3097_v42  ;;  %v3040_v12 = vmax.f32 %v10132_v5, 0.0 }
 0x333   : > { %v10142_v60 = vadd.f32 %v2873_v2, %v1391_v32  ;;  %v7815_v40 = vpop.f32.mrb[156].mxu1  ;;  %v3038_v7 = vmax.f32 %v10137_v39, 0.0 }
 0x334   : > { %v2666_v21 = vadd.f32 %v7815_v40, %v10057_v58  ;;  %v2657_v24 = vpop.f32.mrb[157].mxu1  ;;  %v3041_v33 = vmax.f32 %v10140_v25, 0.0  ;;  %v1437_v40 = vadd.f32 %v9538_v50, %v10062_v51 }
 0x335   : > { %v2658_v47 = vadd.f32 %v10057_v58, %v2657_v24  ;;  %v7816_v44 = vpop.f32.mrb[158].mxu1  ;;  %v3039_v61 = vmax.f32 %v10142_v60, 0.0 }
 0x336   : > { %v2878_v55 = vadd.f32 %v2666_v21, %v9512_v14  ;;  %v2669_v57 = vadd.f32 %v7816_v44, %v10057_v58  ;;  %v2660_v20 = vpop.f32.mrb[159].mxu1  ;;  %v3099_v14 = vpack.c.bf16 %v3041_v33, %v3040_v12 }
 0x337   : > { %v2876_v6 = vadd.f32 %v2658_v47, %v9491_v45  ;;  %v2661_v8 = vadd.f32 %v10057_v58, %v2660_v20  ;;  %v3098_v53 = vpack.c.bf16 %v3039_v61, %v3038_v7  ;;  %v1427_v47 = vadd.f32 %v9519_v19, %v10062_v51 }
 0x338   : > { %v10160_v62 = vadd.f32 %v2878_v55, %v1417_v22  ;;  %v2879_v43 = vadd.f32 %v2669_v57, %v9503_v1  ;;  %v1441_v61 = vadd.f32 %v9546_v0, %v10062_v51 }
 0x339   : > { %v10165_v29 = vadd.f32 %v2876_v6, %v1407_v52  ;;  %v2877_v30 = vadd.f32 %v2661_v8, %v9485_v37  ;;  %7889 = vmatprep.mubr.bf16.mxu0 %v3098_v53 }
 0x33a   : > { %v10168_v45 = vadd.f32 %v2879_v43, %v1421_v38  ;;  %7890 = vmatmul.mubr.bf16.gmra.mrb[184].mxu0 %v3099_v14  ;;  %v3044_v41 = vmax.f32 %v10160_v62, 0.0  ;;  %v1457_v43 = vadd.f32 %v9571_v15, %v10062_v51  ;;  %v12156_v15 = vld [vmem:[#allocation13_spill] sm:$0xff] }
 0x33b   : > { %v10170_v3 = vadd.f32 %v2877_v30, %v1411_v23  ;;  %v3042_v26 = vmax.f32 %v10165_v29, 0.0 }
 0x33c   : > { %v3045_v4 = vmax.f32 %v10168_v45, 0.0 }
 0x33d   : > { %v3043_v1 = vmax.f32 %v10170_v3, 0.0 }
 0x33e   : > { %v3101_v37 = vpack.c.bf16 %v3045_v4, %v3044_v41  ;;  %v12152_v4 = vld [vmem:[#allocation10_spill] sm:$0xff] }
 0x33f   : > { %v7819_v54 = vpop.f32.mrb[160].mxu1  ;;  %v3100_v35 = vpack.c.bf16 %v3043_v1, %v3042_v26  ;;  %v1447_v26 = vadd.f32 %v12152_v4, %v10062_v51  ;;  %v12153_v1 = vld [vmem:[#allocation9_spill] sm:$0xff] }
 0x340   : > { %v2682_v16 = vadd.f32 %v7819_v54, %v10057_v58  ;;  %v2673_v42 = vpop.f32.mrb[161].mxu1  ;;  %v12162_v4 = vld [vmem:[#allocation29_spill] sm:$0xff] }
 0x341   : > { %v2674_v32 = vadd.f32 %v10057_v58, %v2673_v42  ;;  %v7820_v2 = vpop.f32.mrb[162].mxu1  ;;  %7893 = vmatprep.mubr.bf16.mxu0 %v3100_v35  ;;  %v12154_v35 = vld [vmem:[#allocation17_spill] sm:$0xff] }
 0x342   : > { %v2882_v21 = vadd.f32 %v2682_v16, %v9536_v46  ;;  %v2685_v24 = vadd.f32 %v7820_v2, %v10057_v58  ;;  %v2676_v33 = vpop.f32.mrb[163].mxu1  ;;  %7894 = vmatmul.mubr.bf16.gmra.mrb[188].mxu0 %v3101_v37  ;;  %v1431_v46 = vadd.f32 %v9527_v28, %v10062_v51  ;;  %v1461_v16 = vadd.f32 %v12154_v35, %v10062_v51  ;;  %v12155_v37 = vld [vmem:[#allocation16_spill] sm:$0xff]  ;;  %v12164_v35 = vld [vmem:[#allocation23_spill] sm:$0xff] }
 0x343   : > { %v2880_v44 = vadd.f32 %v2674_v32, %v9517_v18  ;;  %v2677_v7 = vadd.f32 %v10057_v58, %v2676_v33 }
 0x344   : > { %v10188_v22 = vadd.f32 %v2882_v21, %v1437_v40  ;;  %v2883_v50 = vadd.f32 %v2685_v24, %v9544_v59  ;;  %v12157_v40 = vld [vmem:[#allocation12_spill] sm:$0xff] }
 0x345   : > { %v10193_v55 = vadd.f32 %v2880_v44, %v1427_v47  ;;  %v2881_v57 = vadd.f32 %v2677_v7, %v9525_v27 }
 0x346   : > { %v10196_v20 = vadd.f32 %v2883_v50, %v1441_v61  ;;  %v3048_v52 = vmax.f32 %v10188_v22, 0.0 }
 0x347   : > { %v10198_v19 = vadd.f32 %v2881_v57, %v1431_v46  ;;  %v3046_v12 = vmax.f32 %v10193_v55, 0.0 }
 0x348   : > { %v3049_v18 = vmax.f32 %v10196_v20, 0.0 }
 0x349   : > { %v3047_v0 = vmax.f32 %v10198_v19, 0.0 }
 0x34a   : > { %v3103_v6 = vpack.c.bf16 %v3049_v18, %v3048_v52 }
 0x34b   : > { %v3102_v59 = vpack.c.bf16 %v3047_v0, %v3046_v12 }
 0x34d   : > { %7897 = vmatprep.mubr.bf16.mxu0 %v3102_v59  ;;  %v12158_v59 = vld [vmem:[#allocation26_spill] sm:$0xff] }
 0x34e   : > { %7898 = vmatmul.mubr.bf16.gmra.mrb[192].mxu0 %v3103_v6  ;;  %v1477_v6 = vadd.f32 %v12158_v59, %v10062_v51 }
 0x34f   : > { %v7823_v28 = vpop.f32.mrb[164].mxu1 }
 0x350   : > { %v2698_v8 = vadd.f32 %v7823_v28, %v10057_v58  ;;  %v2689_v27 = vpop.f32.mrb[165].mxu1  ;;  %v12159_v28 = vld [vmem:[#allocation25_spill] sm:$0xff] }
 0x351   : > { %v2690_v53 = vadd.f32 %v10057_v58, %v2689_v27  ;;  %v7824_v38 = vpop.f32.mrb[166].mxu1 }
 0x352   : > { %v2886_v14 = vadd.f32 %v2698_v8, %v9569_v48  ;;  %v2701_v23 = vadd.f32 %v7824_v38, %v10057_v58  ;;  %v2692_v30 = vpop.f32.mrb[167].mxu1  ;;  %v1451_v48 = vadd.f32 %v12156_v15, %v10062_v51  ;;  %v12160_v38 = vld [vmem:[#allocation20_spill] sm:$0xff] }
 0x353   : > { %v2884_v41 = vadd.f32 %v2690_v53, %v12153_v1  ;;  %v2693_v54 = vadd.f32 %v10057_v58, %v2692_v30 }
 0x354   : > { %v10216_v42 = vadd.f32 %v2886_v14, %v1457_v43  ;;  %v2887_v32 = vadd.f32 %v2701_v23, %v12155_v37  ;;  %v1467_v43 = vadd.f32 %v12160_v38, %v10062_v51  ;;  %v12161_v14 = vld [vmem:[#allocation19_spill] sm:$0xff] }
 0x355   : > { %v10221_v2 = vadd.f32 %v2884_v41, %v1447_v26  ;;  %v2885_v21 = vadd.f32 %v2693_v54, %v12157_v40  ;;  %v1481_v26 = vadd.f32 %v12162_v4, %v10062_v51  ;;  %v12163_v41 = vld [vmem:[#allocation28_spill] sm:$0xff]  ;;  %v8790_v40 = vld [vmem:[%s11913_s5 + $0x40] sm:$0xff]  }
 0x356   : > { %v10224_v24 = vadd.f32 %v2887_v32, %v1461_v16  ;;  %v3052_v61 = vmax.f32 %v10216_v42, 0.0  ;;  %v1471_v16 = vadd.f32 %v12164_v35, %v10062_v51  ;;  %v12165_v32 = vld [vmem:[#allocation22_spill] sm:$0xff]  ;;  %7945 = vmatprep.subr.bf16.mxu1 %v8790_v40  ;;  %v12169_v4 = vld [vmem:[#allocation31_spill] sm:$0xff] }
 0x357   : > { %v10226_v33 = vadd.f32 %v2885_v21, %v1451_v48  ;;  %v3050_v44 = vmax.f32 %v10221_v2, 0.0  ;;  %7946 = vmatpush3.bf16.msra.mxu1 %v8790_v40  ;;  %v12172_v40 = vld [vmem:[#allocation35_spill] sm:$0xff] }
 0x358   : > { %v3053_v47 = vmax.f32 %v10224_v24, 0.0 }
 0x359   : > { %v3051_v7 = vmax.f32 %v10226_v33, 0.0 }
 0x35a   : > { %v3105_v46 = vpack.c.bf16 %v3053_v47, %v3052_v61  ;;  %v8791_v47 = vld [vmem:[%s11913_s5 + $0x48] sm:$0xff]  }
 0x35b   : > { %v3104_v50 = vpack.c.bf16 %v3051_v7, %v3050_v44  ;;  %7947 = vmatprep.subr.bf16.mxu1 %v8791_v47 }
 0x35c   : > { %7948 = vmatpush3.bf16.msra.mxu1 %v8791_v47  ;;  %v1491_v47 = vadd.f32 %v12172_v40, %v10062_v51  ;;  %v12177_v40 = vld [vmem:[#allocation43_spill] sm:$0xff] }
 0x35d   : > { %7901 = vmatprep.mubr.bf16.mxu0 %v3104_v50 }
 0x35e   : > { %7902 = vmatmul.mubr.bf16.gmra.mrb[196].mxu0 %v3105_v46 }
 0x35f   : > { %v7827_v57 = vpop.f32.mrb[168].mxu1 }
 0x360   : > { %v2714_v18 = vadd.f32 %v7827_v57, %v10057_v58  ;;  %v2705_v12 = vpop.f32.mrb[169].mxu1 }
 0x361   : > { %v2706_v0 = vadd.f32 %v10057_v58, %v2705_v12  ;;  %v7828_v52 = vpop.f32.mrb[170].mxu1 }
 0x362   : > { %v2890_v8 = vadd.f32 %v2714_v18, %v12159_v28  ;;  %v2717_v27 = vadd.f32 %v7828_v52, %v10057_v58  ;;  %v2708_v53 = vpop.f32.mrb[171].mxu1  ;;  %v8792_v18 = vld [vmem:[%s11913_s5 + $0x50] sm:$0xff]   ;;  %v12166_v28 = vld [vmem:[#allocation38_spill] sm:$0xff] }
 0x363   : > { %v2888_v23 = vadd.f32 %v2706_v0, %v12161_v14  ;;  %v2709_v30 = vadd.f32 %v10057_v58, %v2708_v53  ;;  %7949 = vmatprep.subr.bf16.mxu1 %v8792_v18  ;;  %v8793_v14 = vld [vmem:[%s11913_s5 + $0x58] sm:$0xff]  }
 0x364   : > { %v10244_v1 = vadd.f32 %v2890_v8, %v1477_v6  ;;  %v2891_v54 = vadd.f32 %v2717_v27, %v12163_v41  ;;  %7950 = vmatpush3.bf16.msra.mxu1 %v8792_v18  ;;  %v1497_v8 = vadd.f32 %v12166_v28, %v10062_v51  ;;  %v12167_v27 = vld [vmem:[#allocation37_spill] sm:$0xff]  ;;  %v8795_v18 = vld [vmem:[%s11913_s5 + $0x68] sm:$0xff]  }
 0x365   : > { %v10249_v37 = vadd.f32 %v2888_v23, %v1467_v43  ;;  %v2889_v15 = vadd.f32 %v2709_v30, %v12165_v32  ;;  %v12168_v23 = vld [vmem:[#allocation32_spill] sm:$0xff]  ;;  %7951 = vmatprep.subr.bf16.mxu1 %v8793_v14 }
 0x366   : > { %v10252_v48 = vadd.f32 %v2891_v54, %v1481_v26  ;;  %v3056_v50 = vmax.f32 %v10244_v1, 0.0  ;;  %v1487_v30 = vadd.f32 %v12168_v23, %v10062_v51  ;;  %v12170_v54 = vld [vmem:[#allocation41_spill] sm:$0xff]  ;;  %v12171_v32 = vld [vmem:[#allocation40_spill] sm:$0xff]  ;;  %v12174_v23 = vld [vmem:[#allocation50_spill] sm:$0xff] }
 0x367   : > { %v10257_v21 = vadd.f32 %v2889_v15, %v1471_v16  ;;  %v3054_v7 = vmax.f32 %v10249_v37, 0.0  ;;  %v1501_v35 = vadd.f32 %v12170_v54, %v10062_v51 }
 0x368   : > { %v3057_v44 = vmax.f32 %v10252_v48, 0.0  ;;  %7952 = vmatpush3.bf16.msra.mxu1 %v8793_v14 }
 0x369   : > { %v3055_v61 = vmax.f32 %v10257_v21, 0.0 }
 0x36a   : > { %v3107_v57 = vpack.c.bf16 %v3057_v44, %v3056_v50 }
 0x36b   : > { %v3106_v46 = vpack.c.bf16 %v3055_v61, %v3054_v7  ;;  %v12173_v7 = vld [vmem:[#allocation34_spill] sm:$0xff] }
 0x36d   : > { %7905 = vmatprep.mubr.bf16.mxu0 %v3106_v46  ;;  %v8794_v46 = vld [vmem:[%s11913_s5 + $0x60] sm:$0xff]  }
 0x36e   : > { %7906 = vmatmul.mubr.bf16.gmra.mrb[200].mxu0 %v3107_v57  ;;  %7953 = vmatprep.subr.bf16.mxu1 %v8794_v46 }
 0x36f   : > { %v7831_v12 = vpop.f32.mrb[172].mxu1  ;;  %7954 = vmatpush3.bf16.msra.mxu1 %v8794_v46 }
 0x370   : > { %v2730_v0 = vadd.f32 %v7831_v12, %v10057_v58  ;;  %v2721_v52 = vpop.f32.mrb[173].mxu1  ;;  %7955 = vmatprep.subr.bf16.mxu1 %v8795_v18 }
 0x371   : > { %v2722_v59 = vadd.f32 %v10057_v58, %v2721_v52  ;;  %v7832_v6 = vpop.f32.mrb[174].mxu1 }
 0x372   : > { %v2894_v53 = vadd.f32 %v2730_v0, %v12167_v27  ;;  %v2733_v38 = vadd.f32 %v7832_v6, %v10057_v58  ;;  %v2724_v43 = vpop.f32.mrb[175].mxu1 }
 0x373   : > { %v2892_v26 = vadd.f32 %v2722_v59, %v12169_v4  ;;  %v2725_v41 = vadd.f32 %v10057_v58, %v2724_v43  ;;  %7956 = vmatpush3.bf16.msra.mxu1 %v8795_v18  ;;  %v12175_v4 = vld [vmem:[#allocation49_spill] sm:$0xff] }
 0x374   : > { %v10284_v16 = vadd.f32 %v2894_v53, %v1497_v8  ;;  %v2895_v15 = vadd.f32 %v2733_v38, %v12171_v32  ;;  %v8796_v8 = vld [vmem:[%s11913_s5 + $0x70] sm:$0xff]   ;;  %v12176_v32 = vld [vmem:[#allocation44_spill] sm:$0xff] }
 0x375   : > { %v10289_v44 = vadd.f32 %v2892_v26, %v1487_v30  ;;  %v2893_v61 = vadd.f32 %v2725_v41, %v12173_v7  ;;  %7957 = vmatprep.subr.bf16.mxu1 %v8796_v8  ;;  %v1517_v30 = vadd.f32 %v12174_v23, %v10062_v51 }
 0x376   : > { %v10292_v50 = vadd.f32 %v2895_v15, %v1501_v35  ;;  %v3060_v59 = vmax.f32 %v10284_v16, 0.0  ;;  %v8797_v35 = vld [vmem:[%s11913_s5 + $0x78] sm:$0xff]   ;;  %v1507_v15 = vadd.f32 %v12176_v32, %v10062_v51 }
 0x377   : > { %v10297_v57 = vadd.f32 %v2893_v61, %v1491_v47  ;;  %v3058_v0 = vmax.f32 %v10289_v44, 0.0  ;;  %7958 = vmatpush3.bf16.msra.mxu1 %v8796_v8  ;;  %v12178_v61 = vld [vmem:[#allocation53_spill] sm:$0xff] }
 0x378   : > { %v3061_v12 = vmax.f32 %v10292_v50, 0.0  ;;  %v1521_v46 = vadd.f32 %v12178_v61, %v10062_v51  ;;  %7959 = vmatprep.subr.bf16.mxu1 %v8797_v35 }
 0x379   : > { %v3059_v52 = vmax.f32 %v10297_v57, 0.0 }
 0x37a   : > { %v3109_v28 = vpack.c.bf16 %v3061_v12, %v3060_v59  ;;  %v12179_v12 = vld [vmem:[#allocation52_spill] sm:$0xff] }
 0x37b   : > { %v3108_v6 = vpack.c.bf16 %v3059_v52, %v3058_v0  ;;  %v12180_v52 = vld [vmem:[#allocation47_spill] sm:$0xff]  ;;  %7960 = vmatpush3.bf16.msra.mxu1 %v8797_v35 }
 0x37c   : > { %v1511_v59 = vadd.f32 %v12180_v52, %v10062_v51  ;;  %v12185_v52 = vld [vmem:[#allocation55_spill] sm:$0xff] }
 0x37d   : > { %7909 = vmatprep.mubr.bf16.mxu0 %v3108_v6 }
 0x37e   : > { %7910 = vmatmul.mubr.bf16.gmra.mrb[204].mxu0 %v3109_v28  ;;  %v12181_v28 = vld [vmem:[#allocation46_spill] sm:$0xff] }
 0x37f   : > { %v7835_v27 = vpop.f32.mrb[176].mxu1 }
 0x380   : > { %v2746_v53 = vadd.f32 %v7835_v27, %v10057_v58  ;;  %v2737_v38 = vpop.f32.mrb[177].mxu1 }
 0x381   : > { %v2738_v43 = vadd.f32 %v10057_v58, %v2737_v38  ;;  %v7836_v14 = vpop.f32.mrb[178].mxu1 }
 0x382   : > { %v2898_v26 = vadd.f32 %v2746_v53, %v12175_v4  ;;  %v2749_v41 = vadd.f32 %v7836_v14, %v10057_v58  ;;  %v2740_v54 = vpop.f32.mrb[179].mxu1 }
 0x383   : > { %v2896_v47 = vadd.f32 %v2738_v43, %v12177_v40  ;;  %v2741_v7 = vadd.f32 %v10057_v58, %v2740_v54 }
 0x384   : > { %v10324_v18 = vadd.f32 %v2898_v26, %v1517_v30  ;;  %v2899_v0 = vadd.f32 %v2749_v41, %v12179_v12  ;;  %v12184_v12 = vld [vmem:[#allocation56_spill] sm:$0xff] }
 0x385   : > { %v10329_v6 = vadd.f32 %v2896_v47, %v1507_v15  ;;  %v2897_v8 = vadd.f32 %v2741_v7, %v12181_v28  ;;  %v12182_v15 = vld [vmem:[#allocation62_spill] sm:$0xff]  ;;  %v12183_v47 = vld [vmem:[#allocation61_spill] sm:$0xff] }
 0x386   : > { %v10332_v27 = vadd.f32 %v2899_v0, %v1521_v46  ;;  %v3064_v23 = vmax.f32 %v10324_v18, 0.0  ;;  %v1537_v40 = vadd.f32 %v12182_v15, %v10062_v51  ;;  %v1527_v0 = vadd.f32 %v12184_v12, %v10062_v51 }
 0x387   : > { %v10334_v53 = vadd.f32 %v2897_v8, %v1511_v59  ;;  %v3062_v43 = vmax.f32 %v10329_v6, 0.0  ;;  %v12186_v8 = vld [vmem:[#allocation65_spill] sm:$0xff] }
 0x388   : > { %v3065_v38 = vmax.f32 %v10332_v27, 0.0 }
 0x389   : > { %v3063_v14 = vmax.f32 %v10334_v53, 0.0 }
 0x38a   : > { %v3111_v4 = vpack.c.bf16 %v3065_v38, %v3064_v23  ;;  %v1541_v38 = vadd.f32 %v12186_v8, %v10062_v51  ;;  %v12190_v8 = vld [vmem:[#allocation74_spill] sm:$0xff] }
 0x38b   : > { %v3110_v30 = vpack.c.bf16 %v3063_v14, %v3062_v43  ;;  %v12187_v14 = vld [vmem:[#allocation64_spill] sm:$0xff] }
 0x38d   : > { %7913 = vmatprep.mubr.bf16.mxu0 %v3110_v30  ;;  %v12188_v30 = vld [vmem:[#allocation59_spill] sm:$0xff] }
 0x38e   : > { %7914 = vmatmul.mubr.bf16.gmra.mrb[208].mxu0 %v3111_v4  ;;  %v1531_v4 = vadd.f32 %v12188_v30, %v10062_v51 }
 0x38f   : > { %v7839_v26 = vpop.f32.mrb[180].mxu1 }
 0x390   : > { %v2762_v41 = vadd.f32 %v7839_v26, %v10057_v58  ;;  %v2753_v54 = vpop.f32.mrb[181].mxu1 }
 0x391   : > { %v2754_v35 = vadd.f32 %v10057_v58, %v2753_v54  ;;  %v7840_v32 = vpop.f32.mrb[182].mxu1 }
 0x392   : > { %v2902_v7 = vadd.f32 %v2762_v41, %v12183_v47  ;;  %v2765_v61 = vadd.f32 %v7840_v32, %v10057_v58  ;;  %v2756_v46 = vpop.f32.mrb[183].mxu1  ;;  %v12189_v41 = vld [vmem:[#allocation58_spill] sm:$0xff] }
 0x393   : > { %v2900_v59 = vadd.f32 %v2754_v35, %v12185_v52  ;;  %v2757_v28 = vadd.f32 %v10057_v58, %v2756_v46 }
 0x394   : > { %v10352_v43 = vadd.f32 %v2902_v7, %v1537_v40  ;;  %v2903_v23 = vadd.f32 %v2765_v61, %v12187_v14  ;;  %v12191_v14 = vld [vmem:[#allocation73_spill] sm:$0xff] }
 0x395   : > { %v10357_v26 = vadd.f32 %v2900_v59, %v1527_v0  ;;  %v2901_v54 = vadd.f32 %v2757_v28, %v12189_v41  ;;  %v12192_v41 = vld [vmem:[#allocation69_spill] sm:$0xff] }
 0x396   : > { %v10360_v32 = vadd.f32 %v2903_v23, %v1541_v38  ;;  %v3068_v7 = vmax.f32 %v10352_v43, 0.0  ;;  %v1557_v38 = vadd.f32 %v12190_v8, %v10062_v51  ;;  %v12197_v8 = vld [vmem:[#allocation72_spill] sm:$0xff] }
 0x397   : > { %v10362_v15 = vadd.f32 %v2901_v54, %v1531_v4  ;;  %v3066_v47 = vmax.f32 %v10357_v26, 0.0  ;;  %v1547_v54 = vadd.f32 %v12192_v41, %v10062_v51 }
 0x398   : > { %v3069_v35 = vmax.f32 %v10360_v32, 0.0 }
 0x399   : > { %v3067_v40 = vmax.f32 %v10362_v15, 0.0 }
 0x39a   : > { %v3113_v46 = vpack.c.bf16 %v3069_v35, %v3068_v7  ;;  %v12193_v35 = vld [vmem:[#allocation68_spill] sm:$0xff]  ;;  %v12194_v7 = vld [vmem:[#allocation77_spill] sm:$0xff] }
 0x39b   : > { %v3112_v61 = vpack.c.bf16 %v3067_v40, %v3066_v47 }
 0x39d   : > { %7917 = vmatprep.mubr.bf16.mxu0 %v3112_v61  ;;  %v1561_v61 = vadd.f32 %v12194_v7, %v10062_v51 }
 0x39e   : > { %7918 = vmatmul.mubr.bf16.gmra.mrb[212].mxu0 %v3113_v46 }
 0x39f   : > { %v7843_v12 = vpop.f32.mrb[184].mxu1 }
 0x3a0   : > { %v2778_v0 = vadd.f32 %v7843_v12, %v10057_v58  ;;  %v2769_v52 = vpop.f32.mrb[185].mxu1  ;;  %v12196_v12 = vld [vmem:[#allocation76_spill] sm:$0xff] }
 0x3a1   : > { %v2770_v59 = vadd.f32 %v10057_v58, %v2769_v52  ;;  %v7844_v28 = vpop.f32.mrb[186].mxu1 }
 0x3a2   : > { %v2906_v23 = vadd.f32 %v2778_v0, %v12191_v14  ;;  %v2781_v30 = vadd.f32 %v7844_v28, %v10057_v58  ;;  %v2772_v4 = vpop.f32.mrb[187].mxu1  ;;  %v1551_v0 = vadd.f32 %v12197_v8, %v10062_v51  ;;  %v12199_v28 = vld [vmem:[#allocation71_spill] sm:$0xff] }
 0x3a3   : > { %v2904_v47 = vadd.f32 %v2770_v59, %v12193_v35  ;;  %v2773_v40 = vadd.f32 %v10057_v58, %v2772_v4 }
 0x3a4   : > { %v10380_v46 = vadd.f32 %v2906_v23, %v1557_v38  ;;  %v2907_v52 = vadd.f32 %v2781_v30, %v12196_v12 }
 0x3a5   : > { %v10385_v14 = vadd.f32 %v2904_v47, %v1547_v54  ;;  %v2905_v31 = vadd.f32 %v2773_v40, %v12199_v28 }
 0x3a6   : > { %12195 = vst [vmem:[#allocation10_spill] sm:$0xff] %v10380_v46  ;;  %v10388_v17 = vadd.f32 %v2907_v52, %v1561_v61  ;;  %v3072_v23 = vmax.f32 %v10380_v46, 0.0  ;;  %v12202_v61 = vld [vmem:[#allocation86_spill] sm:$0xff]  ;;  %v12203_v52 = vld [vmem:[#allocation85_spill] sm:$0xff] }
 0x3a7   : > { %12198 = vst [vmem:[#allocation9_spill] sm:$0xff] %v10385_v14  ;;  %v10390_v41 = vadd.f32 %v2905_v31, %v1551_v0  ;;  %v3070_v4 = vmax.f32 %v10385_v14, 0.0  ;;  %v1577_v12 = vadd.f32 %v12202_v61, %v10062_v51  ;;  %v12209_v61 = vld [vmem:[#allocation84_spill] sm:$0xff] }
 0x3a8   : > { %12200 = vst [vmem:[#allocation17_spill] sm:$0xff] %v10388_v17  ;;  %v3073_v59 = vmax.f32 %v10388_v17, 0.0 }
 0x3a9   : > { %12201 = vst [vmem:[#allocation16_spill] sm:$0xff] %v10390_v41  ;;  %v3071_v38 = vmax.f32 %v10390_v41, 0.0  ;;  %v12208_v41 = vld [vmem:[#allocation88_spill] sm:$0xff] }
 0x3aa   : > { %v3115_v35 = vpack.c.bf16 %v3073_v59, %v3072_v23 }
 0x3ab   : > { %v3114_v30 = vpack.c.bf16 %v3071_v38, %v3070_v4  ;;  %v12204_v4 = vld [vmem:[#allocation81_spill] sm:$0xff]  ;;  %v12205_v38 = vld [vmem:[#allocation80_spill] sm:$0xff] }
 0x3ac   : > { %v1567_v59 = vadd.f32 %v12204_v4, %v10062_v51 }
 0x3ad   : > { %7921 = vmatprep.mubr.bf16.mxu0 %v3114_v30 }
 0x3ae   : > { %7922 = vmatmul.mubr.bf16.gmra.mrb[216].mxu0 %v3115_v35  ;;  %v12206_v35 = vld [vmem:[#allocation89_spill] sm:$0xff] }
 0x3af   : > { %v7847_v54 = vpop.f32.mrb[188].mxu1 }
 0x3b0   : > { %v2794_v47 = vadd.f32 %v7847_v54, %v10057_v58  ;;  %v2785_v40 = vpop.f32.mrb[189].mxu1  ;;  %v1581_v54 = vadd.f32 %v12206_v35, %v10062_v51 }
 0x3b1   : > { %v2786_v7 = vadd.f32 %v10057_v58, %v2785_v40  ;;  %v7848_v31 = vpop.f32.mrb[190].mxu1 }
 0x3b2   : > { %v2910_v8 = vadd.f32 %v2794_v47, %v12203_v52  ;;  %v2797_v0 = vadd.f32 %v7848_v31, %v10057_v58  ;;  %v2788_v28 = vpop.f32.mrb[191].mxu1  ;;  %v1571_v47 = vadd.f32 %v12209_v61, %v10062_v51  ;;  %v12211_v31 = vld [vmem:[#allocation83_spill] sm:$0xff] }
 0x3b3   : > { %v2908_v23 = vadd.f32 %v2786_v7, %v12205_v38  ;;  %v2789_v30 = vadd.f32 %v10057_v58, %v2788_v28 }
 0x3b4   : > { %v10408_v40 = vadd.f32 %v2910_v8, %v1577_v12  ;;  %v2911_v17 = vadd.f32 %v2797_v0, %v12208_v41 }
 0x3b5   : > { %v10413_v52 = vadd.f32 %v2908_v23, %v1567_v59  ;;  %v2909_v14 = vadd.f32 %v2789_v30, %v12211_v31  ;;  %v12214_v30 = vld [vmem:[#allocation98_spill] sm:$0xff] }
 0x3b6   : > { %12207 = vst [vmem:[#allocation13_spill] sm:$0xff] %v10408_v40  ;;  %v10416_v46 = vadd.f32 %v2911_v17, %v1581_v54  ;;  %v3076_v8 = vmax.f32 %v10408_v40, 0.0  ;;  %v1597_v35 = vadd.f32 %v12214_v30, %v10062_v51  ;;  %v12215_v54 = vld [vmem:[#allocation97_spill] sm:$0xff]  ;;  %v12221_v30 = vld [vmem:[#allocation96_spill] sm:$0xff] }
 0x3b7   : > { %12210 = vst [vmem:[#allocation12_spill] sm:$0xff] %v10413_v52  ;;  %v10418_v4 = vadd.f32 %v2909_v14, %v1571_v47  ;;  %v3074_v28 = vmax.f32 %v10413_v52, 0.0 }
 0x3b8   : > { %12212 = vst [vmem:[#allocation26_spill] sm:$0xff] %v10416_v46  ;;  %v3077_v7 = vmax.f32 %v10416_v46, 0.0 }
 0x3b9   : > { %12213 = vst [vmem:[#allocation25_spill] sm:$0xff] %v10418_v4  ;;  %v3075_v12 = vmax.f32 %v10418_v4, 0.0  ;;  %v12220_v4 = vld [vmem:[#allocation100_spill] sm:$0xff] }
 0x3ba   : > { %v3117_v0 = vpack.c.bf16 %v3077_v7, %v3076_v8 }
 0x3bb   : > { %v3116_v41 = vpack.c.bf16 %v3075_v12, %v3074_v28  ;;  %v12216_v28 = vld [vmem:[#allocation93_spill] sm:$0xff]  ;;  %v12217_v12 = vld [vmem:[#allocation92_spill] sm:$0xff] }
 0x3bc   : > { %v1587_v7 = vadd.f32 %v12216_v28, %v10062_v51 }
 0x3bd   : > { %7925 = vmatprep.mubr.bf16.mxu0 %v3116_v41 }
 0x3be   : > { %7926 = vmatmul.mubr.bf16.gmra.mrb[220].mxu0 %v3117_v0  ;;  %v12218_v0 = vld [vmem:[#allocation101_spill] sm:$0xff] }
 0x3bf   : > { %v7851_v59 = vpop.f32.mrb[192].mxu1 }
 0x3c0   : > { %v2810_v38 = vadd.f32 %v7851_v59, %v10057_v58  ;;  %v2801_v23 = vpop.f32.mrb[193].mxu1  ;;  %v1601_v59 = vadd.f32 %v12218_v0, %v10062_v51 }
 0x3c1   : > { %v2802_v17 = vadd.f32 %v10057_v58, %v2801_v23  ;;  %v7852_v14 = vpop.f32.mrb[194].mxu1 }
 0x3c2   : > { %v2914_v61 = vadd.f32 %v2810_v38, %v12215_v54  ;;  %v2813_v47 = vadd.f32 %v7852_v14, %v10057_v58  ;;  %v2804_v31 = vpop.f32.mrb[195].mxu1  ;;  %v1591_v38 = vadd.f32 %v12221_v30, %v10062_v51  ;;  %v12223_v14 = vld [vmem:[#allocation95_spill] sm:$0xff] }
 0x3c3   : > { %v2912_v8 = vadd.f32 %v2802_v17, %v12217_v12  ;;  %v2805_v41 = vadd.f32 %v10057_v58, %v2804_v31 }
 0x3c4   : > { %v10436_v23 = vadd.f32 %v2914_v61, %v1597_v35  ;;  %v2915_v46 = vadd.f32 %v2813_v47, %v12220_v4 }
 0x3c5   : > { %v10441_v54 = vadd.f32 %v2912_v8, %v1587_v7  ;;  %v2913_v52 = vadd.f32 %v2805_v41, %v12223_v14  ;;  %v12226_v41 = vld [vmem:[#allocation110_spill] sm:$0xff] }
 0x3c6   : > { %12219 = vst [vmem:[#allocation20_spill] sm:$0xff] %v10436_v23  ;;  %v10444_v40 = vadd.f32 %v2915_v46, %v1601_v59  ;;  %v3080_v61 = vmax.f32 %v10436_v23, 0.0  ;;  %v1617_v0 = vadd.f32 %v12226_v41, %v10062_v51  ;;  %v12227_v59 = vld [vmem:[#allocation109_spill] sm:$0xff]  ;;  %v12233_v41 = vld [vmem:[#allocation108_spill] sm:$0xff] }
 0x3c7   : > { %12222 = vst [vmem:[#allocation19_spill] sm:$0xff] %v10441_v54  ;;  %v10446_v28 = vadd.f32 %v2913_v52, %v1591_v38  ;;  %v3078_v31 = vmax.f32 %v10441_v54, 0.0 }
 0x3c8   : > { %12224 = vst [vmem:[#allocation29_spill] sm:$0xff] %v10444_v40  ;;  %v3081_v17 = vmax.f32 %v10444_v40, 0.0 }
 0x3c9   : > { %12225 = vst [vmem:[#allocation28_spill] sm:$0xff] %v10446_v28  ;;  %v3079_v35 = vmax.f32 %v10446_v28, 0.0  ;;  %v12232_v28 = vld [vmem:[#allocation112_spill] sm:$0xff] }
 0x3ca   : > { %v3119_v47 = vpack.c.bf16 %v3081_v17, %v3080_v61 }
 0x3cb   : > { %v3118_v4 = vpack.c.bf16 %v3079_v35, %v3078_v31  ;;  %v12228_v31 = vld [vmem:[#allocation105_spill] sm:$0xff]  ;;  %v12229_v35 = vld [vmem:[#allocation104_spill] sm:$0xff] }
 0x3cc   : > { %v1607_v17 = vadd.f32 %v12228_v31, %v10062_v51 }
 0x3cd   : > { %7929 = vmatprep.mubr.bf16.mxu0 %v3118_v4 }
 0x3ce   : > { %7930 = vmatmul.mubr.bf16.gmra.mrb[224].mxu0 %v3119_v47  ;;  %v12230_v47 = vld [vmem:[#allocation113_spill] sm:$0xff] }
 0x3cf   : > { %v7855_v7 = vpop.f32.mrb[196].mxu1 }
 0x3d0   : > { %v2826_v12 = vadd.f32 %v7855_v7, %v10057_v58  ;;  %v2817_v8 = vpop.f32.mrb[197].mxu1  ;;  %v1621_v7 = vadd.f32 %v12230_v47, %v10062_v51 }
 0x3d1   : > { %v2818_v46 = vadd.f32 %v10057_v58, %v2817_v8  ;;  %v7856_v52 = vpop.f32.mrb[198].mxu1 }
 0x3d2   : > { %v2918_v30 = vadd.f32 %v2826_v12, %v12227_v59  ;;  %v2829_v38 = vadd.f32 %v7856_v52, %v10057_v58  ;;  %v2820_v14 = vpop.f32.mrb[199].mxu1  ;;  %v1611_v12 = vadd.f32 %v12233_v41, %v10062_v51  ;;  %v12235_v52 = vld [vmem:[#allocation107_spill] sm:$0xff] }
 0x3d3   : > { %v2916_v61 = vadd.f32 %v2818_v46, %v12229_v35  ;;  %v2821_v4 = vadd.f32 %v10057_v58, %v2820_v14 }
 0x3d4   : > { %v10464_v8 = vadd.f32 %v2918_v30, %v1617_v0  ;;  %v2919_v40 = vadd.f32 %v2829_v38, %v12232_v28 }
 0x3d5   : > { %v10469_v59 = vadd.f32 %v2916_v61, %v1607_v17  ;;  %v2917_v54 = vadd.f32 %v2821_v4, %v12235_v52  ;;  %v12238_v4 = vld [vmem:[#allocation122_spill] sm:$0xff] }
 0x3d6   : > { %12231 = vst [vmem:[#allocation23_spill] sm:$0xff] %v10464_v8  ;;  %v10472_v23 = vadd.f32 %v2919_v40, %v1621_v7  ;;  %v3084_v30 = vmax.f32 %v10464_v8, 0.0  ;;  %v1637_v47 = vadd.f32 %v12238_v4, %v10062_v51  ;;  %v12239_v7 = vld [vmem:[#allocation121_spill] sm:$0xff]  ;;  %v12245_v4 = vld [vmem:[#allocation120_spill] sm:$0xff] }
 0x3d7   : > { %12234 = vst [vmem:[#allocation22_spill] sm:$0xff] %v10469_v59  ;;  %v10474_v31 = vadd.f32 %v2917_v54, %v1611_v12  ;;  %v3082_v14 = vmax.f32 %v10469_v59, 0.0 }
 0x3d8   : > { %12236 = vst [vmem:[#allocation38_spill] sm:$0xff] %v10472_v23  ;;  %v3085_v46 = vmax.f32 %v10472_v23, 0.0 }
 0x3d9   : > { %12237 = vst [vmem:[#allocation37_spill] sm:$0xff] %v10474_v31  ;;  %v3083_v0 = vmax.f32 %v10474_v31, 0.0  ;;  %v12244_v31 = vld [vmem:[#allocation124_spill] sm:$0xff] }
 0x3da   : > { %v3121_v38 = vpack.c.bf16 %v3085_v46, %v3084_v30 }
 0x3db   : > { %v3120_v28 = vpack.c.bf16 %v3083_v0, %v3082_v14  ;;  %v12240_v14 = vld [vmem:[#allocation117_spill] sm:$0xff]  ;;  %v12241_v0 = vld [vmem:[#allocation116_spill] sm:$0xff] }
 0x3dc   : > { %v1627_v46 = vadd.f32 %v12240_v14, %v10062_v51 }
 0x3dd   : > { %7933 = vmatprep.mubr.bf16.mxu0 %v3120_v28 }
 0x3de   : > { %7934 = vmatmul.mubr.bf16.gmra.mrb[228].mxu0 %v3121_v38  ;;  %v12242_v38 = vld [vmem:[#allocation125_spill] sm:$0xff] }
 0x3df   : > { %v7859_v17 = vpop.f32.mrb[200].mxu1 }
 0x3e0   : > { %v2842_v35 = vadd.f32 %v7859_v17, %v10057_v58  ;;  %v2833_v61 = vpop.f32.mrb[201].mxu1  ;;  %v1641_v17 = vadd.f32 %v12242_v38, %v10062_v51 }
 0x3e1   : > { %v2834_v40 = vadd.f32 %v10057_v58, %v2833_v61  ;;  %v7860_v54 = vpop.f32.mrb[202].mxu1 }
 0x3e2   : > { %v2922_v41 = vadd.f32 %v2842_v35, %v12239_v7  ;;  %v2845_v12 = vadd.f32 %v7860_v54, %v10057_v58  ;;  %v2836_v52 = vpop.f32.mrb[203].mxu1  ;;  %v1631_v35 = vadd.f32 %v12245_v4, %v10062_v51  ;;  %v12247_v54 = vld [vmem:[#allocation119_spill] sm:$0xff] }
 0x3e3   : > { %v2920_v30 = vadd.f32 %v2834_v40, %v12241_v0  ;;  %v2837_v28 = vadd.f32 %v10057_v58, %v2836_v52 }
 0x3e4   : > { %v10492_v61 = vadd.f32 %v2922_v41, %v1637_v47  ;;  %v2923_v23 = vadd.f32 %v2845_v12, %v12244_v31 }
 0x3e5   : > { %v10497_v7 = vadd.f32 %v2920_v30, %v1627_v46  ;;  %v2921_v59 = vadd.f32 %v2837_v28, %v12247_v54  ;;  %v12250_v28 = vld [vmem:[#allocation134_spill] sm:$0xff] }
 0x3e6   : > { %12243 = vst [vmem:[#allocation32_spill] sm:$0xff] %v10492_v61  ;;  %v10500_v8 = vadd.f32 %v2923_v23, %v1641_v17  ;;  %v3088_v41 = vmax.f32 %v10492_v61, 0.0  ;;  %v1657_v38 = vadd.f32 %v12250_v28, %v10062_v51  ;;  %v12251_v17 = vld [vmem:[#allocation133_spill] sm:$0xff]  ;;  %v12256_v28 = vld [vmem:[#allocation132_spill] sm:$0xff] }
 0x3e7   : > { %12246 = vst [vmem:[#allocation31_spill] sm:$0xff] %v10497_v7  ;;  %v10502_v14 = vadd.f32 %v2921_v59, %v1631_v35  ;;  %v3086_v52 = vmax.f32 %v10497_v7, 0.0 }
 0x3e8   : > { %12248 = vst [vmem:[#allocation41_spill] sm:$0xff] %v10500_v8  ;;  %v3089_v40 = vmax.f32 %v10500_v8, 0.0 }
 0x3e9   : > { %12249 = vst [vmem:[#allocation40_spill] sm:$0xff] %v10502_v14  ;;  %v3087_v47 = vmax.f32 %v10502_v14, 0.0  ;;  %v12255_v14 = vld [vmem:[#allocation136_spill] sm:$0xff] }
 0x3ea   : > { %v3123_v12 = vpack.c.bf16 %v3089_v40, %v3088_v41 }
 0x3eb   : > { %v3122_v31 = vpack.c.bf16 %v3087_v47, %v3086_v52  ;;  %v12252_v52 = vld [vmem:[#allocation129_spill] sm:$0xff]  ;;  %v12253_v47 = vld [vmem:[#allocation128_spill] sm:$0xff] }
 0x3ec   : > { %v1647_v40 = vadd.f32 %v12252_v52, %v10062_v51 }
 0x3ed   : > { %7937 = vmatprep.mubr.bf16.mxu0 %v3122_v31 }
 0x3ee   : > { %7938 = vmatmul.mubr.bf16.gmra.mrb[232].mxu0 %v3123_v12  ;;  %v12254_v12 = vld [vmem:[#allocation137_spill] sm:$0xff] }
 0x3ef   : > { %v7863_v46 = vpop.f32.mrb[204].mxu1 }
 0x3f0   : > { %v2858_v0 = vadd.f32 %v7863_v46, %v10057_v58  ;;  %v2849_v30 = vpop.f32.mrb[205].mxu1  ;;  %v1661_v46 = vadd.f32 %v12254_v12, %v10062_v51 }
 0x3f1   : > { %v2850_v23 = vadd.f32 %v10057_v58, %v2849_v30  ;;  %v7864_v59 = vpop.f32.mrb[206].mxu1 }
 0x3f2   : > { %v2926_v4 = vadd.f32 %v2858_v0, %v12251_v17  ;;  %v2861_v35 = vadd.f32 %v7864_v59, %v10057_v58  ;;  %v2852_v54 = vpop.f32.mrb[207].mxu1  ;;  %v1651_v0 = vadd.f32 %v12256_v28, %v10062_v51  ;;  %v12257_v59 = vld [vmem:[#allocation131_spill] sm:$0xff] }
 0x3f3   : > { %v2924_v41 = vadd.f32 %v2850_v23, %v12253_v47  ;;  %v2853_v31 = vadd.f32 %v10057_v58, %v2852_v54  ;;  %v10539_v51 = vld [vmem:[%s11912_s4 + $0x1] ss:$0 sm:$0xff] }
 0x3f4   : > { %v10520_v30 = vadd.f32 %v2926_v4, %v1657_v38  ;;  %v2927_v8 = vadd.f32 %v2861_v35, %v12255_v14 }
 0x3f5   : > { %v10525_v17 = vadd.f32 %v2924_v41, %v1647_v40  ;;  %v2925_v7 = vadd.f32 %v2853_v31, %v12257_v59 }
 0x3f6   : > { %v10528_v61 = vadd.f32 %v2927_v8, %v1661_v46  ;;  %v3092_v4 = vmax.f32 %v10520_v30, 0.0 }
 0x3f7   : > { %v10530_v52 = vadd.f32 %v2925_v7, %v1651_v0  ;;  %v3090_v23 = vmax.f32 %v10525_v17, 0.0 }
 0x3f8   : > { %v3093_v58 = vmax.f32 %v10528_v61, 0.0 }
 0x3f9   : > { %12258 = vst [vmem:[#allocation35_spill] sm:$0xff] %v10530_v52  ;;  %v3091_v38 = vmax.f32 %v10530_v52, 0.0 }
 0x3fa   : > { %v3125_v35 = vpack.c.bf16 %v3093_v58, %v3092_v4 }
 0x3fb   : > { %v3124_v14 = vpack.c.bf16 %v3091_v38, %v3090_v23 }
 0x3fd   : > { %v7883_v54 = vpop.f32.mrb[176].mxu0  ;;  %7941 = vmatprep.mubr.bf16.mxu0 %v3124_v14 }
 0x3fe   : > { %v3223_v8 = vadd.f32 %v7883_v54, %v10539_v51  ;;  %v3214_v7 = vpop.f32.mrb[177].mxu0  ;;  %7942 = vmatmul.mubr.bf16.gmra.mrb[236].mxu0 %v3125_v35 }
 0x3ff   : > { %v3215_v40 = vadd.f32 %v10539_v51, %v3214_v7  ;;  %v7884_v47 = vpop.f32.mrb[178].mxu0 }
 0x400   : > { %v3226_v41 = vadd.f32 %v7884_v47, %v10539_v51  ;;  %v3217_v31 = vpop.f32.mrb[179].mxu0  ;;  %v3471_v46 = vmax.f32 %v3223_v8, 0.0 }
 0x401   : > { %v3218_v12 = vadd.f32 %v10539_v51, %v3217_v31  ;;  %v3469_v0 = vmax.f32 %v3215_v40, 0.0 }
 0x402   : > { %v3472_v28 = vmax.f32 %v3226_v41, 0.0 }
 0x403   : > { %v3470_v59 = vmax.f32 %v3218_v12, 0.0 }
 0x404   : > { %v3534_v23 = vpack.c.bf16 %v3472_v28, %v3471_v46 }
 0x405   : > { %v3533_v58 = vpack.c.bf16 %v3470_v59, %v3469_v0  ;;  %v7887_v38 = vpop.f32.mrb[180].mxu0 }
 0x406   : > { %v3239_v4 = vadd.f32 %v7887_v38, %v10539_v51  ;;  %v3230_v14 = vpop.f32.mrb[181].mxu0 }
 0x407   : > { %v3231_v35 = vadd.f32 %v10539_v51, %v3230_v14  ;;  %v7888_v54 = vpop.f32.mrb[182].mxu0  ;;  %7961 = vmatprep.mubr.bf16.mxu1 %v3533_v58 }
 0x408   : > { %v3242_v7 = vadd.f32 %v7888_v54, %v10539_v51  ;;  %v3233_v47 = vpop.f32.mrb[183].mxu0  ;;  %7962 = vmatmul.mubr.bf16.vlgmr.msra.gmra.mrb[208].mxu1 %v3534_v23  ;;  %v3475_v8 = vmax.f32 %v3239_v4, 0.0 }
 0x409   : > { %v3234_v31 = vadd.f32 %v10539_v51, %v3233_v47  ;;  %v3473_v40 = vmax.f32 %v3231_v35, 0.0 }
 0x40a   : > { %v3476_v41 = vmax.f32 %v3242_v7, 0.0 }
 0x40b   : > { %v3474_v12 = vmax.f32 %v3234_v31, 0.0 }
 0x40c   : > { %v3536_v46 = vpack.c.bf16 %v3476_v41, %v3475_v8 }
 0x40d   : > { %v3535_v28 = vpack.c.bf16 %v3474_v12, %v3473_v40  ;;  %v7891_v0 = vpop.f32.mrb[184].mxu0 }
 0x40e   : > { %v3255_v59 = vadd.f32 %v7891_v0, %v10539_v51  ;;  %v3246_v38 = vpop.f32.mrb[185].mxu0 }
 0x40f   : > { %v3247_v14 = vadd.f32 %v10539_v51, %v3246_v38  ;;  %v7892_v52 = vpop.f32.mrb[186].mxu0  ;;  %7965 = vmatprep.mubr.bf16.mxu1 %v3535_v28 }
 0x410   : > { %v3258_v58 = vadd.f32 %v7892_v52, %v10539_v51  ;;  %v3249_v54 = vpop.f32.mrb[187].mxu0  ;;  %7966 = vmatmul.mubr.bf16.gmra.mrb[212].mxu1 %v3536_v46  ;;  %v3479_v4 = vmax.f32 %v3255_v59, 0.0 }
 0x411   : > { %v3250_v23 = vadd.f32 %v10539_v51, %v3249_v54  ;;  %v3477_v35 = vmax.f32 %v3247_v14, 0.0 }
 0x412   : > { %v3480_v7 = vmax.f32 %v3258_v58, 0.0 }
 0x413   : > { %v3478_v47 = vmax.f32 %v3250_v23, 0.0 }
 0x414   : > { %v3538_v31 = vpack.c.bf16 %v3480_v7, %v3479_v4 }
 0x415   : > { %v3537_v8 = vpack.c.bf16 %v3478_v47, %v3477_v35  ;;  %v7895_v41 = vpop.f32.mrb[188].mxu0 }
 0x416   : > { %v3271_v40 = vadd.f32 %v7895_v41, %v10539_v51  ;;  %v3262_v12 = vpop.f32.mrb[189].mxu0 }
 0x417   : > { %v3263_v0 = vadd.f32 %v10539_v51, %v3262_v12  ;;  %v7896_v38 = vpop.f32.mrb[190].mxu0  ;;  %7969 = vmatprep.mubr.bf16.mxu1 %v3537_v8 }
 0x418   : > { %v3274_v52 = vadd.f32 %v7896_v38, %v10539_v51  ;;  %v3265_v28 = vpop.f32.mrb[191].mxu0  ;;  %7970 = vmatmul.mubr.bf16.gmra.mrb[216].mxu1 %v3538_v31  ;;  %v3483_v59 = vmax.f32 %v3271_v40, 0.0 }
 0x419   : > { %v3266_v46 = vadd.f32 %v10539_v51, %v3265_v28  ;;  %v3481_v14 = vmax.f32 %v3263_v0, 0.0 }
 0x41a   : > { %v3484_v58 = vmax.f32 %v3274_v52, 0.0 }
 0x41b   : > { %v3482_v54 = vmax.f32 %v3266_v46, 0.0 }
 0x41c   : > { %v3540_v23 = vpack.c.bf16 %v3484_v58, %v3483_v59 }
 0x41d   : > { %v3539_v4 = vpack.c.bf16 %v3482_v54, %v3481_v14 }
 0x41f   : > { %7973 = vmatprep.mubr.bf16.mxu1 %v3539_v4 }
 0x420   : > { %7974 = vmatmul.mubr.bf16.gmra.mrb[220].mxu1 %v3540_v23 }
 0x421   : > { %v7899_v7 = vpop.f32.mrb[192].mxu0 }
 0x422   : > { %v3287_v35 = vadd.f32 %v7899_v7, %v10539_v51  ;;  %v3278_v47 = vpop.f32.mrb[193].mxu0 }
 0x423   : > { %v3279_v8 = vadd.f32 %v10539_v51, %v3278_v47  ;;  %v7900_v41 = vpop.f32.mrb[194].mxu0 }
 0x424   : > { %v3290_v12 = vadd.f32 %v7900_v41, %v10539_v51  ;;  %v3281_v31 = vpop.f32.mrb[195].mxu0  ;;  %v3487_v40 = vmax.f32 %v3287_v35, 0.0 }
 0x425   : > { %v3282_v38 = vadd.f32 %v10539_v51, %v3281_v31  ;;  %v3485_v0 = vmax.f32 %v3279_v8, 0.0 }
 0x426   : > { %v3488_v52 = vmax.f32 %v3290_v12, 0.0 }
 0x427   : > { %v3486_v28 = vmax.f32 %v3282_v38, 0.0 }
 0x428   : > { %v3542_v46 = vpack.c.bf16 %v3488_v52, %v3487_v40 }
 0x429   : > { %v3541_v59 = vpack.c.bf16 %v3486_v28, %v3485_v0 }
 0x42b   : > { %7977 = vmatprep.mubr.bf16.mxu1 %v3541_v59 }
 0x42c   : > { %7978 = vmatmul.mubr.bf16.gmra.mrb[224].mxu1 %v3542_v46 }
 0x431   : > { %v7903_v58 = vpop.f32.mrb[196].mxu0 }
 0x432   : > { %v3303_v14 = vadd.f32 %v7903_v58, %v10539_v51  ;;  %v3294_v54 = vpop.f32.mrb[197].mxu0 }
 0x433   : > { %v3295_v23 = vadd.f32 %v10539_v51, %v3294_v54  ;;  %v7904_v4 = vpop.f32.mrb[198].mxu0 }
 0x434   : > { %v3306_v7 = vadd.f32 %v7904_v4, %v10539_v51  ;;  %v3297_v47 = vpop.f32.mrb[199].mxu0  ;;  %v3491_v35 = vmax.f32 %v3303_v14, 0.0 }
 0x435   : > { %v3298_v41 = vadd.f32 %v10539_v51, %v3297_v47  ;;  %v3489_v8 = vmax.f32 %v3295_v23, 0.0 }
 0x436   : > { %v3492_v12 = vmax.f32 %v3306_v7, 0.0 }
 0x437   : > { %v3490_v31 = vmax.f32 %v3298_v41, 0.0 }
 0x438   : > { %v3544_v38 = vpack.c.bf16 %v3492_v12, %v3491_v35  ;;  %v8798_v35 = vld [vmem:[%s11911_s3 + $0x80] sm:$0xff]  }
 0x439   : > { %v3543_v40 = vpack.c.bf16 %v3490_v31, %v3489_v8  ;;  %8025 = vmatprep.subr.bf16.mxu0 %v8798_v35  ;;  %v8799_v8 = vld [vmem:[%s11911_s3 + $0x88] sm:$0xff]   ;;  %v8800_v31 = vld [vmem:[%s11911_s3 + $0x90] sm:$0xff]  }
 0x43a   : > { %8026 = vmatpush3.bf16.msra.mxu0 %v8798_v35 }
 0x43b   : > { %7981 = vmatprep.mubr.bf16.mxu1 %v3543_v40  ;;  %8027 = vmatprep.subr.bf16.mxu0 %v8799_v8 }
 0x43c   : > { %7982 = vmatmul.mubr.bf16.gmra.mrb[228].mxu1 %v3544_v38 }
 0x43e   : > { %8028 = vmatpush3.bf16.msra.mxu0 %v8799_v8  ;;  %v8804_v8 = vld [vmem:[%s11911_s3 + $0xb0] sm:$0xff]  }
 0x43f   : > { %8029 = vmatprep.subr.bf16.mxu0 %v8800_v31 }
 0x441   : > { %v7907_v52 = vpop.f32.mrb[200].mxu0 }
 0x442   : > { %v3319_v0 = vadd.f32 %v7907_v52, %v10539_v51  ;;  %v3310_v28 = vpop.f32.mrb[201].mxu0  ;;  %8030 = vmatpush3.bf16.msra.mxu0 %v8800_v31 }
 0x443   : > { %v3311_v46 = vadd.f32 %v10539_v51, %v3310_v28  ;;  %v7908_v59 = vpop.f32.mrb[202].mxu0 }
 0x444   : > { %v3322_v58 = vadd.f32 %v7908_v59, %v10539_v51  ;;  %v3313_v54 = vpop.f32.mrb[203].mxu0  ;;  %v3495_v14 = vmax.f32 %v3319_v0, 0.0 }
 0x445   : > { %v3314_v4 = vadd.f32 %v10539_v51, %v3313_v54  ;;  %v3493_v23 = vmax.f32 %v3311_v46, 0.0 }
 0x446   : > { %v3496_v7 = vmax.f32 %v3322_v58, 0.0  ;;  %v8801_v58 = vld [vmem:[%s11911_s3 + $0x98] sm:$0xff]  }
 0x447   : > { %v3494_v47 = vmax.f32 %v3314_v4, 0.0  ;;  %8031 = vmatprep.subr.bf16.mxu0 %v8801_v58 }
 0x448   : > { %v3546_v41 = vpack.c.bf16 %v3496_v7, %v3495_v14  ;;  %8032 = vmatpush3.bf16.msra.mxu0 %v8801_v58 }
 0x449   : > { %v3545_v12 = vpack.c.bf16 %v3494_v47, %v3493_v23 }
 0x44b   : > { %7985 = vmatprep.mubr.bf16.mxu1 %v3545_v12  ;;  %v8803_v12 = vld [vmem:[%s11911_s3 + $0xa8] sm:$0xff]  }
 0x44c   : > { %7986 = vmatmul.mubr.bf16.gmra.mrb[232].mxu1 %v3546_v41  ;;  %v8802_v41 = vld [vmem:[%s11911_s3 + $0xa0] sm:$0xff]  }
 0x44d   : > { %8033 = vmatprep.subr.bf16.mxu0 %v8802_v41 }
 0x44e   : > { %8034 = vmatpush3.bf16.msra.mxu0 %v8802_v41 }
 0x44f   : > { %8035 = vmatprep.subr.bf16.mxu0 %v8803_v12 }
 0x451   : > { %v7911_v38 = vpop.f32.mrb[204].mxu0 }
 0x452   : > { %v3335_v40 = vadd.f32 %v7911_v38, %v10539_v51  ;;  %v3326_v52 = vpop.f32.mrb[205].mxu0  ;;  %8036 = vmatpush3.bf16.msra.mxu0 %v8803_v12 }
 0x453   : > { %v3327_v0 = vadd.f32 %v10539_v51, %v3326_v52  ;;  %v7912_v28 = vpop.f32.mrb[206].mxu0  ;;  %8037 = vmatprep.subr.bf16.mxu0 %v8804_v8 }
 0x454   : > { %v3338_v46 = vadd.f32 %v7912_v28, %v10539_v51  ;;  %v3329_v59 = vpop.f32.mrb[207].mxu0  ;;  %v3499_v4 = vmax.f32 %v3335_v40, 0.0 }
 0x455   : > { %v3330_v54 = vadd.f32 %v10539_v51, %v3329_v59  ;;  %v3497_v7 = vmax.f32 %v3327_v0, 0.0  ;;  %v8805_v59 = vld [vmem:[%s11911_s3 + $0xb8] sm:$0xff]  }
 0x456   : > { %v3500_v14 = vmax.f32 %v3338_v46, 0.0  ;;  %8038 = vmatpush3.bf16.msra.mxu0 %v8804_v8 }
 0x457   : > { %v3498_v23 = vmax.f32 %v3330_v54, 0.0  ;;  %8039 = vmatprep.subr.bf16.mxu0 %v8805_v59 }
 0x458   : > { %v3548_v47 = vpack.c.bf16 %v3500_v14, %v3499_v4 }
 0x459   : > { %v3547_v35 = vpack.c.bf16 %v3498_v23, %v3497_v7 }
 0x45a   : > { %8040 = vmatpush3.bf16.msra.mxu0 %v8805_v59 }
 0x45b   : > { %7989 = vmatprep.mubr.bf16.mxu1 %v3547_v35 }
 0x45c   : > { %7990 = vmatmul.mubr.bf16.gmra.mrb[236].mxu1 %v3548_v47 }
 0x461   : > { %v7915_v31 = vpop.f32.mrb[208].mxu0 }
 0x462   : > { %v3351_v38 = vadd.f32 %v7915_v31, %v10539_v51  ;;  %v3342_v40 = vpop.f32.mrb[209].mxu0 }
 0x463   : > { %v3343_v52 = vadd.f32 %v10539_v51, %v3342_v40  ;;  %v7916_v0 = vpop.f32.mrb[210].mxu0 }
 0x464   : > { %v3354_v28 = vadd.f32 %v7916_v0, %v10539_v51  ;;  %v3345_v46 = vpop.f32.mrb[211].mxu0  ;;  %v3503_v54 = vmax.f32 %v3351_v38, 0.0 }
 0x465   : > { %v3346_v58 = vadd.f32 %v10539_v51, %v3345_v46  ;;  %v3501_v14 = vmax.f32 %v3343_v52, 0.0 }
 0x466   : > { %v3504_v4 = vmax.f32 %v3354_v28, 0.0 }
 0x467   : > { %v3502_v7 = vmax.f32 %v3346_v58, 0.0 }
 0x468   : > { %v3550_v23 = vpack.c.bf16 %v3504_v4, %v3503_v54 }
 0x469   : > { %v3549_v47 = vpack.c.bf16 %v3502_v7, %v3501_v14 }
 0x46b   : > { %7993 = vmatprep.mubr.bf16.mxu1 %v3549_v47 }
 0x46c   : > { %7994 = vmatmul.mubr.bf16.gmra.mrb[240].mxu1 %v3550_v23 }
 0x471   : > { %v7919_v41 = vpop.f32.mrb[212].mxu0 }
 0x472   : > { %v3367_v35 = vadd.f32 %v7919_v41, %v10539_v51  ;;  %v3358_v12 = vpop.f32.mrb[213].mxu0 }
 0x473   : > { %v3359_v8 = vadd.f32 %v10539_v51, %v3358_v12  ;;  %v7920_v31 = vpop.f32.mrb[214].mxu0 }
 0x474   : > { %v3370_v40 = vadd.f32 %v7920_v31, %v10539_v51  ;;  %v3361_v0 = vpop.f32.mrb[215].mxu0  ;;  %v3507_v28 = vmax.f32 %v3367_v35, 0.0 }
 0x475   : > { %v3362_v38 = vadd.f32 %v10539_v51, %v3361_v0  ;;  %v3505_v46 = vmax.f32 %v3359_v8, 0.0 }
 0x476   : > { %v3508_v52 = vmax.f32 %v3370_v40, 0.0 }
 0x477   : > { %v3506_v59 = vmax.f32 %v3362_v38, 0.0 }
 0x478   : > { %v3552_v58 = vpack.c.bf16 %v3508_v52, %v3507_v28 }
 0x479   : > { %v3551_v54 = vpack.c.bf16 %v3506_v59, %v3505_v46 }
 0x47b   : > { %7997 = vmatprep.mubr.bf16.mxu1 %v3551_v54 }
 0x47c   : > { %7998 = vmatmul.mubr.bf16.gmra.mrb[244].mxu1 %v3552_v58 }
 0x481   : > { %v7923_v4 = vpop.f32.mrb[216].mxu0 }
 0x482   : > { %v3383_v14 = vadd.f32 %v7923_v4, %v10539_v51  ;;  %v3374_v7 = vpop.f32.mrb[217].mxu0 }
 0x483   : > { %v3375_v23 = vadd.f32 %v10539_v51, %v3374_v7  ;;  %v7924_v47 = vpop.f32.mrb[218].mxu0 }
 0x484   : > { %v3386_v41 = vadd.f32 %v7924_v47, %v10539_v51  ;;  %v3377_v12 = vpop.f32.mrb[219].mxu0  ;;  %v3511_v35 = vmax.f32 %v3383_v14, 0.0 }
 0x485   : > { %v3378_v31 = vadd.f32 %v10539_v51, %v3377_v12  ;;  %v3509_v8 = vmax.f32 %v3375_v23, 0.0 }
 0x486   : > { %v3512_v40 = vmax.f32 %v3386_v41, 0.0 }
 0x487   : > { %v3510_v0 = vmax.f32 %v3378_v31, 0.0 }
 0x488   : > { %v3554_v38 = vpack.c.bf16 %v3512_v40, %v3511_v35 }
 0x489   : > { %v3553_v28 = vpack.c.bf16 %v3510_v0, %v3509_v8 }
 0x48b   : > { %8001 = vmatprep.mubr.bf16.mxu1 %v3553_v28 }
 0x48c   : > { %8002 = vmatmul.mubr.bf16.gmra.mrb[248].mxu1 %v3554_v38 }
 0x491   : > { %v7927_v52 = vpop.f32.mrb[220].mxu0 }
 0x492   : > { %v3399_v46 = vadd.f32 %v7927_v52, %v10539_v51  ;;  %v3390_v59 = vpop.f32.mrb[221].mxu0 }
 0x493   : > { %v3391_v58 = vadd.f32 %v10539_v51, %v3390_v59  ;;  %v7928_v54 = vpop.f32.mrb[222].mxu0 }
 0x494   : > { %v3402_v4 = vadd.f32 %v7928_v54, %v10539_v51  ;;  %v3393_v7 = vpop.f32.mrb[223].mxu0  ;;  %v3515_v14 = vmax.f32 %v3399_v46, 0.0 }
 0x495   : > { %v3394_v47 = vadd.f32 %v10539_v51, %v3393_v7  ;;  %v3513_v23 = vmax.f32 %v3391_v58, 0.0 }
 0x496   : > { %v3516_v41 = vmax.f32 %v3402_v4, 0.0 }
 0x497   : > { %v3514_v12 = vmax.f32 %v3394_v47, 0.0 }
 0x498   : > { %v3556_v31 = vpack.c.bf16 %v3516_v41, %v3515_v14 }
 0x499   : > { %v3555_v35 = vpack.c.bf16 %v3514_v12, %v3513_v23 }
 0x49b   : > { %8005 = vmatprep.mubr.bf16.mxu1 %v3555_v35 }
 0x49c   : > { %8006 = vmatmul.mubr.bf16.gmra.mrb[252].mxu1 %v3556_v31 }
 0x4a1   : > { %v7931_v40 = vpop.f32.mrb[224].mxu0 }
 0x4a2   : > { %v3415_v8 = vadd.f32 %v7931_v40, %v10539_v51  ;;  %v3406_v0 = vpop.f32.mrb[225].mxu0 }
 0x4a3   : > { %v3407_v38 = vadd.f32 %v10539_v51, %v3406_v0  ;;  %v7932_v28 = vpop.f32.mrb[226].mxu0 }
 0x4a4   : > { %v3418_v52 = vadd.f32 %v7932_v28, %v10539_v51  ;;  %v3409_v59 = vpop.f32.mrb[227].mxu0  ;;  %v3519_v46 = vmax.f32 %v3415_v8, 0.0 }
 0x4a5   : > { %v3410_v54 = vadd.f32 %v10539_v51, %v3409_v59  ;;  %v3517_v58 = vmax.f32 %v3407_v38, 0.0 }
 0x4a6   : > { %v3520_v4 = vmax.f32 %v3418_v52, 0.0 }
 0x4a7   : > { %v3518_v7 = vmax.f32 %v3410_v54, 0.0 }
 0x4a8   : > { %v3558_v47 = vpack.c.bf16 %v3520_v4, %v3519_v46 }
 0x4a9   : > { %v3557_v14 = vpack.c.bf16 %v3518_v7, %v3517_v58 }
 0x4ab   : > { %8009 = vmatprep.mubr.bf16.mxu1 %v3557_v14 }
 0x4ac   : > { %8010 = vmatmul.mubr.bf16.gmra.mrb[0].mxu1 %v3558_v47 }
 0x4b1   : > { %v7935_v41 = vpop.f32.mrb[228].mxu0 }
 0x4b2   : > { %v3431_v23 = vadd.f32 %v7935_v41, %v10539_v51  ;;  %v3422_v12 = vpop.f32.mrb[229].mxu0 }
 0x4b3   : > { %v3423_v31 = vadd.f32 %v10539_v51, %v3422_v12  ;;  %v7936_v35 = vpop.f32.mrb[230].mxu0 }
 0x4b4   : > { %v3434_v40 = vadd.f32 %v7936_v35, %v10539_v51  ;;  %v3425_v0 = vpop.f32.mrb[231].mxu0  ;;  %v3523_v8 = vmax.f32 %v3431_v23, 0.0 }
 0x4b5   : > { %v3426_v28 = vadd.f32 %v10539_v51, %v3425_v0  ;;  %v3521_v38 = vmax.f32 %v3423_v31, 0.0 }
 0x4b6   : > { %v3524_v52 = vmax.f32 %v3434_v40, 0.0 }
 0x4b7   : > { %v3522_v59 = vmax.f32 %v3426_v28, 0.0 }
 0x4b8   : > { %v3560_v54 = vpack.c.bf16 %v3524_v52, %v3523_v8 }
 0x4b9   : > { %v3559_v46 = vpack.c.bf16 %v3522_v59, %v3521_v38 }
 0x4bb   : > { %8013 = vmatprep.mubr.bf16.mxu1 %v3559_v46 }
 0x4bc   : > { %8014 = vmatmul.mubr.bf16.gmra.mrb[4].mxu1 %v3560_v54 }
 0x4c1   : > { %v7939_v4 = vpop.f32.mrb[232].mxu0 }
 0x4c2   : > { %v3447_v58 = vadd.f32 %v7939_v4, %v10539_v51  ;;  %v3438_v7 = vpop.f32.mrb[233].mxu0 }
 0x4c3   : > { %v3439_v47 = vadd.f32 %v10539_v51, %v3438_v7  ;;  %v7940_v14 = vpop.f32.mrb[234].mxu0 }
 0x4c4   : > { %v3450_v41 = vadd.f32 %v7940_v14, %v10539_v51  ;;  %v3441_v12 = vpop.f32.mrb[235].mxu0  ;;  %v3527_v23 = vmax.f32 %v3447_v58, 0.0 }
 0x4c5   : > { %v3442_v35 = vadd.f32 %v10539_v51, %v3441_v12  ;;  %v3525_v31 = vmax.f32 %v3439_v47, 0.0  ;;  %v744_v47 = vsub.s32 2, %v9387_v49 }
 0x4c6   : > { %v3528_v40 = vmax.f32 %v3450_v41, 0.0 }
 0x4c7   : > { %v3526_v0 = vmax.f32 %v3442_v35, 0.0 }
 0x4c8   : > { %v3562_v28 = vpack.c.bf16 %v3528_v40, %v3527_v23 }
 0x4c9   : > { %v3561_v8 = vpack.c.bf16 %v3526_v0, %v3525_v31  ;;  %v10633_v31 = vld [vmem:[%s11914_s6 + $0x1] ss:$0 sm:$0xff] }
 0x4ca   : > { %v8855_v0 = vld [vmem:[%s11910_s2] sm:$0x7] }
 0x4cb   : > { %8017 = vmatprep.mubr.bf16.mxu1 %v3561_v8 }
 0x4cc   : > { %8018 = vmatmul.mubr.bf16.gmra.mrb[8].mxu1 %v3562_v28  ;;  %v10638_v28 = vrot.slane %v8855_v0, %v744_v47  ;;  %v12262_v0 = vld [vmem:[#allocation4_spill] sm:$0xff] }
 0x4d1   : > { %v7943_v52 = vpop.f32.mrb[236].mxu0 }
 0x4d2   : > { %v3463_v38 = vadd.f32 %v7943_v52, %v10539_v51  ;;  %v3454_v59 = vpop.f32.mrb[237].mxu0 }
 0x4d3   : > { %v3455_v54 = vadd.f32 %v10539_v51, %v3454_v59  ;;  %v7944_v46 = vpop.f32.mrb[238].mxu0  ;;  %v12259_v59 = vld [vmem:[#allocation5_spill] sm:$0xff] }
 0x4d4   : > { %v3466_v4 = vadd.f32 %v7944_v46, %v10539_v51  ;;  %v3457_v7 = vpop.f32.mrb[239].mxu0  ;;  %v3531_v58 = vmax.f32 %v3463_v38, 0.0 }
 0x4d5   : > { %v3458_v14 = vadd.f32 %v10539_v51, %v3457_v7  ;;  %v3529_v12 = vmax.f32 %v3455_v54, 0.0  ;;  %v1706_v54 = vadd.f32 %v12259_v59, %v10638_v28 }
 0x4d6   : > { %v3532_v41 = vmax.f32 %v3466_v4, 0.0 }
 0x4d7   : > { %v3530_v35 = vmax.f32 %v3458_v14, 0.0  ;;  %v12260_v14 = vld [vmem:[#allocation3_spill] sm:$0xff] }
 0x4d8   : > { %v3564_v23 = vpack.c.bf16 %v3532_v41, %v3531_v58  ;;  %v1698_v58 = vadd.f32 %v12260_v14, %v10638_v28  ;;  %v12265_v14 = vld [vmem:[#allocation11_spill] sm:$0xff] }
 0x4d9   : > { %v3563_v40 = vpack.c.bf16 %v3530_v35, %v3529_v12  ;;  %v12261_v12 = vld [vmem:[#allocation6_spill] sm:$0xff] }
 0x4da   : > { %v1709_v35 = vadd.f32 %v12261_v12, %v10638_v28 }
 0x4db   : > { %v7963_v51 = vpop.f32.mrb[208].mxu1  ;;  %8021 = vmatprep.mubr.bf16.mxu1 %v3563_v40 }
 0x4dc   : > { %v3662_v8 = vadd.f32 %v7963_v51, %v10633_v31  ;;  %v3653_v49 = vpop.f32.mrb[209].mxu1  ;;  %8022 = vmatmul.mubr.bf16.gmra.mrb[12].mxu1 %v3564_v23 }
 0x4dd   : > { %v3654_v52 = vadd.f32 %v10633_v31, %v3653_v49  ;;  %v7964_v38 = vpop.f32.mrb[210].mxu1 }
 0x4de   : > { %v3910_v46 = vadd.f32 %v3662_v8, %v10076_v36  ;;  %v3665_v4 = vadd.f32 %v7964_v38, %v10633_v31  ;;  %v3656_v7 = vpop.f32.mrb[211].mxu1  ;;  %v1701_v36 = vadd.f32 %v12262_v0, %v10638_v28 }
 0x4df   : > { %v3908_v41 = vadd.f32 %v3654_v52, %v10081_v10  ;;  %v3657_v47 = vadd.f32 %v10633_v31, %v3656_v7 }
 0x4e0   : > { %v10652_v23 = vadd.f32 %v3910_v46, %v1706_v54  ;;  %v3911_v40 = vadd.f32 %v3665_v4, %v10084_v13 }
 0x4e1   : > { %v10657_v51 = vadd.f32 %v3908_v41, %v1698_v58  ;;  %v3909_v8 = vadd.f32 %v3657_v47, %v10086_v34  ;;  %v1722_v34 = vadd.f32 %v12265_v14, %v10638_v28 }
 0x4e2   : > { %v10660_v49 = vadd.f32 %v3911_v40, %v1709_v35  ;;  %v4076_v58 = vmax.f32 %v10652_v23, 0.0  ;;  %v12266_v35 = vld [vmem:[#allocation7_spill] sm:$0xff] }
 0x4e3   : > { %v10662_v38 = vadd.f32 %v3909_v8, %v1701_v36  ;;  %v7967_v10 = vpop.f32.mrb[212].mxu1  ;;  %v4074_v4 = vmax.f32 %v10657_v51, 0.0  ;;  %v1714_v40 = vadd.f32 %v12266_v35, %v10638_v28 }
 0x4e4   : > { %12263 = vst [vmem:[#allocation34_spill] sm:$0xff] %v10660_v49  ;;  %v4077_v52 = vmax.f32 %v10660_v49, 0.0  ;;  %v3678_v59 = vadd.f32 %v7967_v10, %v10633_v31  ;;  %v3669_v54 = vpop.f32.mrb[213].mxu1  ;;  %v12267_v10 = vld [vmem:[#allocation14_spill] sm:$0xff] }
 0x4e5   : > { %12264 = vst [vmem:[#allocation50_spill] sm:$0xff] %v10662_v38  ;;  %v3670_v46 = vadd.f32 %v10633_v31, %v3669_v54  ;;  %v7968_v13 = vpop.f32.mrb[214].mxu1  ;;  %v4075_v7 = vmax.f32 %v10662_v38, 0.0  ;;  %v1725_v54 = vadd.f32 %v12267_v10, %v10638_v28 }
 0x4e6   : > { %v3914_v41 = vadd.f32 %v3678_v59, %v10104_v56  ;;  %v3681_v47 = vadd.f32 %v7968_v13, %v10633_v31  ;;  %v3672_v12 = vpop.f32.mrb[215].mxu1  ;;  %v4139_v38 = vpack.c.bf16 %v4077_v52, %v4076_v58  ;;  %v12268_v56 = vld [vmem:[#allocation8_spill] sm:$0xff] }
 0x4e7   : > { %v3912_v0 = vadd.f32 %v3670_v46, %v10109_v9  ;;  %v3673_v36 = vadd.f32 %v10633_v31, %v3672_v12  ;;  %v4138_v8 = vpack.c.bf16 %v4075_v7, %v4074_v4  ;;  %v1717_v59 = vadd.f32 %v12268_v56, %v10638_v28 }
 0x4e8   : > { %v10680_v14 = vadd.f32 %v3914_v41, %v1722_v34  ;;  %v3915_v49 = vadd.f32 %v3681_v47, %v10112_v11 }
 0x4e9   : > { %v10685_v13 = vadd.f32 %v3912_v0, %v1714_v40  ;;  %v3913_v35 = vadd.f32 %v3673_v36, %v10114_v63  ;;  %8041 = vmatprep.mubr.bf16.mxu0 %v4138_v8  ;;  %v12269_v63 = vld [vmem:[#allocation21_spill] sm:$0xff]  ;;  %v12270_v36 = vld [vmem:[#allocation15_spill] sm:$0xff] }
 0x4ea   : > { %v10688_v9 = vadd.f32 %v3915_v49, %v1725_v54  ;;  %8042 = vmatmul.mubr.bf16.vlgmr.msra.gmra.mrb[240].mxu0 %v4139_v38  ;;  %v1738_v49 = vadd.f32 %v12269_v63, %v10638_v28  ;;  %v4080_v0 = vmax.f32 %v10680_v14, 0.0  ;;  %v1730_v8 = vadd.f32 %v12270_v36, %v10638_v28 }
 0x4eb   : > { %v10690_v46 = vadd.f32 %v3913_v35, %v1717_v59  ;;  %v7971_v4 = vpop.f32.mrb[216].mxu1  ;;  %v4078_v41 = vmax.f32 %v10685_v13, 0.0  ;;  %v12271_v59 = vld [vmem:[#allocation24_spill] sm:$0xff] }
 0x4ec   : > { %v3694_v52 = vadd.f32 %v7971_v4, %v10633_v31  ;;  %v3685_v7 = vpop.f32.mrb[217].mxu1  ;;  %v4081_v34 = vmax.f32 %v10688_v9, 0.0  ;;  %v1741_v35 = vadd.f32 %v12271_v59, %v10638_v28  ;;  %v12274_v59 = vld [vmem:[#allocation27_spill] sm:$0xff] }
 0x4ed   : > { %v3686_v11 = vadd.f32 %v10633_v31, %v3685_v7  ;;  %v7972_v58 = vpop.f32.mrb[218].mxu1  ;;  %v4079_v47 = vmax.f32 %v10690_v46, 0.0  ;;  %v12272_v7 = vld [vmem:[#allocation18_spill] sm:$0xff] }
 0x4ee   : > { %v3918_v38 = vadd.f32 %v3694_v52, %v10132_v5  ;;  %v3697_v12 = vadd.f32 %v7972_v58, %v10633_v31  ;;  %v3688_v40 = vpop.f32.mrb[219].mxu1  ;;  %v4141_v52 = vpack.c.bf16 %v4081_v34, %v4080_v0  ;;  %v1733_v58 = vadd.f32 %v12272_v7, %v10638_v28 }
 0x4ef   : > { %v3916_v10 = vadd.f32 %v3686_v11, %v10137_v39  ;;  %v3689_v54 = vadd.f32 %v10633_v31, %v3688_v40  ;;  %v4140_v56 = vpack.c.bf16 %v4079_v47, %v4078_v41 }
 0x4f0   : > { %v10708_v4 = vadd.f32 %v3918_v38, %v1738_v49  ;;  %v3919_v5 = vadd.f32 %v3697_v12, %v10140_v25 }
 0x4f1   : > { %v10713_v63 = vadd.f32 %v3916_v10, %v1730_v8  ;;  %v3917_v36 = vadd.f32 %v3689_v54, %v10142_v60  ;;  %8045 = vmatprep.mubr.bf16.mxu0 %v4140_v56  ;;  %v12273_v60 = vld [vmem:[#allocation33_spill] sm:$0xff] }
 0x4f2   : > { %v10716_v39 = vadd.f32 %v3919_v5, %v1741_v35  ;;  %8046 = vmatmul.mubr.bf16.gmra.mrb[244].mxu0 %v4141_v52  ;;  %v1754_v0 = vadd.f32 %v12273_v60, %v10638_v28  ;;  %v4084_v56 = vmax.f32 %v10708_v4, 0.0  ;;  %v1746_v35 = vadd.f32 %v12274_v59, %v10638_v28 }
 0x4f3   : > { %v10718_v11 = vadd.f32 %v3917_v36, %v1733_v58  ;;  %v7975_v41 = vpop.f32.mrb[220].mxu1  ;;  %v4082_v12 = vmax.f32 %v10713_v63, 0.0  ;;  %v12275_v58 = vld [vmem:[#allocation36_spill] sm:$0xff] }
 0x4f4   : > { %v3710_v47 = vadd.f32 %v7975_v41, %v10633_v31  ;;  %v3701_v49 = vpop.f32.mrb[221].mxu1  ;;  %v4085_v25 = vmax.f32 %v10716_v39, 0.0  ;;  %v1757_v36 = vadd.f32 %v12275_v58, %v10638_v28 }
 0x4f5   : > { %v3702_v34 = vadd.f32 %v10633_v31, %v3701_v49  ;;  %v7976_v38 = vpop.f32.mrb[222].mxu1  ;;  %v4083_v40 = vmax.f32 %v10718_v11, 0.0  ;;  %v12276_v49 = vld [vmem:[#allocation30_spill] sm:$0xff] }
 0x4f6   : > { %v3922_v8 = vadd.f32 %v3710_v47, %v10160_v62  ;;  %v3713_v10 = vadd.f32 %v7976_v38, %v10633_v31  ;;  %v3704_v54 = vpop.f32.mrb[223].mxu1  ;;  %v4143_v47 = vpack.c.bf16 %v4085_v25, %v4084_v56  ;;  %v1749_v38 = vadd.f32 %v12276_v49, %v10638_v28 }
 0x4f7   : > { %v3920_v5 = vadd.f32 %v3702_v34, %v10165_v29  ;;  %v3705_v52 = vadd.f32 %v10633_v31, %v3704_v54  ;;  %v4142_v7 = vpack.c.bf16 %v4083_v40, %v4082_v12 }
 0x4f8   : > { %v10736_v41 = vadd.f32 %v3922_v8, %v1754_v0  ;;  %v3923_v62 = vadd.f32 %v3713_v10, %v10168_v45 }
 0x4f9   : > { %v10741_v60 = vadd.f32 %v3920_v5, %v1746_v35  ;;  %v3921_v59 = vadd.f32 %v3705_v52, %v10170_v3  ;;  %8049 = vmatprep.mubr.bf16.mxu0 %v4142_v7  ;;  %v12277_v5 = vld [vmem:[#allocation45_spill] sm:$0xff] }
 0x4fa   : > { %v10744_v29 = vadd.f32 %v3923_v62, %v1757_v36  ;;  %8050 = vmatmul.mubr.bf16.gmra.mrb[248].mxu0 %v4143_v47  ;;  %v4088_v25 = vmax.f32 %v10736_v41, 0.0  ;;  %v1770_v52 = vadd.f32 %v12277_v5, %v10638_v28  ;;  %v12278_v62 = vld [vmem:[#allocation39_spill] sm:$0xff] }
 0x4fb   : > { %v10746_v34 = vadd.f32 %v3921_v59, %v1749_v38  ;;  %v4086_v40 = vmax.f32 %v10741_v60, 0.0  ;;  %v1762_v47 = vadd.f32 %v12278_v62, %v10638_v28  ;;  %v12279_v59 = vld [vmem:[#allocation48_spill] sm:$0xff]  ;;  %v12281_v62 = vld [vmem:[#allocation57_spill] sm:$0xff] }
 0x4fc   : > { %v4089_v12 = vmax.f32 %v10744_v29, 0.0 }
 0x4fd   : > { %v4087_v45 = vmax.f32 %v10746_v34, 0.0 }
 0x4fe   : > { %v4145_v3 = vpack.c.bf16 %v4089_v12, %v4088_v25  ;;  %v1773_v12 = vadd.f32 %v12279_v59, %v10638_v28 }
 0x4ff   : > { %v7979_v0 = vpop.f32.mrb[224].mxu1  ;;  %v4144_v8 = vpack.c.bf16 %v4087_v45, %v4086_v40 }
 0x500   : > { %v3726_v10 = vadd.f32 %v7979_v0, %v10633_v31  ;;  %v3717_v54 = vpop.f32.mrb[225].mxu1 }
 0x501   : > { %v3718_v56 = vadd.f32 %v10633_v31, %v3717_v54  ;;  %v7980_v35 = vpop.f32.mrb[226].mxu1  ;;  %8053 = vmatprep.mubr.bf16.mxu0 %v4144_v8 }
 0x502   : > { %v3926_v7 = vadd.f32 %v3726_v10, %v10188_v22  ;;  %v3729_v58 = vadd.f32 %v7980_v35, %v10633_v31  ;;  %v3720_v36 = vpop.f32.mrb[227].mxu1  ;;  %8054 = vmatmul.mubr.bf16.gmra.mrb[252].mxu0 %v4145_v3  ;;  %v12280_v22 = vld [vmem:[#allocation42_spill] sm:$0xff] }
 0x503   : > { %v3924_v49 = vadd.f32 %v3718_v56, %v10193_v55  ;;  %v3721_v38 = vadd.f32 %v10633_v31, %v3720_v36  ;;  %v1765_v25 = vadd.f32 %v12280_v22, %v10638_v28 }
 0x504   : > { %v10764_v40 = vadd.f32 %v3926_v7, %v1770_v52  ;;  %v3927_v45 = vadd.f32 %v3729_v58, %v10196_v20 }
 0x505   : > { %v10769_v0 = vadd.f32 %v3924_v49, %v1762_v47  ;;  %v3925_v8 = vadd.f32 %v3721_v38, %v10198_v19  ;;  %v1786_v47 = vadd.f32 %v12281_v62, %v10638_v28 }
 0x506   : > { %v10772_v10 = vadd.f32 %v3927_v45, %v1773_v12  ;;  %v4092_v35 = vmax.f32 %v10764_v40, 0.0  ;;  %v12282_v12 = vld [vmem:[#allocation51_spill] sm:$0xff] }
 0x507   : > { %v10774_v54 = vadd.f32 %v3925_v8, %v1765_v25  ;;  %v4090_v3 = vmax.f32 %v10769_v0, 0.0  ;;  %v1778_v45 = vadd.f32 %v12282_v12, %v10638_v28  ;;  %v12283_v8 = vld [vmem:[#allocation60_spill] sm:$0xff]  ;;  %v12289_v12 = vld [vmem:[#allocation67_spill] sm:$0xff] }
 0x508   : > { %v4093_v55 = vmax.f32 %v10772_v10, 0.0 }
 0x509   : > { %v4091_v56 = vmax.f32 %v10774_v54, 0.0 }
 0x50a   : > { %v4147_v5 = vpack.c.bf16 %v4093_v55, %v4092_v35  ;;  %v1789_v55 = vadd.f32 %v12283_v8, %v10638_v28  ;;  %v12285_v35 = vld [vmem:[#allocation54_spill] sm:$0xff] }
 0x50b   : > { %v4146_v20 = vpack.c.bf16 %v4091_v56, %v4090_v3 }
 0x50d   : > { %8057 = vmatprep.mubr.bf16.mxu0 %v4146_v20 }
 0x50e   : > { %8058 = vmatmul.mubr.bf16.gmra.mrb[0].mxu0 %v4147_v5 }
 0x50f   : > { %v7983_v52 = vpop.f32.mrb[228].mxu1 }
 0x510   : > { %v3742_v7 = vadd.f32 %v7983_v52, %v10633_v31  ;;  %v3733_v19 = vpop.f32.mrb[229].mxu1 }
 0x511   : > { %v3734_v58 = vadd.f32 %v10633_v31, %v3733_v19  ;;  %v7984_v36 = vpop.f32.mrb[230].mxu1 }
 0x512   : > { %v3930_v49 = vadd.f32 %v3742_v7, %v10216_v42  ;;  %v3745_v38 = vadd.f32 %v7984_v36, %v10633_v31  ;;  %v3736_v59 = vpop.f32.mrb[231].mxu1  ;;  %v1781_v42 = vadd.f32 %v12285_v35, %v10638_v28 }
 0x513   : > { %v3928_v22 = vadd.f32 %v3734_v58, %v10221_v2  ;;  %v3737_v25 = vadd.f32 %v10633_v31, %v3736_v59 }
 0x514   : > { %v10792_v3 = vadd.f32 %v3930_v49, %v1786_v47  ;;  %v3931_v56 = vadd.f32 %v3745_v38, %v10224_v24 }
 0x515   : > { %v10797_v20 = vadd.f32 %v3928_v22, %v1778_v45  ;;  %v3929_v5 = vadd.f32 %v3737_v25, %v10226_v33  ;;  %v1802_v45 = vadd.f32 %v12289_v12, %v10638_v28 }
 0x516   : > { %12284 = vst [vmem:[#allocation49_spill] sm:$0xff] %v10792_v3  ;;  %v10800_v52 = vadd.f32 %v3931_v56, %v1789_v55  ;;  %v4096_v36 = vmax.f32 %v10792_v3, 0.0  ;;  %v12290_v55 = vld [vmem:[#allocation63_spill] sm:$0xff] }
 0x517   : > { %12286 = vst [vmem:[#allocation44_spill] sm:$0xff] %v10797_v20  ;;  %v10802_v7 = vadd.f32 %v3929_v5, %v1781_v42  ;;  %v4094_v19 = vmax.f32 %v10797_v20, 0.0  ;;  %v1794_v56 = vadd.f32 %v12290_v55, %v10638_v28  ;;  %v12291_v5 = vld [vmem:[#allocation70_spill] sm:$0xff] }
 0x518   : > { %12287 = vst [vmem:[#allocation43_spill] sm:$0xff] %v10800_v52  ;;  %v4097_v2 = vmax.f32 %v10800_v52, 0.0 }
 0x519   : > { %12288 = vst [vmem:[#allocation53_spill] sm:$0xff] %v10802_v7  ;;  %v4095_v58 = vmax.f32 %v10802_v7, 0.0  ;;  %v12343_v7 = vld [vmem:[#allocation38_spill] sm:$0xff] }
 0x51a   : > { %v4149_v62 = vpack.c.bf16 %v4097_v2, %v4096_v36  ;;  %v1805_v2 = vadd.f32 %v12291_v5, %v10638_v28  ;;  %v12293_v36 = vld [vmem:[#allocation66_spill] sm:$0xff] }
 0x51b   : > { %v4148_v24 = vpack.c.bf16 %v4095_v58, %v4094_v19 }
 0x51d   : > { %8061 = vmatprep.mubr.bf16.mxu0 %v4148_v24 }
 0x51e   : > { %8062 = vmatmul.mubr.bf16.gmra.mrb[4].mxu0 %v4149_v62 }
 0x51f   : > { %v7987_v47 = vpop.f32.mrb[232].mxu1 }
 0x520   : > { %v3758_v49 = vadd.f32 %v7987_v47, %v10633_v31  ;;  %v3749_v33 = vpop.f32.mrb[233].mxu1 }
 0x521   : > { %v3750_v38 = vadd.f32 %v10633_v31, %v3749_v33  ;;  %v7988_v59 = vpop.f32.mrb[234].mxu1 }
 0x522   : > { %v3934_v22 = vadd.f32 %v3758_v49, %v10244_v1  ;;  %v3761_v25 = vadd.f32 %v7988_v59, %v10633_v31  ;;  %v3752_v8 = vpop.f32.mrb[235].mxu1  ;;  %v1797_v1 = vadd.f32 %v12293_v36, %v10638_v28 }
 0x523   : > { %v3932_v35 = vadd.f32 %v3750_v38, %v10249_v37  ;;  %v3753_v42 = vadd.f32 %v10633_v31, %v3752_v8  ;;  %v8806_v37 = vld [vmem:[%s11913_s5 + $0x80] sm:$0xff]  }
 0x524   : > { %v10820_v19 = vadd.f32 %v3934_v22, %v1802_v45  ;;  %v3935_v58 = vadd.f32 %v3761_v25, %v10252_v48  ;;  %8105 = vmatprep.subr.bf16.mxu1 %v8806_v37  ;;  %v8808_v22 = vld [vmem:[%s11913_s5 + $0x90] sm:$0xff]  }
 0x525   : > { %v10825_v24 = vadd.f32 %v3932_v35, %v1794_v56  ;;  %v3933_v62 = vadd.f32 %v3753_v42, %v10257_v21  ;;  %8106 = vmatpush3.bf16.msra.mxu1 %v8806_v37  ;;  %v8807_v21 = vld [vmem:[%s11913_s5 + $0x88] sm:$0xff]   ;;  %v12297_v42 = vld [vmem:[#allocation79_spill] sm:$0xff] }
 0x526   : > { %12292 = vst [vmem:[#allocation52_spill] sm:$0xff] %v10820_v19  ;;  %v10828_v47 = vadd.f32 %v3935_v58, %v1805_v2  ;;  %v4100_v59 = vmax.f32 %v10820_v19, 0.0  ;;  %8107 = vmatprep.subr.bf16.mxu1 %v8807_v21  ;;  %v1818_v5 = vadd.f32 %v12297_v42, %v10638_v28 }
 0x527   : > { %12294 = vst [vmem:[#allocation47_spill] sm:$0xff] %v10825_v24  ;;  %v10833_v49 = vadd.f32 %v3933_v62, %v1797_v1  ;;  %v4098_v48 = vmax.f32 %v10825_v24, 0.0  ;;  %v8809_v1 = vld [vmem:[%s11913_s5 + $0x98] sm:$0xff]   ;;  %v12298_v62 = vld [vmem:[#allocation75_spill] sm:$0xff] }
 0x528   : > { %12295 = vst [vmem:[#allocation46_spill] sm:$0xff] %v10828_v47  ;;  %v4101_v33 = vmax.f32 %v10828_v47, 0.0  ;;  %v1810_v37 = vadd.f32 %v12298_v62, %v10638_v28 }
 0x529   : > { %12296 = vst [vmem:[#allocation62_spill] sm:$0xff] %v10833_v49  ;;  %v4099_v38 = vmax.f32 %v10833_v49, 0.0  ;;  %8108 = vmatpush3.bf16.msra.mxu1 %v8807_v21  ;;  %v12334_v49 = vld [vmem:[#allocation29_spill] sm:$0xff] }
 0x52a   : > { %v4151_v45 = vpack.c.bf16 %v4101_v33, %v4100_v59  ;;  %8109 = vmatprep.subr.bf16.mxu1 %v8808_v22 }
 0x52b   : > { %v4150_v12 = vpack.c.bf16 %v4099_v38, %v4098_v48  ;;  %v12299_v38 = vld [vmem:[#allocation82_spill] sm:$0xff] }
 0x52c   : > { %v1821_v59 = vadd.f32 %v12299_v38, %v10638_v28 }
 0x52d   : > { %8065 = vmatprep.mubr.bf16.mxu0 %v4150_v12  ;;  %8110 = vmatpush3.bf16.msra.mxu1 %v8808_v22  ;;  %v12301_v12 = vld [vmem:[#allocation78_spill] sm:$0xff] }
 0x52e   : > { %8066 = vmatmul.mubr.bf16.gmra.mrb[8].mxu0 %v4151_v45  ;;  %8111 = vmatprep.subr.bf16.mxu1 %v8809_v1  ;;  %v1813_v45 = vadd.f32 %v12301_v12, %v10638_v28 }
 0x52f   : > { %v7991_v25 = vpop.f32.mrb[236].mxu1 }
 0x530   : > { %v3774_v8 = vadd.f32 %v7991_v25, %v10633_v31  ;;  %v3765_v55 = vpop.f32.mrb[237].mxu1 }
 0x531   : > { %v3766_v56 = vadd.f32 %v10633_v31, %v3765_v55  ;;  %v7992_v35 = vpop.f32.mrb[238].mxu1  ;;  %8112 = vmatpush3.bf16.msra.mxu1 %v8809_v1 }
 0x532   : > { %v3938_v2 = vadd.f32 %v3774_v8, %v10284_v16  ;;  %v3777_v58 = vadd.f32 %v7992_v35, %v10633_v31  ;;  %v3768_v36 = vpop.f32.mrb[239].mxu1 }
 0x533   : > { %v3936_v33 = vadd.f32 %v3766_v56, %v10289_v44  ;;  %v3769_v48 = vadd.f32 %v10633_v31, %v3768_v36  ;;  %v8810_v44 = vld [vmem:[%s11913_s5 + $0xa0] sm:$0xff]  }
 0x534   : > { %v10860_v21 = vadd.f32 %v3938_v2, %v1818_v5  ;;  %v3939_v16 = vadd.f32 %v3777_v58, %v10292_v50  ;;  %8113 = vmatprep.subr.bf16.mxu1 %v8810_v44  ;;  %v8812_v58 = vld [vmem:[%s11913_s5 + $0xb0] sm:$0xff]  }
 0x535   : > { %v10865_v22 = vadd.f32 %v3936_v33, %v1810_v37  ;;  %v3937_v25 = vadd.f32 %v3769_v48, %v10297_v57  ;;  %8114 = vmatpush3.bf16.msra.mxu1 %v8810_v44  ;;  %v8811_v57 = vld [vmem:[%s11913_s5 + $0xa8] sm:$0xff]   ;;  %v12305_v48 = vld [vmem:[#allocation91_spill] sm:$0xff] }
 0x536   : > { %12300 = vst [vmem:[#allocation61_spill] sm:$0xff] %v10860_v21  ;;  %v10868_v8 = vadd.f32 %v3939_v16, %v1821_v59  ;;  %v4104_v42 = vmax.f32 %v10860_v21, 0.0  ;;  %8115 = vmatprep.subr.bf16.mxu1 %v8811_v57  ;;  %v1834_v38 = vadd.f32 %v12305_v48, %v10638_v28 }
 0x537   : > { %12302 = vst [vmem:[#allocation56_spill] sm:$0xff] %v10865_v22  ;;  %v10873_v55 = vadd.f32 %v3937_v25, %v1813_v45  ;;  %v4102_v50 = vmax.f32 %v10865_v22, 0.0  ;;  %v8813_v45 = vld [vmem:[%s11913_s5 + $0xb8] sm:$0xff]   ;;  %v12306_v25 = vld [vmem:[#allocation87_spill] sm:$0xff] }
 0x538   : > { %12303 = vst [vmem:[#allocation55_spill] sm:$0xff] %v10868_v8  ;;  %v4105_v56 = vmax.f32 %v10868_v8, 0.0  ;;  %v1826_v44 = vadd.f32 %v12306_v25, %v10638_v28  ;;  %v12309_v25 = vld [vmem:[#allocation103_spill] sm:$0xff] }
 0x539   : > { %12304 = vst [vmem:[#allocation65_spill] sm:$0xff] %v10873_v55  ;;  %v4103_v35 = vmax.f32 %v10873_v55, 0.0  ;;  %8116 = vmatpush3.bf16.msra.mxu1 %v8811_v57  ;;  %v12326_v55 = vld [vmem:[#allocation26_spill] sm:$0xff] }
 0x53a   : > { %v4153_v2 = vpack.c.bf16 %v4105_v56, %v4104_v42  ;;  %8117 = vmatprep.subr.bf16.mxu1 %v8812_v58 }
 0x53b   : > { %v4152_v5 = vpack.c.bf16 %v4103_v35, %v4102_v50  ;;  %v12307_v35 = vld [vmem:[#allocation94_spill] sm:$0xff] }
 0x53c   : > { %v1837_v42 = vadd.f32 %v12307_v35, %v10638_v28 }
 0x53d   : > { %8069 = vmatprep.mubr.bf16.mxu0 %v4152_v5  ;;  %8118 = vmatpush3.bf16.msra.mxu1 %v8812_v58  ;;  %v12308_v5 = vld [vmem:[#allocation90_spill] sm:$0xff] }
 0x53e   : > { %8070 = vmatmul.mubr.bf16.gmra.mrb[12].mxu0 %v4153_v2  ;;  %8119 = vmatprep.subr.bf16.mxu1 %v8813_v45  ;;  %v1829_v2 = vadd.f32 %v12308_v5, %v10638_v28 }
 0x53f   : > { %v7995_v36 = vpop.f32.mrb[240].mxu1 }
 0x540   : > { %v3790_v1 = vadd.f32 %v7995_v36, %v10633_v31  ;;  %v3781_v62 = vpop.f32.mrb[241].mxu1 }
 0x541   : > { %v3782_v37 = vadd.f32 %v10633_v31, %v3781_v62  ;;  %v7996_v33 = vpop.f32.mrb[242].mxu1  ;;  %8120 = vmatpush3.bf16.msra.mxu1 %v8813_v45 }
 0x542   : > { %v3942_v59 = vadd.f32 %v3790_v1, %v10324_v18  ;;  %v3793_v16 = vadd.f32 %v7996_v33, %v10633_v31  ;;  %v3784_v12 = vpop.f32.mrb[243].mxu1 }
 0x543   : > { %v3940_v56 = vadd.f32 %v3782_v37, %v10329_v6  ;;  %v3785_v50 = vadd.f32 %v10633_v31, %v3784_v12 }
 0x544   : > { %v10900_v57 = vadd.f32 %v3942_v59, %v1834_v38  ;;  %v3943_v18 = vadd.f32 %v3793_v16, %v10332_v27 }
 0x545   : > { %v10905_v58 = vadd.f32 %v3940_v56, %v1826_v44  ;;  %v3941_v36 = vadd.f32 %v3785_v50, %v10334_v53  ;;  %v1850_v44 = vadd.f32 %v12309_v25, %v10638_v28 }
 0x546   : > { %v10908_v1 = vadd.f32 %v3943_v18, %v1837_v42  ;;  %v4108_v62 = vmax.f32 %v10900_v57, 0.0  ;;  %v12310_v42 = vld [vmem:[#allocation99_spill] sm:$0xff] }
 0x547   : > { %v10910_v6 = vadd.f32 %v3941_v36, %v1829_v2  ;;  %v4106_v33 = vmax.f32 %v10905_v58, 0.0  ;;  %v1842_v18 = vadd.f32 %v12310_v42, %v10638_v28  ;;  %v12311_v36 = vld [vmem:[#allocation106_spill] sm:$0xff]  ;;  %v12313_v42 = vld [vmem:[#allocation115_spill] sm:$0xff] }
 0x548   : > { %v4109_v37 = vmax.f32 %v10908_v1, 0.0 }
 0x549   : > { %v4107_v27 = vmax.f32 %v10910_v6, 0.0 }
 0x54a   : > { %v4155_v48 = vpack.c.bf16 %v4109_v37, %v4108_v62  ;;  %v1853_v62 = vadd.f32 %v12311_v36, %v10638_v28 }
 0x54b   : > { %v4154_v38 = vpack.c.bf16 %v4107_v27, %v4106_v33  ;;  %v12312_v27 = vld [vmem:[#allocation102_spill] sm:$0xff] }
 0x54d   : > { %8073 = vmatprep.mubr.bf16.mxu0 %v4154_v38 }
 0x54e   : > { %8074 = vmatmul.mubr.bf16.gmra.mrb[16].mxu0 %v4155_v48 }
 0x54f   : > { %v7999_v59 = vpop.f32.mrb[244].mxu1 }
 0x550   : > { %v3806_v53 = vadd.f32 %v7999_v59, %v10633_v31  ;;  %v3797_v16 = vpop.f32.mrb[245].mxu1 }
 0x551   : > { %v3798_v12 = vadd.f32 %v10633_v31, %v3797_v16  ;;  %v8000_v45 = vpop.f32.mrb[246].mxu1 }
 0x552   : > { %v3946_v56 = vadd.f32 %v3806_v53, %v10352_v43  ;;  %v3809_v50 = vadd.f32 %v8000_v45, %v10633_v31  ;;  %v3800_v35 = vpop.f32.mrb[247].mxu1  ;;  %v1845_v43 = vadd.f32 %v12312_v27, %v10638_v28 }
 0x553   : > { %v3944_v5 = vadd.f32 %v3798_v12, %v10357_v26  ;;  %v3801_v2 = vadd.f32 %v10633_v31, %v3800_v35 }
 0x554   : > { %v10928_v37 = vadd.f32 %v3946_v56, %v1850_v44  ;;  %v3947_v33 = vadd.f32 %v3809_v50, %v10360_v32 }
 0x555   : > { %v10933_v48 = vadd.f32 %v3944_v5, %v1842_v18  ;;  %v3945_v38 = vadd.f32 %v3801_v2, %v10362_v15  ;;  %v1866_v18 = vadd.f32 %v12313_v42, %v10638_v28  ;;  %v12314_v5 = vld [vmem:[#allocation10_spill] sm:$0xff] }
 0x556   : > { %v10936_v59 = vadd.f32 %v3947_v33, %v1853_v62  ;;  %v4112_v26 = vmax.f32 %v10928_v37, 0.0  ;;  %v12315_v33 = vld [vmem:[#allocation111_spill] sm:$0xff] }
 0x557   : > { %v10938_v53 = vadd.f32 %v3945_v38, %v1845_v43  ;;  %v4110_v12 = vmax.f32 %v10933_v48, 0.0  ;;  %v1858_v27 = vadd.f32 %v12315_v33, %v10638_v28  ;;  %v12316_v43 = vld [vmem:[#allocation9_spill] sm:$0xff] }
 0x558   : > { %v4113_v16 = vmax.f32 %v10936_v59, 0.0 }
 0x559   : > { %v4111_v45 = vmax.f32 %v10938_v53, 0.0 }
 0x55a   : > { %v4157_v32 = vpack.c.bf16 %v4113_v16, %v4112_v26  ;;  %v12317_v16 = vld [vmem:[#allocation118_spill] sm:$0xff] }
 0x55b   : > { %v4156_v25 = vpack.c.bf16 %v4111_v45, %v4110_v12  ;;  %v1869_v12 = vadd.f32 %v12317_v16, %v10638_v28 }
 0x55d   : > { %8077 = vmatprep.mubr.bf16.mxu0 %v4156_v25 }
 0x55e   : > { %8078 = vmatmul.mubr.bf16.gmra.mrb[20].mxu0 %v4157_v32  ;;  %v12318_v32 = vld [vmem:[#allocation17_spill] sm:$0xff] }
 0x55f   : > { %v8003_v44 = vpop.f32.mrb[248].mxu1 }
 0x560   : > { %v3822_v56 = vadd.f32 %v8003_v44, %v10633_v31  ;;  %v3813_v15 = vpop.f32.mrb[249].mxu1  ;;  %v12319_v44 = vld [vmem:[#allocation114_spill] sm:$0xff] }
 0x561   : > { %v3814_v50 = vadd.f32 %v10633_v31, %v3813_v15  ;;  %v8004_v35 = vpop.f32.mrb[250].mxu1 }
 0x562   : > { %v3950_v2 = vadd.f32 %v3822_v56, %v12314_v5  ;;  %v3825_v36 = vadd.f32 %v8004_v35, %v10633_v31  ;;  %v3816_v62 = vpop.f32.mrb[251].mxu1  ;;  %v1861_v56 = vadd.f32 %v12319_v44, %v10638_v28  ;;  %v12320_v35 = vld [vmem:[#allocation16_spill] sm:$0xff]  ;;  %v12322_v44 = vld [vmem:[#allocation13_spill] sm:$0xff] }
 0x563   : > { %v3948_v38 = vadd.f32 %v3814_v50, %v12316_v43  ;;  %v3817_v26 = vadd.f32 %v10633_v31, %v3816_v62 }
 0x564   : > { %v10956_v45 = vadd.f32 %v3950_v2, %v1866_v18  ;;  %v3951_v25 = vadd.f32 %v3825_v36, %v12318_v32  ;;  %v12321_v32 = vld [vmem:[#allocation127_spill] sm:$0xff] }
 0x565   : > { %v10961_v15 = vadd.f32 %v3948_v38, %v1858_v27  ;;  %v3949_v42 = vadd.f32 %v3817_v26, %v12320_v35 }
 0x566   : > { %v10964_v5 = vadd.f32 %v3951_v25, %v1869_v12  ;;  %v4116_v50 = vmax.f32 %v10956_v45, 0.0  ;;  %v1882_v25 = vadd.f32 %v12321_v32, %v10638_v28  ;;  %v12327_v32 = vld [vmem:[#allocation126_spill] sm:$0xff] }
 0x567   : > { %v10966_v33 = vadd.f32 %v3949_v42, %v1861_v56  ;;  %v4114_v18 = vmax.f32 %v10961_v15, 0.0 }
 0x568   : > { %v4117_v62 = vmax.f32 %v10964_v5, 0.0 }
 0x569   : > { %v4115_v2 = vmax.f32 %v10966_v33, 0.0 }
 0x56a   : > { %v4159_v36 = vpack.c.bf16 %v4117_v62, %v4116_v50  ;;  %v12323_v50 = vld [vmem:[#allocation123_spill] sm:$0xff] }
 0x56b   : > { %v4158_v43 = vpack.c.bf16 %v4115_v2, %v4114_v18  ;;  %v1874_v62 = vadd.f32 %v12323_v50, %v10638_v28  ;;  %v12324_v18 = vld [vmem:[#allocation12_spill] sm:$0xff] }
 0x56d   : > { %8081 = vmatprep.mubr.bf16.mxu0 %v4158_v43  ;;  %v12325_v43 = vld [vmem:[#allocation130_spill] sm:$0xff] }
 0x56e   : > { %8082 = vmatmul.mubr.bf16.gmra.mrb[24].mxu0 %v4159_v36 }
 0x56f   : > { %v8007_v27 = vpop.f32.mrb[252].mxu1 }
 0x570   : > { %v3838_v38 = vadd.f32 %v8007_v27, %v10633_v31  ;;  %v3829_v26 = vpop.f32.mrb[253].mxu1  ;;  %v1885_v27 = vadd.f32 %v12325_v43, %v10638_v28 }
 0x571   : > { %v3830_v16 = vadd.f32 %v10633_v31, %v3829_v26  ;;  %v8008_v12 = vpop.f32.mrb[254].mxu1 }
 0x572   : > { %v3954_v56 = vadd.f32 %v3838_v38, %v12322_v44  ;;  %v3841_v35 = vadd.f32 %v8008_v12, %v10633_v31  ;;  %v3832_v42 = vpop.f32.mrb[255].mxu1  ;;  %v1877_v38 = vadd.f32 %v12327_v32, %v10638_v28  ;;  %v12328_v12 = vld [vmem:[#allocation25_spill] sm:$0xff] }
 0x573   : > { %v3952_v2 = vadd.f32 %v3830_v16, %v12324_v18  ;;  %v3833_v36 = vadd.f32 %v10633_v31, %v3832_v42 }
 0x574   : > { %v10984_v26 = vadd.f32 %v3954_v56, %v1882_v25  ;;  %v3955_v8 = vadd.f32 %v3841_v35, %v12326_v55 }
 0x575   : > { %v10989_v44 = vadd.f32 %v3952_v2, %v1874_v62  ;;  %v3953_v22 = vadd.f32 %v3833_v36, %v12328_v12  ;;  %v12329_v36 = vld [vmem:[#allocation139_spill] sm:$0xff] }
 0x576   : > { %v10992_v21 = vadd.f32 %v3955_v8, %v1885_v27  ;;  %v4120_v16 = vmax.f32 %v10984_v26, 0.0  ;;  %v1898_v43 = vadd.f32 %v12329_v36, %v10638_v28  ;;  %v12330_v27 = vld [vmem:[#allocation20_spill] sm:$0xff]  ;;  %v12335_v36 = vld [vmem:[#allocation138_spill] sm:$0xff] }
 0x577   : > { %v10994_v50 = vadd.f32 %v3953_v22, %v1877_v38  ;;  %v4118_v25 = vmax.f32 %v10989_v44, 0.0 }
 0x578   : > { %v4121_v42 = vmax.f32 %v10992_v21, 0.0 }
 0x579   : > { %v4119_v56 = vmax.f32 %v10994_v50, 0.0 }
 0x57a   : > { %v4161_v55 = vpack.c.bf16 %v4121_v42, %v4120_v16  ;;  %v12331_v16 = vld [vmem:[#allocation135_spill] sm:$0xff] }
 0x57b   : > { %v4160_v35 = vpack.c.bf16 %v4119_v56, %v4118_v25  ;;  %v1890_v42 = vadd.f32 %v12331_v16, %v10638_v28  ;;  %v12332_v25 = vld [vmem:[#allocation19_spill] sm:$0xff] }
 0x57d   : > { %8085 = vmatprep.mubr.bf16.mxu0 %v4160_v35  ;;  %v12333_v35 = vld [vmem:[#allocation140_spill] sm:$0xff] }
 0x57e   : > { %8086 = vmatmul.mubr.bf16.gmra.mrb[28].mxu0 %v4161_v55 }
 0x57f   : > { %v8011_v62 = vpop.f32.mrb[0].mxu1 }
 0x580   : > { %v3854_v18 = vadd.f32 %v8011_v62, %v10633_v31  ;;  %v3845_v2 = vpop.f32.mrb[1].mxu1  ;;  %v1901_v62 = vadd.f32 %v12333_v35, %v10638_v28 }
 0x581   : > { %v3846_v8 = vadd.f32 %v10633_v31, %v3845_v2  ;;  %v8012_v22 = vpop.f32.mrb[2].mxu1 }
 0x582   : > { %v3958_v32 = vadd.f32 %v3854_v18, %v12330_v27  ;;  %v3857_v38 = vadd.f32 %v8012_v22, %v10633_v31  ;;  %v3848_v12 = vpop.f32.mrb[3].mxu1  ;;  %v1893_v18 = vadd.f32 %v12335_v36, %v10638_v28  ;;  %v12336_v22 = vld [vmem:[#allocation28_spill] sm:$0xff] }
 0x583   : > { %v3956_v56 = vadd.f32 %v3846_v8, %v12332_v25  ;;  %v3849_v55 = vadd.f32 %v10633_v31, %v3848_v12 }
 0x584   : > { %v11012_v2 = vadd.f32 %v3958_v32, %v1898_v43  ;;  %v3959_v47 = vadd.f32 %v3857_v38, %v12334_v49 }
 0x585   : > { %v11017_v27 = vadd.f32 %v3956_v56, %v1890_v42  ;;  %v3957_v24 = vadd.f32 %v3849_v55, %v12336_v22  ;;  %v12337_v55 = vld [vmem:[#allocation143_spill] sm:$0xff] }
 0x586   : > { %v11020_v19 = vadd.f32 %v3959_v47, %v1901_v62  ;;  %v4124_v8 = vmax.f32 %v11012_v2, 0.0  ;;  %v1914_v35 = vadd.f32 %v12337_v55, %v10638_v28  ;;  %v12338_v62 = vld [vmem:[#allocation23_spill] sm:$0xff]  ;;  %v12344_v55 = vld [vmem:[#allocation142_spill] sm:$0xff] }
 0x587   : > { %v11022_v16 = vadd.f32 %v3957_v24, %v1893_v18  ;;  %v4122_v43 = vmax.f32 %v11017_v27, 0.0 }
 0x588   : > { %v4125_v12 = vmax.f32 %v11020_v19, 0.0 }
 0x589   : > { %v4123_v32 = vmax.f32 %v11022_v16, 0.0 }
 0x58a   : > { %v4163_v49 = vpack.c.bf16 %v4125_v12, %v4124_v8  ;;  %v12339_v8 = vld [vmem:[#allocation141_spill] sm:$0xff] }
 0x58b   : > { %v4162_v38 = vpack.c.bf16 %v4123_v32, %v4122_v43  ;;  %v1906_v12 = vadd.f32 %v12339_v8, %v10638_v28  ;;  %v12340_v43 = vld [vmem:[#allocation22_spill] sm:$0xff] }
 0x58d   : > { %8089 = vmatprep.mubr.bf16.mxu0 %v4162_v38  ;;  %v12341_v38 = vld [vmem:[#allocation144_spill] sm:$0xff] }
 0x58e   : > { %8090 = vmatmul.mubr.bf16.gmra.mrb[32].mxu0 %v4163_v49 }
 0x58f   : > { %v8015_v42 = vpop.f32.mrb[4].mxu1 }
 0x590   : > { %v3870_v25 = vadd.f32 %v8015_v42, %v10633_v31  ;;  %v3861_v56 = vpop.f32.mrb[5].mxu1  ;;  %v1917_v42 = vadd.f32 %v12341_v38, %v10638_v28 }
 0x591   : > { %v3862_v47 = vadd.f32 %v10633_v31, %v3861_v56  ;;  %v8016_v24 = vpop.f32.mrb[6].mxu1 }
 0x592   : > { %v3962_v36 = vadd.f32 %v3870_v25, %v12338_v62  ;;  %v3873_v18 = vadd.f32 %v8016_v24, %v10633_v31  ;;  %v3864_v22 = vpop.f32.mrb[7].mxu1  ;;  %v1909_v25 = vadd.f32 %v12344_v55, %v10638_v28  ;;  %v12346_v24 = vld [vmem:[#allocation37_spill] sm:$0xff] }
 0x593   : > { %v3960_v32 = vadd.f32 %v3862_v47, %v12340_v43  ;;  %v3865_v49 = vadd.f32 %v10633_v31, %v3864_v22 }
 0x594   : > { %v11040_v56 = vadd.f32 %v3962_v36, %v1914_v35  ;;  %v3963_v52 = vadd.f32 %v3873_v18, %v12343_v7 }
 0x595   : > { %v11045_v62 = vadd.f32 %v3960_v32, %v1906_v12  ;;  %v3961_v20 = vadd.f32 %v3865_v49, %v12346_v24  ;;  %v12349_v49 = vld [vmem:[#allocation147_spill] sm:$0xff] }
 0x596   : > { %12342 = vst [vmem:[#allocation64_spill] sm:$0xff] %v11040_v56  ;;  %v11048_v3 = vadd.f32 %v3963_v52, %v1917_v42  ;;  %v4128_v47 = vmax.f32 %v11040_v56, 0.0  ;;  %v1930_v38 = vadd.f32 %v12349_v49, %v10638_v28  ;;  %v12350_v42 = vld [vmem:[#allocation32_spill] sm:$0xff]  ;;  %v12355_v49 = vld [vmem:[#allocation146_spill] sm:$0xff] }
 0x597   : > { %12345 = vst [vmem:[#allocation59_spill] sm:$0xff] %v11045_v62  ;;  %v11050_v8 = vadd.f32 %v3961_v20, %v1909_v25  ;;  %v4126_v35 = vmax.f32 %v11045_v62, 0.0 }
 0x598   : > { %12347 = vst [vmem:[#allocation58_spill] sm:$0xff] %v11048_v3  ;;  %v4129_v22 = vmax.f32 %v11048_v3, 0.0 }
 0x599   : > { %12348 = vst [vmem:[#allocation74_spill] sm:$0xff] %v11050_v8  ;;  %v4127_v36 = vmax.f32 %v11050_v8, 0.0  ;;  %v12354_v8 = vld [vmem:[#allocation41_spill] sm:$0xff] }
 0x59a   : > { %v4165_v7 = vpack.c.bf16 %v4129_v22, %v4128_v47  ;;  %v12351_v47 = vld [vmem:[#allocation145_spill] sm:$0xff] }
 0x59b   : > { %v4164_v18 = vpack.c.bf16 %v4127_v36, %v4126_v35  ;;  %v1922_v22 = vadd.f32 %v12351_v47, %v10638_v28  ;;  %v12352_v35 = vld [vmem:[#allocation31_spill] sm:$0xff] }
 0x59d   : > { %8093 = vmatprep.mubr.bf16.mxu0 %v4164_v18  ;;  %v12353_v18 = vld [vmem:[#allocation148_spill] sm:$0xff] }
 0x59e   : > { %8094 = vmatmul.mubr.bf16.gmra.mrb[36].mxu0 %v4165_v7 }
 0x59f   : > { %v8019_v12 = vpop.f32.mrb[8].mxu1 }
 0x5a0   : > { %v3886_v43 = vadd.f32 %v8019_v12, %v10633_v31  ;;  %v3877_v32 = vpop.f32.mrb[9].mxu1  ;;  %v1933_v12 = vadd.f32 %v12353_v18, %v10638_v28 }
 0x5a1   : > { %v3878_v52 = vadd.f32 %v10633_v31, %v3877_v32  ;;  %v8020_v20 = vpop.f32.mrb[10].mxu1 }
 0x5a2   : > { %v3966_v55 = vadd.f32 %v3886_v43, %v12350_v42  ;;  %v3889_v25 = vadd.f32 %v8020_v20, %v10633_v31  ;;  %v3880_v24 = vpop.f32.mrb[11].mxu1  ;;  %v1925_v43 = vadd.f32 %v12355_v49, %v10638_v28  ;;  %v12356_v20 = vld [vmem:[#allocation40_spill] sm:$0xff] }
 0x5a3   : > { %v3964_v36 = vadd.f32 %v3878_v52, %v12352_v35  ;;  %v3881_v7 = vadd.f32 %v10633_v31, %v3880_v24 }
 0x5a4   : > { %v11068_v32 = vadd.f32 %v3966_v55, %v1930_v38  ;;  %v3967_v3 = vadd.f32 %v3889_v25, %v12354_v8 }
 0x5a5   : > { %v11073_v42 = vadd.f32 %v3964_v36, %v1922_v22  ;;  %v3965_v62 = vadd.f32 %v3881_v7, %v12356_v20  ;;  %v12358_v7 = vld [vmem:[#allocation151_spill] sm:$0xff]  ;;  %v12359_v20 = vld [vmem:[#allocation149_spill] sm:$0xff] }
 0x5a6   : > { %v11076_v56 = vadd.f32 %v3967_v3, %v1933_v12  ;;  %v4132_v52 = vmax.f32 %v11068_v32, 0.0  ;;  %v1946_v18 = vadd.f32 %v12358_v7, %v10638_v28 }
 0x5a7   : > { %v11078_v47 = vadd.f32 %v3965_v62, %v1925_v43  ;;  %v4130_v38 = vmax.f32 %v11073_v42, 0.0 }
 0x5a8   : > { %v4133_v24 = vmax.f32 %v11076_v56, 0.0 }
 0x5a9   : > { %12357 = vst [vmem:[#allocation73_spill] sm:$0xff] %v11078_v47  ;;  %v4131_v55 = vmax.f32 %v11078_v47, 0.0 }
 0x5aa   : > { %v4167_v8 = vpack.c.bf16 %v4133_v24, %v4132_v52  ;;  %v1938_v52 = vadd.f32 %v12359_v20, %v10638_v28 }
 0x5ab   : > { %v4166_v25 = vpack.c.bf16 %v4131_v55, %v4130_v38  ;;  %v12360_v55 = vld [vmem:[#allocation152_spill] sm:$0xff] }
 0x5ad   : > { %8097 = vmatprep.mubr.bf16.mxu0 %v4166_v25 }
 0x5ae   : > { %8098 = vmatmul.mubr.bf16.gmra.mrb[40].mxu0 %v4167_v8  ;;  %v1949_v8 = vadd.f32 %v12360_v55, %v10638_v28 }
 0x5af   : > { %v8023_v22 = vpop.f32.mrb[12].mxu1 }
 0x5b0   : > { %v3902_v35 = vadd.f32 %v8023_v22, %v10633_v31  ;;  %v3893_v36 = vpop.f32.mrb[13].mxu1 }
 0x5b1   : > { %v3894_v3 = vadd.f32 %v10633_v31, %v3893_v36  ;;  %v8024_v62 = vpop.f32.mrb[14].mxu1  ;;  %v12361_v36 = vld [vmem:[#allocation150_spill] sm:$0xff] }
 0x5b2   : > { %v3970_v12 = vadd.f32 %v3902_v35, %v10520_v30  ;;  %v3905_v49 = vadd.f32 %v8024_v62, %v10633_v31  ;;  %v3896_v43 = vpop.f32.mrb[15].mxu1  ;;  %v1941_v30 = vadd.f32 %v12361_v36, %v10638_v28  ;;  %v12362_v62 = vld [vmem:[#allocation35_spill] sm:$0xff] }
 0x5b3   : > { %v3968_v24 = vadd.f32 %v3894_v3, %v10525_v17  ;;  %v3897_v38 = vadd.f32 %v10633_v31, %v3896_v43  ;;  %v11115_v28 = vld [vmem:[%s11912_s4 + $0x2] ss:$0 sm:$0xff] }
 0x5b4   : > { %v11096_v25 = vadd.f32 %v3970_v12, %v1946_v18  ;;  %v3971_v22 = vadd.f32 %v3905_v49, %v10528_v61 }
 0x5b5   : > { %v11101_v35 = vadd.f32 %v3968_v24, %v1938_v52  ;;  %v3969_v7 = vadd.f32 %v3897_v38, %v12362_v62 }
 0x5b6   : > { %v11104_v47 = vadd.f32 %v3971_v22, %v1949_v8  ;;  %v4136_v17 = vmax.f32 %v11096_v25, 0.0 }
 0x5b7   : > { %v11106_v20 = vadd.f32 %v3969_v7, %v1941_v30  ;;  %v4134_v3 = vmax.f32 %v11101_v35, 0.0 }
 0x5b8   : > { %v4137_v31 = vmax.f32 %v11104_v47, 0.0 }
 0x5b9   : > { %12363 = vst [vmem:[#allocation69_spill] sm:$0xff] %v11106_v20  ;;  %v4135_v18 = vmax.f32 %v11106_v20, 0.0 }
 0x5ba   : > { %v4169_v61 = vpack.c.bf16 %v4137_v31, %v4136_v17 }
 0x5bb   : > { %v4168_v12 = vpack.c.bf16 %v4135_v18, %v4134_v3 }
 0x5bd   : > { %v8043_v49 = vpop.f32.mrb[240].mxu0  ;;  %8101 = vmatprep.mubr.bf16.mxu0 %v4168_v12 }
 0x5be   : > { %v4267_v43 = vadd.f32 %v8043_v49, %v11115_v28  ;;  %v4258_v52 = vpop.f32.mrb[241].mxu0  ;;  %8102 = vmatmul.mubr.bf16.gmra.mrb[44].mxu0 %v4169_v61 }
 0x5bf   : > { %v4259_v24 = vadd.f32 %v11115_v28, %v4258_v52  ;;  %v8044_v38 = vpop.f32.mrb[242].mxu0 }
 0x5c0   : > { %v4270_v55 = vadd.f32 %v8044_v38, %v11115_v28  ;;  %v4261_v8 = vpop.f32.mrb[243].mxu0  ;;  %v4515_v36 = vmax.f32 %v4267_v43, 0.0 }
 0x5c1   : > { %v4262_v22 = vadd.f32 %v11115_v28, %v4261_v8  ;;  %v4513_v62 = vmax.f32 %v4259_v24, 0.0 }
 0x5c2   : > { %v4516_v30 = vmax.f32 %v4270_v55, 0.0 }
 0x5c3   : > { %v4514_v7 = vmax.f32 %v4262_v22, 0.0 }
 0x5c4   : > { %v4578_v17 = vpack.c.bf16 %v4516_v30, %v4515_v36 }
 0x5c5   : > { %v4577_v31 = vpack.c.bf16 %v4514_v7, %v4513_v62  ;;  %v8047_v3 = vpop.f32.mrb[244].mxu0 }
 0x5c6   : > { %v4283_v18 = vadd.f32 %v8047_v3, %v11115_v28  ;;  %v4274_v12 = vpop.f32.mrb[245].mxu0 }
 0x5c7   : > { %v4275_v61 = vadd.f32 %v11115_v28, %v4274_v12  ;;  %v8048_v49 = vpop.f32.mrb[246].mxu0  ;;  %8121 = vmatprep.mubr.bf16.mxu1 %v4577_v31 }
 0x5c8   : > { %v4286_v52 = vadd.f32 %v8048_v49, %v11115_v28  ;;  %v4277_v38 = vpop.f32.mrb[247].mxu0  ;;  %8122 = vmatmul.mubr.bf16.vlgmr.msra.gmra.mrb[16].mxu1 %v4578_v17  ;;  %v4519_v43 = vmax.f32 %v4283_v18, 0.0 }
 0x5c9   : > { %v4278_v8 = vadd.f32 %v11115_v28, %v4277_v38  ;;  %v4517_v24 = vmax.f32 %v4275_v61, 0.0 }
 0x5ca   : > { %v4520_v55 = vmax.f32 %v4286_v52, 0.0 }
 0x5cb   : > { %v4518_v22 = vmax.f32 %v4278_v8, 0.0 }
 0x5cc   : > { %v4580_v36 = vpack.c.bf16 %v4520_v55, %v4519_v43 }
 0x5cd   : > { %v4579_v30 = vpack.c.bf16 %v4518_v22, %v4517_v24  ;;  %v8051_v62 = vpop.f32.mrb[248].mxu0 }
 0x5ce   : > { %v4299_v7 = vadd.f32 %v8051_v62, %v11115_v28  ;;  %v4290_v3 = vpop.f32.mrb[249].mxu0 }
 0x5cf   : > { %v4291_v12 = vadd.f32 %v11115_v28, %v4290_v3  ;;  %v8052_v20 = vpop.f32.mrb[250].mxu0  ;;  %8125 = vmatprep.mubr.bf16.mxu1 %v4579_v30 }
 0x5d0   : > { %v4302_v31 = vadd.f32 %v8052_v20, %v11115_v28  ;;  %v4293_v49 = vpop.f32.mrb[251].mxu0  ;;  %8126 = vmatmul.mubr.bf16.gmra.mrb[20].mxu1 %v4580_v36  ;;  %v4523_v18 = vmax.f32 %v4299_v7, 0.0 }
 0x5d1   : > { %v4294_v17 = vadd.f32 %v11115_v28, %v4293_v49  ;;  %v4521_v61 = vmax.f32 %v4291_v12, 0.0 }
 0x5d2   : > { %v4524_v52 = vmax.f32 %v4302_v31, 0.0 }
 0x5d3   : > { %v4522_v38 = vmax.f32 %v4294_v17, 0.0 }
 0x5d4   : > { %v4582_v8 = vpack.c.bf16 %v4524_v52, %v4523_v18 }
 0x5d5   : > { %v4581_v43 = vpack.c.bf16 %v4522_v38, %v4521_v61  ;;  %v8055_v55 = vpop.f32.mrb[252].mxu0 }
 0x5d6   : > { %v4315_v24 = vadd.f32 %v8055_v55, %v11115_v28  ;;  %v4306_v22 = vpop.f32.mrb[253].mxu0 }
 0x5d7   : > { %v4307_v62 = vadd.f32 %v11115_v28, %v4306_v22  ;;  %v8056_v3 = vpop.f32.mrb[254].mxu0  ;;  %8129 = vmatprep.mubr.bf16.mxu1 %v4581_v43 }
 0x5d8   : > { %v4318_v20 = vadd.f32 %v8056_v3, %v11115_v28  ;;  %v4309_v30 = vpop.f32.mrb[255].mxu0  ;;  %8130 = vmatmul.mubr.bf16.gmra.mrb[24].mxu1 %v4582_v8  ;;  %v4527_v7 = vmax.f32 %v4315_v24, 0.0 }
 0x5d9   : > { %v4310_v36 = vadd.f32 %v11115_v28, %v4309_v30  ;;  %v4525_v12 = vmax.f32 %v4307_v62, 0.0 }
 0x5da   : > { %v4528_v31 = vmax.f32 %v4318_v20, 0.0 }
 0x5db   : > { %v4526_v49 = vmax.f32 %v4310_v36, 0.0 }
 0x5dc   : > { %v4584_v17 = vpack.c.bf16 %v4528_v31, %v4527_v7 }
 0x5dd   : > { %v4583_v18 = vpack.c.bf16 %v4526_v49, %v4525_v12 }
 0x5df   : > { %8133 = vmatprep.mubr.bf16.mxu1 %v4583_v18 }
 0x5e0   : > { %8134 = vmatmul.mubr.bf16.gmra.mrb[28].mxu1 %v4584_v17 }
 0x5e1   : > { %v8059_v52 = vpop.f32.mrb[0].mxu0 }
 0x5e2   : > { %v4331_v61 = vadd.f32 %v8059_v52, %v11115_v28  ;;  %v4322_v38 = vpop.f32.mrb[1].mxu0 }
 0x5e3   : > { %v4323_v43 = vadd.f32 %v11115_v28, %v4322_v38  ;;  %v8060_v55 = vpop.f32.mrb[2].mxu0 }
 0x5e4   : > { %v4334_v22 = vadd.f32 %v8060_v55, %v11115_v28  ;;  %v4325_v8 = vpop.f32.mrb[3].mxu0  ;;  %v4531_v24 = vmax.f32 %v4331_v61, 0.0 }
 0x5e5   : > { %v4326_v3 = vadd.f32 %v11115_v28, %v4325_v8  ;;  %v4529_v62 = vmax.f32 %v4323_v43, 0.0 }
 0x5e6   : > { %v4532_v20 = vmax.f32 %v4334_v22, 0.0 }
 0x5e7   : > { %v4530_v30 = vmax.f32 %v4326_v3, 0.0 }
 0x5e8   : > { %v4586_v36 = vpack.c.bf16 %v4532_v20, %v4531_v24 }
 0x5e9   : > { %v4585_v7 = vpack.c.bf16 %v4530_v30, %v4529_v62 }
 0x5eb   : > { %8137 = vmatprep.mubr.bf16.mxu1 %v4585_v7 }
 0x5ec   : > { %8138 = vmatmul.mubr.bf16.gmra.mrb[32].mxu1 %v4586_v36 }
 0x5f1   : > { %v8063_v31 = vpop.f32.mrb[4].mxu0 }
 0x5f2   : > { %v4347_v12 = vadd.f32 %v8063_v31, %v11115_v28  ;;  %v4338_v49 = vpop.f32.mrb[5].mxu0 }
 0x5f3   : > { %v4339_v17 = vadd.f32 %v11115_v28, %v4338_v49  ;;  %v8064_v18 = vpop.f32.mrb[6].mxu0 }
 0x5f4   : > { %v4350_v52 = vadd.f32 %v8064_v18, %v11115_v28  ;;  %v4341_v38 = vpop.f32.mrb[7].mxu0  ;;  %v4535_v61 = vmax.f32 %v4347_v12, 0.0 }
 0x5f5   : > { %v4342_v55 = vadd.f32 %v11115_v28, %v4341_v38  ;;  %v4533_v43 = vmax.f32 %v4339_v17, 0.0 }
 0x5f6   : > { %v4536_v22 = vmax.f32 %v4350_v52, 0.0 }
 0x5f7   : > { %v4534_v8 = vmax.f32 %v4342_v55, 0.0 }
 0x5f8   : > { %v4588_v3 = vpack.c.bf16 %v4536_v22, %v4535_v61 }
 0x5f9   : > { %v4587_v24 = vpack.c.bf16 %v4534_v8, %v4533_v43 }
 0x5fb   : > { %8141 = vmatprep.mubr.bf16.mxu1 %v4587_v24 }
 0x5fc   : > { %8142 = vmatmul.mubr.bf16.gmra.mrb[36].mxu1 %v4588_v3 }
 0x601   : > { %v8067_v20 = vpop.f32.mrb[8].mxu0 }
 0x602   : > { %v4363_v62 = vadd.f32 %v8067_v20, %v11115_v28  ;;  %v4354_v30 = vpop.f32.mrb[9].mxu0 }
 0x603   : > { %v4355_v36 = vadd.f32 %v11115_v28, %v4354_v30  ;;  %v8068_v7 = vpop.f32.mrb[10].mxu0 }
 0x604   : > { %v4366_v31 = vadd.f32 %v8068_v7, %v11115_v28  ;;  %v4357_v49 = vpop.f32.mrb[11].mxu0  ;;  %v4539_v12 = vmax.f32 %v4363_v62, 0.0 }
 0x605   : > { %v4358_v18 = vadd.f32 %v11115_v28, %v4357_v49  ;;  %v4537_v17 = vmax.f32 %v4355_v36, 0.0 }
 0x606   : > { %v4540_v52 = vmax.f32 %v4366_v31, 0.0 }
 0x607   : > { %v4538_v38 = vmax.f32 %v4358_v18, 0.0 }
 0x608   : > { %v4590_v55 = vpack.c.bf16 %v4540_v52, %v4539_v12  ;;  %v8814_v52 = vld [vmem:[%s11911_s3 + $0xc0] sm:$0xff]  }
 0x609   : > { %v4589_v61 = vpack.c.bf16 %v4538_v38, %v4537_v17  ;;  %v8815_v17 = vld [vmem:[%s11911_s3 + $0xc8] sm:$0xff]   ;;  %8185 = vmatprep.subr.bf16.mxu0 %v8814_v52  ;;  %v8816_v38 = vld [vmem:[%s11911_s3 + $0xd0] sm:$0xff]  }
 0x60a   : > { %8186 = vmatpush3.bf16.msra.mxu0 %v8814_v52 }
 0x60b   : > { %8145 = vmatprep.mubr.bf16.mxu1 %v4589_v61  ;;  %8187 = vmatprep.subr.bf16.mxu0 %v8815_v17 }
 0x60c   : > { %8146 = vmatmul.mubr.bf16.gmra.mrb[40].mxu1 %v4590_v55 }
 0x60e   : > { %8188 = vmatpush3.bf16.msra.mxu0 %v8815_v17 }
 0x60f   : > { %8189 = vmatprep.subr.bf16.mxu0 %v8816_v38 }
 0x611   : > { %v8071_v22 = vpop.f32.mrb[12].mxu0 }
 0x612   : > { %v4379_v43 = vadd.f32 %v8071_v22, %v11115_v28  ;;  %v4370_v8 = vpop.f32.mrb[13].mxu0  ;;  %8190 = vmatpush3.bf16.msra.mxu0 %v8816_v38 }
 0x613   : > { %v4371_v3 = vadd.f32 %v11115_v28, %v4370_v8  ;;  %v8072_v24 = vpop.f32.mrb[14].mxu0 }
 0x614   : > { %v4382_v20 = vadd.f32 %v8072_v24, %v11115_v28  ;;  %v4373_v30 = vpop.f32.mrb[15].mxu0  ;;  %v4543_v62 = vmax.f32 %v4379_v43, 0.0 }
 0x615   : > { %v4374_v7 = vadd.f32 %v11115_v28, %v4373_v30  ;;  %v4541_v36 = vmax.f32 %v4371_v3, 0.0 }
 0x616   : > { %v4544_v31 = vmax.f32 %v4382_v20, 0.0  ;;  %v8817_v20 = vld [vmem:[%s11911_s3 + $0xd8] sm:$0xff]  }
 0x617   : > { %v4542_v49 = vmax.f32 %v4374_v7, 0.0  ;;  %8191 = vmatprep.subr.bf16.mxu0 %v8817_v20 }
 0x618   : > { %v4592_v18 = vpack.c.bf16 %v4544_v31, %v4543_v62  ;;  %8192 = vmatpush3.bf16.msra.mxu0 %v8817_v20 }
 0x619   : > { %v4591_v12 = vpack.c.bf16 %v4542_v49, %v4541_v36 }
 0x61b   : > { %8149 = vmatprep.mubr.bf16.mxu1 %v4591_v12 }
 0x61c   : > { %8150 = vmatmul.mubr.bf16.gmra.mrb[44].mxu1 %v4592_v18  ;;  %v8818_v18 = vld [vmem:[%s11911_s3 + $0xe0] sm:$0xff]  }
 0x61d   : > { %8193 = vmatprep.subr.bf16.mxu0 %v8818_v18 }
 0x61e   : > { %8194 = vmatpush3.bf16.msra.mxu0 %v8818_v18 }
 0x621   : > { %v8075_v55 = vpop.f32.mrb[16].mxu0 }
 0x622   : > { %v4395_v61 = vadd.f32 %v8075_v55, %v11115_v28  ;;  %v4386_v22 = vpop.f32.mrb[17].mxu0 }
 0x623   : > { %v4387_v43 = vadd.f32 %v11115_v28, %v4386_v22  ;;  %v8076_v8 = vpop.f32.mrb[18].mxu0 }
 0x624   : > { %v4398_v3 = vadd.f32 %v8076_v8, %v11115_v28  ;;  %v4389_v24 = vpop.f32.mrb[19].mxu0  ;;  %v4547_v7 = vmax.f32 %v4395_v61, 0.0 }
 0x625   : > { %v4390_v30 = vadd.f32 %v11115_v28, %v4389_v24  ;;  %v4545_v31 = vmax.f32 %v4387_v43, 0.0 }
 0x626   : > { %v4548_v62 = vmax.f32 %v4398_v3, 0.0 }
 0x627   : > { %v4546_v36 = vmax.f32 %v4390_v30, 0.0 }
 0x628   : > { %v4594_v49 = vpack.c.bf16 %v4548_v62, %v4547_v7 }
 0x629   : > { %v4593_v12 = vpack.c.bf16 %v4546_v36, %v4545_v31 }
 0x62b   : > { %8153 = vmatprep.mubr.bf16.mxu1 %v4593_v12 }
 0x62c   : > { %8154 = vmatmul.mubr.bf16.gmra.mrb[16].mxu1 %v4594_v49 }
 0x631   : > { %v8079_v52 = vpop.f32.mrb[20].mxu0 }
 0x632   : > { %v4411_v17 = vadd.f32 %v8079_v52, %v11115_v28  ;;  %v4402_v55 = vpop.f32.mrb[21].mxu0 }
 0x633   : > { %v4403_v61 = vadd.f32 %v11115_v28, %v4402_v55  ;;  %v8080_v22 = vpop.f32.mrb[22].mxu0 }
 0x634   : > { %v4414_v38 = vadd.f32 %v8080_v22, %v11115_v28  ;;  %v4405_v43 = vpop.f32.mrb[23].mxu0  ;;  %v4551_v3 = vmax.f32 %v4411_v17, 0.0 }
 0x635   : > { %v4406_v8 = vadd.f32 %v11115_v28, %v4405_v43  ;;  %v4549_v30 = vmax.f32 %v4403_v61, 0.0 }
 0x636   : > { %v4552_v24 = vmax.f32 %v4414_v38, 0.0 }
 0x637   : > { %v4550_v7 = vmax.f32 %v4406_v8, 0.0 }
 0x638   : > { %v4596_v20 = vpack.c.bf16 %v4552_v24, %v4551_v3 }
 0x639   : > { %v4595_v62 = vpack.c.bf16 %v4550_v7, %v4549_v30 }
 0x63b   : > { %8157 = vmatprep.mubr.bf16.mxu1 %v4595_v62 }
 0x63c   : > { %8158 = vmatmul.mubr.bf16.gmra.mrb[20].mxu1 %v4596_v20 }
 0x641   : > { %v8083_v31 = vpop.f32.mrb[24].mxu0 }
 0x642   : > { %v4427_v36 = vadd.f32 %v8083_v31, %v11115_v28  ;;  %v4418_v49 = vpop.f32.mrb[25].mxu0 }
 0x643   : > { %v4419_v18 = vadd.f32 %v11115_v28, %v4418_v49  ;;  %v8084_v12 = vpop.f32.mrb[26].mxu0 }
 0x644   : > { %v4430_v52 = vadd.f32 %v8084_v12, %v11115_v28  ;;  %v4421_v55 = vpop.f32.mrb[27].mxu0  ;;  %v4555_v17 = vmax.f32 %v4427_v36, 0.0 }
 0x645   : > { %v4422_v22 = vadd.f32 %v11115_v28, %v4421_v55  ;;  %v4553_v61 = vmax.f32 %v4419_v18, 0.0 }
 0x646   : > { %v4556_v38 = vmax.f32 %v4430_v52, 0.0 }
 0x647   : > { %v4554_v43 = vmax.f32 %v4422_v22, 0.0 }
 0x648   : > { %v4598_v8 = vpack.c.bf16 %v4556_v38, %v4555_v17 }
 0x649   : > { %v4597_v3 = vpack.c.bf16 %v4554_v43, %v4553_v61 }
 0x64b   : > { %8161 = vmatprep.mubr.bf16.mxu1 %v4597_v3 }
 0x64c   : > { %8162 = vmatmul.mubr.bf16.gmra.mrb[24].mxu1 %v4598_v8 }
 0x651   : > { %v8087_v24 = vpop.f32.mrb[28].mxu0 }
 0x652   : > { %v4443_v30 = vadd.f32 %v8087_v24, %v11115_v28  ;;  %v4434_v7 = vpop.f32.mrb[29].mxu0 }
 0x653   : > { %v4435_v20 = vadd.f32 %v11115_v28, %v4434_v7  ;;  %v8088_v62 = vpop.f32.mrb[30].mxu0 }
 0x654   : > { %v4446_v31 = vadd.f32 %v8088_v62, %v11115_v28  ;;  %v4437_v49 = vpop.f32.mrb[31].mxu0  ;;  %v4559_v36 = vmax.f32 %v4443_v30, 0.0 }
 0x655   : > { %v4438_v12 = vadd.f32 %v11115_v28, %v4437_v49  ;;  %v4557_v18 = vmax.f32 %v4435_v20, 0.0 }
 0x656   : > { %v4560_v52 = vmax.f32 %v4446_v31, 0.0 }
 0x657   : > { %v4558_v55 = vmax.f32 %v4438_v12, 0.0 }
 0x658   : > { %v4600_v22 = vpack.c.bf16 %v4560_v52, %v4559_v36 }
 0x659   : > { %v4599_v17 = vpack.c.bf16 %v4558_v55, %v4557_v18 }
 0x65b   : > { %8165 = vmatprep.mubr.bf16.mxu1 %v4599_v17 }
 0x65c   : > { %8166 = vmatmul.mubr.bf16.gmra.mrb[28].mxu1 %v4600_v22 }
 0x661   : > { %v8091_v38 = vpop.f32.mrb[32].mxu0 }
 0x662   : > { %v4459_v61 = vadd.f32 %v8091_v38, %v11115_v28  ;;  %v4450_v43 = vpop.f32.mrb[33].mxu0 }
 0x663   : > { %v4451_v8 = vadd.f32 %v11115_v28, %v4450_v43  ;;  %v8092_v3 = vpop.f32.mrb[34].mxu0 }
 0x664   : > { %v4462_v24 = vadd.f32 %v8092_v3, %v11115_v28  ;;  %v4453_v7 = vpop.f32.mrb[35].mxu0  ;;  %v4563_v30 = vmax.f32 %v4459_v61, 0.0 }
 0x665   : > { %v4454_v62 = vadd.f32 %v11115_v28, %v4453_v7  ;;  %v4561_v20 = vmax.f32 %v4451_v8, 0.0 }
 0x666   : > { %v4564_v31 = vmax.f32 %v4462_v24, 0.0 }
 0x667   : > { %v4562_v49 = vmax.f32 %v4454_v62, 0.0 }
 0x668   : > { %v4602_v12 = vpack.c.bf16 %v4564_v31, %v4563_v30  ;;  %v8819_v31 = vld [vmem:[%s11911_s3 + $0xe8] sm:$0xff]  }
 0x669   : > { %v4601_v36 = vpack.c.bf16 %v4562_v49, %v4561_v20  ;;  %8195 = vmatprep.subr.bf16.mxu0 %v8819_v31 }
 0x66a   : > { %8196 = vmatpush3.bf16.msra.mxu0 %v8819_v31 }
 0x66b   : > { %8169 = vmatprep.mubr.bf16.mxu1 %v4601_v36  ;;  %v8820_v36 = vld [vmem:[%s11911_s3 + $0xf0] sm:$0xff]  }
 0x66c   : > { %8170 = vmatmul.mubr.bf16.gmra.mrb[32].mxu1 %v4602_v12  ;;  %8197 = vmatprep.subr.bf16.mxu0 %v8820_v36 }
 0x66e   : > { %8198 = vmatpush3.bf16.msra.mxu0 %v8820_v36 }
 0x671   : > { %v8095_v52 = vpop.f32.mrb[36].mxu0 }
 0x672   : > { %v4475_v18 = vadd.f32 %v8095_v52, %v11115_v28  ;;  %v4466_v55 = vpop.f32.mrb[37].mxu0 }
 0x673   : > { %v4467_v22 = vadd.f32 %v11115_v28, %v4466_v55  ;;  %v8096_v17 = vpop.f32.mrb[38].mxu0 }
 0x674   : > { %v4478_v38 = vadd.f32 %v8096_v17, %v11115_v28  ;;  %v4469_v43 = vpop.f32.mrb[39].mxu0  ;;  %v4567_v61 = vmax.f32 %v4475_v18, 0.0 }
 0x675   : > { %v4470_v3 = vadd.f32 %v11115_v28, %v4469_v43  ;;  %v4565_v8 = vmax.f32 %v4467_v22, 0.0 }
 0x676   : > { %v4568_v24 = vmax.f32 %v4478_v38, 0.0 }
 0x677   : > { %v4566_v7 = vmax.f32 %v4470_v3, 0.0  ;;  %v8821_v3 = vld [vmem:[%s11911_s3 + $0xf8] sm:$0xff]  }
 0x678   : > { %v4604_v62 = vpack.c.bf16 %v4568_v24, %v4567_v61  ;;  %8199 = vmatprep.subr.bf16.mxu0 %v8821_v3 }
 0x679   : > { %v4603_v30 = vpack.c.bf16 %v4566_v7, %v4565_v8  ;;  %8200 = vmatpush3.bf16.msra.mxu0 %v8821_v3  ;;  %v8441_v3 = vadd.f32 %v10900_v57, %v10652_v23  ;;  %v8822_v57 = vld [vmem:[%s11913_s5 + $0xc0] sm:$0xff]  }
 0x67a   : > { %8233 = vmatprep.subr.bf16.mxu1 %v8822_v57 }
 0x67b   : > { %8173 = vmatprep.mubr.bf16.mxu1 %v4603_v30  ;;  %8234 = vmatpush3.bf16.msra.mxu1 %v8822_v57  ;;  %v8461_v57 = vadd.f32 %v10933_v48, %v10685_v13 }
 0x67c   : > { %8174 = vmatmul.mubr.bf16.gmra.mrb[36].mxu1 %v4604_v62 }
 0x681   : > { %v8099_v20 = vpop.f32.mrb[40].mxu0 }
 0x682   : > { %v4491_v49 = vadd.f32 %v8099_v20, %v11115_v28  ;;  %v4482_v12 = vpop.f32.mrb[41].mxu0 }
 0x683   : > { %v4483_v52 = vadd.f32 %v11115_v28, %v4482_v12  ;;  %v8100_v18 = vpop.f32.mrb[42].mxu0 }
 0x684   : > { %v4494_v55 = vadd.f32 %v8100_v18, %v11115_v28  ;;  %v4485_v22 = vpop.f32.mrb[43].mxu0  ;;  %v4571_v38 = vmax.f32 %v4491_v49, 0.0 }
 0x685   : > { %v4486_v17 = vadd.f32 %v11115_v28, %v4485_v22  ;;  %v4569_v61 = vmax.f32 %v4483_v52, 0.0 }
 0x686   : > { %v4572_v43 = vmax.f32 %v4494_v55, 0.0 }
 0x687   : > { %v4570_v24 = vmax.f32 %v4486_v17, 0.0 }
 0x688   : > { %v4606_v8 = vpack.c.bf16 %v4572_v43, %v4571_v38 }
 0x689   : > { %v4605_v7 = vpack.c.bf16 %v4570_v24, %v4569_v61  ;;  %v11210_v61 = vld [vmem:[%s11914_s6 + $0x2] ss:$0 sm:$0xff]  ;;  %v8445_v24 = vadd.f32 %v10905_v58, %v10657_v51  ;;  %v8823_v51 = vld [vmem:[%s11913_s5 + $0xc8] sm:$0xff]  }
 0x68a   : > { %8235 = vmatprep.subr.bf16.mxu1 %v8823_v51  ;;  %v8462_v13 = vadd.f32 %v8461_v57, %v11210_v61  ;;  %v8473_v57 = vadd.f32 %v10956_v45, %v10708_v4 }
 0x68b   : > { %8177 = vmatprep.mubr.bf16.mxu1 %v4605_v7  ;;  %v12365_v7 = vld [vmem:[#allocation50_spill] sm:$0xff]  ;;  %8236 = vmatpush3.bf16.msra.mxu1 %v8823_v51 }
 0x68c   : > { %8178 = vmatmul.mubr.bf16.gmra.mrb[40].mxu1 %v4606_v8 }
 0x691   : > { %v8103_v62 = vpop.f32.mrb[44].mxu0 }
 0x692   : > { %v4507_v30 = vadd.f32 %v8103_v62, %v11115_v28  ;;  %v4498_v31 = vpop.f32.mrb[45].mxu0  ;;  %v8453_v62 = vadd.f32 %v10910_v6, %v12365_v7 }
 0x693   : > { %v4499_v20 = vadd.f32 %v11115_v28, %v4498_v31  ;;  %v8104_v49 = vpop.f32.mrb[46].mxu0  ;;  %v8446_v31 = vadd.f32 %v8445_v24, %v11210_v61 }
 0x694   : > { %v4510_v12 = vadd.f32 %v8104_v49, %v11115_v28  ;;  %v4501_v36 = vpop.f32.mrb[47].mxu0  ;;  %v4575_v52 = vmax.f32 %v4507_v30, 0.0  ;;  %v8442_v30 = vadd.f32 %v8441_v3, %v11210_v61  ;;  %v8454_v58 = vadd.f32 %v8453_v62, %v11210_v61 }
 0x695   : > { %v4502_v18 = vadd.f32 %v11115_v28, %v4501_v36  ;;  %v4573_v22 = vmax.f32 %v4499_v20, 0.0  ;;  %v12364_v28 = vld [vmem:[#allocation34_spill] sm:$0xff]  ;;  %v8447_v20 = vadd.f32 %v8446_v31, %v11210_v61 }
 0x696   : > { %v4576_v55 = vmax.f32 %v4510_v12, 0.0  ;;  %v8449_v8 = vadd.f32 %v10908_v1, %v12364_v28  ;;  %v8443_v1 = vadd.f32 %v8442_v30, %v11210_v61  ;;  %v8457_v30 = vadd.f32 %v10928_v37, %v10680_v14 }
 0x697   : > { %v4574_v17 = vmax.f32 %v4502_v18, 0.0  ;;  %v8824_v18 = vld [vmem:[%s11913_s5 + $0xd0] sm:$0xff]   ;;  %v8469_v14 = vadd.f32 %v10938_v53, %v10690_v46  ;;  %v8463_v53 = vadd.f32 %v8462_v13, %v11210_v61 }
 0x698   : > { %v4608_v38 = vpack.c.bf16 %v4576_v55, %v4575_v52  ;;  %v8450_v23 = vadd.f32 %v8449_v8, %v11210_v61  ;;  %8237 = vmatprep.subr.bf16.mxu1 %v8824_v18  ;;  %v8825_v8 = vld [vmem:[%s11913_s5 + $0xd8] sm:$0xff]  }
 0x699   : > { %v4607_v43 = vpack.c.bf16 %v4574_v17, %v4573_v22  ;;  %v8455_v22 = vadd.f32 %v8454_v58, %v11210_v61  ;;  %8238 = vmatpush3.bf16.msra.mxu1 %v8824_v18  ;;  %v8465_v58 = vadd.f32 %v10936_v59, %v10688_v9  ;;  %v8827_v9 = vld [vmem:[%s11913_s5 + $0xe8] sm:$0xff]   ;;  %v8470_v59 = vadd.f32 %v8469_v14, %v11210_v61 }
 0x69a   : > { %v8451_v36 = vadd.f32 %v8450_v23, %v11210_v61  ;;  %8239 = vmatprep.subr.bf16.mxu1 %v8825_v8  ;;  %v8481_v14 = vadd.f32 %v10964_v5, %v10716_v39 }
 0x69b   : > { %8181 = vmatprep.mubr.bf16.mxu1 %v4607_v43  ;;  %v8466_v48 = vadd.f32 %v8465_v58, %v11210_v61 }
 0x69c   : > { %8182 = vmatmul.mubr.bf16.gmra.mrb[44].mxu1 %v4608_v38  ;;  %v8482_v45 = vadd.f32 %v8481_v14, %v11210_v61 }
 0x69d   : > { %8240 = vmatpush3.bf16.msra.mxu1 %v8825_v8  ;;  %v8467_v18 = vadd.f32 %v8466_v48, %v11210_v61  ;;  %v8474_v48 = vadd.f32 %v8473_v57, %v11210_v61  ;;  %v8493_v57 = vadd.f32 %v10989_v44, %v10741_v60 }
 0x6ff   : > { %v8155_v6 = vpop.f32.mrb[16].mxu1 }
 0x700   : > { %v8444_v49 = vadd.f32 %v8443_v1, %v8155_v6  ;;  %v4825_v12 = vpop.f32.mrb[17].mxu1  ;;  %v8826_v1 = vld [vmem:[%s11913_s5 + $0xe0] sm:$0xff]  }
 0x701   : > { %v8448_v52 = vadd.f32 %v8447_v20, %v4825_v12  ;;  %v8156_v55 = vpop.f32.mrb[18].mxu1  ;;  %v8458_v20 = vadd.f32 %v8457_v30, %v11210_v61  ;;  %8241 = vmatprep.subr.bf16.mxu1 %v8826_v1 }
 0x702   : > { %v8452_v17 = vadd.f32 %v8451_v36, %v8156_v55  ;;  %v4828_v38 = vpop.f32.mrb[19].mxu1  ;;  %v11237_v24 = vmul.f32 0.5, %v8444_v49  ;;  %8242 = vmatpush3.bf16.msra.mxu1 %v8826_v1  ;;  %v8477_v1 = vadd.f32 %v10961_v15, %v10713_v63  ;;  %v8475_v15 = vadd.f32 %v8474_v48, %v11210_v61 }
 0x703   : > { %v11235_v43 = vmul.f32 0.5, %v8448_v52  ;;  %v8456_v3 = vadd.f32 %v8455_v22, %v4828_v38  ;;  %v8459_v49 = vadd.f32 %v8458_v20, %v11210_v61  ;;  %8243 = vmatprep.subr.bf16.mxu1 %v8827_v9  ;;  %v8471_v22 = vadd.f32 %v8470_v59, %v11210_v61 }
 0x704   : > { %v11239_v28 = vmul.f32 0.5, %v8452_v17  ;;  %v5120_v51 = vmax.f32 %v11237_v24, 0.0  ;;  %v8485_v20 = vadd.f32 %v10966_v33, %v10718_v11  ;;  %v8478_v4 = vadd.f32 %v8477_v1, %v11210_v61 }
 0x705   : > { %v11244_v7 = vmul.f32 0.5, %v8456_v3  ;;  %v5118_v31 = vmax.f32 %v11235_v43, 0.0  ;;  %v8483_v11 = vadd.f32 %v8482_v45, %v11210_v61 }
 0x706   : > { %v5121_v62 = vmax.f32 %v11239_v28, 0.0  ;;  %8244 = vmatpush3.bf16.msra.mxu1 %v8827_v9  ;;  %v8486_v63 = vadd.f32 %v8485_v20, %v11210_v61  ;;  %v8479_v39 = vadd.f32 %v8478_v4, %v11210_v61 }
 0x707   : > { %v5119_v23 = vmax.f32 %v11244_v7, 0.0 }
 0x708   : > { %v5151_v37 = vpack.c.bf16 %v5121_v62, %v5120_v51 }
 0x709   : > { %v5150_v6 = vpack.c.bf16 %v5119_v23, %v5118_v31 }
 0x70b   : > { %8201 = vmatprep.mubr.bf16.mxu0 %v5150_v6 }
 0x70c   : > { %8202 = vmatmul.mubr.bf16.vlgmr.msra.gmra.mrb[48].mxu0 %v5151_v37 }
 0x70f   : > { %v8159_v46 = vpop.f32.mrb[20].mxu1 }
 0x710   : > { %v8460_v12 = vadd.f32 %v8459_v49, %v8159_v46  ;;  %v4841_v36 = vpop.f32.mrb[21].mxu1  ;;  %v8487_v46 = vadd.f32 %v8486_v63, %v11210_v61 }
 0x711   : > { %v8464_v52 = vadd.f32 %v8463_v53, %v4841_v36  ;;  %v8160_v55 = vpop.f32.mrb[22].mxu1 }
 0x712   : > { %v8468_v17 = vadd.f32 %v8467_v18, %v8160_v55  ;;  %v4844_v38 = vpop.f32.mrb[23].mxu1  ;;  %v11274_v62 = vmul.f32 0.5, %v8460_v12 }
 0x713   : > { %v11272_v3 = vmul.f32 0.5, %v8464_v52  ;;  %v8472_v8 = vadd.f32 %v8471_v22, %v4844_v38  ;;  %v8489_v38 = vadd.f32 %v10984_v26, %v10736_v41  ;;  %v8494_v41 = vadd.f32 %v8493_v57, %v11210_v61 }
 0x714   : > { %v11276_v30 = vmul.f32 0.5, %v8468_v17  ;;  %v5124_v6 = vmax.f32 %v11274_v62, 0.0 }
 0x715   : > { %v11278_v31 = vmul.f32 0.5, %v8472_v8  ;;  %v5122_v51 = vmax.f32 %v11272_v3, 0.0 }
 0x716   : > { %v5125_v23 = vmax.f32 %v11276_v30, 0.0 }
 0x717   : > { %v5123_v58 = vmax.f32 %v11278_v31, 0.0 }
 0x718   : > { %v5153_v13 = vpack.c.bf16 %v5125_v23, %v5124_v6  ;;  %v8501_v6 = vadd.f32 %v10994_v50, %v10746_v34 }
 0x719   : > { %v5152_v37 = vpack.c.bf16 %v5123_v58, %v5122_v51  ;;  %v8497_v58 = vadd.f32 %v10992_v21, %v10744_v29  ;;  %v8495_v29 = vadd.f32 %v8494_v41, %v11210_v61 }
 0x71a   : > { %v8502_v60 = vadd.f32 %v8501_v6, %v11210_v61 }
 0x71b   : > { %8205 = vmatprep.mubr.bf16.mxu0 %v5152_v37  ;;  %v8490_v37 = vadd.f32 %v8489_v38, %v11210_v61  ;;  %v8498_v26 = vadd.f32 %v8497_v58, %v11210_v61  ;;  %v8517_v38 = vadd.f32 %v11022_v16, %v10774_v54 }
 0x71c   : > { %8206 = vmatmul.mubr.bf16.gmra.mrb[52].mxu0 %v5153_v13  ;;  %v8503_v4 = vadd.f32 %v8502_v60, %v11210_v61 }
 0x71d   : > { %v8491_v44 = vadd.f32 %v8490_v37, %v11210_v61  ;;  %v8499_v34 = vadd.f32 %v8498_v26, %v11210_v61 }
 0x71f   : > { %v8163_v9 = vpop.f32.mrb[24].mxu1 }
 0x720   : > { %v8476_v5 = vadd.f32 %v8475_v15, %v8163_v9  ;;  %v4857_v59 = vpop.f32.mrb[25].mxu1 }
 0x721   : > { %v8480_v33 = vadd.f32 %v8479_v39, %v4857_v59  ;;  %v8164_v49 = vpop.f32.mrb[26].mxu1 }
 0x722   : > { %v8484_v53 = vadd.f32 %v8483_v11, %v8164_v49  ;;  %v4860_v12 = vpop.f32.mrb[27].mxu1  ;;  %v11302_v52 = vmul.f32 0.5, %v8476_v5 }
 0x723   : > { %v11300_v36 = vmul.f32 0.5, %v8480_v33  ;;  %v8488_v18 = vadd.f32 %v8487_v46, %v4860_v12  ;;  %v8505_v33 = vadd.f32 %v11012_v2, %v10764_v40 }
 0x724   : > { %v11304_v55 = vmul.f32 0.5, %v8484_v53  ;;  %v5128_v51 = vmax.f32 %v11302_v52, 0.0  ;;  %v8509_v53 = vadd.f32 %v11017_v27, %v10769_v0  ;;  %v8518_v0 = vadd.f32 %v8517_v38, %v11210_v61 }
 0x725   : > { %v11306_v22 = vmul.f32 0.5, %v8488_v18  ;;  %v5126_v8 = vmax.f32 %v11300_v36, 0.0  ;;  %v8513_v18 = vadd.f32 %v11020_v19, %v10772_v10 }
 0x726   : > { %v5129_v17 = vmax.f32 %v11304_v55, 0.0  ;;  %v8510_v40 = vadd.f32 %v8509_v53, %v11210_v61  ;;  %v12373_v53 = vld [vmem:[#allocation74_spill] sm:$0xff] }
 0x727   : > { %v5127_v23 = vmax.f32 %v11306_v22, 0.0  ;;  %v8514_v2 = vadd.f32 %v8513_v18, %v11210_v61 }
 0x728   : > { %v5155_v14 = vpack.c.bf16 %v5129_v17, %v5128_v51  ;;  %v8511_v10 = vadd.f32 %v8510_v40, %v11210_v61 }
 0x729   : > { %v5154_v1 = vpack.c.bf16 %v5127_v23, %v5126_v8  ;;  %v8506_v23 = vadd.f32 %v8505_v33, %v11210_v61  ;;  %v8515_v54 = vadd.f32 %v8514_v2, %v11210_v61 }
 0x72b   : > { %8209 = vmatprep.mubr.bf16.mxu0 %v5154_v1  ;;  %v8507_v27 = vadd.f32 %v8506_v23, %v11210_v61  ;;  %v8519_v1 = vadd.f32 %v8518_v0, %v11210_v61 }
 0x72c   : > { %8210 = vmatmul.mubr.bf16.gmra.mrb[56].mxu0 %v5155_v14 }
 0x72f   : > { %v8167_v20 = vpop.f32.mrb[28].mxu1 }
 0x730   : > { %v8492_v21 = vadd.f32 %v8491_v44, %v8167_v20  ;;  %v4873_v13 = vpop.f32.mrb[29].mxu1 }
 0x731   : > { %v8496_v50 = vadd.f32 %v8495_v29, %v4873_v13  ;;  %v8168_v48 = vpop.f32.mrb[30].mxu1  ;;  %v12366_v29 = vld [vmem:[#allocation49_spill] sm:$0xff] }
 0x732   : > { %v8500_v45 = vadd.f32 %v8499_v34, %v8168_v48  ;;  %v4876_v63 = vpop.f32.mrb[31].mxu1  ;;  %v11330_v39 = vmul.f32 0.5, %v8492_v21  ;;  %v12367_v21 = vld [vmem:[#allocation64_spill] sm:$0xff] }
 0x733   : > { %v11328_v15 = vmul.f32 0.5, %v8496_v50  ;;  %v8504_v9 = vadd.f32 %v8503_v4, %v4876_v63  ;;  %v8521_v13 = vadd.f32 %v12367_v21, %v12366_v29  ;;  %v12368_v48 = vld [vmem:[#allocation44_spill] sm:$0xff]  ;;  %v12369_v4 = vld [vmem:[#allocation59_spill] sm:$0xff] }
 0x734   : > { %v11332_v5 = vmul.f32 0.5, %v8500_v45  ;;  %v5132_v12 = vmax.f32 %v11330_v39, 0.0  ;;  %v8525_v45 = vadd.f32 %v12369_v4, %v12368_v48  ;;  %v12374_v21 = vld [vmem:[#allocation52_spill] sm:$0xff]  ;;  %v12375_v48 = vld [vmem:[#allocation47_spill] sm:$0xff] }
 0x735   : > { %v11334_v59 = vmul.f32 0.5, %v8504_v9  ;;  %v5130_v49 = vmax.f32 %v11328_v15, 0.0  ;;  %v12370_v9 = vld [vmem:[#allocation43_spill] sm:$0xff]  ;;  %v8541_v4 = vadd.f32 %v11073_v42, %v12375_v48 }
 0x736   : > { %v5133_v11 = vmax.f32 %v11332_v5, 0.0  ;;  %v8526_v38 = vadd.f32 %v8525_v45, %v11210_v61 }
 0x737   : > { %v5131_v46 = vmax.f32 %v11334_v59, 0.0 }
 0x738   : > { %v5157_v8 = vpack.c.bf16 %v5133_v11, %v5132_v12  ;;  %v12371_v11 = vld [vmem:[#allocation58_spill] sm:$0xff]  ;;  %v8527_v0 = vadd.f32 %v8526_v38, %v11210_v61 }
 0x739   : > { %v5156_v17 = vpack.c.bf16 %v5131_v46, %v5130_v49  ;;  %v8529_v33 = vadd.f32 %v12371_v11, %v12370_v9  ;;  %v12372_v46 = vld [vmem:[#allocation53_spill] sm:$0xff] }
 0x73a   : > { %v8533_v12 = vadd.f32 %v12373_v53, %v12372_v46 }
 0x73b   : > { %8213 = vmatprep.mubr.bf16.mxu0 %v5156_v17  ;;  %v8522_v17 = vadd.f32 %v8521_v13, %v11210_v61  ;;  %v8537_v13 = vadd.f32 %v11068_v32, %v12374_v21  ;;  %v8542_v32 = vadd.f32 %v8541_v4, %v11210_v61  ;;  %v12380_v4 = vld [vmem:[#allocation56_spill] sm:$0xff] }
 0x73c   : > { %8214 = vmatmul.mubr.bf16.gmra.mrb[60].mxu0 %v5157_v8  ;;  %v8530_v8 = vadd.f32 %v8529_v33, %v11210_v61  ;;  %v8534_v23 = vadd.f32 %v8533_v12, %v11210_v61  ;;  %v12377_v33 = vld [vmem:[#allocation62_spill] sm:$0xff] }
 0x73d   : > { %v8523_v40 = vadd.f32 %v8522_v17, %v11210_v61  ;;  %v8538_v12 = vadd.f32 %v8537_v13, %v11210_v61  ;;  %v12379_v13 = vld [vmem:[#allocation61_spill] sm:$0xff] }
 0x73f   : > { %v8171_v57 = vpop.f32.mrb[32].mxu1  ;;  %v8539_v17 = vadd.f32 %v8538_v12, %v11210_v61 }
 0x740   : > { %v8508_v19 = vadd.f32 %v8507_v27, %v8171_v57  ;;  %v4889_v51 = vpop.f32.mrb[33].mxu1 }
 0x741   : > { %v8512_v16 = vadd.f32 %v8511_v10, %v4889_v51  ;;  %v8172_v58 = vpop.f32.mrb[34].mxu1  ;;  %v8531_v10 = vadd.f32 %v8530_v8, %v11210_v61 }
 0x742   : > { %v8516_v6 = vadd.f32 %v8515_v54, %v8172_v58  ;;  %v4892_v14 = vpop.f32.mrb[35].mxu1  ;;  %v11358_v26 = vmul.f32 0.5, %v8508_v19  ;;  %v8535_v54 = vadd.f32 %v8534_v23, %v11210_v61 }
 0x743   : > { %v11356_v37 = vmul.f32 0.5, %v8512_v16  ;;  %v8520_v41 = vadd.f32 %v8519_v1, %v4892_v14 }
 0x744   : > { %v11360_v60 = vmul.f32 0.5, %v8516_v6  ;;  %v5136_v63 = vmax.f32 %v11358_v26, 0.0 }
 0x745   : > { %v11362_v44 = vmul.f32 0.5, %v8520_v41  ;;  %v5134_v34 = vmax.f32 %v11356_v37, 0.0 }
 0x746   : > { %v5137_v20 = vmax.f32 %v11360_v60, 0.0 }
 0x747   : > { %v5135_v50 = vmax.f32 %v11362_v44, 0.0 }
 0x748   : > { %v5159_v18 = vpack.c.bf16 %v5137_v20, %v5136_v63  ;;  %v12376_v63 = vld [vmem:[#allocation46_spill] sm:$0xff] }
 0x749   : > { %v5158_v49 = vpack.c.bf16 %v5135_v50, %v5134_v34  ;;  %v8545_v9 = vadd.f32 %v11076_v56, %v12376_v63  ;;  %v8543_v56 = vadd.f32 %v8542_v32, %v11210_v61 }
 0x74b   : > { %8217 = vmatprep.mubr.bf16.mxu0 %v5158_v49  ;;  %v12378_v49 = vld [vmem:[#allocation73_spill] sm:$0xff] }
 0x74c   : > { %8218 = vmatmul.mubr.bf16.gmra.mrb[64].mxu0 %v5159_v18  ;;  %v8549_v46 = vadd.f32 %v12378_v49, %v12377_v33  ;;  %v8546_v18 = vadd.f32 %v8545_v9, %v11210_v61  ;;  %v12381_v9 = vld [vmem:[#allocation55_spill] sm:$0xff]  ;;  %v12382_v49 = vld [vmem:[#allocation65_spill] sm:$0xff] }
 0x74e   : > { %v8550_v42 = vadd.f32 %v8549_v46, %v11210_v61  ;;  %v12383_v46 = vld [vmem:[#allocation69_spill] sm:$0xff] }
 0x74f   : > { %v8175_v2 = vpop.f32.mrb[36].mxu1 }
 0x750   : > { %v8524_v27 = vadd.f32 %v8523_v40, %v8175_v2  ;;  %v4905_v57 = vpop.f32.mrb[37].mxu1  ;;  %v8547_v40 = vadd.f32 %v8546_v18, %v11210_v61  ;;  %v8828_v2 = vld [vmem:[%s11913_s5 + $0xf0] sm:$0xff]  }
 0x751   : > { %v8528_v19 = vadd.f32 %v8527_v0, %v4905_v57  ;;  %v8176_v51 = vpop.f32.mrb[38].mxu1  ;;  %v8551_v57 = vadd.f32 %v8550_v42, %v11210_v61  ;;  %8245 = vmatprep.subr.bf16.mxu1 %v8828_v2 }
 0x752   : > { %v8532_v16 = vadd.f32 %v8531_v10, %v8176_v51  ;;  %v4908_v58 = vpop.f32.mrb[39].mxu1  ;;  %v11386_v14 = vmul.f32 0.5, %v8524_v27  ;;  %8246 = vmatpush3.bf16.msra.mxu1 %v8828_v2 }
 0x753   : > { %v11384_v1 = vmul.f32 0.5, %v8528_v19  ;;  %v8536_v6 = vadd.f32 %v8535_v54, %v4908_v58 }
 0x754   : > { %v11388_v41 = vmul.f32 0.5, %v8532_v16  ;;  %v5140_v45 = vmax.f32 %v11386_v14, 0.0 }
 0x755   : > { %v11390_v20 = vmul.f32 0.5, %v8536_v6  ;;  %v5138_v34 = vmax.f32 %v11384_v1, 0.0  ;;  %v8829_v6 = vld [vmem:[%s11913_s5 + $0xf8] sm:$0xff]  }
 0x756   : > { %v5141_v29 = vmax.f32 %v11388_v41, 0.0  ;;  %8247 = vmatprep.subr.bf16.mxu1 %v8829_v6 }
 0x757   : > { %v5139_v50 = vmax.f32 %v11390_v20, 0.0  ;;  %8248 = vmatpush3.bf16.msra.mxu1 %v8829_v6 }
 0x758   : > { %v5161_v53 = vpack.c.bf16 %v5141_v29, %v5140_v45  ;;  %v8557_v45 = vadd.f32 %v11101_v35, %v12380_v4  ;;  %v8830_v4 = vld [vmem:[%s11911_s3 + $0x100] sm:$0xff]  }
 0x759   : > { %v5160_v11 = vpack.c.bf16 %v5139_v50, %v5138_v34  ;;  %v8553_v34 = vadd.f32 %v11096_v25, %v12379_v13  ;;  %8281 = vmatprep.subr.bf16.mxu0 %v8830_v4 }
 0x75a   : > { %v8558_v32 = vadd.f32 %v8557_v45, %v11210_v61  ;;  %v8831_v45 = vld [vmem:[%s11911_s3 + $0x108] sm:$0xff]   ;;  %8282 = vmatpush3.bf16.msra.mxu0 %v8830_v4 }
 0x75b   : > { %8221 = vmatprep.mubr.bf16.mxu0 %v5160_v11  ;;  %v8561_v11 = vadd.f32 %v11104_v47, %v12381_v9  ;;  %v8554_v25 = vadd.f32 %v8553_v34, %v11210_v61  ;;  %8283 = vmatprep.subr.bf16.mxu0 %v8831_v45  ;;  %v8832_v9 = vld [vmem:[%s11911_s3 + $0x110] sm:$0xff]  }
 0x75c   : > { %8222 = vmatmul.mubr.bf16.gmra.mrb[68].mxu0 %v5161_v53  ;;  %v8565_v53 = vadd.f32 %v12383_v46, %v12382_v49  ;;  %v8559_v47 = vadd.f32 %v8558_v32, %v11210_v61  ;;  %v8833_v32 = vld [vmem:[%s11911_s3 + $0x118] sm:$0xff]  }
 0x75d   : > { %v8562_v18 = vadd.f32 %v8561_v11, %v11210_v61  ;;  %v8555_v42 = vadd.f32 %v8554_v25, %v11210_v61 }
 0x75e   : > { %v8566_v35 = vadd.f32 %v8565_v53, %v11210_v61  ;;  %8284 = vmatpush3.bf16.msra.mxu0 %v8831_v45 }
 0x75f   : > { %v8179_v38 = vpop.f32.mrb[40].mxu1  ;;  %8285 = vmatprep.subr.bf16.mxu0 %v8832_v9 }
 0x760   : > { %v8540_v8 = vadd.f32 %v8539_v17, %v8179_v38  ;;  %v4921_v23 = vpop.f32.mrb[41].mxu1  ;;  %v8567_v2 = vadd.f32 %v8566_v35, %v11210_v61 }
 0x761   : > { %v8544_v0 = vadd.f32 %v8543_v56, %v4921_v23  ;;  %v8180_v27 = vpop.f32.mrb[42].mxu1 }
 0x762   : > { %v8548_v10 = vadd.f32 %v8547_v40, %v8180_v27  ;;  %v4924_v19 = vpop.f32.mrb[43].mxu1  ;;  %v11417_v16 = vmul.f32 0.5, %v8540_v8  ;;  %v8563_v8 = vadd.f32 %v8562_v18, %v11210_v61  ;;  %8286 = vmatpush3.bf16.msra.mxu0 %v8832_v9 }
 0x763   : > { %v11415_v51 = vmul.f32 0.5, %v8544_v0  ;;  %v8552_v54 = vadd.f32 %v8551_v57, %v4924_v19  ;;  %8287 = vmatprep.subr.bf16.mxu0 %v8833_v32 }
 0x764   : > { %v11419_v58 = vmul.f32 0.5, %v8548_v10  ;;  %v5144_v63 = vmax.f32 %v11417_v16, 0.0 }
 0x765   : > { %v11424_v29 = vmul.f32 0.5, %v8552_v54  ;;  %v5142_v50 = vmax.f32 %v11415_v51, 0.0 }
 0x766   : > { %v5145_v21 = vmax.f32 %v11419_v58, 0.0  ;;  %8288 = vmatpush3.bf16.msra.mxu0 %v8833_v32 }
 0x767   : > { %v5143_v48 = vmax.f32 %v11424_v29, 0.0 }
 0x768   : > { %v5163_v12 = vpack.c.bf16 %v5145_v21, %v5144_v63  ;;  %v11467_v63 = vld [vmem:[%s11912_s4 + $0x3] ss:$0 sm:$0xff] }
 0x769   : > { %v5162_v33 = vpack.c.bf16 %v5143_v48, %v5142_v50 }
 0x76b   : > { %8225 = vmatprep.mubr.bf16.mxu0 %v5162_v33 }
 0x76c   : > { %8226 = vmatmul.mubr.bf16.gmra.mrb[72].mxu0 %v5163_v12 }
 0x76f   : > { %v8183_v17 = vpop.f32.mrb[44].mxu1 }
 0x770   : > { %v8556_v38 = vadd.f32 %v8555_v42, %v8183_v17  ;;  %v4937_v56 = vpop.f32.mrb[45].mxu1 }
 0x771   : > { %v8560_v23 = vadd.f32 %v8559_v47, %v4937_v56  ;;  %v8184_v40 = vpop.f32.mrb[46].mxu1  ;;  %v8834_v56 = vld [vmem:[%s11911_s3 + $0x120] sm:$0xff]  }
 0x772   : > { %v8564_v0 = vadd.f32 %v8563_v8, %v8184_v40  ;;  %v4940_v27 = vpop.f32.mrb[47].mxu1  ;;  %v11448_v19 = vmul.f32 0.5, %v8556_v38  ;;  %8289 = vmatprep.subr.bf16.mxu0 %v8834_v56 }
 0x773   : > { %v11446_v57 = vmul.f32 0.5, %v8560_v23  ;;  %v8568_v10 = vadd.f32 %v8567_v2, %v4940_v27  ;;  %8290 = vmatpush3.bf16.msra.mxu0 %v8834_v56 }
 0x774   : > { %v11450_v54 = vmul.f32 0.5, %v8564_v0  ;;  %v5148_v50 = vmax.f32 %v11448_v19, 0.0 }
 0x775   : > { %v11452_v6 = vmul.f32 0.5, %v8568_v10  ;;  %v5146_v13 = vmax.f32 %v11446_v57, 0.0 }
 0x776   : > { %v5149_v21 = vmax.f32 %v11450_v54, 0.0 }
 0x777   : > { %v5147_v34 = vmax.f32 %v11452_v6, 0.0 }
 0x778   : > { %v5165_v48 = vpack.c.bf16 %v5149_v21, %v5148_v50 }
 0x779   : > { %v5164_v61 = vpack.c.bf16 %v5147_v34, %v5146_v13 }
 0x77b   : > { %8229 = vmatprep.mubr.bf16.mxu0 %v5164_v61 }
 0x77c   : > { %8230 = vmatmul.mubr.bf16.gmra.mrb[76].mxu0 %v5165_v48 }
 0x7df   : > { %v8203_v11 = vpop.f32.mrb[48].mxu0 }
 0x7e0   : > { %v5263_v33 = vadd.f32 %v8203_v11, %v11467_v63  ;;  %v5254_v49 = vpop.f32.mrb[49].mxu0 }
 0x7e1   : > { %v5255_v46 = vadd.f32 %v11467_v63, %v5254_v49  ;;  %v8204_v53 = vpop.f32.mrb[50].mxu0 }
 0x7e2   : > { %v5266_v12 = vadd.f32 %v8204_v53, %v11467_v63  ;;  %v5257_v25 = vpop.f32.mrb[51].mxu0  ;;  %v5383_v35 = vmax.f32 %v5263_v33, 0.0 }
 0x7e3   : > { %v5258_v18 = vadd.f32 %v11467_v63, %v5257_v25  ;;  %v5381_v17 = vmax.f32 %v5255_v46, 0.0 }
 0x7e4   : > { %v5384_v42 = vmax.f32 %v5266_v12, 0.0 }
 0x7e5   : > { %v5382_v47 = vmax.f32 %v5258_v18, 0.0 }
 0x7e6   : > { %v5414_v38 = vpack.c.bf16 %v5384_v42, %v5383_v35 }
 0x7e7   : > { %v5413_v8 = vpack.c.bf16 %v5382_v47, %v5381_v17 }
 0x7e9   : > { %8249 = vmatprep.mubr.bf16.mxu1 %v5413_v8 }
 0x7ea   : > { %8250 = vmatmul.mubr.bf16.vlgmr.msra.gmra.mrb[48].mxu1 %v5414_v38 }
 0x7ef   : > { %v8207_v23 = vpop.f32.mrb[52].mxu0 }
 0x7f0   : > { %v5279_v40 = vadd.f32 %v8207_v23, %v11467_v63  ;;  %v5270_v2 = vpop.f32.mrb[53].mxu0 }
 0x7f1   : > { %v5271_v0 = vadd.f32 %v11467_v63, %v5270_v2  ;;  %v8208_v27 = vpop.f32.mrb[54].mxu0 }
 0x7f2   : > { %v5282_v10 = vadd.f32 %v8208_v27, %v11467_v63  ;;  %v5273_v21 = vpop.f32.mrb[55].mxu0  ;;  %v5387_v34 = vmax.f32 %v5279_v40, 0.0 }
 0x7f3   : > { %v5274_v13 = vadd.f32 %v11467_v63, %v5273_v21  ;;  %v5385_v61 = vmax.f32 %v5271_v0, 0.0 }
 0x7f4   : > { %v5388_v50 = vmax.f32 %v5282_v10, 0.0 }
 0x7f5   : > { %v5386_v48 = vmax.f32 %v5274_v13, 0.0 }
 0x7f6   : > { %v5416_v4 = vpack.c.bf16 %v5388_v50, %v5387_v34 }
 0x7f7   : > { %v5415_v45 = vpack.c.bf16 %v5386_v48, %v5385_v61 }
 0x7f9   : > { %8253 = vmatprep.mubr.bf16.mxu1 %v5415_v45 }
 0x7fa   : > { %8254 = vmatmul.mubr.bf16.gmra.mrb[52].mxu1 %v5416_v4 }
 0x7ff   : > { %v8211_v9 = vpop.f32.mrb[56].mxu0 }
 0x800   : > { %v5295_v11 = vadd.f32 %v8211_v9, %v11467_v63  ;;  %v5286_v33 = vpop.f32.mrb[57].mxu0 }
 0x801   : > { %v5287_v49 = vadd.f32 %v11467_v63, %v5286_v33  ;;  %v8212_v46 = vpop.f32.mrb[58].mxu0 }
 0x802   : > { %v5298_v53 = vadd.f32 %v8212_v46, %v11467_v63  ;;  %v5289_v12 = vpop.f32.mrb[59].mxu0  ;;  %v5391_v32 = vmax.f32 %v5295_v11, 0.0 }
 0x803   : > { %v5290_v25 = vadd.f32 %v11467_v63, %v5289_v12  ;;  %v5389_v35 = vmax.f32 %v5287_v49, 0.0 }
 0x804   : > { %v5392_v18 = vmax.f32 %v5298_v53, 0.0 }
 0x805   : > { %v5390_v42 = vmax.f32 %v5290_v25, 0.0 }
 0x806   : > { %v5418_v17 = vpack.c.bf16 %v5392_v18, %v5391_v32 }
 0x807   : > { %v5417_v47 = vpack.c.bf16 %v5390_v42, %v5389_v35 }
 0x809   : > { %8257 = vmatprep.mubr.bf16.mxu1 %v5417_v47 }
 0x80a   : > { %8258 = vmatmul.mubr.bf16.gmra.mrb[56].mxu1 %v5418_v17 }
 0x80f   : > { %v8215_v38 = vpop.f32.mrb[60].mxu0 }
 0x810   : > { %v5311_v56 = vadd.f32 %v8215_v38, %v11467_v63  ;;  %v5302_v8 = vpop.f32.mrb[61].mxu0 }
 0x811   : > { %v5303_v23 = vadd.f32 %v11467_v63, %v5302_v8  ;;  %v8216_v40 = vpop.f32.mrb[62].mxu0 }
 0x812   : > { %v5314_v2 = vadd.f32 %v8216_v40, %v11467_v63  ;;  %v5305_v0 = vpop.f32.mrb[63].mxu0  ;;  %v5395_v10 = vmax.f32 %v5311_v56, 0.0 }
 0x813   : > { %v5306_v27 = vadd.f32 %v11467_v63, %v5305_v0  ;;  %v5393_v13 = vmax.f32 %v5303_v23, 0.0 }
 0x814   : > { %v5396_v21 = vmax.f32 %v5314_v2, 0.0 }
 0x815   : > { %v5394_v34 = vmax.f32 %v5306_v27, 0.0 }
 0x816   : > { %v5420_v50 = vpack.c.bf16 %v5396_v21, %v5395_v10 }
 0x817   : > { %v5419_v61 = vpack.c.bf16 %v5394_v34, %v5393_v13  ;;  %v8835_v34 = vld [vmem:[%s11911_s3 + $0x128] sm:$0xff]  }
 0x818   : > { %8291 = vmatprep.subr.bf16.mxu0 %v8835_v34 }
 0x819   : > { %8261 = vmatprep.mubr.bf16.mxu1 %v5419_v61  ;;  %8292 = vmatpush3.bf16.msra.mxu0 %v8835_v34  ;;  %v8838_v34 = vld [vmem:[%s11913_s5 + $0x100] sm:$0xff]  }
 0x81a   : > { %8262 = vmatmul.mubr.bf16.gmra.mrb[60].mxu1 %v5420_v50  ;;  %8329 = vmatprep.subr.bf16.mxu1 %v8838_v34 }
 0x81b   : > { %8330 = vmatpush3.bf16.msra.mxu1 %v8838_v34 }
 0x81f   : > { %v8219_v48 = vpop.f32.mrb[64].mxu0 }
 0x820   : > { %v5327_v4 = vadd.f32 %v8219_v48, %v11467_v63  ;;  %v5318_v45 = vpop.f32.mrb[65].mxu0 }
 0x821   : > { %v5319_v9 = vadd.f32 %v11467_v63, %v5318_v45  ;;  %v8220_v11 = vpop.f32.mrb[66].mxu0 }
 0x822   : > { %v5330_v33 = vadd.f32 %v8220_v11, %v11467_v63  ;;  %v5321_v49 = vpop.f32.mrb[67].mxu0  ;;  %v5399_v53 = vmax.f32 %v5327_v4, 0.0  ;;  %v8836_v4 = vld [vmem:[%s11911_s3 + $0x130] sm:$0xff]  }
 0x823   : > { %v5322_v46 = vadd.f32 %v11467_v63, %v5321_v49  ;;  %v5397_v25 = vmax.f32 %v5319_v9, 0.0  ;;  %8293 = vmatprep.subr.bf16.mxu0 %v8836_v4 }
 0x824   : > { %v5400_v12 = vmax.f32 %v5330_v33, 0.0  ;;  %8294 = vmatpush3.bf16.msra.mxu0 %v8836_v4 }
 0x825   : > { %v5398_v32 = vmax.f32 %v5322_v46, 0.0 }
 0x826   : > { %v5422_v18 = vpack.c.bf16 %v5400_v12, %v5399_v53  ;;  %v8837_v12 = vld [vmem:[%s11911_s3 + $0x138] sm:$0xff]  }
 0x827   : > { %v5421_v35 = vpack.c.bf16 %v5398_v32, %v5397_v25  ;;  %8295 = vmatprep.subr.bf16.mxu0 %v8837_v12 }
 0x828   : > { %8296 = vmatpush3.bf16.msra.mxu0 %v8837_v12 }
 0x829   : > { %8265 = vmatprep.mubr.bf16.mxu1 %v5421_v35 }
 0x82a   : > { %8266 = vmatmul.mubr.bf16.gmra.mrb[64].mxu1 %v5422_v18 }
 0x82f   : > { %v8223_v42 = vpop.f32.mrb[68].mxu0 }
 0x830   : > { %v5343_v17 = vadd.f32 %v8223_v42, %v11467_v63  ;;  %v5334_v47 = vpop.f32.mrb[69].mxu0 }
 0x831   : > { %v5335_v38 = vadd.f32 %v11467_v63, %v5334_v47  ;;  %v8224_v56 = vpop.f32.mrb[70].mxu0 }
 0x832   : > { %v5346_v8 = vadd.f32 %v8224_v56, %v11467_v63  ;;  %v5337_v23 = vpop.f32.mrb[71].mxu0  ;;  %v5403_v2 = vmax.f32 %v5343_v17, 0.0 }
 0x833   : > { %v5338_v40 = vadd.f32 %v11467_v63, %v5337_v23  ;;  %v5401_v27 = vmax.f32 %v5335_v38, 0.0 }
 0x834   : > { %v5404_v0 = vmax.f32 %v5346_v8, 0.0 }
 0x835   : > { %v5402_v10 = vmax.f32 %v5338_v40, 0.0 }
 0x836   : > { %v5424_v21 = vpack.c.bf16 %v5404_v0, %v5403_v2 }
 0x837   : > { %v5423_v13 = vpack.c.bf16 %v5402_v10, %v5401_v27 }
 0x839   : > { %8269 = vmatprep.mubr.bf16.mxu1 %v5423_v13 }
 0x83a   : > { %8270 = vmatmul.mubr.bf16.gmra.mrb[68].mxu1 %v5424_v21 }
 0x83f   : > { %v8227_v50 = vpop.f32.mrb[72].mxu0 }
 0x840   : > { %v5359_v61 = vadd.f32 %v8227_v50, %v11467_v63  ;;  %v5350_v48 = vpop.f32.mrb[73].mxu0  ;;  %v8839_v50 = vld [vmem:[%s11913_s5 + $0x108] sm:$0xff]  }
 0x841   : > { %v5351_v45 = vadd.f32 %v11467_v63, %v5350_v48  ;;  %v8228_v9 = vpop.f32.mrb[74].mxu0  ;;  %8331 = vmatprep.subr.bf16.mxu1 %v8839_v50 }
 0x842   : > { %v5362_v11 = vadd.f32 %v8228_v9, %v11467_v63  ;;  %v5353_v33 = vpop.f32.mrb[75].mxu0  ;;  %v5407_v46 = vmax.f32 %v5359_v61, 0.0  ;;  %8332 = vmatpush3.bf16.msra.mxu1 %v8839_v50 }
 0x843   : > { %v5354_v49 = vadd.f32 %v11467_v63, %v5353_v33  ;;  %v5405_v25 = vmax.f32 %v5351_v45, 0.0  ;;  %v8840_v45 = vld [vmem:[%s11913_s5 + $0x110] sm:$0xff]  }
 0x844   : > { %v5408_v53 = vmax.f32 %v5362_v11, 0.0  ;;  %8333 = vmatprep.subr.bf16.mxu1 %v8840_v45 }
 0x845   : > { %v5406_v32 = vmax.f32 %v5354_v49, 0.0 }
 0x846   : > { %v5426_v18 = vpack.c.bf16 %v5408_v53, %v5407_v46  ;;  %8334 = vmatpush3.bf16.msra.mxu1 %v8840_v45 }
 0x847   : > { %v5425_v35 = vpack.c.bf16 %v5406_v32, %v5405_v25  ;;  %v8841_v32 = vld [vmem:[%s11913_s5 + $0x118] sm:$0xff]  }
 0x848   : > { %8335 = vmatprep.subr.bf16.mxu1 %v8841_v32 }
 0x849   : > { %8273 = vmatprep.mubr.bf16.mxu1 %v5425_v35 }
 0x84a   : > { %8274 = vmatmul.mubr.bf16.gmra.mrb[72].mxu1 %v5426_v18 }
 0x84b   : > { %8336 = vmatpush3.bf16.msra.mxu1 %v8841_v32 }
 0x84f   : > { %v8231_v42 = vpop.f32.mrb[76].mxu0 }
 0x850   : > { %v5375_v17 = vadd.f32 %v8231_v42, %v11467_v63  ;;  %v5366_v47 = vpop.f32.mrb[77].mxu0 }
 0x851   : > { %v5367_v38 = vadd.f32 %v11467_v63, %v5366_v47  ;;  %v8232_v56 = vpop.f32.mrb[78].mxu0 }
 0x852   : > { %v5378_v8 = vadd.f32 %v8232_v56, %v11467_v63  ;;  %v5369_v23 = vpop.f32.mrb[79].mxu0  ;;  %v5411_v2 = vmax.f32 %v5375_v17, 0.0 }
 0x853   : > { %v5370_v40 = vadd.f32 %v11467_v63, %v5369_v23  ;;  %v5409_v27 = vmax.f32 %v5367_v38, 0.0  ;;  %v11528_v63 = vld [vmem:[%s11914_s6 + $0x3] ss:$0 sm:$0xff] }
 0x854   : > { %v5412_v0 = vmax.f32 %v5378_v8, 0.0 }
 0x855   : > { %v5410_v10 = vmax.f32 %v5370_v40, 0.0 }
 0x856   : > { %v5428_v21 = vpack.c.bf16 %v5412_v0, %v5411_v2 }
 0x857   : > { %v5427_v13 = vpack.c.bf16 %v5410_v10, %v5409_v27 }
 0x859   : > { %8277 = vmatprep.mubr.bf16.mxu1 %v5427_v13 }
 0x85a   : > { %8278 = vmatmul.mubr.bf16.gmra.mrb[76].mxu1 %v5428_v21 }
 0x8bd   : > { %v8251_v61 = vpop.f32.mrb[48].mxu1 }
 0x8be   : > { %v5526_v48 = vadd.f32 %v8251_v61, %v11528_v63  ;;  %v5517_v4 = vpop.f32.mrb[49].mxu1 }
 0x8bf   : > { %v5518_v9 = vadd.f32 %v11528_v63, %v5517_v4  ;;  %v8252_v11 = vpop.f32.mrb[50].mxu1 }
 0x8c0   : > { %v5529_v33 = vadd.f32 %v8252_v11, %v11528_v63  ;;  %v5520_v49 = vpop.f32.mrb[51].mxu1  ;;  %v11541_v12 = vadd.f32 %v5526_v48, %v11237_v24 }
 0x8c1   : > { %v11537_v46 = vadd.f32 %v5518_v9, %v11235_v43  ;;  %v5521_v53 = vadd.f32 %v11528_v63, %v5520_v49 }
 0x8c2   : > { %v11544_v25 = vadd.f32 %v5529_v33, %v11239_v28  ;;  %v5716_v24 = vmax.f32 %v11541_v12, 0.0  ;;  %v8842_v28 = vld [vmem:[%s11913_s5 + $0x120] sm:$0xff]  }
 0x8c3   : > { %v11550_v18 = vadd.f32 %v5521_v53, %v11244_v7  ;;  %v5714_v35 = vmax.f32 %v11537_v46, 0.0  ;;  %8337 = vmatprep.subr.bf16.mxu1 %v8842_v28  ;;  %v8843_v7 = vld [vmem:[%s11913_s5 + $0x128] sm:$0xff]  }
 0x8c4   : > { %v5717_v43 = vmax.f32 %v11544_v25, 0.0  ;;  %8338 = vmatpush3.bf16.msra.mxu1 %v8842_v28 }
 0x8c5   : > { %v5715_v42 = vmax.f32 %v11550_v18, 0.0  ;;  %8339 = vmatprep.subr.bf16.mxu1 %v8843_v7 }
 0x8c6   : > { %v5747_v47 = vpack.c.bf16 %v5717_v43, %v5716_v24 }
 0x8c7   : > { %v5746_v17 = vpack.c.bf16 %v5715_v42, %v5714_v35 }
 0x8c8   : > { %8340 = vmatpush3.bf16.msra.mxu1 %v8843_v7 }
 0x8c9   : > { %8297 = vmatprep.mubr.bf16.mxu0 %v5746_v17 }
 0x8ca   : > { %8298 = vmatmul.mubr.bf16.vlgmr.msra.gmra.mrb[80].mxu0 %v5747_v47 }
 0x8cd   : > { %v8255_v38 = vpop.f32.mrb[52].mxu1 }
 0x8ce   : > { %v5542_v56 = vadd.f32 %v8255_v38, %v11528_v63  ;;  %v5533_v8 = vpop.f32.mrb[53].mxu1 }
 0x8cf   : > { %v5534_v23 = vadd.f32 %v11528_v63, %v5533_v8  ;;  %v8256_v40 = vpop.f32.mrb[54].mxu1 }
 0x8d0   : > { %v5545_v2 = vadd.f32 %v8256_v40, %v11528_v63  ;;  %v5536_v0 = vpop.f32.mrb[55].mxu1  ;;  %v11570_v21 = vadd.f32 %v5542_v56, %v11274_v62 }
 0x8d1   : > { %v11566_v27 = vadd.f32 %v5534_v23, %v11272_v3  ;;  %v5537_v10 = vadd.f32 %v11528_v63, %v5536_v0 }
 0x8d2   : > { %v11573_v13 = vadd.f32 %v5545_v2, %v11276_v30  ;;  %v5720_v3 = vmax.f32 %v11570_v21, 0.0 }
 0x8d3   : > { %v11576_v34 = vadd.f32 %v5537_v10, %v11278_v31  ;;  %v5718_v61 = vmax.f32 %v11566_v27, 0.0 }
 0x8d4   : > { %v5721_v50 = vmax.f32 %v11573_v13, 0.0 }
 0x8d5   : > { %v5719_v48 = vmax.f32 %v11576_v34, 0.0 }
 0x8d6   : > { %v5749_v45 = vpack.c.bf16 %v5721_v50, %v5720_v3 }
 0x8d7   : > { %v5748_v4 = vpack.c.bf16 %v5719_v48, %v5718_v61 }
 0x8d9   : > { %8301 = vmatprep.mubr.bf16.mxu0 %v5748_v4 }
 0x8da   : > { %8302 = vmatmul.mubr.bf16.gmra.mrb[84].mxu0 %v5749_v45 }
 0x8dd   : > { %v8259_v62 = vpop.f32.mrb[56].mxu1 }
 0x8de   : > { %v5558_v9 = vadd.f32 %v8259_v62, %v11528_v63  ;;  %v5549_v30 = vpop.f32.mrb[57].mxu1 }
 0x8df   : > { %v5550_v11 = vadd.f32 %v11528_v63, %v5549_v30  ;;  %v8260_v31 = vpop.f32.mrb[58].mxu1 }
 0x8e0   : > { %v5561_v33 = vadd.f32 %v8260_v31, %v11528_v63  ;;  %v5552_v49 = vpop.f32.mrb[59].mxu1  ;;  %v11590_v43 = vadd.f32 %v5558_v9, %v11302_v52 }
 0x8e1   : > { %v11586_v53 = vadd.f32 %v5550_v11, %v11300_v36  ;;  %v5553_v32 = vadd.f32 %v11528_v63, %v5552_v49 }
 0x8e2   : > { %v11593_v35 = vadd.f32 %v5561_v33, %v11304_v55  ;;  %v5724_v36 = vmax.f32 %v11590_v43, 0.0 }
 0x8e3   : > { %v11596_v42 = vadd.f32 %v5553_v32, %v11306_v22  ;;  %v5722_v28 = vmax.f32 %v11586_v53, 0.0 }
 0x8e4   : > { %v5725_v24 = vmax.f32 %v11593_v35, 0.0 }
 0x8e5   : > { %v5723_v17 = vmax.f32 %v11596_v42, 0.0 }
 0x8e6   : > { %v5751_v7 = vpack.c.bf16 %v5725_v24, %v5724_v36 }
 0x8e7   : > { %v5750_v47 = vpack.c.bf16 %v5723_v17, %v5722_v28 }
 0x8e9   : > { %8305 = vmatprep.mubr.bf16.mxu0 %v5750_v47 }
 0x8ea   : > { %8306 = vmatmul.mubr.bf16.gmra.mrb[88].mxu0 %v5751_v7 }
 0x8ed   : > { %v8263_v52 = vpop.f32.mrb[60].mxu1 }
 0x8ee   : > { %v5574_v38 = vadd.f32 %v8263_v52, %v11528_v63  ;;  %v5565_v55 = vpop.f32.mrb[61].mxu1 }
 0x8ef   : > { %v5566_v56 = vadd.f32 %v11528_v63, %v5565_v55  ;;  %v8264_v22 = vpop.f32.mrb[62].mxu1 }
 0x8f0   : > { %v5577_v8 = vadd.f32 %v8264_v22, %v11528_v63  ;;  %v5568_v23 = vpop.f32.mrb[63].mxu1  ;;  %v11610_v0 = vadd.f32 %v5574_v38, %v11330_v39 }
 0x8f1   : > { %v11606_v40 = vadd.f32 %v5566_v56, %v11328_v15  ;;  %v5569_v2 = vadd.f32 %v11528_v63, %v5568_v23 }
 0x8f2   : > { %v11613_v10 = vadd.f32 %v5577_v8, %v11332_v5  ;;  %v5728_v15 = vmax.f32 %v11610_v0, 0.0 }
 0x8f3   : > { %v11616_v50 = vadd.f32 %v5569_v2, %v11334_v59  ;;  %v5726_v48 = vmax.f32 %v11606_v40, 0.0 }
 0x8f4   : > { %v5729_v61 = vmax.f32 %v11613_v10, 0.0 }
 0x8f5   : > { %v5727_v3 = vmax.f32 %v11616_v50, 0.0 }
 0x8f6   : > { %v5753_v45 = vpack.c.bf16 %v5729_v61, %v5728_v15 }
 0x8f7   : > { %v5752_v4 = vpack.c.bf16 %v5727_v3, %v5726_v48 }
 0x8f9   : > { %8309 = vmatprep.mubr.bf16.mxu0 %v5752_v4 }
 0x8fa   : > { %8310 = vmatmul.mubr.bf16.gmra.mrb[92].mxu0 %v5753_v45 }
 0x8fd   : > { %v8267_v39 = vpop.f32.mrb[64].mxu1 }
 0x8fe   : > { %v5590_v62 = vadd.f32 %v8267_v39, %v11528_v63  ;;  %v5581_v5 = vpop.f32.mrb[65].mxu1 }
 0x8ff   : > { %v5582_v9 = vadd.f32 %v11528_v63, %v5581_v5  ;;  %v8268_v59 = vpop.f32.mrb[66].mxu1 }
 0x900   : > { %v5593_v30 = vadd.f32 %v8268_v59, %v11528_v63  ;;  %v5584_v11 = vpop.f32.mrb[67].mxu1  ;;  %v11630_v49 = vadd.f32 %v5590_v62, %v11358_v26 }
 0x901   : > { %v11626_v31 = vadd.f32 %v5582_v9, %v11356_v37  ;;  %v5585_v33 = vadd.f32 %v11528_v63, %v5584_v11 }
 0x902   : > { %v11633_v32 = vadd.f32 %v5593_v30, %v11360_v60  ;;  %v5732_v37 = vmax.f32 %v11630_v49, 0.0 }
 0x903   : > { %v11636_v24 = vadd.f32 %v5585_v33, %v11362_v44  ;;  %v5730_v17 = vmax.f32 %v11626_v31, 0.0 }
 0x904   : > { %v5733_v28 = vmax.f32 %v11633_v32, 0.0 }
 0x905   : > { %v5731_v36 = vmax.f32 %v11636_v24, 0.0 }
 0x906   : > { %v5755_v7 = vpack.c.bf16 %v5733_v28, %v5732_v37 }
 0x907   : > { %v5754_v47 = vpack.c.bf16 %v5731_v36, %v5730_v17  ;;  %v8845_v17 = vld [vmem:[%s11913_s5 + $0x138] sm:$0xff]  }
 0x909   : > { %8313 = vmatprep.mubr.bf16.mxu0 %v5754_v47 }
 0x90a   : > { %8314 = vmatmul.mubr.bf16.gmra.mrb[96].mxu0 %v5755_v7 }
 0x90d   : > { %v8271_v26 = vpop.f32.mrb[68].mxu1 }
 0x90e   : > { %v5606_v52 = vadd.f32 %v8271_v26, %v11528_v63  ;;  %v5597_v60 = vpop.f32.mrb[69].mxu1 }
 0x90f   : > { %v5598_v38 = vadd.f32 %v11528_v63, %v5597_v60  ;;  %v8272_v44 = vpop.f32.mrb[70].mxu1 }
 0x910   : > { %v5609_v55 = vadd.f32 %v8272_v44, %v11528_v63  ;;  %v5600_v56 = vpop.f32.mrb[71].mxu1  ;;  %v11650_v23 = vadd.f32 %v5606_v52, %v11386_v14 }
 0x911   : > { %v11646_v22 = vadd.f32 %v5598_v38, %v11384_v1  ;;  %v5601_v8 = vadd.f32 %v11528_v63, %v5600_v56 }
 0x912   : > { %v11653_v2 = vadd.f32 %v5609_v55, %v11388_v41  ;;  %v5736_v1 = vmax.f32 %v11650_v23, 0.0 }
 0x913   : > { %v11656_v61 = vadd.f32 %v5601_v8, %v11390_v20  ;;  %v5734_v3 = vmax.f32 %v11646_v22, 0.0  ;;  %v8844_v20 = vld [vmem:[%s11913_s5 + $0x130] sm:$0xff]  }
 0x914   : > { %v5737_v48 = vmax.f32 %v11653_v2, 0.0  ;;  %8341 = vmatprep.subr.bf16.mxu1 %v8844_v20 }
 0x915   : > { %v5735_v15 = vmax.f32 %v11656_v61, 0.0  ;;  %8342 = vmatpush3.bf16.msra.mxu1 %v8844_v20 }
 0x916   : > { %v5757_v45 = vpack.c.bf16 %v5737_v48, %v5736_v1  ;;  %8343 = vmatprep.subr.bf16.mxu1 %v8845_v17 }
 0x917   : > { %v5756_v4 = vpack.c.bf16 %v5735_v15, %v5734_v3 }
 0x919   : > { %8317 = vmatprep.mubr.bf16.mxu0 %v5756_v4  ;;  %8344 = vmatpush3.bf16.msra.mxu1 %v8845_v17  ;;  %v8849_v17 = vld [vmem:[%s11915_s7 + $0x18] sm:$0xff]  }
 0x91a   : > { %8318 = vmatmul.mubr.bf16.gmra.mrb[100].mxu0 %v5757_v45 }
 0x91d   : > { %v8275_v14 = vpop.f32.mrb[72].mxu1 }
 0x91e   : > { %v5622_v39 = vadd.f32 %v8275_v14, %v11528_v63  ;;  %v5613_v41 = vpop.f32.mrb[73].mxu1 }
 0x91f   : > { %v5614_v62 = vadd.f32 %v11528_v63, %v5613_v41  ;;  %v8276_v5 = vpop.f32.mrb[74].mxu1 }
 0x920   : > { %v5625_v9 = vadd.f32 %v8276_v5, %v11528_v63  ;;  %v5616_v59 = vpop.f32.mrb[75].mxu1  ;;  %v11673_v33 = vadd.f32 %v5622_v39, %v11417_v16 }
 0x921   : > { %v11669_v30 = vadd.f32 %v5614_v62, %v11415_v51  ;;  %v5617_v11 = vadd.f32 %v11528_v63, %v5616_v59 }
 0x922   : > { %v11676_v28 = vadd.f32 %v5625_v9, %v11419_v58  ;;  %v5740_v16 = vmax.f32 %v11673_v33, 0.0 }
 0x923   : > { %v11682_v36 = vadd.f32 %v5617_v11, %v11424_v29  ;;  %v5738_v51 = vmax.f32 %v11669_v30, 0.0 }
 0x924   : > { %v5741_v37 = vmax.f32 %v11676_v28, 0.0 }
 0x925   : > { %v5739_v47 = vmax.f32 %v11682_v36, 0.0 }
 0x926   : > { %v5759_v58 = vpack.c.bf16 %v5741_v37, %v5740_v16 }
 0x927   : > { %v5758_v7 = vpack.c.bf16 %v5739_v47, %v5738_v51 }
 0x929   : > { %8321 = vmatprep.mubr.bf16.mxu0 %v5758_v7 }
 0x92a   : > { %8322 = vmatmul.mubr.bf16.gmra.mrb[104].mxu0 %v5759_v58 }
 0x92d   : > { %v8279_v26 = vpop.f32.mrb[76].mxu1 }
 0x92e   : > { %v5638_v52 = vadd.f32 %v8279_v26, %v11528_v63  ;;  %v5629_v60 = vpop.f32.mrb[77].mxu1  ;;  %v8850_v26 = vld [vmem:[%s11915_s7 + $0x20] sm:$0xff]  }
 0x92f   : > { %v5630_v29 = vadd.f32 %v11528_v63, %v5629_v60  ;;  %v8280_v38 = vpop.f32.mrb[78].mxu1 }
 0x930   : > { %v5641_v44 = vadd.f32 %v8280_v38, %v11528_v63  ;;  %v5632_v55 = vpop.f32.mrb[79].mxu1  ;;  %v11696_v48 = vadd.f32 %v5638_v52, %v11448_v19  ;;  %v8846_v19 = vld [vmem:[%s11915_s7] sm:$0xff]  }
 0x931   : > { %v11692_v56 = vadd.f32 %v5630_v29, %v11446_v57  ;;  %v5633_v8 = vadd.f32 %v11528_v63, %v5632_v55  ;;  %8377 = vmatprep.subr.bf16.mxu0 %v8846_v19  ;;  %v8848_v63 = vld [vmem:[%s11915_s7 + $0x10] sm:$0xff]  }
 0x932   : > { %v11699_v3 = vadd.f32 %v5641_v44, %v11450_v54  ;;  %v5744_v57 = vmax.f32 %v11696_v48, 0.0  ;;  %v8847_v54 = vld [vmem:[%s11915_s7 + $0x8] sm:$0xff]   ;;  %8378 = vmatpush3.bf16.msra.mxu0 %v8846_v19 }
 0x933   : > { %v11702_v15 = vadd.f32 %v5633_v8, %v11452_v6  ;;  %v5742_v4 = vmax.f32 %v11692_v56, 0.0  ;;  %v11717_v6 = vld [vmem:[%s11912_s4 + $0x4] ss:$0 sm:$0xff]  ;;  %8379 = vmatprep.subr.bf16.mxu0 %v8847_v54 }
 0x934   : > { %v5745_v1 = vmax.f32 %v11699_v3, 0.0 }
 0x935   : > { %v5743_v45 = vmax.f32 %v11702_v15, 0.0 }
 0x936   : > { %v5761_v39 = vpack.c.bf16 %v5745_v1, %v5744_v57  ;;  %8380 = vmatpush3.bf16.msra.mxu0 %v8847_v54 }
 0x937   : > { %v5760_v14 = vpack.c.bf16 %v5743_v45, %v5742_v4  ;;  %8381 = vmatprep.subr.bf16.mxu0 %v8848_v63 }
 0x939   : > { %8325 = vmatprep.mubr.bf16.mxu0 %v5760_v14 }
 0x93a   : > { %8326 = vmatmul.mubr.bf16.gmra.mrb[108].mxu0 %v5761_v39 }
 0x93b   : > { %8382 = vmatpush3.bf16.msra.mxu0 %v8848_v63 }
 0x93c   : > { %8383 = vmatprep.subr.bf16.mxu0 %v8849_v17 }
 0x93f   : > { %8384 = vmatpush3.bf16.msra.mxu0 %v8849_v17 }
 0x940   : > { %8385 = vmatprep.subr.bf16.mxu0 %v8850_v26 }
 0x943   : > { %8386 = vmatpush3.bf16.msra.mxu0 %v8850_v26 }
 0x99d   : > { %v8299_v41 = vpop.f32.mrb[80].mxu0 }
 0x99e   : > { %v5859_v20 = vadd.f32 %v8299_v41, %v11717_v6  ;;  %v5850_v62 = vpop.f32.mrb[81].mxu0 }
 0x99f   : > { %v5851_v5 = vadd.f32 %v11717_v6, %v5850_v62  ;;  %v8300_v9 = vpop.f32.mrb[82].mxu0 }
 0x9a0   : > { %v5862_v59 = vadd.f32 %v8300_v9, %v11717_v6  ;;  %v5853_v11 = vpop.f32.mrb[83].mxu0  ;;  %v5979_v51 = vmax.f32 %v5859_v20, 0.0 }
 0x9a1   : > { %v5854_v37 = vadd.f32 %v11717_v6, %v5853_v11  ;;  %v5977_v16 = vmax.f32 %v5851_v5, 0.0 }
 0x9a2   : > { %v5980_v47 = vmax.f32 %v5862_v59, 0.0 }
 0x9a3   : > { %v5978_v7 = vmax.f32 %v5854_v37, 0.0 }
 0x9a4   : > { %v6010_v58 = vpack.c.bf16 %v5980_v47, %v5979_v51 }
 0x9a5   : > { %v6009_v52 = vpack.c.bf16 %v5978_v7, %v5977_v16 }
 0x9a7   : > { %8345 = vmatprep.mubr.bf16.mxu1 %v6009_v52 }
 0x9a8   : > { %8346 = vmatmul.mubr.bf16.vlgmr.msra.gmra.mrb[80].mxu1 %v6010_v58 }
 0x9ad   : > { %v8303_v60 = vpop.f32.mrb[84].mxu0 }
 0x9ae   : > { %v5875_v29 = vadd.f32 %v8303_v60, %v11717_v6  ;;  %v5866_v38 = vpop.f32.mrb[85].mxu0 }
 0x9af   : > { %v5867_v44 = vadd.f32 %v11717_v6, %v5866_v38  ;;  %v8304_v55 = vpop.f32.mrb[86].mxu0 }
 0x9b0   : > { %v5878_v8 = vadd.f32 %v8304_v55, %v11717_v6  ;;  %v5869_v1 = vpop.f32.mrb[87].mxu0  ;;  %v5983_v45 = vmax.f32 %v5875_v29, 0.0 }
 0x9b1   : > { %v5870_v4 = vadd.f32 %v11717_v6, %v5869_v1  ;;  %v5981_v14 = vmax.f32 %v5867_v44, 0.0 }
 0x9b2   : > { %v5984_v57 = vmax.f32 %v5878_v8, 0.0 }
 0x9b3   : > { %v5982_v39 = vmax.f32 %v5870_v4, 0.0 }
 0x9b4   : > { %v6012_v19 = vpack.c.bf16 %v5984_v57, %v5983_v45 }
 0x9b5   : > { %v6011_v54 = vpack.c.bf16 %v5982_v39, %v5981_v14 }
 0x9b7   : > { %8349 = vmatprep.mubr.bf16.mxu1 %v6011_v54 }
 0x9b8   : > { %8350 = vmatmul.mubr.bf16.gmra.mrb[84].mxu1 %v6012_v19 }
 0x9bd   : > { %v8307_v63 = vpop.f32.mrb[88].mxu0 }
 0x9be   : > { %v5891_v41 = vadd.f32 %v8307_v63, %v11717_v6  ;;  %v5882_v20 = vpop.f32.mrb[89].mxu0 }
 0x9bf   : > { %v5883_v62 = vadd.f32 %v11717_v6, %v5882_v20  ;;  %v8308_v5 = vpop.f32.mrb[90].mxu0 }
 0x9c0   : > { %v5894_v9 = vadd.f32 %v8308_v5, %v11717_v6  ;;  %v5885_v59 = vpop.f32.mrb[91].mxu0  ;;  %v5987_v17 = vmax.f32 %v5891_v41, 0.0 }
 0x9c1   : > { %v5886_v11 = vadd.f32 %v11717_v6, %v5885_v59  ;;  %v5985_v51 = vmax.f32 %v5883_v62, 0.0 }
 0x9c2   : > { %v5988_v37 = vmax.f32 %v5894_v9, 0.0 }
 0x9c3   : > { %v5986_v47 = vmax.f32 %v5886_v11, 0.0 }
 0x9c4   : > { %v6014_v16 = vpack.c.bf16 %v5988_v37, %v5987_v17 }
 0x9c5   : > { %v6013_v7 = vpack.c.bf16 %v5986_v47, %v5985_v51 }
 0x9c7   : > { %8353 = vmatprep.mubr.bf16.mxu1 %v6013_v7 }
 0x9c8   : > { %8354 = vmatmul.mubr.bf16.gmra.mrb[88].mxu1 %v6014_v16 }
 0x9cd   : > { %v8311_v58 = vpop.f32.mrb[92].mxu0 }
 0x9ce   : > { %v5907_v26 = vadd.f32 %v8311_v58, %v11717_v6  ;;  %v5898_v52 = vpop.f32.mrb[93].mxu0 }
 0x9cf   : > { %v5899_v60 = vadd.f32 %v11717_v6, %v5898_v52  ;;  %v8312_v29 = vpop.f32.mrb[94].mxu0 }
 0x9d0   : > { %v5910_v38 = vadd.f32 %v8312_v29, %v11717_v6  ;;  %v5901_v44 = vpop.f32.mrb[95].mxu0  ;;  %v5991_v8 = vmax.f32 %v5907_v26, 0.0 }
 0x9d1   : > { %v5902_v55 = vadd.f32 %v11717_v6, %v5901_v44  ;;  %v5989_v4 = vmax.f32 %v5899_v60, 0.0 }
 0x9d2   : > { %v5992_v1 = vmax.f32 %v5910_v38, 0.0 }
 0x9d3   : > { %v5990_v45 = vmax.f32 %v5902_v55, 0.0 }
 0x9d4   : > { %v6016_v57 = vpack.c.bf16 %v5992_v1, %v5991_v8 }
 0x9d5   : > { %v6015_v14 = vpack.c.bf16 %v5990_v45, %v5989_v4  ;;  %v8851_v45 = vld [vmem:[%s11915_s7 + $0x28] sm:$0xff]  }
 0x9d6   : > { %8387 = vmatprep.subr.bf16.mxu0 %v8851_v45 }
 0x9d7   : > { %8357 = vmatprep.mubr.bf16.mxu1 %v6015_v14  ;;  %8388 = vmatpush3.bf16.msra.mxu0 %v8851_v45  ;;  %v11772_v45 = vld [vmem:[%s11914_s6 + $0x4] ss:$0 sm:$0xff] }
 0x9d8   : > { %8358 = vmatmul.mubr.bf16.gmra.mrb[92].mxu1 %v6016_v57 }
 0x9dd   : > { %v8315_v39 = vpop.f32.mrb[96].mxu0 }
 0x9de   : > { %v5923_v19 = vadd.f32 %v8315_v39, %v11717_v6  ;;  %v5914_v54 = vpop.f32.mrb[97].mxu0 }
 0x9df   : > { %v5915_v63 = vadd.f32 %v11717_v6, %v5914_v54  ;;  %v8316_v41 = vpop.f32.mrb[98].mxu0 }
 0x9e0   : > { %v5926_v20 = vadd.f32 %v8316_v41, %v11717_v6  ;;  %v5917_v62 = vpop.f32.mrb[99].mxu0  ;;  %v5995_v9 = vmax.f32 %v5923_v19, 0.0  ;;  %v8852_v19 = vld [vmem:[%s11915_s7 + $0x30] sm:$0xff]  }
 0x9e1   : > { %v5918_v5 = vadd.f32 %v11717_v6, %v5917_v62  ;;  %v5993_v11 = vmax.f32 %v5915_v63, 0.0  ;;  %8389 = vmatprep.subr.bf16.mxu0 %v8852_v19 }
 0x9e2   : > { %v5996_v59 = vmax.f32 %v5926_v20, 0.0  ;;  %8390 = vmatpush3.bf16.msra.mxu0 %v8852_v19 }
 0x9e3   : > { %v5994_v17 = vmax.f32 %v5918_v5, 0.0 }
 0x9e4   : > { %v6018_v37 = vpack.c.bf16 %v5996_v59, %v5995_v9  ;;  %v8853_v59 = vld [vmem:[%s11915_s7 + $0x38] sm:$0xff]  }
 0x9e5   : > { %v6017_v51 = vpack.c.bf16 %v5994_v17, %v5993_v11  ;;  %8391 = vmatprep.subr.bf16.mxu0 %v8853_v59 }
 0x9e6   : > { %8392 = vmatpush3.bf16.msra.mxu0 %v8853_v59 }
 0x9e7   : > { %8361 = vmatprep.mubr.bf16.mxu1 %v6017_v51 }
 0x9e8   : > { %8362 = vmatmul.mubr.bf16.gmra.mrb[96].mxu1 %v6018_v37 }
 0x9ed   : > { %v8319_v47 = vpop.f32.mrb[100].mxu0 }
 0x9ee   : > { %v5939_v16 = vadd.f32 %v8319_v47, %v11717_v6  ;;  %v5930_v7 = vpop.f32.mrb[101].mxu0 }
 0x9ef   : > { %v5931_v58 = vadd.f32 %v11717_v6, %v5930_v7  ;;  %v8320_v26 = vpop.f32.mrb[102].mxu0 }
 0x9f0   : > { %v5942_v52 = vadd.f32 %v8320_v26, %v11717_v6  ;;  %v5933_v60 = vpop.f32.mrb[103].mxu0  ;;  %v5999_v38 = vmax.f32 %v5939_v16, 0.0 }
 0x9f1   : > { %v5934_v29 = vadd.f32 %v11717_v6, %v5933_v60  ;;  %v5997_v55 = vmax.f32 %v5931_v58, 0.0 }
 0x9f2   : > { %v6000_v44 = vmax.f32 %v5942_v52, 0.0 }
 0x9f3   : > { %v5998_v8 = vmax.f32 %v5934_v29, 0.0 }
 0x9f4   : > { %v6020_v1 = vpack.c.bf16 %v6000_v44, %v5999_v38 }
 0x9f5   : > { %v6019_v4 = vpack.c.bf16 %v5998_v8, %v5997_v55 }
 0x9f7   : > { %8365 = vmatprep.mubr.bf16.mxu1 %v6019_v4 }
 0x9f8   : > { %8366 = vmatmul.mubr.bf16.gmra.mrb[100].mxu1 %v6020_v1 }
 0x9fd   : > { %v8323_v57 = vpop.f32.mrb[104].mxu0 }
 0x9fe   : > { %v5955_v14 = vadd.f32 %v8323_v57, %v11717_v6  ;;  %v5946_v39 = vpop.f32.mrb[105].mxu0 }
 0x9ff   : > { %v5947_v54 = vadd.f32 %v11717_v6, %v5946_v39  ;;  %v8324_v63 = vpop.f32.mrb[106].mxu0 }
 0xa00   : > { %v5958_v41 = vadd.f32 %v8324_v63, %v11717_v6  ;;  %v5949_v20 = vpop.f32.mrb[107].mxu0  ;;  %v6003_v5 = vmax.f32 %v5955_v14, 0.0 }
 0xa01   : > { %v5950_v62 = vadd.f32 %v11717_v6, %v5949_v20  ;;  %v6001_v11 = vmax.f32 %v5947_v54, 0.0 }
 0xa02   : > { %v6004_v9 = vmax.f32 %v5958_v41, 0.0 }
 0xa03   : > { %v6002_v17 = vmax.f32 %v5950_v62, 0.0 }
 0xa04   : > { %v6022_v37 = vpack.c.bf16 %v6004_v9, %v6003_v5 }
 0xa05   : > { %v6021_v51 = vpack.c.bf16 %v6002_v17, %v6001_v11 }
 0xa07   : > { %8369 = vmatprep.mubr.bf16.mxu1 %v6021_v51 }
 0xa08   : > { %8370 = vmatmul.mubr.bf16.gmra.mrb[104].mxu1 %v6022_v37 }
 0xa0d   : > { %v8327_v47 = vpop.f32.mrb[108].mxu0 }
 0xa0e   : > { %v5971_v16 = vadd.f32 %v8327_v47, %v11717_v6  ;;  %v5962_v7 = vpop.f32.mrb[109].mxu0 }
 0xa0f   : > { %v5963_v58 = vadd.f32 %v11717_v6, %v5962_v7  ;;  %v8328_v26 = vpop.f32.mrb[110].mxu0 }
 0xa10   : > { %v5974_v52 = vadd.f32 %v8328_v26, %v11717_v6  ;;  %v5965_v60 = vpop.f32.mrb[111].mxu0  ;;  %v6007_v38 = vmax.f32 %v5971_v16, 0.0 }
 0xa11   : > { %v5966_v29 = vadd.f32 %v11717_v6, %v5965_v60  ;;  %v6005_v55 = vmax.f32 %v5963_v58, 0.0 }
 0xa12   : > { %v6008_v44 = vmax.f32 %v5974_v52, 0.0 }
 0xa13   : > { %v6006_v8 = vmax.f32 %v5966_v29, 0.0 }
 0xa14   : > { %v6024_v1 = vpack.c.bf16 %v6008_v44, %v6007_v38 }
 0xa15   : > { %v6023_v4 = vpack.c.bf16 %v6006_v8, %v6005_v55 }
 0xa17   : > { %8373 = vmatprep.mubr.bf16.mxu1 %v6023_v4 }
 0xa18   : > { %8374 = vmatmul.mubr.bf16.gmra.mrb[108].mxu1 %v6024_v1 }
 0xa7b   : > { %v8347_v57 = vpop.f32.mrb[80].mxu1 }
 0xa7c   : > { %v6122_v14 = vadd.f32 %v8347_v57, %v11772_v45  ;;  %v6113_v39 = vpop.f32.mrb[81].mxu1 }
 0xa7d   : > { %v6114_v19 = vadd.f32 %v11772_v45, %v6113_v39  ;;  %v8348_v6 = vpop.f32.mrb[82].mxu1 }
 0xa7e   : > { %v6242_v54 = vadd.f32 %v6122_v14, %v11541_v12  ;;  %v6125_v63 = vadd.f32 %v8348_v6, %v11772_v45  ;;  %v6116_v41 = vpop.f32.mrb[83].mxu1 }
 0xa7f   : > { %v6240_v20 = vadd.f32 %v6114_v19, %v11537_v46  ;;  %v6117_v62 = vadd.f32 %v11772_v45, %v6116_v41 }
 0xa80   : > { %v6243_v5 = vadd.f32 %v6125_v63, %v11544_v25  ;;  %v6274_v59 = vmax.f32 %v6242_v54, 0.0 }
 0xa81   : > { %v6241_v9 = vadd.f32 %v6117_v62, %v11550_v18  ;;  %v6272_v17 = vmax.f32 %v6240_v20, 0.0 }
 0xa82   : > { %v6275_v11 = vmax.f32 %v6243_v5, 0.0 }
 0xa83   : > { %v6273_v37 = vmax.f32 %v6241_v9, 0.0 }
 0xa84   : > { %v6305_v51 = vpack.c.bf16 %v6275_v11, %v6274_v59 }
 0xa85   : > { %v6304_v47 = vpack.c.bf16 %v6273_v37, %v6272_v17 }
 0xa87   : > { %8393 = vmatprep.mubr.bf16.mxu0 %v6304_v47 }
 0xa88   : > { %8394 = vmatmul.mubr.bf16.vlgmr.msra.gmra.mrb[112].mxu0 %v6305_v51 }
 0xa8b   : > { %v8351_v12 = vpop.f32.mrb[84].mxu1 }
 0xa8c   : > { %v6138_v16 = vadd.f32 %v8351_v12, %v11772_v45  ;;  %v6129_v7 = vpop.f32.mrb[85].mxu1 }
 0xa8d   : > { %v6130_v46 = vadd.f32 %v11772_v45, %v6129_v7  ;;  %v8352_v58 = vpop.f32.mrb[86].mxu1 }
 0xa8e   : > { %v6246_v26 = vadd.f32 %v6138_v16, %v11570_v21  ;;  %v6141_v25 = vadd.f32 %v8352_v58, %v11772_v45  ;;  %v6132_v18 = vpop.f32.mrb[87].mxu1 }
 0xa8f   : > { %v6244_v52 = vadd.f32 %v6130_v46, %v11566_v27  ;;  %v6133_v60 = vadd.f32 %v11772_v45, %v6132_v18 }
 0xa90   : > { %v6247_v29 = vadd.f32 %v6141_v25, %v11573_v13  ;;  %v6278_v44 = vmax.f32 %v6246_v26, 0.0 }
 0xa91   : > { %v6245_v38 = vadd.f32 %v6133_v60, %v11576_v34  ;;  %v6276_v8 = vmax.f32 %v6244_v52, 0.0 }
 0xa92   : > { %v6279_v55 = vmax.f32 %v6247_v29, 0.0 }
 0xa93   : > { %v6277_v1 = vmax.f32 %v6245_v38, 0.0 }
 0xa94   : > { %v6307_v4 = vpack.c.bf16 %v6279_v55, %v6278_v44 }
 0xa95   : > { %v6306_v57 = vpack.c.bf16 %v6277_v1, %v6276_v8 }
 0xa97   : > { %8397 = vmatprep.mubr.bf16.mxu0 %v6306_v57 }
 0xa98   : > { %8398 = vmatmul.mubr.bf16.gmra.mrb[116].mxu0 %v6307_v4 }
 0xa9b   : > { %v8355_v21 = vpop.f32.mrb[88].mxu1 }
 0xa9c   : > { %v6154_v14 = vadd.f32 %v8355_v21, %v11772_v45  ;;  %v6145_v39 = vpop.f32.mrb[89].mxu1 }
 0xa9d   : > { %v6146_v27 = vadd.f32 %v11772_v45, %v6145_v39  ;;  %v8356_v19 = vpop.f32.mrb[90].mxu1 }
 0xa9e   : > { %v6250_v6 = vadd.f32 %v6154_v14, %v11590_v43  ;;  %v6157_v13 = vadd.f32 %v8356_v19, %v11772_v45  ;;  %v6148_v34 = vpop.f32.mrb[91].mxu1 }
 0xa9f   : > { %v6248_v54 = vadd.f32 %v6146_v27, %v11586_v53  ;;  %v6149_v63 = vadd.f32 %v11772_v45, %v6148_v34 }
 0xaa0   : > { %v6251_v41 = vadd.f32 %v6157_v13, %v11593_v35  ;;  %v6282_v62 = vmax.f32 %v6250_v6, 0.0 }
 0xaa1   : > { %v6249_v20 = vadd.f32 %v6149_v63, %v11596_v42  ;;  %v6280_v9 = vmax.f32 %v6248_v54, 0.0 }
 0xaa2   : > { %v6283_v5 = vmax.f32 %v6251_v41, 0.0 }
 0xaa3   : > { %v6281_v59 = vmax.f32 %v6249_v20, 0.0 }
 0xaa4   : > { %v6309_v11 = vpack.c.bf16 %v6283_v5, %v6282_v62 }
 0xaa5   : > { %v6308_v17 = vpack.c.bf16 %v6281_v59, %v6280_v9 }
 0xaa7   : > { %8401 = vmatprep.mubr.bf16.mxu0 %v6308_v17 }
 0xaa8   : > { %8402 = vmatmul.mubr.bf16.gmra.mrb[120].mxu0 %v6309_v11 }
 0xaab   : > { %v8359_v43 = vpop.f32.mrb[92].mxu1 }
 0xaac   : > { %v6170_v37 = vadd.f32 %v8359_v43, %v11772_v45  ;;  %v6161_v51 = vpop.f32.mrb[93].mxu1 }
 0xaad   : > { %v6162_v53 = vadd.f32 %v11772_v45, %v6161_v51  ;;  %v8360_v47 = vpop.f32.mrb[94].mxu1 }
 0xaae   : > { %v6254_v12 = vadd.f32 %v6170_v37, %v11610_v0  ;;  %v6173_v35 = vadd.f32 %v8360_v47, %v11772_v45  ;;  %v6164_v42 = vpop.f32.mrb[95].mxu1 }
 0xaaf   : > { %v6252_v16 = vadd.f32 %v6162_v53, %v11606_v40  ;;  %v6165_v7 = vadd.f32 %v11772_v45, %v6164_v42 }
 0xab0   : > { %v6255_v46 = vadd.f32 %v6173_v35, %v11613_v10  ;;  %v6286_v26 = vmax.f32 %v6254_v12, 0.0 }
 0xab1   : > { %v6253_v58 = vadd.f32 %v6165_v7, %v11616_v50  ;;  %v6284_v18 = vmax.f32 %v6252_v16, 0.0 }
 0xab2   : > { %v6287_v25 = vmax.f32 %v6255_v46, 0.0 }
 0xab3   : > { %v6285_v52 = vmax.f32 %v6253_v58, 0.0 }
 0xab4   : > { %v6311_v60 = vpack.c.bf16 %v6287_v25, %v6286_v26 }
 0xab5   : > { %v6310_v29 = vpack.c.bf16 %v6285_v52, %v6284_v18 }
 0xab7   : > { %8405 = vmatprep.mubr.bf16.mxu0 %v6310_v29 }
 0xab8   : > { %8406 = vmatmul.mubr.bf16.gmra.mrb[124].mxu0 %v6311_v60 }
 0xabb   : > { %v8363_v0 = vpop.f32.mrb[96].mxu1 }
 0xabc   : > { %v6186_v38 = vadd.f32 %v8363_v0, %v11772_v45  ;;  %v6177_v44 = vpop.f32.mrb[97].mxu1 }
 0xabd   : > { %v6178_v40 = vadd.f32 %v11772_v45, %v6177_v44  ;;  %v8364_v55 = vpop.f32.mrb[98].mxu1 }
 0xabe   : > { %v6258_v8 = vadd.f32 %v6186_v38, %v11630_v49  ;;  %v6189_v10 = vadd.f32 %v8364_v55, %v11772_v45  ;;  %v6180_v50 = vpop.f32.mrb[99].mxu1 }
 0xabf   : > { %v6256_v1 = vadd.f32 %v6178_v40, %v11626_v31  ;;  %v6181_v4 = vadd.f32 %v11772_v45, %v6180_v50 }
 0xac0   : > { %v6259_v57 = vadd.f32 %v6189_v10, %v11633_v32  ;;  %v6290_v14 = vmax.f32 %v6258_v8, 0.0 }
 0xac1   : > { %v6257_v21 = vadd.f32 %v6181_v4, %v11636_v24  ;;  %v6288_v27 = vmax.f32 %v6256_v1, 0.0 }
 0xac2   : > { %v6291_v39 = vmax.f32 %v6259_v57, 0.0 }
 0xac3   : > { %v6289_v19 = vmax.f32 %v6257_v21, 0.0 }
 0xac4   : > { %v6313_v6 = vpack.c.bf16 %v6291_v39, %v6290_v14 }
 0xac5   : > { %v6312_v13 = vpack.c.bf16 %v6289_v19, %v6288_v27 }
 0xac7   : > { %8409 = vmatprep.mubr.bf16.mxu0 %v6312_v13 }
 0xac8   : > { %8410 = vmatmul.mubr.bf16.gmra.mrb[128].mxu0 %v6313_v6 }
 0xacb   : > { %v8367_v49 = vpop.f32.mrb[100].mxu1 }
 0xacc   : > { %v6202_v34 = vadd.f32 %v8367_v49, %v11772_v45  ;;  %v6193_v54 = vpop.f32.mrb[101].mxu1 }
 0xacd   : > { %v6194_v31 = vadd.f32 %v11772_v45, %v6193_v54  ;;  %v8368_v63 = vpop.f32.mrb[102].mxu1 }
 0xace   : > { %v6262_v41 = vadd.f32 %v6202_v34, %v11650_v23  ;;  %v6205_v32 = vadd.f32 %v8368_v63, %v11772_v45  ;;  %v6196_v24 = vpop.f32.mrb[103].mxu1 }
 0xacf   : > { %v6260_v20 = vadd.f32 %v6194_v31, %v11646_v22  ;;  %v6197_v62 = vadd.f32 %v11772_v45, %v6196_v24 }
 0xad0   : > { %v6263_v5 = vadd.f32 %v6205_v32, %v11653_v2  ;;  %v6294_v59 = vmax.f32 %v6262_v41, 0.0 }
 0xad1   : > { %v6261_v9 = vadd.f32 %v6197_v62, %v11656_v61  ;;  %v6292_v17 = vmax.f32 %v6260_v20, 0.0 }
 0xad2   : > { %v6295_v11 = vmax.f32 %v6263_v5, 0.0 }
 0xad3   : > { %v6293_v43 = vmax.f32 %v6261_v9, 0.0 }
 0xad4   : > { %v6315_v37 = vpack.c.bf16 %v6295_v11, %v6294_v59 }
 0xad5   : > { %v6314_v51 = vpack.c.bf16 %v6293_v43, %v6292_v17 }
 0xad7   : > { %8413 = vmatprep.mubr.bf16.mxu0 %v6314_v51 }
 0xad8   : > { %8414 = vmatmul.mubr.bf16.gmra.mrb[132].mxu0 %v6315_v37 }
 0xadb   : > { %v8371_v23 = vpop.f32.mrb[104].mxu1 }
 0xadc   : > { %v6218_v53 = vadd.f32 %v8371_v23, %v11772_v45  ;;  %v6209_v47 = vpop.f32.mrb[105].mxu1 }
 0xadd   : > { %v6210_v22 = vadd.f32 %v11772_v45, %v6209_v47  ;;  %v8372_v12 = vpop.f32.mrb[106].mxu1 }
 0xade   : > { %v6266_v35 = vadd.f32 %v6218_v53, %v11673_v33  ;;  %v6221_v2 = vadd.f32 %v8372_v12, %v11772_v45  ;;  %v6212_v61 = vpop.f32.mrb[107].mxu1 }
 0xadf   : > { %v6264_v42 = vadd.f32 %v6210_v22, %v11669_v30  ;;  %v6213_v16 = vadd.f32 %v11772_v45, %v6212_v61 }
 0xae0   : > { %v6267_v7 = vadd.f32 %v6221_v2, %v11676_v28  ;;  %v6298_v58 = vmax.f32 %v6266_v35, 0.0 }
 0xae1   : > { %v6265_v46 = vadd.f32 %v6213_v16, %v11682_v36  ;;  %v6296_v25 = vmax.f32 %v6264_v42, 0.0 }
 0xae2   : > { %v6299_v26 = vmax.f32 %v6267_v7, 0.0 }
 0xae3   : > { %v6297_v18 = vmax.f32 %v6265_v46, 0.0 }
 0xae4   : > { %v6317_v52 = vpack.c.bf16 %v6299_v26, %v6298_v58 }
 0xae5   : > { %v6316_v60 = vpack.c.bf16 %v6297_v18, %v6296_v25 }
 0xae7   : > { %8417 = vmatprep.mubr.bf16.mxu0 %v6316_v60 }
 0xae8   : > { %8418 = vmatmul.mubr.bf16.gmra.mrb[136].mxu0 %v6317_v52 }
 0xaeb   : > { %v8375_v33 = vpop.f32.mrb[108].mxu1 }
 0xaec   : > { %v6234_v29 = vadd.f32 %v8375_v33, %v11772_v45  ;;  %v6225_v0 = vpop.f32.mrb[109].mxu1 }
 0xaed   : > { %v6226_v30 = vadd.f32 %v11772_v45, %v6225_v0  ;;  %v8376_v38 = vpop.f32.mrb[110].mxu1 }
 0xaee   : > { %v6270_v28 = vadd.f32 %v6234_v29, %v11696_v48  ;;  %v6237_v36 = vadd.f32 %v8376_v38, %v11772_v45  ;;  %v6228_v44 = vpop.f32.mrb[111].mxu1 }
 0xaef   : > { %v6268_v40 = vadd.f32 %v6226_v30, %v11692_v56  ;;  %v6229_v55 = vadd.f32 %v11772_v45, %v6228_v44  ;;  %v11843_v56 = vld [vmem:[%s11916_s8] ss:$0 sm:$0xff] }
 0xaf0   : > { %v6271_v8 = vadd.f32 %v6237_v36, %v11699_v3  ;;  %v6302_v50 = vmax.f32 %v6270_v28, 0.0 }
 0xaf1   : > { %v6269_v10 = vadd.f32 %v6229_v55, %v11702_v15  ;;  %v6300_v4 = vmax.f32 %v6268_v40, 0.0 }
 0xaf2   : > { %v6303_v1 = vmax.f32 %v6271_v8, 0.0 }
 0xaf3   : > { %v6301_v57 = vmax.f32 %v6269_v10, 0.0 }
 0xaf4   : > { %v6319_v21 = vpack.c.bf16 %v6303_v1, %v6302_v50 }
 0xaf5   : > { %v6318_v14 = vpack.c.bf16 %v6301_v57, %v6300_v4 }
 0xaf7   : > { %8421 = vmatprep.mubr.bf16.mxu0 %v6318_v14 }
 0xaf8   : > { %8422 = vmatmul.mubr.bf16.gmra.mrb[140].mxu0 %v6319_v21 }
 0xb5b   : > { %v8395_v48 = vpop.f32.mrb[112].mxu0 }
 0xb5c   : > { %v6425_v3 = vpop.f32.mrb[113].mxu0  ;;  %v6434_v45 = vadd.f32 %v8395_v48, %v11843_v56 }
 0xb5d   : > { %v8396_v15 = vpop.f32.mrb[114].mxu0  ;;  %v6426_v19 = vadd.f32 %v11843_v56, %v6425_v3 }
 0xb5e   : > { %v6437_v39 = vadd.f32 %v8396_v15, %v11843_v56  ;;  %v6428_v27 = vpop.f32.mrb[115].mxu0 }
 0xb5f   : > { %v6429_v6 = vadd.f32 %v11843_v56, %v6428_v27 }
 0xb60   : > { %v7258_v13 = vpack.c.bf16 %v6437_v39, %v6434_v45 }
 0xb61   : > { %v7253_v49 = vpack.c.bf16 %v6429_v6, %v6426_v19 }
 0xb62   : > { %7330 = vst [vmem:[%s11851_s15 + $0x8] sm:$0xff] %v7258_v13  }
 0xb63   : > { %7254 = vst [vmem:[%s11851_s15] sm:$0xff] %v7253_v49  }
 0xb6b   : > { %v8399_v34 = vpop.f32.mrb[116].mxu0 }
 0xb6c   : > { %v6441_v54 = vpop.f32.mrb[117].mxu0  ;;  %v6450_v63 = vadd.f32 %v8399_v34, %v11843_v56 }
 0xb6d   : > { %v8400_v31 = vpop.f32.mrb[118].mxu0  ;;  %v6442_v24 = vadd.f32 %v11843_v56, %v6441_v54 }
 0xb6e   : > { %v6453_v41 = vadd.f32 %v8400_v31, %v11843_v56  ;;  %v6444_v32 = vpop.f32.mrb[119].mxu0 }
 0xb6f   : > { %v6445_v20 = vadd.f32 %v11843_v56, %v6444_v32 }
 0xb70   : > { %v7268_v62 = vpack.c.bf16 %v6453_v41, %v6450_v63 }
 0xb71   : > { %v7263_v5 = vpack.c.bf16 %v6445_v20, %v6442_v24 }
 0xb72   : > { %7332 = vst [vmem:[%s11851_s15 + $0x18] sm:$0xff] %v7268_v62  }
 0xb73   : > { %7331 = vst [vmem:[%s11851_s15 + $0x10] sm:$0xff] %v7263_v5  }
 0xb7b   : > { %v8403_v9 = vpop.f32.mrb[120].mxu0 }
 0xb7c   : > { %v6457_v59 = vpop.f32.mrb[121].mxu0  ;;  %v6466_v17 = vadd.f32 %v8403_v9, %v11843_v56 }
 0xb7d   : > { %v8404_v11 = vpop.f32.mrb[122].mxu0  ;;  %v6458_v51 = vadd.f32 %v11843_v56, %v6457_v59 }
 0xb7e   : > { %v6469_v43 = vadd.f32 %v8404_v11, %v11843_v56  ;;  %v6460_v37 = vpop.f32.mrb[123].mxu0 }
 0xb7f   : > { %v6461_v23 = vadd.f32 %v11843_v56, %v6460_v37 }
 0xb80   : > { %v7278_v53 = vpack.c.bf16 %v6469_v43, %v6466_v17 }
 0xb81   : > { %v7273_v47 = vpack.c.bf16 %v6461_v23, %v6458_v51 }
 0xb82   : > { %7334 = vst [vmem:[%s11851_s15 + $0x28] sm:$0xff] %v7278_v53  }
 0xb83   : > { %7333 = vst [vmem:[%s11851_s15 + $0x20] sm:$0xff] %v7273_v47  }
 0xb8b   : > { %v8407_v22 = vpop.f32.mrb[124].mxu0 }
 0xb8c   : > { %v6473_v12 = vpop.f32.mrb[125].mxu0  ;;  %v6482_v2 = vadd.f32 %v8407_v22, %v11843_v56 }
 0xb8d   : > { %v8408_v35 = vpop.f32.mrb[126].mxu0  ;;  %v6474_v16 = vadd.f32 %v11843_v56, %v6473_v12 }
 0xb8e   : > { %v6485_v61 = vadd.f32 %v8408_v35, %v11843_v56  ;;  %v6476_v42 = vpop.f32.mrb[127].mxu0 }
 0xb8f   : > { %v6477_v7 = vadd.f32 %v11843_v56, %v6476_v42 }
 0xb90   : > { %v7288_v46 = vpack.c.bf16 %v6485_v61, %v6482_v2 }
 0xb91   : > { %v7283_v58 = vpack.c.bf16 %v6477_v7, %v6474_v16 }
 0xb92   : > { %7336 = vst [vmem:[%s11851_s15 + $0x38] sm:$0xff] %v7288_v46  }
 0xb93   : > { %7335 = vst [vmem:[%s11851_s15 + $0x30] sm:$0xff] %v7283_v58  }
 0xb9b   : > { %v8411_v26 = vpop.f32.mrb[128].mxu0 }
 0xb9c   : > { %v6489_v25 = vpop.f32.mrb[129].mxu0  ;;  %v6498_v52 = vadd.f32 %v8411_v26, %v11843_v56 }
 0xb9d   : > { %v8412_v18 = vpop.f32.mrb[130].mxu0  ;;  %v6490_v29 = vadd.f32 %v11843_v56, %v6489_v25 }
 0xb9e   : > { %v6501_v60 = vadd.f32 %v8412_v18, %v11843_v56  ;;  %v6492_v33 = vpop.f32.mrb[131].mxu0 }
 0xb9f   : > { %v6493_v0 = vadd.f32 %v11843_v56, %v6492_v33 }
 0xba0   : > { %v7298_v30 = vpack.c.bf16 %v6501_v60, %v6498_v52 }
 0xba1   : > { %v7293_v38 = vpack.c.bf16 %v6493_v0, %v6490_v29 }
 0xba2   : > { %7338 = vst [vmem:[%s11851_s15 + $0x48] sm:$0xff] %v7298_v30  }
 0xba3   : > { %7337 = vst [vmem:[%s11851_s15 + $0x40] sm:$0xff] %v7293_v38  }
 0xbab   : > { %v8415_v28 = vpop.f32.mrb[132].mxu0 }
 0xbac   : > { %v6505_v36 = vpop.f32.mrb[133].mxu0  ;;  %v6514_v40 = vadd.f32 %v8415_v28, %v11843_v56 }
 0xbad   : > { %v8416_v44 = vpop.f32.mrb[134].mxu0  ;;  %v6506_v10 = vadd.f32 %v11843_v56, %v6505_v36 }
 0xbae   : > { %v6517_v55 = vadd.f32 %v8416_v44, %v11843_v56  ;;  %v6508_v8 = vpop.f32.mrb[135].mxu0 }
 0xbaf   : > { %v6509_v50 = vadd.f32 %v11843_v56, %v6508_v8 }
 0xbb0   : > { %v7308_v1 = vpack.c.bf16 %v6517_v55, %v6514_v40 }
 0xbb1   : > { %v7303_v4 = vpack.c.bf16 %v6509_v50, %v6506_v10 }
 0xbb2   : > { %7340 = vst [vmem:[%s11851_s15 + $0x58] sm:$0xff] %v7308_v1  }
 0xbb3   : > { %7339 = vst [vmem:[%s11851_s15 + $0x50] sm:$0xff] %v7303_v4  }
 0xbbb   : > { %v8419_v57 = vpop.f32.mrb[136].mxu0 }
 0xbbc   : > { %v6521_v21 = vpop.f32.mrb[137].mxu0  ;;  %v6530_v48 = vadd.f32 %v8419_v57, %v11843_v56 }
 0xbbd   : > { %v8420_v14 = vpop.f32.mrb[138].mxu0  ;;  %v6522_v45 = vadd.f32 %v11843_v56, %v6521_v21 }
 0xbbe   : > { %v6533_v3 = vadd.f32 %v8420_v14, %v11843_v56  ;;  %v6524_v15 = vpop.f32.mrb[139].mxu0 }
 0xbbf   : > { %v6525_v39 = vadd.f32 %v11843_v56, %v6524_v15 }
 0xbc0   : > { %v7318_v27 = vpack.c.bf16 %v6533_v3, %v6530_v48 }
 0xbc1   : > { %v7313_v19 = vpack.c.bf16 %v6525_v39, %v6522_v45 }
 0xbc2   : > { %7342 = vst [vmem:[%s11851_s15 + $0x68] sm:$0xff] %v7318_v27  }
 0xbc3   : > { %7341 = vst [vmem:[%s11851_s15 + $0x60] sm:$0xff] %v7313_v19  }
 0xbcb   : > { %v8423_v6 = vpop.f32.mrb[140].mxu0 }
 0xbcc   : > { %v6537_v13 = vpop.f32.mrb[141].mxu0  ;;  %v6546_v34 = vadd.f32 %v8423_v6, %v11843_v56 }
 0xbcd   : > { %v8424_v49 = vpop.f32.mrb[142].mxu0  ;;  %v6538_v63 = vadd.f32 %v11843_v56, %v6537_v13 }
 0xbce   : > { %v6549_v54 = vadd.f32 %v8424_v49, %v11843_v56  ;;  %v6540_v31 = vpop.f32.mrb[143].mxu0 }
 0xbcf   : > { %v6541_v41 = vadd.f32 %v11843_v56, %v6540_v31 }
 0xbd0   : > { %v7328_v32 = vpack.c.bf16 %v6549_v54, %v6546_v34 }
 0xbd1   : > { %v7323_v24 = vpack.c.bf16 %v6541_v41, %v6538_v63 }
 0xbd2   : > { %7344 = vst [vmem:[%s11851_s15 + $0x78] sm:$0xff] %v7328_v32  }
 0xbd3   : > { %7343 = vst [vmem:[%s11851_s15 + $0x70] sm:$0xff] %v7323_v24  }
 0xbd4 PF: > { %p16_p9 = scmp.ge.s32.totalorder %s8948_s13, 4   ;;  %s12384_s30 = smov %s8874_s10 }
 0xbd5   : > { %s12385_s10 = smov %s8957_s16  ;;  %s12386_s11 = smov %s8948_s13 }
 0xbd6   :  { %18 = sbr.rel (!%p16_p9) target bundleno = 2 (0x2), region = 145 }

</bundles_post_ra>
